<compile_context>
chip_gen: v7x
topology: tpu7x:2x2x1
jax: 0.10.0
libtpu: 0.0.40
codegen_flags: <defaults>
</compile_context>

<pallas_src>
import jax
import jax.numpy as jnp
from jax.experimental import pallas as pl
from jax.experimental.pallas import tpu as pltpu


# ---------------------------------------------------------------------------
# Fused encoder + decoder kernel (no grid: everything resident, loops in-kernel)
# ---------------------------------------------------------------------------

def _seq2seq_kernel(tf_ref,                                   # SMEM (T,) int32
                    src_emb_ref, tf_emb_ref,                  # (S,B,E) f32, (T,B,E) f32
                    w_enc_in_ref, enc_b_ref,                  # (H+E,4H) bf16, (1,4H) f32
                    dec_emb_ref,                              # (V,E) f32
                    w_eh_ref, w_es_ref, b_e_ref,              # (1,H), (1,H), (1,1) f32
                    w_dec_in_ref, dec_b_ref,                  # (2H+E,4H) bf16, (1,4H) f32
                    w_fc_ref, b_fc_ref,                       # (H,V) bf16, (1,V) f32
                    out_ref,                                  # (T,B,V) f32
                    enc_scr):                                 # VMEM (S,B,H) f32 scratch
    S, B, E = src_emb_ref.shape
    T = tf_emb_ref.shape[0]
    H = w_eh_ref.shape[1]
    V = w_fc_ref.shape[1]
    f32 = jnp.float32
    bf16 = jnp.bfloat16

    def lstm_cell(gates, c):
        # H = 128 -> all gate slices are lane-aligned
        i = jax.nn.sigmoid(gates[:, 0 * H:1 * H])
        f = jax.nn.sigmoid(gates[:, 1 * H:2 * H])
        g = jnp.tanh(gates[:, 2 * H:3 * H])
        o = jax.nn.sigmoid(gates[:, 3 * H:4 * H])
        c_new = f * c + i * g
        h_new = o * jnp.tanh(c_new)
        return h_new, c_new

    # ---------------- encoder: in-kernel loop over source time ----------------
    lane_s = jax.lax.broadcasted_iota(jnp.int32, (1, S), 1)   # lane index 0..S-1
    w_es = w_es_ref[...]                                       # (1, H)

    h = jnp.zeros((B, H), f32)
    c = jnp.zeros((B, H), f32)
    e_s = jnp.zeros((B, S), f32)                               # hoisted attention term
    for s in range(S):                                         # fully unrolled (S small)
        x = src_emb_ref[s]                                     # (B, E)
        packed = jnp.concatenate([h, x], axis=-1)              # (B, H+E), 128-aligned
        gates = (jnp.dot(packed.astype(bf16), w_enc_in_ref[...],
                         preferred_element_type=f32)
                 + enc_b_ref[...])                             # (B, 4H)
        h, c = lstm_cell(gates, c)
        enc_scr[s] = h                                         # keep state for attention
        # t-invariant attention term e_s[b, s] = sum_h h[b,h] * w_es[h], built lane-dense
        col = jnp.sum(h * w_es, axis=-1, keepdims=True)        # (B, 1) lane reduce
        e_s = e_s + col * (lane_s == s).astype(f32)            # place into lane s of (B,S)
    e_s = e_s + b_e_ref[...]                                   # fold attention bias once

    # outputs[0] stays zero, exactly like the reference forward
    out_ref[0] = jnp.zeros((B, V), f32)

    # ---------------- decoder: in-kernel loop over target time ----------------
    w_eh = w_eh_ref[...]                                       # (1, H)
    emb = tf_emb_ref[0]                                        # x = target[0] embedding

    for t in range(T - 1):                                     # fully unrolled (T small)
        if t > 0:
            # teacher forcing: per-step bit selects target[t] embedding vs prev guess
            m = (tf_ref[t] > 0).astype(f32)
            emb = m * tf_emb_ref[t] + (1.0 - m) * emb          # (B, E)

        # --- additive attention, lane-dense (B, S) energies / softmax ---
        e_h = jnp.sum(h * w_eh, axis=-1, keepdims=True)        # (B, 1)
        energy = jnp.maximum(e_s + e_h, 0.0)                   # (B, S)
        energy = energy - jnp.max(energy, axis=-1, keepdims=True)
        att = jnp.exp(energy)
        att = att * pl.reciprocal(jnp.sum(att, axis=-1, keepdims=True), approx=True)
        # context[b, :] = sum_s att[b, s] * enc_states[s, b, :]   (VPU mul-adds)
        context = att[:, 0:1] * enc_scr[0]
        for s in range(1, S):
            context = context + att[:, s:s + 1] * enc_scr[s]   # (B, H)

        # --- LSTM cell: one fused matmul over [context | h | emb] ---
        packed = jnp.concatenate([context, h, emb], axis=-1)   # (B, 2H+E), 128-aligned
        gates = (jnp.dot(packed.astype(bf16), w_dec_in_ref[...],
                         preferred_element_type=f32)
                 + dec_b_ref[...])                              # (B, 4H)
        h, c = lstm_cell(gates, c)

        # --- vocab projection (lane-dense V) ---
        logits = (jnp.dot(h.astype(bf16), w_fc_ref[...],
                          preferred_element_type=f32)
                  + b_fc_ref[...])                              # (B, V)
        out_ref[t + 1] = logits

        # --- greedy feedback: first-argmax one-hot @ embedding table (no gather) ---
        mx = jnp.max(logits, axis=-1, keepdims=True)
        lane = jax.lax.broadcasted_iota(jnp.int32, logits.shape, 1)
        first = jnp.min(jnp.where(logits == mx, lane, V), axis=-1, keepdims=True)
        onehot = (lane == first).astype(f32)                    # (B, V)
        emb = jnp.dot(onehot, dec_emb_ref[...],
                      preferred_element_type=f32)               # (B, E)


# ---------------------------------------------------------------------------
# Forward pass (mirrors Seq2Seq.forward; outputs[0] stays zero)
# ---------------------------------------------------------------------------

def seq2seq_forward(source, target, params, teacher_force_ratio=0.5,
                    key=jax.random.PRNGKey(1)):
    S, B = source.shape
    T, _ = target.shape
    E = params['enc_emb'].shape[1]
    H = params['enc_w_hh'].shape[0]
    V = params['w_fc'].shape[1]

    # embedding gathers + teacher-forcing bits are plain-JAX glue outside the kernel
    src_emb = params['enc_emb'][source]                        # (S, B, E)
    tf_emb = params['dec_emb'][target]                         # (T, B, E)
    tf_bits = (jax.random.uniform(key, (T,)) < teacher_force_ratio).astype(jnp.int32)

    # stacked, bf16 MXU weights (order must match the in-kernel activation concats)
    w_enc_in = jnp.concatenate([params['enc_w_hh'], params['enc_w_ih']],
                               axis=0).astype(jnp.bfloat16)    # (H+E, 4H)
    w_dec_in = jnp.concatenate([params['dec_w_ctx'], params['dec_w_hh'],
                                params['dec_w_emb']],
                               axis=0).astype(jnp.bfloat16)    # (2H+E, 4H)
    w_fc = params['w_fc'].astype(jnp.bfloat16)                 # (H, V)

    vmem = pltpu.MemorySpace.VMEM
    smem = pltpu.MemorySpace.SMEM
    outputs = pl.pallas_call(
        _seq2seq_kernel,
        out_shape=jax.ShapeDtypeStruct((T, B, V), jnp.float32),
        in_specs=[
            pl.BlockSpec(memory_space=smem),   # tf_bits   (T,)
            pl.BlockSpec(memory_space=vmem),   # src_emb   (S,B,E)
            pl.BlockSpec(memory_space=vmem),   # tf_emb    (T,B,E)
            pl.BlockSpec(memory_space=vmem),   # w_enc_in  (H+E,4H) bf16
            pl.BlockSpec(memory_space=vmem),   # enc_b     (1,4H)
            pl.BlockSpec(memory_space=vmem),   # dec_emb   (V,E)
            pl.BlockSpec(memory_space=vmem),   # w_eh      (1,H)
            pl.BlockSpec(memory_space=vmem),   # w_es      (1,H)
            pl.BlockSpec(memory_space=vmem),   # b_e       (1,1)
            pl.BlockSpec(memory_space=vmem),   # w_dec_in  (2H+E,4H) bf16
            pl.BlockSpec(memory_space=vmem),   # dec_b     (1,4H)
            pl.BlockSpec(memory_space=vmem),   # w_fc      (H,V) bf16
            pl.BlockSpec(memory_space=vmem),   # b_fc      (1,V)
        ],
        out_specs=pl.BlockSpec(memory_space=vmem),
        scratch_shapes=[pltpu.VMEM((S, B, H), jnp.float32)],   # encoder states
    )(tf_bits, src_emb, tf_emb,
      w_enc_in, params['enc_b'],
      params['dec_emb'], params['w_eh'], params['w_es'], params['b_e'],
      w_dec_in, params['dec_b'], w_fc, params['b_fc'])
    return outputs


# ---------------------------------------------------------------------------
# Deterministic parameter construction (synthetic weights, no checkpoint load)
# ---------------------------------------------------------------------------

def make_params(key, *, v_src, v_trg, emb_dim, hidden):
    ks = jax.random.split(key, 13)
    s = 0.1
    return {
        # encoder
        'enc_emb':   s * jax.random.normal(ks[0], (v_src, emb_dim), jnp.float32),
        'enc_w_ih':  s * jax.random.normal(ks[1], (emb_dim, 4 * hidden), jnp.float32),
        'enc_w_hh':  s * jax.random.normal(ks[2], (hidden, 4 * hidden), jnp.float32),
        'enc_b':     s * jax.random.normal(ks[3], (1, 4 * hidden), jnp.float32),
        # decoder attention energy Linear(2H -> 1) split into hidden / enc-state parts
        'dec_emb':   s * jax.random.normal(ks[4], (v_trg, emb_dim), jnp.float32),
        'w_eh':      s * jax.random.normal(ks[5], (1, hidden), jnp.float32),
        'w_es':      s * jax.random.normal(ks[6], (1, hidden), jnp.float32),
        'b_e':       s * jax.random.normal(ks[7], (1, 1), jnp.float32),
        # decoder LSTM over (context(H), emb(E)) with split input weights (no concat)
        'dec_w_ctx': s * jax.random.normal(ks[8], (hidden, 4 * hidden), jnp.float32),
        'dec_w_emb': s * jax.random.normal(ks[9], (emb_dim, 4 * hidden), jnp.float32),
        'dec_w_hh':  s * jax.random.normal(ks[10], (hidden, 4 * hidden), jnp.float32),
        'dec_b':     s * jax.random.normal(ks[11], (1, 4 * hidden), jnp.float32),
        # output projection fc(H -> V_trg)
        'w_fc':      s * jax.random.normal(ks[12], (hidden, v_trg), jnp.float32),
        'b_fc':      jnp.zeros((1, v_trg), jnp.float32),
    }


if __name__ == "__main__":
    # TPU-friendly small sizes: B = one sublane group, H lane-aligned gates,
    # V lane-dense logits / clean in-kernel argmax.
    S, T, B = 8, 8, 8            # source len, target len, batch
    V_SRC, V_TRG = 128, 128      # vocab sizes
    E, H = 32, 128               # embedding dim, hidden size

    key = jax.random.PRNGKey(0)
    k_par, k_src, k_trg, k_tf = jax.random.split(key, 4)

    params = make_params(k_par, v_src=V_SRC, v_trg=V_TRG, emb_dim=E, hidden=H)
    source = jax.random.randint(k_src, (S, B), 0, V_SRC, dtype=jnp.int32)
    target = jax.random.randint(k_trg, (T, B), 0, V_TRG, dtype=jnp.int32)

    fwd = jax.jit(lambda src, trg, k: seq2seq_forward(src, trg, params,
                                                      teacher_force_ratio=0.5, key=k))
    outputs = fwd(source, target, k_tf)
    outputs = jax.block_until_ready(outputs)

    assert outputs.shape == (T, B, V_TRG)
    assert bool(jnp.all(jnp.isfinite(outputs)))
    assert bool(jnp.all(outputs[0] == 0.0))
    print("KERNEL_OK")
</pallas_src>

<mosaic_0001>
module attributes {stable_mosaic.version = 11 : i64} {
  func.func @_seq2seq_kernel(%arg0: memref<8xi32, #tpu.memory_space<smem>>, %arg1: memref<8x8x32xf32, #tpu.memory_space<vmem>>, %arg2: memref<8x8x32xf32, #tpu.memory_space<vmem>>, %arg3: memref<160x512xbf16, #tpu.memory_space<vmem>>, %arg4: memref<1x512xf32, #tpu.memory_space<vmem>>, %arg5: memref<128x32xf32, #tpu.memory_space<vmem>>, %arg6: memref<1x128xf32, #tpu.memory_space<vmem>>, %arg7: memref<1x128xf32, #tpu.memory_space<vmem>>, %arg8: memref<1x1xf32, #tpu.memory_space<vmem>>, %arg9: memref<288x512xbf16, #tpu.memory_space<vmem>>, %arg10: memref<1x512xf32, #tpu.memory_space<vmem>>, %arg11: memref<128x128xbf16, #tpu.memory_space<vmem>>, %arg12: memref<1x128xf32, #tpu.memory_space<vmem>>, %arg13: memref<8x8x128xf32, #tpu.memory_space<vmem>>, %arg14: memref<8x8x128xf32, #tpu.memory_space<vmem>>) attributes {dimension_semantics = [], scalar_prefetch = 0 : i64, scratch_operands = 1 : i64, tpu.core_type = #tpu.core_type<tc>} {
    %0 = tpu.iota {dimensions = array<i32: 1>} : vector<1x8xi32>
    %c0 = arith.constant 0 : index
    %c0_0 = arith.constant 0 : index
    %1 = vector.load %arg7[%c0, %c0_0] : memref<1x128xf32, #tpu.memory_space<vmem>>, vector<1x128xf32>
    %cst = arith.constant 0.000000e+00 : f32
    %2 = vector.broadcast %cst : f32 to vector<8x128xf32>
    %cst_1 = arith.constant 0.000000e+00 : f32
    %3 = vector.broadcast %cst_1 : f32 to vector<8x128xf32>
    %cst_2 = arith.constant 0.000000e+00 : f32
    %4 = vector.broadcast %cst_2 : f32 to vector<8x8xf32>
    %c0_3 = arith.constant 0 : index
    %c0_4 = arith.constant 0 : index
    %c0_5 = arith.constant 0 : index
    %5 = vector.load %arg1[%c0_3, %c0_4, %c0_5] : memref<8x8x32xf32, #tpu.memory_space<vmem>>, vector<1x8x32xf32>
    %6 = vector.shape_cast %5 : vector<1x8x32xf32> to vector<8x32xf32>
    %7 = tpu.concatenate %2, %6 in 1 : vector<8x128xf32>, vector<8x32xf32> -> vector<8x160xf32>
    %8 = arith.truncf %7 : vector<8x160xf32> to vector<8x160xbf16>
    %c0_6 = arith.constant 0 : index
    %c0_7 = arith.constant 0 : index
    %9 = vector.load %arg3[%c0_6, %c0_7] : memref<160x512xbf16, #tpu.memory_space<vmem>>, vector<160x512xbf16>
    %cst_8 = arith.constant dense<0.000000e+00> : vector<8x512xf32>
    %10 = tpu.matmul %8, %9, %cst_8 {dimension_numbers = #tpu.dot_dimension_numbers<[1], [0], [0], [1], [0, 0, 1, 1], [], []>} : vector<8x160xbf16>, vector<160x512xbf16>, vector<8x512xf32> -> vector<8x512xf32>
    %c0_9 = arith.constant 0 : index
    %c0_10 = arith.constant 0 : index
    %11 = vector.load %arg4[%c0_9, %c0_10] : memref<1x512xf32, #tpu.memory_space<vmem>>, vector<1x512xf32>
    %12 = vector.broadcast %11 : vector<1x512xf32> to vector<8x512xf32>
    %13 = arith.addf %10, %12 : vector<8x512xf32>
    %14 = vector.extract_strided_slice %13 {offsets = [0, 0], sizes = [8, 128], strides = [1, 1]} : vector<8x512xf32> to vector<8x128xf32>
    %15 = arith.negf %14 : vector<8x128xf32>
    %16 = math.exp %15 : vector<8x128xf32>
    %cst_11 = arith.constant 1.000000e+00 : f32
    %17 = vector.broadcast %cst_11 : f32 to vector<8x128xf32>
    %18 = arith.addf %17, %16 : vector<8x128xf32>
    %19 = arith.divf %17, %18 : vector<8x128xf32>
    %20 = vector.extract_strided_slice %13 {offsets = [0, 128], sizes = [8, 128], strides = [1, 1]} : vector<8x512xf32> to vector<8x128xf32>
    %21 = arith.negf %20 : vector<8x128xf32>
    %22 = math.exp %21 : vector<8x128xf32>
    %cst_12 = arith.constant 1.000000e+00 : f32
    %23 = vector.broadcast %cst_12 : f32 to vector<8x128xf32>
    %24 = arith.addf %23, %22 : vector<8x128xf32>
    %25 = arith.divf %23, %24 : vector<8x128xf32>
    %26 = vector.extract_strided_slice %13 {offsets = [0, 256], sizes = [8, 128], strides = [1, 1]} : vector<8x512xf32> to vector<8x128xf32>
    %27 = math.tanh %26 : vector<8x128xf32>
    %28 = vector.extract_strided_slice %13 {offsets = [0, 384], sizes = [8, 128], strides = [1, 1]} : vector<8x512xf32> to vector<8x128xf32>
    %29 = arith.negf %28 : vector<8x128xf32>
    %30 = math.exp %29 : vector<8x128xf32>
    %cst_13 = arith.constant 1.000000e+00 : f32
    %31 = vector.broadcast %cst_13 : f32 to vector<8x128xf32>
    %32 = arith.addf %31, %30 : vector<8x128xf32>
    %33 = arith.divf %31, %32 : vector<8x128xf32>
    %34 = arith.mulf %25, %3 : vector<8x128xf32>
    %35 = arith.mulf %19, %27 : vector<8x128xf32>
    %36 = arith.addf %34, %35 : vector<8x128xf32>
    %37 = math.tanh %36 : vector<8x128xf32>
    %38 = arith.mulf %33, %37 : vector<8x128xf32>
    %c0_14 = arith.constant 0 : index
    %c0_15 = arith.constant 0 : index
    %c0_16 = arith.constant 0 : index
    %39 = vector.load %arg14[%c0_14, %c0_15, %c0_16] : memref<8x8x128xf32, #tpu.memory_space<vmem>>, vector<1x8x128xf32>
    %40 = vector.shape_cast %39 : vector<1x8x128xf32> to vector<8x128xf32>
    %41 = vector.shape_cast %38 : vector<8x128xf32> to vector<1x8x128xf32>
    tpu.vector_store %arg14[%c0_14, %c0_15, %c0_16], %41 {strides = array<i32>} : memref<8x8x128xf32, #tpu.memory_space<vmem>>, vector<1x8x128xf32>,
    %42 = vector.broadcast %1 : vector<1x128xf32> to vector<8x128xf32>
    %43 = arith.mulf %38, %42 : vector<8x128xf32>
    %cst_17 = arith.constant dense<0.000000e+00> : vector<8xf32>
    %44 = vector.multi_reduction <add>, %43, %cst_17 [1] : vector<8x128xf32> to vector<8xf32>
    %45 = vector.shape_cast %44 : vector<8xf32> to vector<8x1xf32>
    %c0_i32 = arith.constant 0 : i32
    %46 = vector.broadcast %c0_i32 : i32 to vector<1x8xi32>
    %47 = arith.cmpi eq, %0, %46 : vector<1x8xi32>
    %48 = arith.extui %47 : vector<1x8xi1> to vector<1x8xi32>
    %49 = arith.sitofp %48 : vector<1x8xi32> to vector<1x8xf32>
    %50 = vector.broadcast %45 : vector<8x1xf32> to vector<8x8xf32>
    %51 = vector.broadcast %49 : vector<1x8xf32> to vector<8x8xf32>
    %52 = arith.mulf %50, %51 : vector<8x8xf32>
    %53 = arith.addf %4, %52 : vector<8x8xf32>
    %c1 = arith.constant 1 : index
    %c0_18 = arith.constant 0 : index
    %c0_19 = arith.constant 0 : index
    %54 = vector.load %arg1[%c1, %c0_18, %c0_19] : memref<8x8x32xf32, #tpu.memory_space<vmem>>, vector<1x8x32xf32>
    %55 = vector.shape_cast %54 : vector<1x8x32xf32> to vector<8x32xf32>
    %56 = tpu.concatenate %38, %55 in 1 : vector<8x128xf32>, vector<8x32xf32> -> vector<8x160xf32>
    %57 = arith.truncf %56 : vector<8x160xf32> to vector<8x160xbf16>
    %c0_20 = arith.constant 0 : index
    %c0_21 = arith.constant 0 : index
    %58 = vector.load %arg3[%c0_20, %c0_21] : memref<160x512xbf16, #tpu.memory_space<vmem>>, vector<160x512xbf16>
    %cst_22 = arith.constant dense<0.000000e+00> : vector<8x512xf32>
    %59 = tpu.matmul %57, %58, %cst_22 {dimension_numbers = #tpu.dot_dimension_numbers<[1], [0], [0], [1], [0, 0, 1, 1], [], []>} : vector<8x160xbf16>, vector<160x512xbf16>, vector<8x512xf32> -> vector<8x512xf32>
    %c0_23 = arith.constant 0 : index
    %c0_24 = arith.constant 0 : index
    %60 = vector.load %arg4[%c0_23, %c0_24] : memref<1x512xf32, #tpu.memory_space<vmem>>, vector<1x512xf32>
    %61 = vector.broadcast %60 : vector<1x512xf32> to vector<8x512xf32>
    %62 = arith.addf %59, %61 : vector<8x512xf32>
    %63 = vector.extract_strided_slice %62 {offsets = [0, 0], sizes = [8, 128], strides = [1, 1]} : vector<8x512xf32> to vector<8x128xf32>
    %64 = arith.negf %63 : vector<8x128xf32>
    %65 = math.exp %64 : vector<8x128xf32>
    %cst_25 = arith.constant 1.000000e+00 : f32
    %66 = vector.broadcast %cst_25 : f32 to vector<8x128xf32>
    %67 = arith.addf %66, %65 : vector<8x128xf32>
    %68 = arith.divf %66, %67 : vector<8x128xf32>
    %69 = vector.extract_strided_slice %62 {offsets = [0, 128], sizes = [8, 128], strides = [1, 1]} : vector<8x512xf32> to vector<8x128xf32>
    %70 = arith.negf %69 : vector<8x128xf32>
    %71 = math.exp %70 : vector<8x128xf32>
    %cst_26 = arith.constant 1.000000e+00 : f32
    %72 = vector.broadcast %cst_26 : f32 to vector<8x128xf32>
    %73 = arith.addf %72, %71 : vector<8x128xf32>
    %74 = arith.divf %72, %73 : vector<8x128xf32>
    %75 = vector.extract_strided_slice %62 {offsets = [0, 256], sizes = [8, 128], strides = [1, 1]} : vector<8x512xf32> to vector<8x128xf32>
    %76 = math.tanh %75 : vector<8x128xf32>
    %77 = vector.extract_strided_slice %62 {offsets = [0, 384], sizes = [8, 128], strides = [1, 1]} : vector<8x512xf32> to vector<8x128xf32>
    %78 = arith.negf %77 : vector<8x128xf32>
    %79 = math.exp %78 : vector<8x128xf32>
    %cst_27 = arith.constant 1.000000e+00 : f32
    %80 = vector.broadcast %cst_27 : f32 to vector<8x128xf32>
    %81 = arith.addf %80, %79 : vector<8x128xf32>
    %82 = arith.divf %80, %81 : vector<8x128xf32>
    %83 = arith.mulf %74, %36 : vector<8x128xf32>
    %84 = arith.mulf %68, %76 : vector<8x128xf32>
    %85 = arith.addf %83, %84 : vector<8x128xf32>
    %86 = math.tanh %85 : vector<8x128xf32>
    %87 = arith.mulf %82, %86 : vector<8x128xf32>
    %c1_28 = arith.constant 1 : index
    %c0_29 = arith.constant 0 : index
    %c0_30 = arith.constant 0 : index
    %88 = vector.load %arg14[%c1_28, %c0_29, %c0_30] : memref<8x8x128xf32, #tpu.memory_space<vmem>>, vector<1x8x128xf32>
    %89 = vector.shape_cast %88 : vector<1x8x128xf32> to vector<8x128xf32>
    %90 = vector.shape_cast %87 : vector<8x128xf32> to vector<1x8x128xf32>
    tpu.vector_store %arg14[%c1_28, %c0_29, %c0_30], %90 {strides = array<i32>} : memref<8x8x128xf32, #tpu.memory_space<vmem>>, vector<1x8x128xf32>,
    %91 = vector.broadcast %1 : vector<1x128xf32> to vector<8x128xf32>
    %92 = arith.mulf %87, %91 : vector<8x128xf32>
    %cst_31 = arith.constant dense<0.000000e+00> : vector<8xf32>
    %93 = vector.multi_reduction <add>, %92, %cst_31 [1] : vector<8x128xf32> to vector<8xf32>
    %94 = vector.shape_cast %93 : vector<8xf32> to vector<8x1xf32>
    %c1_i32 = arith.constant 1 : i32
    %95 = vector.broadcast %c1_i32 : i32 to vector<1x8xi32>
    %96 = arith.cmpi eq, %0, %95 : vector<1x8xi32>
    %97 = arith.extui %96 : vector<1x8xi1> to vector<1x8xi32>
    %98 = arith.sitofp %97 : vector<1x8xi32> to vector<1x8xf32>
    %99 = vector.broadcast %94 : vector<8x1xf32> to vector<8x8xf32>
    %100 = vector.broadcast %98 : vector<1x8xf32> to vector<8x8xf32>
    %101 = arith.mulf %99, %100 : vector<8x8xf32>
    %102 = arith.addf %53, %101 : vector<8x8xf32>
    %c2 = arith.constant 2 : index
    %c0_32 = arith.constant 0 : index
    %c0_33 = arith.constant 0 : index
    %103 = vector.load %arg1[%c2, %c0_32, %c0_33] : memref<8x8x32xf32, #tpu.memory_space<vmem>>, vector<1x8x32xf32>
    %104 = vector.shape_cast %103 : vector<1x8x32xf32> to vector<8x32xf32>
    %105 = tpu.concatenate %87, %104 in 1 : vector<8x128xf32>, vector<8x32xf32> -> vector<8x160xf32>
    %106 = arith.truncf %105 : vector<8x160xf32> to vector<8x160xbf16>
    %c0_34 = arith.constant 0 : index
    %c0_35 = arith.constant 0 : index
    %107 = vector.load %arg3[%c0_34, %c0_35] : memref<160x512xbf16, #tpu.memory_space<vmem>>, vector<160x512xbf16>
    %cst_36 = arith.constant dense<0.000000e+00> : vector<8x512xf32>
    %108 = tpu.matmul %106, %107, %cst_36 {dimension_numbers = #tpu.dot_dimension_numbers<[1], [0], [0], [1], [0, 0, 1, 1], [], []>} : vector<8x160xbf16>, vector<160x512xbf16>, vector<8x512xf32> -> vector<8x512xf32>
    %c0_37 = arith.constant 0 : index
    %c0_38 = arith.constant 0 : index
    %109 = vector.load %arg4[%c0_37, %c0_38] : memref<1x512xf32, #tpu.memory_space<vmem>>, vector<1x512xf32>
    %110 = vector.broadcast %109 : vector<1x512xf32> to vector<8x512xf32>
    %111 = arith.addf %108, %110 : vector<8x512xf32>
    %112 = vector.extract_strided_slice %111 {offsets = [0, 0], sizes = [8, 128], strides = [1, 1]} : vector<8x512xf32> to vector<8x128xf32>
    %113 = arith.negf %112 : vector<8x128xf32>
    %114 = math.exp %113 : vector<8x128xf32>
    %cst_39 = arith.constant 1.000000e+00 : f32
    %115 = vector.broadcast %cst_39 : f32 to vector<8x128xf32>
    %116 = arith.addf %115, %114 : vector<8x128xf32>
    %117 = arith.divf %115, %116 : vector<8x128xf32>
    %118 = vector.extract_strided_slice %111 {offsets = [0, 128], sizes = [8, 128], strides = [1, 1]} : vector<8x512xf32> to vector<8x128xf32>
    %119 = arith.negf %118 : vector<8x128xf32>
    %120 = math.exp %119 : vector<8x128xf32>
    %cst_40 = arith.constant 1.000000e+00 : f32
    %121 = vector.broadcast %cst_40 : f32 to vector<8x128xf32>
    %122 = arith.addf %121, %120 : vector<8x128xf32>
    %123 = arith.divf %121, %122 : vector<8x128xf32>
    %124 = vector.extract_strided_slice %111 {offsets = [0, 256], sizes = [8, 128], strides = [1, 1]} : vector<8x512xf32> to vector<8x128xf32>
    %125 = math.tanh %124 : vector<8x128xf32>
    %126 = vector.extract_strided_slice %111 {offsets = [0, 384], sizes = [8, 128], strides = [1, 1]} : vector<8x512xf32> to vector<8x128xf32>
    %127 = arith.negf %126 : vector<8x128xf32>
    %128 = math.exp %127 : vector<8x128xf32>
    %cst_41 = arith.constant 1.000000e+00 : f32
    %129 = vector.broadcast %cst_41 : f32 to vector<8x128xf32>
    %130 = arith.addf %129, %128 : vector<8x128xf32>
    %131 = arith.divf %129, %130 : vector<8x128xf32>
    %132 = arith.mulf %123, %85 : vector<8x128xf32>
    %133 = arith.mulf %117, %125 : vector<8x128xf32>
    %134 = arith.addf %132, %133 : vector<8x128xf32>
    %135 = math.tanh %134 : vector<8x128xf32>
    %136 = arith.mulf %131, %135 : vector<8x128xf32>
    %c2_42 = arith.constant 2 : index
    %c0_43 = arith.constant 0 : index
    %c0_44 = arith.constant 0 : index
    %137 = vector.load %arg14[%c2_42, %c0_43, %c0_44] : memref<8x8x128xf32, #tpu.memory_space<vmem>>, vector<1x8x128xf32>
    %138 = vector.shape_cast %137 : vector<1x8x128xf32> to vector<8x128xf32>
    %139 = vector.shape_cast %136 : vector<8x128xf32> to vector<1x8x128xf32>
    tpu.vector_store %arg14[%c2_42, %c0_43, %c0_44], %139 {strides = array<i32>} : memref<8x8x128xf32, #tpu.memory_space<vmem>>, vector<1x8x128xf32>,
    %140 = vector.broadcast %1 : vector<1x128xf32> to vector<8x128xf32>
    %141 = arith.mulf %136, %140 : vector<8x128xf32>
    %cst_45 = arith.constant dense<0.000000e+00> : vector<8xf32>
    %142 = vector.multi_reduction <add>, %141, %cst_45 [1] : vector<8x128xf32> to vector<8xf32>
    %143 = vector.shape_cast %142 : vector<8xf32> to vector<8x1xf32>
    %c2_i32 = arith.constant 2 : i32
    %144 = vector.broadcast %c2_i32 : i32 to vector<1x8xi32>
    %145 = arith.cmpi eq, %0, %144 : vector<1x8xi32>
    %146 = arith.extui %145 : vector<1x8xi1> to vector<1x8xi32>
    %147 = arith.sitofp %146 : vector<1x8xi32> to vector<1x8xf32>
    %148 = vector.broadcast %143 : vector<8x1xf32> to vector<8x8xf32>
    %149 = vector.broadcast %147 : vector<1x8xf32> to vector<8x8xf32>
    %150 = arith.mulf %148, %149 : vector<8x8xf32>
    %151 = arith.addf %102, %150 : vector<8x8xf32>
    %c3 = arith.constant 3 : index
    %c0_46 = arith.constant 0 : index
    %c0_47 = arith.constant 0 : index
    %152 = vector.load %arg1[%c3, %c0_46, %c0_47] : memref<8x8x32xf32, #tpu.memory_space<vmem>>, vector<1x8x32xf32>
    %153 = vector.shape_cast %152 : vector<1x8x32xf32> to vector<8x32xf32>
    %154 = tpu.concatenate %136, %153 in 1 : vector<8x128xf32>, vector<8x32xf32> -> vector<8x160xf32>
    %155 = arith.truncf %154 : vector<8x160xf32> to vector<8x160xbf16>
    %c0_48 = arith.constant 0 : index
    %c0_49 = arith.constant 0 : index
    %156 = vector.load %arg3[%c0_48, %c0_49] : memref<160x512xbf16, #tpu.memory_space<vmem>>, vector<160x512xbf16>
    %cst_50 = arith.constant dense<0.000000e+00> : vector<8x512xf32>
    %157 = tpu.matmul %155, %156, %cst_50 {dimension_numbers = #tpu.dot_dimension_numbers<[1], [0], [0], [1], [0, 0, 1, 1], [], []>} : vector<8x160xbf16>, vector<160x512xbf16>, vector<8x512xf32> -> vector<8x512xf32>
    %c0_51 = arith.constant 0 : index
    %c0_52 = arith.constant 0 : index
    %158 = vector.load %arg4[%c0_51, %c0_52] : memref<1x512xf32, #tpu.memory_space<vmem>>, vector<1x512xf32>
    %159 = vector.broadcast %158 : vector<1x512xf32> to vector<8x512xf32>
    %160 = arith.addf %157, %159 : vector<8x512xf32>
    %161 = vector.extract_strided_slice %160 {offsets = [0, 0], sizes = [8, 128], strides = [1, 1]} : vector<8x512xf32> to vector<8x128xf32>
    %162 = arith.negf %161 : vector<8x128xf32>
    %163 = math.exp %162 : vector<8x128xf32>
    %cst_53 = arith.constant 1.000000e+00 : f32
    %164 = vector.broadcast %cst_53 : f32 to vector<8x128xf32>
    %165 = arith.addf %164, %163 : vector<8x128xf32>
    %166 = arith.divf %164, %165 : vector<8x128xf32>
    %167 = vector.extract_strided_slice %160 {offsets = [0, 128], sizes = [8, 128], strides = [1, 1]} : vector<8x512xf32> to vector<8x128xf32>
    %168 = arith.negf %167 : vector<8x128xf32>
    %169 = math.exp %168 : vector<8x128xf32>
    %cst_54 = arith.constant 1.000000e+00 : f32
    %170 = vector.broadcast %cst_54 : f32 to vector<8x128xf32>
    %171 = arith.addf %170, %169 : vector<8x128xf32>
    %172 = arith.divf %170, %171 : vector<8x128xf32>
    %173 = vector.extract_strided_slice %160 {offsets = [0, 256], sizes = [8, 128], strides = [1, 1]} : vector<8x512xf32> to vector<8x128xf32>
    %174 = math.tanh %173 : vector<8x128xf32>
    %175 = vector.extract_strided_slice %160 {offsets = [0, 384], sizes = [8, 128], strides = [1, 1]} : vector<8x512xf32> to vector<8x128xf32>
    %176 = arith.negf %175 : vector<8x128xf32>
    %177 = math.exp %176 : vector<8x128xf32>
    %cst_55 = arith.constant 1.000000e+00 : f32
    %178 = vector.broadcast %cst_55 : f32 to vector<8x128xf32>
    %179 = arith.addf %178, %177 : vector<8x128xf32>
    %180 = arith.divf %178, %179 : vector<8x128xf32>
    %181 = arith.mulf %172, %134 : vector<8x128xf32>
    %182 = arith.mulf %166, %174 : vector<8x128xf32>
    %183 = arith.addf %181, %182 : vector<8x128xf32>
    %184 = math.tanh %183 : vector<8x128xf32>
    %185 = arith.mulf %180, %184 : vector<8x128xf32>
    %c3_56 = arith.constant 3 : index
    %c0_57 = arith.constant 0 : index
    %c0_58 = arith.constant 0 : index
    %186 = vector.load %arg14[%c3_56, %c0_57, %c0_58] : memref<8x8x128xf32, #tpu.memory_space<vmem>>, vector<1x8x128xf32>
    %187 = vector.shape_cast %186 : vector<1x8x128xf32> to vector<8x128xf32>
    %188 = vector.shape_cast %185 : vector<8x128xf32> to vector<1x8x128xf32>
    tpu.vector_store %arg14[%c3_56, %c0_57, %c0_58], %188 {strides = array<i32>} : memref<8x8x128xf32, #tpu.memory_space<vmem>>, vector<1x8x128xf32>,
    %189 = vector.broadcast %1 : vector<1x128xf32> to vector<8x128xf32>
    %190 = arith.mulf %185, %189 : vector<8x128xf32>
    %cst_59 = arith.constant dense<0.000000e+00> : vector<8xf32>
    %191 = vector.multi_reduction <add>, %190, %cst_59 [1] : vector<8x128xf32> to vector<8xf32>
    %192 = vector.shape_cast %191 : vector<8xf32> to vector<8x1xf32>
    %c3_i32 = arith.constant 3 : i32
    %193 = vector.broadcast %c3_i32 : i32 to vector<1x8xi32>
    %194 = arith.cmpi eq, %0, %193 : vector<1x8xi32>
    %195 = arith.extui %194 : vector<1x8xi1> to vector<1x8xi32>
    %196 = arith.sitofp %195 : vector<1x8xi32> to vector<1x8xf32>
    %197 = vector.broadcast %192 : vector<8x1xf32> to vector<8x8xf32>
    %198 = vector.broadcast %196 : vector<1x8xf32> to vector<8x8xf32>
    %199 = arith.mulf %197, %198 : vector<8x8xf32>
    %200 = arith.addf %151, %199 : vector<8x8xf32>
    %c4 = arith.constant 4 : index
    %c0_60 = arith.constant 0 : index
    %c0_61 = arith.constant 0 : index
    %201 = vector.load %arg1[%c4, %c0_60, %c0_61] : memref<8x8x32xf32, #tpu.memory_space<vmem>>, vector<1x8x32xf32>
    %202 = vector.shape_cast %201 : vector<1x8x32xf32> to vector<8x32xf32>
    %203 = tpu.concatenate %185, %202 in 1 : vector<8x128xf32>, vector<8x32xf32> -> vector<8x160xf32>
    %204 = arith.truncf %203 : vector<8x160xf32> to vector<8x160xbf16>
    %c0_62 = arith.constant 0 : index
    %c0_63 = arith.constant 0 : index
    %205 = vector.load %arg3[%c0_62, %c0_63] : memref<160x512xbf16, #tpu.memory_space<vmem>>, vector<160x512xbf16>
    %cst_64 = arith.constant dense<0.000000e+00> : vector<8x512xf32>
    %206 = tpu.matmul %204, %205, %cst_64 {dimension_numbers = #tpu.dot_dimension_numbers<[1], [0], [0], [1], [0, 0, 1, 1], [], []>} : vector<8x160xbf16>, vector<160x512xbf16>, vector<8x512xf32> -> vector<8x512xf32>
    %c0_65 = arith.constant 0 : index
    %c0_66 = arith.constant 0 : index
    %207 = vector.load %arg4[%c0_65, %c0_66] : memref<1x512xf32, #tpu.memory_space<vmem>>, vector<1x512xf32>
    %208 = vector.broadcast %207 : vector<1x512xf32> to vector<8x512xf32>
    %209 = arith.addf %206, %208 : vector<8x512xf32>
    %210 = vector.extract_strided_slice %209 {offsets = [0, 0], sizes = [8, 128], strides = [1, 1]} : vector<8x512xf32> to vector<8x128xf32>
    %211 = arith.negf %210 : vector<8x128xf32>
    %212 = math.exp %211 : vector<8x128xf32>
    %cst_67 = arith.constant 1.000000e+00 : f32
    %213 = vector.broadcast %cst_67 : f32 to vector<8x128xf32>
    %214 = arith.addf %213, %212 : vector<8x128xf32>
    %215 = arith.divf %213, %214 : vector<8x128xf32>
    %216 = vector.extract_strided_slice %209 {offsets = [0, 128], sizes = [8, 128], strides = [1, 1]} : vector<8x512xf32> to vector<8x128xf32>
    %217 = arith.negf %216 : vector<8x128xf32>
    %218 = math.exp %217 : vector<8x128xf32>
    %cst_68 = arith.constant 1.000000e+00 : f32
    %219 = vector.broadcast %cst_68 : f32 to vector<8x128xf32>
    %220 = arith.addf %219, %218 : vector<8x128xf32>
    %221 = arith.divf %219, %220 : vector<8x128xf32>
    %222 = vector.extract_strided_slice %209 {offsets = [0, 256], sizes = [8, 128], strides = [1, 1]} : vector<8x512xf32> to vector<8x128xf32>
    %223 = math.tanh %222 : vector<8x128xf32>
    %224 = vector.extract_strided_slice %209 {offsets = [0, 384], sizes = [8, 128], strides = [1, 1]} : vector<8x512xf32> to vector<8x128xf32>
    %225 = arith.negf %224 : vector<8x128xf32>
    %226 = math.exp %225 : vector<8x128xf32>
    %cst_69 = arith.constant 1.000000e+00 : f32
    %227 = vector.broadcast %cst_69 : f32 to vector<8x128xf32>
    %228 = arith.addf %227, %226 : vector<8x128xf32>
    %229 = arith.divf %227, %228 : vector<8x128xf32>
    %230 = arith.mulf %221, %183 : vector<8x128xf32>
    %231 = arith.mulf %215, %223 : vector<8x128xf32>
    %232 = arith.addf %230, %231 : vector<8x128xf32>
    %233 = math.tanh %232 : vector<8x128xf32>
    %234 = arith.mulf %229, %233 : vector<8x128xf32>
    %c4_70 = arith.constant 4 : index
    %c0_71 = arith.constant 0 : index
    %c0_72 = arith.constant 0 : index
    %235 = vector.load %arg14[%c4_70, %c0_71, %c0_72] : memref<8x8x128xf32, #tpu.memory_space<vmem>>, vector<1x8x128xf32>
    %236 = vector.shape_cast %235 : vector<1x8x128xf32> to vector<8x128xf32>
    %237 = vector.shape_cast %234 : vector<8x128xf32> to vector<1x8x128xf32>
    tpu.vector_store %arg14[%c4_70, %c0_71, %c0_72], %237 {strides = array<i32>} : memref<8x8x128xf32, #tpu.memory_space<vmem>>, vector<1x8x128xf32>,
    %238 = vector.broadcast %1 : vector<1x128xf32> to vector<8x128xf32>
    %239 = arith.mulf %234, %238 : vector<8x128xf32>
    %cst_73 = arith.constant dense<0.000000e+00> : vector<8xf32>
    %240 = vector.multi_reduction <add>, %239, %cst_73 [1] : vector<8x128xf32> to vector<8xf32>
    %241 = vector.shape_cast %240 : vector<8xf32> to vector<8x1xf32>
    %c4_i32 = arith.constant 4 : i32
    %242 = vector.broadcast %c4_i32 : i32 to vector<1x8xi32>
    %243 = arith.cmpi eq, %0, %242 : vector<1x8xi32>
    %244 = arith.extui %243 : vector<1x8xi1> to vector<1x8xi32>
    %245 = arith.sitofp %244 : vector<1x8xi32> to vector<1x8xf32>
    %246 = vector.broadcast %241 : vector<8x1xf32> to vector<8x8xf32>
    %247 = vector.broadcast %245 : vector<1x8xf32> to vector<8x8xf32>
    %248 = arith.mulf %246, %247 : vector<8x8xf32>
    %249 = arith.addf %200, %248 : vector<8x8xf32>
    %c5 = arith.constant 5 : index
    %c0_74 = arith.constant 0 : index
    %c0_75 = arith.constant 0 : index
    %250 = vector.load %arg1[%c5, %c0_74, %c0_75] : memref<8x8x32xf32, #tpu.memory_space<vmem>>, vector<1x8x32xf32>
    %251 = vector.shape_cast %250 : vector<1x8x32xf32> to vector<8x32xf32>
    %252 = tpu.concatenate %234, %251 in 1 : vector<8x128xf32>, vector<8x32xf32> -> vector<8x160xf32>
    %253 = arith.truncf %252 : vector<8x160xf32> to vector<8x160xbf16>
    %c0_76 = arith.constant 0 : index
    %c0_77 = arith.constant 0 : index
    %254 = vector.load %arg3[%c0_76, %c0_77] : memref<160x512xbf16, #tpu.memory_space<vmem>>, vector<160x512xbf16>
    %cst_78 = arith.constant dense<0.000000e+00> : vector<8x512xf32>
    %255 = tpu.matmul %253, %254, %cst_78 {dimension_numbers = #tpu.dot_dimension_numbers<[1], [0], [0], [1], [0, 0, 1, 1], [], []>} : vector<8x160xbf16>, vector<160x512xbf16>, vector<8x512xf32> -> vector<8x512xf32>
    %c0_79 = arith.constant 0 : index
    %c0_80 = arith.constant 0 : index
    %256 = vector.load %arg4[%c0_79, %c0_80] : memref<1x512xf32, #tpu.memory_space<vmem>>, vector<1x512xf32>
    %257 = vector.broadcast %256 : vector<1x512xf32> to vector<8x512xf32>
    %258 = arith.addf %255, %257 : vector<8x512xf32>
    %259 = vector.extract_strided_slice %258 {offsets = [0, 0], sizes = [8, 128], strides = [1, 1]} : vector<8x512xf32> to vector<8x128xf32>
    %260 = arith.negf %259 : vector<8x128xf32>
    %261 = math.exp %260 : vector<8x128xf32>
    %cst_81 = arith.constant 1.000000e+00 : f32
    %262 = vector.broadcast %cst_81 : f32 to vector<8x128xf32>
    %263 = arith.addf %262, %261 : vector<8x128xf32>
    %264 = arith.divf %262, %263 : vector<8x128xf32>
    %265 = vector.extract_strided_slice %258 {offsets = [0, 128], sizes = [8, 128], strides = [1, 1]} : vector<8x512xf32> to vector<8x128xf32>
    %266 = arith.negf %265 : vector<8x128xf32>
    %267 = math.exp %266 : vector<8x128xf32>
    %cst_82 = arith.constant 1.000000e+00 : f32
    %268 = vector.broadcast %cst_82 : f32 to vector<8x128xf32>
    %269 = arith.addf %268, %267 : vector<8x128xf32>
    %270 = arith.divf %268, %269 : vector<8x128xf32>
    %271 = vector.extract_strided_slice %258 {offsets = [0, 256], sizes = [8, 128], strides = [1, 1]} : vector<8x512xf32> to vector<8x128xf32>
    %272 = math.tanh %271 : vector<8x128xf32>
    %273 = vector.extract_strided_slice %258 {offsets = [0, 384], sizes = [8, 128], strides = [1, 1]} : vector<8x512xf32> to vector<8x128xf32>
    %274 = arith.negf %273 : vector<8x128xf32>
    %275 = math.exp %274 : vector<8x128xf32>
    %cst_83 = arith.constant 1.000000e+00 : f32
    %276 = vector.broadcast %cst_83 : f32 to vector<8x128xf32>
    %277 = arith.addf %276, %275 : vector<8x128xf32>
    %278 = arith.divf %276, %277 : vector<8x128xf32>
    %279 = arith.mulf %270, %232 : vector<8x128xf32>
    %280 = arith.mulf %264, %272 : vector<8x128xf32>
    %281 = arith.addf %279, %280 : vector<8x128xf32>
    %282 = math.tanh %281 : vector<8x128xf32>
    %283 = arith.mulf %278, %282 : vector<8x128xf32>
    %c5_84 = arith.constant 5 : index
    %c0_85 = arith.constant 0 : index
    %c0_86 = arith.constant 0 : index
    %284 = vector.load %arg14[%c5_84, %c0_85, %c0_86] : memref<8x8x128xf32, #tpu.memory_space<vmem>>, vector<1x8x128xf32>
    %285 = vector.shape_cast %284 : vector<1x8x128xf32> to vector<8x128xf32>
    %286 = vector.shape_cast %283 : vector<8x128xf32> to vector<1x8x128xf32>
    tpu.vector_store %arg14[%c5_84, %c0_85, %c0_86], %286 {strides = array<i32>} : memref<8x8x128xf32, #tpu.memory_space<vmem>>, vector<1x8x128xf32>,
    %287 = vector.broadcast %1 : vector<1x128xf32> to vector<8x128xf32>
    %288 = arith.mulf %283, %287 : vector<8x128xf32>
    %cst_87 = arith.constant dense<0.000000e+00> : vector<8xf32>
    %289 = vector.multi_reduction <add>, %288, %cst_87 [1] : vector<8x128xf32> to vector<8xf32>
    %290 = vector.shape_cast %289 : vector<8xf32> to vector<8x1xf32>
    %c5_i32 = arith.constant 5 : i32
    %291 = vector.broadcast %c5_i32 : i32 to vector<1x8xi32>
    %292 = arith.cmpi eq, %0, %291 : vector<1x8xi32>
    %293 = arith.extui %292 : vector<1x8xi1> to vector<1x8xi32>
    %294 = arith.sitofp %293 : vector<1x8xi32> to vector<1x8xf32>
    %295 = vector.broadcast %290 : vector<8x1xf32> to vector<8x8xf32>
    %296 = vector.broadcast %294 : vector<1x8xf32> to vector<8x8xf32>
    %297 = arith.mulf %295, %296 : vector<8x8xf32>
    %298 = arith.addf %249, %297 : vector<8x8xf32>
    %c6 = arith.constant 6 : index
    %c0_88 = arith.constant 0 : index
    %c0_89 = arith.constant 0 : index
    %299 = vector.load %arg1[%c6, %c0_88, %c0_89] : memref<8x8x32xf32, #tpu.memory_space<vmem>>, vector<1x8x32xf32>
    %300 = vector.shape_cast %299 : vector<1x8x32xf32> to vector<8x32xf32>
    %301 = tpu.concatenate %283, %300 in 1 : vector<8x128xf32>, vector<8x32xf32> -> vector<8x160xf32>
    %302 = arith.truncf %301 : vector<8x160xf32> to vector<8x160xbf16>
    %c0_90 = arith.constant 0 : index
    %c0_91 = arith.constant 0 : index
    %303 = vector.load %arg3[%c0_90, %c0_91] : memref<160x512xbf16, #tpu.memory_space<vmem>>, vector<160x512xbf16>
    %cst_92 = arith.constant dense<0.000000e+00> : vector<8x512xf32>
    %304 = tpu.matmul %302, %303, %cst_92 {dimension_numbers = #tpu.dot_dimension_numbers<[1], [0], [0], [1], [0, 0, 1, 1], [], []>} : vector<8x160xbf16>, vector<160x512xbf16>, vector<8x512xf32> -> vector<8x512xf32>
    %c0_93 = arith.constant 0 : index
    %c0_94 = arith.constant 0 : index
    %305 = vector.load %arg4[%c0_93, %c0_94] : memref<1x512xf32, #tpu.memory_space<vmem>>, vector<1x512xf32>
    %306 = vector.broadcast %305 : vector<1x512xf32> to vector<8x512xf32>
    %307 = arith.addf %304, %306 : vector<8x512xf32>
    %308 = vector.extract_strided_slice %307 {offsets = [0, 0], sizes = [8, 128], strides = [1, 1]} : vector<8x512xf32> to vector<8x128xf32>
    %309 = arith.negf %308 : vector<8x128xf32>
    %310 = math.exp %309 : vector<8x128xf32>
    %cst_95 = arith.constant 1.000000e+00 : f32
    %311 = vector.broadcast %cst_95 : f32 to vector<8x128xf32>
    %312 = arith.addf %311, %310 : vector<8x128xf32>
    %313 = arith.divf %311, %312 : vector<8x128xf32>
    %314 = vector.extract_strided_slice %307 {offsets = [0, 128], sizes = [8, 128], strides = [1, 1]} : vector<8x512xf32> to vector<8x128xf32>
    %315 = arith.negf %314 : vector<8x128xf32>
    %316 = math.exp %315 : vector<8x128xf32>
    %cst_96 = arith.constant 1.000000e+00 : f32
    %317 = vector.broadcast %cst_96 : f32 to vector<8x128xf32>
    %318 = arith.addf %317, %316 : vector<8x128xf32>
    %319 = arith.divf %317, %318 : vector<8x128xf32>
    %320 = vector.extract_strided_slice %307 {offsets = [0, 256], sizes = [8, 128], strides = [1, 1]} : vector<8x512xf32> to vector<8x128xf32>
    %321 = math.tanh %320 : vector<8x128xf32>
    %322 = vector.extract_strided_slice %307 {offsets = [0, 384], sizes = [8, 128], strides = [1, 1]} : vector<8x512xf32> to vector<8x128xf32>
    %323 = arith.negf %322 : vector<8x128xf32>
    %324 = math.exp %323 : vector<8x128xf32>
    %cst_97 = arith.constant 1.000000e+00 : f32
    %325 = vector.broadcast %cst_97 : f32 to vector<8x128xf32>
    %326 = arith.addf %325, %324 : vector<8x128xf32>
    %327 = arith.divf %325, %326 : vector<8x128xf32>
    %328 = arith.mulf %319, %281 : vector<8x128xf32>
    %329 = arith.mulf %313, %321 : vector<8x128xf32>
    %330 = arith.addf %328, %329 : vector<8x128xf32>
    %331 = math.tanh %330 : vector<8x128xf32>
    %332 = arith.mulf %327, %331 : vector<8x128xf32>
    %c6_98 = arith.constant 6 : index
    %c0_99 = arith.constant 0 : index
    %c0_100 = arith.constant 0 : index
    %333 = vector.load %arg14[%c6_98, %c0_99, %c0_100] : memref<8x8x128xf32, #tpu.memory_space<vmem>>, vector<1x8x128xf32>
    %334 = vector.shape_cast %333 : vector<1x8x128xf32> to vector<8x128xf32>
    %335 = vector.shape_cast %332 : vector<8x128xf32> to vector<1x8x128xf32>
    tpu.vector_store %arg14[%c6_98, %c0_99, %c0_100], %335 {strides = array<i32>} : memref<8x8x128xf32, #tpu.memory_space<vmem>>, vector<1x8x128xf32>,
    %336 = vector.broadcast %1 : vector<1x128xf32> to vector<8x128xf32>
    %337 = arith.mulf %332, %336 : vector<8x128xf32>
    %cst_101 = arith.constant dense<0.000000e+00> : vector<8xf32>
    %338 = vector.multi_reduction <add>, %337, %cst_101 [1] : vector<8x128xf32> to vector<8xf32>
    %339 = vector.shape_cast %338 : vector<8xf32> to vector<8x1xf32>
    %c6_i32 = arith.constant 6 : i32
    %340 = vector.broadcast %c6_i32 : i32 to vector<1x8xi32>
    %341 = arith.cmpi eq, %0, %340 : vector<1x8xi32>
    %342 = arith.extui %341 : vector<1x8xi1> to vector<1x8xi32>
    %343 = arith.sitofp %342 : vector<1x8xi32> to vector<1x8xf32>
    %344 = vector.broadcast %339 : vector<8x1xf32> to vector<8x8xf32>
    %345 = vector.broadcast %343 : vector<1x8xf32> to vector<8x8xf32>
    %346 = arith.mulf %344, %345 : vector<8x8xf32>
    %347 = arith.addf %298, %346 : vector<8x8xf32>
    %c7 = arith.constant 7 : index
    %c0_102 = arith.constant 0 : index
    %c0_103 = arith.constant 0 : index
    %348 = vector.load %arg1[%c7, %c0_102, %c0_103] : memref<8x8x32xf32, #tpu.memory_space<vmem>>, vector<1x8x32xf32>
    %349 = vector.shape_cast %348 : vector<1x8x32xf32> to vector<8x32xf32>
    %350 = tpu.concatenate %332, %349 in 1 : vector<8x128xf32>, vector<8x32xf32> -> vector<8x160xf32>
    %351 = arith.truncf %350 : vector<8x160xf32> to vector<8x160xbf16>
    %c0_104 = arith.constant 0 : index
    %c0_105 = arith.constant 0 : index
    %352 = vector.load %arg3[%c0_104, %c0_105] : memref<160x512xbf16, #tpu.memory_space<vmem>>, vector<160x512xbf16>
    %cst_106 = arith.constant dense<0.000000e+00> : vector<8x512xf32>
    %353 = tpu.matmul %351, %352, %cst_106 {dimension_numbers = #tpu.dot_dimension_numbers<[1], [0], [0], [1], [0, 0, 1, 1], [], []>} : vector<8x160xbf16>, vector<160x512xbf16>, vector<8x512xf32> -> vector<8x512xf32>
    %c0_107 = arith.constant 0 : index
    %c0_108 = arith.constant 0 : index
    %354 = vector.load %arg4[%c0_107, %c0_108] : memref<1x512xf32, #tpu.memory_space<vmem>>, vector<1x512xf32>
    %355 = vector.broadcast %354 : vector<1x512xf32> to vector<8x512xf32>
    %356 = arith.addf %353, %355 : vector<8x512xf32>
    %357 = vector.extract_strided_slice %356 {offsets = [0, 0], sizes = [8, 128], strides = [1, 1]} : vector<8x512xf32> to vector<8x128xf32>
    %358 = arith.negf %357 : vector<8x128xf32>
    %359 = math.exp %358 : vector<8x128xf32>
    %cst_109 = arith.constant 1.000000e+00 : f32
    %360 = vector.broadcast %cst_109 : f32 to vector<8x128xf32>
    %361 = arith.addf %360, %359 : vector<8x128xf32>
    %362 = arith.divf %360, %361 : vector<8x128xf32>
    %363 = vector.extract_strided_slice %356 {offsets = [0, 128], sizes = [8, 128], strides = [1, 1]} : vector<8x512xf32> to vector<8x128xf32>
    %364 = arith.negf %363 : vector<8x128xf32>
    %365 = math.exp %364 : vector<8x128xf32>
    %cst_110 = arith.constant 1.000000e+00 : f32
    %366 = vector.broadcast %cst_110 : f32 to vector<8x128xf32>
    %367 = arith.addf %366, %365 : vector<8x128xf32>
    %368 = arith.divf %366, %367 : vector<8x128xf32>
    %369 = vector.extract_strided_slice %356 {offsets = [0, 256], sizes = [8, 128], strides = [1, 1]} : vector<8x512xf32> to vector<8x128xf32>
    %370 = math.tanh %369 : vector<8x128xf32>
    %371 = vector.extract_strided_slice %356 {offsets = [0, 384], sizes = [8, 128], strides = [1, 1]} : vector<8x512xf32> to vector<8x128xf32>
    %372 = arith.negf %371 : vector<8x128xf32>
    %373 = math.exp %372 : vector<8x128xf32>
    %cst_111 = arith.constant 1.000000e+00 : f32
    %374 = vector.broadcast %cst_111 : f32 to vector<8x128xf32>
    %375 = arith.addf %374, %373 : vector<8x128xf32>
    %376 = arith.divf %374, %375 : vector<8x128xf32>
    %377 = arith.mulf %368, %330 : vector<8x128xf32>
    %378 = arith.mulf %362, %370 : vector<8x128xf32>
    %379 = arith.addf %377, %378 : vector<8x128xf32>
    %380 = math.tanh %379 : vector<8x128xf32>
    %381 = arith.mulf %376, %380 : vector<8x128xf32>
    %c7_112 = arith.constant 7 : index
    %c0_113 = arith.constant 0 : index
    %c0_114 = arith.constant 0 : index
    %382 = vector.load %arg14[%c7_112, %c0_113, %c0_114] : memref<8x8x128xf32, #tpu.memory_space<vmem>>, vector<1x8x128xf32>
    %383 = vector.shape_cast %382 : vector<1x8x128xf32> to vector<8x128xf32>
    %384 = vector.shape_cast %381 : vector<8x128xf32> to vector<1x8x128xf32>
    tpu.vector_store %arg14[%c7_112, %c0_113, %c0_114], %384 {strides = array<i32>} : memref<8x8x128xf32, #tpu.memory_space<vmem>>, vector<1x8x128xf32>,
    %385 = vector.broadcast %1 : vector<1x128xf32> to vector<8x128xf32>
    %386 = arith.mulf %381, %385 : vector<8x128xf32>
    %cst_115 = arith.constant dense<0.000000e+00> : vector<8xf32>
    %387 = vector.multi_reduction <add>, %386, %cst_115 [1] : vector<8x128xf32> to vector<8xf32>
    %388 = vector.shape_cast %387 : vector<8xf32> to vector<8x1xf32>
    %c7_i32 = arith.constant 7 : i32
    %389 = vector.broadcast %c7_i32 : i32 to vector<1x8xi32>
    %390 = arith.cmpi eq, %0, %389 : vector<1x8xi32>
    %391 = arith.extui %390 : vector<1x8xi1> to vector<1x8xi32>
    %392 = arith.sitofp %391 : vector<1x8xi32> to vector<1x8xf32>
    %393 = vector.broadcast %388 : vector<8x1xf32> to vector<8x8xf32>
    %394 = vector.broadcast %392 : vector<1x8xf32> to vector<8x8xf32>
    %395 = arith.mulf %393, %394 : vector<8x8xf32>
    %396 = arith.addf %347, %395 : vector<8x8xf32>
    %c0_116 = arith.constant 0 : index
    %c0_117 = arith.constant 0 : index
    %397 = vector.load %arg8[%c0_116, %c0_117] : memref<1x1xf32, #tpu.memory_space<vmem>>, vector<1x1xf32>
    %398 = vector.broadcast %397 : vector<1x1xf32> to vector<8x8xf32>
    %399 = arith.addf %396, %398 : vector<8x8xf32>
    %cst_118 = arith.constant 0.000000e+00 : f32
    %400 = vector.broadcast %cst_118 : f32 to vector<8x128xf32>
    %c0_119 = arith.constant 0 : index
    %c0_120 = arith.constant 0 : index
    %c0_121 = arith.constant 0 : index
    %401 = vector.load %arg13[%c0_119, %c0_120, %c0_121] : memref<8x8x128xf32, #tpu.memory_space<vmem>>, vector<1x8x128xf32>
    %402 = vector.shape_cast %401 : vector<1x8x128xf32> to vector<8x128xf32>
    %403 = vector.shape_cast %400 : vector<8x128xf32> to vector<1x8x128xf32>
    tpu.vector_store %arg13[%c0_119, %c0_120, %c0_121], %403 {strides = array<i32>} : memref<8x8x128xf32, #tpu.memory_space<vmem>>, vector<1x8x128xf32>,
    %c0_122 = arith.constant 0 : index
    %c0_123 = arith.constant 0 : index
    %404 = vector.load %arg6[%c0_122, %c0_123] : memref<1x128xf32, #tpu.memory_space<vmem>>, vector<1x128xf32>
    %c0_124 = arith.constant 0 : index
    %c0_125 = arith.constant 0 : index
    %c0_126 = arith.constant 0 : index
    %405 = vector.load %arg2[%c0_124, %c0_125, %c0_126] : memref<8x8x32xf32, #tpu.memory_space<vmem>>, vector<1x8x32xf32>
    %406 = vector.shape_cast %405 : vector<1x8x32xf32> to vector<8x32xf32>
    %407 = vector.broadcast %404 : vector<1x128xf32> to vector<8x128xf32>
    %408 = arith.mulf %381, %407 : vector<8x128xf32>
    %cst_127 = arith.constant dense<0.000000e+00> : vector<8xf32>
    %409 = vector.multi_reduction <add>, %408, %cst_127 [1] : vector<8x128xf32> to vector<8xf32>
    %410 = vector.shape_cast %409 : vector<8xf32> to vector<8x1xf32>
    %411 = vector.broadcast %410 : vector<8x1xf32> to vector<8x8xf32>
    %412 = arith.addf %399, %411 : vector<8x8xf32>
    %cst_128 = arith.constant 0.000000e+00 : f32
    %413 = vector.broadcast %cst_128 : f32 to vector<8x8xf32>
    %414 = arith.maximumf %412, %413 : vector<8x8xf32>
    %cst_129 = arith.constant dense<0xFF800000> : vector<8xf32>
    %415 = vector.multi_reduction <maximumf>, %414, %cst_129 [1] : vector<8x8xf32> to vector<8xf32>
    %416 = vector.shape_cast %415 : vector<8xf32> to vector<8x1xf32>
    %417 = vector.broadcast %416 : vector<8x1xf32> to vector<8x8xf32>
    %418 = arith.subf %414, %417 : vector<8x8xf32>
    %419 = math.exp %418 : vector<8x8xf32>
    %cst_130 = arith.constant dense<0.000000e+00> : vector<8xf32>
    %420 = vector.multi_reduction <add>, %419, %cst_130 [1] : vector<8x8xf32> to vector<8xf32>
    %421 = vector.shape_cast %420 : vector<8xf32> to vector<8x1xf32>
    %422 = tpu.reciprocal %421 {approx = true} : vector<8x1xf32> -> vector<8x1xf32>
    %423 = vector.broadcast %422 : vector<8x1xf32> to vector<8x8xf32>
    %424 = arith.mulf %419, %423 : vector<8x8xf32>
    %425 = vector.extract_strided_slice %424 {offsets = [0, 0], sizes = [8, 1], strides = [1, 1]} : vector<8x8xf32> to vector<8x1xf32>
    %c0_131 = arith.constant 0 : index
    %c0_132 = arith.constant 0 : index
    %c0_133 = arith.constant 0 : index
    %426 = vector.load %arg14[%c0_131, %c0_132, %c0_133] : memref<8x8x128xf32, #tpu.memory_space<vmem>>, vector<1x8x128xf32>
    %427 = vector.shape_cast %426 : vector<1x8x128xf32> to vector<8x128xf32>
    %428 = vector.broadcast %425 : vector<8x1xf32> to vector<8x128xf32>
    %429 = arith.mulf %428, %427 : vector<8x128xf32>
    %430 = vector.extract_strided_slice %424 {offsets = [0, 1], sizes = [8, 1], strides = [1, 1]} : vector<8x8xf32> to vector<8x1xf32>
    %c1_134 = arith.constant 1 : index
    %c0_135 = arith.constant 0 : index
    %c0_136 = arith.constant 0 : index
    %431 = vector.load %arg14[%c1_134, %c0_135, %c0_136] : memref<8x8x128xf32, #tpu.memory_space<vmem>>, vector<1x8x128xf32>
    %432 = vector.shape_cast %431 : vector<1x8x128xf32> to vector<8x128xf32>
    %433 = vector.broadcast %430 : vector<8x1xf32> to vector<8x128xf32>
    %434 = arith.mulf %433, %432 : vector<8x128xf32>
    %435 = arith.addf %429, %434 : vector<8x128xf32>
    %436 = vector.extract_strided_slice %424 {offsets = [0, 2], sizes = [8, 1], strides = [1, 1]} : vector<8x8xf32> to vector<8x1xf32>
    %c2_137 = arith.constant 2 : index
    %c0_138 = arith.constant 0 : index
    %c0_139 = arith.constant 0 : index
    %437 = vector.load %arg14[%c2_137, %c0_138, %c0_139] : memref<8x8x128xf32, #tpu.memory_space<vmem>>, vector<1x8x128xf32>
    %438 = vector.shape_cast %437 : vector<1x8x128xf32> to vector<8x128xf32>
    %439 = vector.broadcast %436 : vector<8x1xf32> to vector<8x128xf32>
    %440 = arith.mulf %439, %438 : vector<8x128xf32>
    %441 = arith.addf %435, %440 : vector<8x128xf32>
    %442 = vector.extract_strided_slice %424 {offsets = [0, 3], sizes = [8, 1], strides = [1, 1]} : vector<8x8xf32> to vector<8x1xf32>
    %c3_140 = arith.constant 3 : index
    %c0_141 = arith.constant 0 : index
    %c0_142 = arith.constant 0 : index
    %443 = vector.load %arg14[%c3_140, %c0_141, %c0_142] : memref<8x8x128xf32, #tpu.memory_space<vmem>>, vector<1x8x128xf32>
    %444 = vector.shape_cast %443 : vector<1x8x128xf32> to vector<8x128xf32>
    %445 = vector.broadcast %442 : vector<8x1xf32> to vector<8x128xf32>
    %446 = arith.mulf %445, %444 : vector<8x128xf32>
    %447 = arith.addf %441, %446 : vector<8x128xf32>
    %448 = vector.extract_strided_slice %424 {offsets = [0, 4], sizes = [8, 1], strides = [1, 1]} : vector<8x8xf32> to vector<8x1xf32>
    %c4_143 = arith.constant 4 : index
    %c0_144 = arith.constant 0 : index
    %c0_145 = arith.constant 0 : index
    %449 = vector.load %arg14[%c4_143, %c0_144, %c0_145] : memref<8x8x128xf32, #tpu.memory_space<vmem>>, vector<1x8x128xf32>
    %450 = vector.shape_cast %449 : vector<1x8x128xf32> to vector<8x128xf32>
    %451 = vector.broadcast %448 : vector<8x1xf32> to vector<8x128xf32>
    %452 = arith.mulf %451, %450 : vector<8x128xf32>
    %453 = arith.addf %447, %452 : vector<8x128xf32>
    %454 = vector.extract_strided_slice %424 {offsets = [0, 5], sizes = [8, 1], strides = [1, 1]} : vector<8x8xf32> to vector<8x1xf32>
    %c5_146 = arith.constant 5 : index
    %c0_147 = arith.constant 0 : index
    %c0_148 = arith.constant 0 : index
    %455 = vector.load %arg14[%c5_146, %c0_147, %c0_148] : memref<8x8x128xf32, #tpu.memory_space<vmem>>, vector<1x8x128xf32>
    %456 = vector.shape_cast %455 : vector<1x8x128xf32> to vector<8x128xf32>
    %457 = vector.broadcast %454 : vector<8x1xf32> to vector<8x128xf32>
    %458 = arith.mulf %457, %456 : vector<8x128xf32>
    %459 = arith.addf %453, %458 : vector<8x128xf32>
    %460 = vector.extract_strided_slice %424 {offsets = [0, 6], sizes = [8, 1], strides = [1, 1]} : vector<8x8xf32> to vector<8x1xf32>
    %c6_149 = arith.constant 6 : index
    %c0_150 = arith.constant 0 : index
    %c0_151 = arith.constant 0 : index
    %461 = vector.load %arg14[%c6_149, %c0_150, %c0_151] : memref<8x8x128xf32, #tpu.memory_space<vmem>>, vector<1x8x128xf32>
    %462 = vector.shape_cast %461 : vector<1x8x128xf32> to vector<8x128xf32>
    %463 = vector.broadcast %460 : vector<8x1xf32> to vector<8x128xf32>
    %464 = arith.mulf %463, %462 : vector<8x128xf32>
    %465 = arith.addf %459, %464 : vector<8x128xf32>
    %466 = vector.extract_strided_slice %424 {offsets = [0, 7], sizes = [8, 1], strides = [1, 1]} : vector<8x8xf32> to vector<8x1xf32>
    %c7_152 = arith.constant 7 : index
    %c0_153 = arith.constant 0 : index
    %c0_154 = arith.constant 0 : index
    %467 = vector.load %arg14[%c7_152, %c0_153, %c0_154] : memref<8x8x128xf32, #tpu.memory_space<vmem>>, vector<1x8x128xf32>
    %468 = vector.shape_cast %467 : vector<1x8x128xf32> to vector<8x128xf32>
    %469 = vector.broadcast %466 : vector<8x1xf32> to vector<8x128xf32>
    %470 = arith.mulf %469, %468 : vector<8x128xf32>
    %471 = arith.addf %465, %470 : vector<8x128xf32>
    %472 = tpu.concatenate %471, %381, %406 in 1 : vector<8x128xf32>, vector<8x128xf32>, vector<8x32xf32> -> vector<8x288xf32>
    %473 = arith.truncf %472 : vector<8x288xf32> to vector<8x288xbf16>
    %c0_155 = arith.constant 0 : index
    %c0_156 = arith.constant 0 : index
    %474 = vector.load %arg9[%c0_155, %c0_156] : memref<288x512xbf16, #tpu.memory_space<vmem>>, vector<288x512xbf16>
    %cst_157 = arith.constant dense<0.000000e+00> : vector<8x512xf32>
    %475 = tpu.matmul %473, %474, %cst_157 {dimension_numbers = #tpu.dot_dimension_numbers<[1], [0], [0], [1], [0, 0, 1, 1], [], []>} : vector<8x288xbf16>, vector<288x512xbf16>, vector<8x512xf32> -> vector<8x512xf32>
    %c0_158 = arith.constant 0 : index
    %c0_159 = arith.constant 0 : index
    %476 = vector.load %arg10[%c0_158, %c0_159] : memref<1x512xf32, #tpu.memory_space<vmem>>, vector<1x512xf32>
    %477 = vector.broadcast %476 : vector<1x512xf32> to vector<8x512xf32>
    %478 = arith.addf %475, %477 : vector<8x512xf32>
    %479 = vector.extract_strided_slice %478 {offsets = [0, 0], sizes = [8, 128], strides = [1, 1]} : vector<8x512xf32> to vector<8x128xf32>
    %480 = arith.negf %479 : vector<8x128xf32>
    %481 = math.exp %480 : vector<8x128xf32>
    %cst_160 = arith.constant 1.000000e+00 : f32
    %482 = vector.broadcast %cst_160 : f32 to vector<8x128xf32>
    %483 = arith.addf %482, %481 : vector<8x128xf32>
    %484 = arith.divf %482, %483 : vector<8x128xf32>
    %485 = vector.extract_strided_slice %478 {offsets = [0, 128], sizes = [8, 128], strides = [1, 1]} : vector<8x512xf32> to vector<8x128xf32>
    %486 = arith.negf %485 : vector<8x128xf32>
    %487 = math.exp %486 : vector<8x128xf32>
    %cst_161 = arith.constant 1.000000e+00 : f32
    %488 = vector.broadcast %cst_161 : f32 to vector<8x128xf32>
    %489 = arith.addf %488, %487 : vector<8x128xf32>
    %490 = arith.divf %488, %489 : vector<8x128xf32>
    %491 = vector.extract_strided_slice %478 {offsets = [0, 256], sizes = [8, 128], strides = [1, 1]} : vector<8x512xf32> to vector<8x128xf32>
    %492 = math.tanh %491 : vector<8x128xf32>
    %493 = vector.extract_strided_slice %478 {offsets = [0, 384], sizes = [8, 128], strides = [1, 1]} : vector<8x512xf32> to vector<8x128xf32>
    %494 = arith.negf %493 : vector<8x128xf32>
    %495 = math.exp %494 : vector<8x128xf32>
    %cst_162 = arith.constant 1.000000e+00 : f32
    %496 = vector.broadcast %cst_162 : f32 to vector<8x128xf32>
    %497 = arith.addf %496, %495 : vector<8x128xf32>
    %498 = arith.divf %496, %497 : vector<8x128xf32>
    %499 = arith.mulf %490, %379 : vector<8x128xf32>
    %500 = arith.mulf %484, %492 : vector<8x128xf32>
    %501 = arith.addf %499, %500 : vector<8x128xf32>
    %502 = math.tanh %501 : vector<8x128xf32>
    %503 = arith.mulf %498, %502 : vector<8x128xf32>
    %504 = arith.truncf %503 : vector<8x128xf32> to vector<8x128xbf16>
    %c0_163 = arith.constant 0 : index
    %c0_164 = arith.constant 0 : index
    %505 = vector.load %arg11[%c0_163, %c0_164] : memref<128x128xbf16, #tpu.memory_space<vmem>>, vector<128x128xbf16>
    %cst_165 = arith.constant dense<0.000000e+00> : vector<8x128xf32>
    %506 = tpu.matmul %504, %505, %cst_165 {dimension_numbers = #tpu.dot_dimension_numbers<[1], [0], [0], [1], [0, 0, 1, 1], [], []>} : vector<8x128xbf16>, vector<128x128xbf16>, vector<8x128xf32> -> vector<8x128xf32>
    %c0_166 = arith.constant 0 : index
    %c0_167 = arith.constant 0 : index
    %507 = vector.load %arg12[%c0_166, %c0_167] : memref<1x128xf32, #tpu.memory_space<vmem>>, vector<1x128xf32>
    %508 = vector.broadcast %507 : vector<1x128xf32> to vector<8x128xf32>
    %509 = arith.addf %506, %508 : vector<8x128xf32>
    %c1_168 = arith.constant 1 : index
    %c0_169 = arith.constant 0 : index
    %c0_170 = arith.constant 0 : index
    %510 = vector.load %arg13[%c1_168, %c0_169, %c0_170] : memref<8x8x128xf32, #tpu.memory_space<vmem>>, vector<1x8x128xf32>
    %511 = vector.shape_cast %510 : vector<1x8x128xf32> to vector<8x128xf32>
    %512 = vector.shape_cast %509 : vector<8x128xf32> to vector<1x8x128xf32>
    tpu.vector_store %arg13[%c1_168, %c0_169, %c0_170], %512 {strides = array<i32>} : memref<8x8x128xf32, #tpu.memory_space<vmem>>, vector<1x8x128xf32>,
    %cst_171 = arith.constant dense<0xFF800000> : vector<8xf32>
    %513 = vector.multi_reduction <maximumf>, %509, %cst_171 [1] : vector<8x128xf32> to vector<8xf32>
    %514 = vector.shape_cast %513 : vector<8xf32> to vector<8x1xf32>
    %515 = tpu.iota {dimensions = array<i32: 1>} : vector<8x128xi32>
    %516 = vector.broadcast %514 : vector<8x1xf32> to vector<8x128xf32>
    %517 = arith.cmpf oeq, %509, %516 : vector<8x128xf32>
    %c128_i32 = arith.constant 128 : i32
    %518 = vector.broadcast %c128_i32 : i32 to vector<8x128xi32>
    %519 = arith.select %517, %515, %518 : vector<8x128xi1>, vector<8x128xi32>
    %cst_172 = arith.constant dense<2147483647> : vector<8xi32>
    %520 = vector.multi_reduction <minsi>, %519, %cst_172 [1] : vector<8x128xi32> to vector<8xi32>
    %521 = vector.shape_cast %520 : vector<8xi32> to vector<8x1xi32>
    %522 = vector.broadcast %521 : vector<8x1xi32> to vector<8x128xi32>
    %523 = arith.cmpi eq, %515, %522 : vector<8x128xi32>
    %524 = arith.extui %523 : vector<8x128xi1> to vector<8x128xi32>
    %525 = arith.sitofp %524 : vector<8x128xi32> to vector<8x128xf32>
    %c0_173 = arith.constant 0 : index
    %c0_174 = arith.constant 0 : index
    %526 = vector.load %arg5[%c0_173, %c0_174] : memref<128x32xf32, #tpu.memory_space<vmem>>, vector<128x32xf32>
    %cst_175 = arith.constant dense<0.000000e+00> : vector<8x32xf32>
    %527 = tpu.matmul %525, %526, %cst_175 {dimension_numbers = #tpu.dot_dimension_numbers<[1], [0], [0], [1], [0, 0, 1, 1], [], []>} : vector<8x128xf32>, vector<128x32xf32>, vector<8x32xf32> -> vector<8x32xf32>
    %c1_176 = arith.constant 1 : index
    %528 = memref.load %arg0[%c1_176] : memref<8xi32, #tpu.memory_space<smem>>
    %c0_i32_177 = arith.constant 0 : i32
    %529 = arith.cmpi sgt, %528, %c0_i32_177 : i32
    %530 = arith.extui %529 : i1 to i32
    %531 = arith.sitofp %530 : i32 to f32
    %c1_178 = arith.constant 1 : index
    %c0_179 = arith.constant 0 : index
    %c0_180 = arith.constant 0 : index
    %532 = vector.load %arg2[%c1_178, %c0_179, %c0_180] : memref<8x8x32xf32, #tpu.memory_space<vmem>>, vector<1x8x32xf32>
    %533 = vector.shape_cast %532 : vector<1x8x32xf32> to vector<8x32xf32>
    %534 = vector.broadcast %531 : f32 to vector<8x32xf32>
    %535 = arith.mulf %534, %533 : vector<8x32xf32>
    %cst_181 = arith.constant 1.000000e+00 : f32
    %536 = arith.subf %cst_181, %531 : f32
    %537 = vector.broadcast %536 : f32 to vector<8x32xf32>
    %538 = arith.mulf %537, %527 : vector<8x32xf32>
    %539 = arith.addf %535, %538 : vector<8x32xf32>
    %540 = vector.broadcast %404 : vector<1x128xf32> to vector<8x128xf32>
    %541 = arith.mulf %503, %540 : vector<8x128xf32>
    %cst_182 = arith.constant dense<0.000000e+00> : vector<8xf32>
    %542 = vector.multi_reduction <add>, %541, %cst_182 [1] : vector<8x128xf32> to vector<8xf32>
    %543 = vector.shape_cast %542 : vector<8xf32> to vector<8x1xf32>
    %544 = vector.broadcast %543 : vector<8x1xf32> to vector<8x8xf32>
    %545 = arith.addf %399, %544 : vector<8x8xf32>
    %cst_183 = arith.constant 0.000000e+00 : f32
    %546 = vector.broadcast %cst_183 : f32 to vector<8x8xf32>
    %547 = arith.maximumf %545, %546 : vector<8x8xf32>
    %cst_184 = arith.constant dense<0xFF800000> : vector<8xf32>
    %548 = vector.multi_reduction <maximumf>, %547, %cst_184 [1] : vector<8x8xf32> to vector<8xf32>
    %549 = vector.shape_cast %548 : vector<8xf32> to vector<8x1xf32>
    %550 = vector.broadcast %549 : vector<8x1xf32> to vector<8x8xf32>
    %551 = arith.subf %547, %550 : vector<8x8xf32>
    %552 = math.exp %551 : vector<8x8xf32>
    %cst_185 = arith.constant dense<0.000000e+00> : vector<8xf32>
    %553 = vector.multi_reduction <add>, %552, %cst_185 [1] : vector<8x8xf32> to vector<8xf32>
    %554 = vector.shape_cast %553 : vector<8xf32> to vector<8x1xf32>
    %555 = tpu.reciprocal %554 {approx = true} : vector<8x1xf32> -> vector<8x1xf32>
    %556 = vector.broadcast %555 : vector<8x1xf32> to vector<8x8xf32>
    %557 = arith.mulf %552, %556 : vector<8x8xf32>
    %558 = vector.extract_strided_slice %557 {offsets = [0, 0], sizes = [8, 1], strides = [1, 1]} : vector<8x8xf32> to vector<8x1xf32>
    %c0_186 = arith.constant 0 : index
    %c0_187 = arith.constant 0 : index
    %c0_188 = arith.constant 0 : index
    %559 = vector.load %arg14[%c0_186, %c0_187, %c0_188] : memref<8x8x128xf32, #tpu.memory_space<vmem>>, vector<1x8x128xf32>
    %560 = vector.shape_cast %559 : vector<1x8x128xf32> to vector<8x128xf32>
    %561 = vector.broadcast %558 : vector<8x1xf32> to vector<8x128xf32>
    %562 = arith.mulf %561, %560 : vector<8x128xf32>
    %563 = vector.extract_strided_slice %557 {offsets = [0, 1], sizes = [8, 1], strides = [1, 1]} : vector<8x8xf32> to vector<8x1xf32>
    %c1_189 = arith.constant 1 : index
    %c0_190 = arith.constant 0 : index
    %c0_191 = arith.constant 0 : index
    %564 = vector.load %arg14[%c1_189, %c0_190, %c0_191] : memref<8x8x128xf32, #tpu.memory_space<vmem>>, vector<1x8x128xf32>
    %565 = vector.shape_cast %564 : vector<1x8x128xf32> to vector<8x128xf32>
    %566 = vector.broadcast %563 : vector<8x1xf32> to vector<8x128xf32>
    %567 = arith.mulf %566, %565 : vector<8x128xf32>
    %568 = arith.addf %562, %567 : vector<8x128xf32>
    %569 = vector.extract_strided_slice %557 {offsets = [0, 2], sizes = [8, 1], strides = [1, 1]} : vector<8x8xf32> to vector<8x1xf32>
    %c2_192 = arith.constant 2 : index
    %c0_193 = arith.constant 0 : index
    %c0_194 = arith.constant 0 : index
    %570 = vector.load %arg14[%c2_192, %c0_193, %c0_194] : memref<8x8x128xf32, #tpu.memory_space<vmem>>, vector<1x8x128xf32>
    %571 = vector.shape_cast %570 : vector<1x8x128xf32> to vector<8x128xf32>
    %572 = vector.broadcast %569 : vector<8x1xf32> to vector<8x128xf32>
    %573 = arith.mulf %572, %571 : vector<8x128xf32>
    %574 = arith.addf %568, %573 : vector<8x128xf32>
    %575 = vector.extract_strided_slice %557 {offsets = [0, 3], sizes = [8, 1], strides = [1, 1]} : vector<8x8xf32> to vector<8x1xf32>
    %c3_195 = arith.constant 3 : index
    %c0_196 = arith.constant 0 : index
    %c0_197 = arith.constant 0 : index
    %576 = vector.load %arg14[%c3_195, %c0_196, %c0_197] : memref<8x8x128xf32, #tpu.memory_space<vmem>>, vector<1x8x128xf32>
    %577 = vector.shape_cast %576 : vector<1x8x128xf32> to vector<8x128xf32>
    %578 = vector.broadcast %575 : vector<8x1xf32> to vector<8x128xf32>
    %579 = arith.mulf %578, %577 : vector<8x128xf32>
    %580 = arith.addf %574, %579 : vector<8x128xf32>
    %581 = vector.extract_strided_slice %557 {offsets = [0, 4], sizes = [8, 1], strides = [1, 1]} : vector<8x8xf32> to vector<8x1xf32>
    %c4_198 = arith.constant 4 : index
    %c0_199 = arith.constant 0 : index
    %c0_200 = arith.constant 0 : index
    %582 = vector.load %arg14[%c4_198, %c0_199, %c0_200] : memref<8x8x128xf32, #tpu.memory_space<vmem>>, vector<1x8x128xf32>
    %583 = vector.shape_cast %582 : vector<1x8x128xf32> to vector<8x128xf32>
    %584 = vector.broadcast %581 : vector<8x1xf32> to vector<8x128xf32>
    %585 = arith.mulf %584, %583 : vector<8x128xf32>
    %586 = arith.addf %580, %585 : vector<8x128xf32>
    %587 = vector.extract_strided_slice %557 {offsets = [0, 5], sizes = [8, 1], strides = [1, 1]} : vector<8x8xf32> to vector<8x1xf32>
    %c5_201 = arith.constant 5 : index
    %c0_202 = arith.constant 0 : index
    %c0_203 = arith.constant 0 : index
    %588 = vector.load %arg14[%c5_201, %c0_202, %c0_203] : memref<8x8x128xf32, #tpu.memory_space<vmem>>, vector<1x8x128xf32>
    %589 = vector.shape_cast %588 : vector<1x8x128xf32> to vector<8x128xf32>
    %590 = vector.broadcast %587 : vector<8x1xf32> to vector<8x128xf32>
    %591 = arith.mulf %590, %589 : vector<8x128xf32>
    %592 = arith.addf %586, %591 : vector<8x128xf32>
    %593 = vector.extract_strided_slice %557 {offsets = [0, 6], sizes = [8, 1], strides = [1, 1]} : vector<8x8xf32> to vector<8x1xf32>
    %c6_204 = arith.constant 6 : index
    %c0_205 = arith.constant 0 : index
    %c0_206 = arith.constant 0 : index
    %594 = vector.load %arg14[%c6_204, %c0_205, %c0_206] : memref<8x8x128xf32, #tpu.memory_space<vmem>>, vector<1x8x128xf32>
    %595 = vector.shape_cast %594 : vector<1x8x128xf32> to vector<8x128xf32>
    %596 = vector.broadcast %593 : vector<8x1xf32> to vector<8x128xf32>
    %597 = arith.mulf %596, %595 : vector<8x128xf32>
    %598 = arith.addf %592, %597 : vector<8x128xf32>
    %599 = vector.extract_strided_slice %557 {offsets = [0, 7], sizes = [8, 1], strides = [1, 1]} : vector<8x8xf32> to vector<8x1xf32>
    %c7_207 = arith.constant 7 : index
    %c0_208 = arith.constant 0 : index
    %c0_209 = arith.constant 0 : index
    %600 = vector.load %arg14[%c7_207, %c0_208, %c0_209] : memref<8x8x128xf32, #tpu.memory_space<vmem>>, vector<1x8x128xf32>
    %601 = vector.shape_cast %600 : vector<1x8x128xf32> to vector<8x128xf32>
    %602 = vector.broadcast %599 : vector<8x1xf32> to vector<8x128xf32>
    %603 = arith.mulf %602, %601 : vector<8x128xf32>
    %604 = arith.addf %598, %603 : vector<8x128xf32>
    %605 = tpu.concatenate %604, %503, %539 in 1 : vector<8x128xf32>, vector<8x128xf32>, vector<8x32xf32> -> vector<8x288xf32>
    %606 = arith.truncf %605 : vector<8x288xf32> to vector<8x288xbf16>
    %c0_210 = arith.constant 0 : index
    %c0_211 = arith.constant 0 : index
    %607 = vector.load %arg9[%c0_210, %c0_211] : memref<288x512xbf16, #tpu.memory_space<vmem>>, vector<288x512xbf16>
    %cst_212 = arith.constant dense<0.000000e+00> : vector<8x512xf32>
    %608 = tpu.matmul %606, %607, %cst_212 {dimension_numbers = #tpu.dot_dimension_numbers<[1], [0], [0], [1], [0, 0, 1, 1], [], []>} : vector<8x288xbf16>, vector<288x512xbf16>, vector<8x512xf32> -> vector<8x512xf32>
    %c0_213 = arith.constant 0 : index
    %c0_214 = arith.constant 0 : index
    %609 = vector.load %arg10[%c0_213, %c0_214] : memref<1x512xf32, #tpu.memory_space<vmem>>, vector<1x512xf32>
    %610 = vector.broadcast %609 : vector<1x512xf32> to vector<8x512xf32>
    %611 = arith.addf %608, %610 : vector<8x512xf32>
    %612 = vector.extract_strided_slice %611 {offsets = [0, 0], sizes = [8, 128], strides = [1, 1]} : vector<8x512xf32> to vector<8x128xf32>
    %613 = arith.negf %612 : vector<8x128xf32>
    %614 = math.exp %613 : vector<8x128xf32>
    %cst_215 = arith.constant 1.000000e+00 : f32
    %615 = vector.broadcast %cst_215 : f32 to vector<8x128xf32>
    %616 = arith.addf %615, %614 : vector<8x128xf32>
    %617 = arith.divf %615, %616 : vector<8x128xf32>
    %618 = vector.extract_strided_slice %611 {offsets = [0, 128], sizes = [8, 128], strides = [1, 1]} : vector<8x512xf32> to vector<8x128xf32>
    %619 = arith.negf %618 : vector<8x128xf32>
    %620 = math.exp %619 : vector<8x128xf32>
    %cst_216 = arith.constant 1.000000e+00 : f32
    %621 = vector.broadcast %cst_216 : f32 to vector<8x128xf32>
    %622 = arith.addf %621, %620 : vector<8x128xf32>
    %623 = arith.divf %621, %622 : vector<8x128xf32>
    %624 = vector.extract_strided_slice %611 {offsets = [0, 256], sizes = [8, 128], strides = [1, 1]} : vector<8x512xf32> to vector<8x128xf32>
    %625 = math.tanh %624 : vector<8x128xf32>
    %626 = vector.extract_strided_slice %611 {offsets = [0, 384], sizes = [8, 128], strides = [1, 1]} : vector<8x512xf32> to vector<8x128xf32>
    %627 = arith.negf %626 : vector<8x128xf32>
    %628 = math.exp %627 : vector<8x128xf32>
    %cst_217 = arith.constant 1.000000e+00 : f32
    %629 = vector.broadcast %cst_217 : f32 to vector<8x128xf32>
    %630 = arith.addf %629, %628 : vector<8x128xf32>
    %631 = arith.divf %629, %630 : vector<8x128xf32>
    %632 = arith.mulf %623, %501 : vector<8x128xf32>
    %633 = arith.mulf %617, %625 : vector<8x128xf32>
    %634 = arith.addf %632, %633 : vector<8x128xf32>
    %635 = math.tanh %634 : vector<8x128xf32>
    %636 = arith.mulf %631, %635 : vector<8x128xf32>
    %637 = arith.truncf %636 : vector<8x128xf32> to vector<8x128xbf16>
    %c0_218 = arith.constant 0 : index
    %c0_219 = arith.constant 0 : index
    %638 = vector.load %arg11[%c0_218, %c0_219] : memref<128x128xbf16, #tpu.memory_space<vmem>>, vector<128x128xbf16>
    %cst_220 = arith.constant dense<0.000000e+00> : vector<8x128xf32>
    %639 = tpu.matmul %637, %638, %cst_220 {dimension_numbers = #tpu.dot_dimension_numbers<[1], [0], [0], [1], [0, 0, 1, 1], [], []>} : vector<8x128xbf16>, vector<128x128xbf16>, vector<8x128xf32> -> vector<8x128xf32>
    %c0_221 = arith.constant 0 : index
    %c0_222 = arith.constant 0 : index
    %640 = vector.load %arg12[%c0_221, %c0_222] : memref<1x128xf32, #tpu.memory_space<vmem>>, vector<1x128xf32>
    %641 = vector.broadcast %640 : vector<1x128xf32> to vector<8x128xf32>
    %642 = arith.addf %639, %641 : vector<8x128xf32>
    %c2_223 = arith.constant 2 : index
    %c0_224 = arith.constant 0 : index
    %c0_225 = arith.constant 0 : index
    %643 = vector.load %arg13[%c2_223, %c0_224, %c0_225] : memref<8x8x128xf32, #tpu.memory_space<vmem>>, vector<1x8x128xf32>
    %644 = vector.shape_cast %643 : vector<1x8x128xf32> to vector<8x128xf32>
    %645 = vector.shape_cast %642 : vector<8x128xf32> to vector<1x8x128xf32>
    tpu.vector_store %arg13[%c2_223, %c0_224, %c0_225], %645 {strides = array<i32>} : memref<8x8x128xf32, #tpu.memory_space<vmem>>, vector<1x8x128xf32>,
    %cst_226 = arith.constant dense<0xFF800000> : vector<8xf32>
    %646 = vector.multi_reduction <maximumf>, %642, %cst_226 [1] : vector<8x128xf32> to vector<8xf32>
    %647 = vector.shape_cast %646 : vector<8xf32> to vector<8x1xf32>
    %648 = tpu.iota {dimensions = array<i32: 1>} : vector<8x128xi32>
    %649 = vector.broadcast %647 : vector<8x1xf32> to vector<8x128xf32>
    %650 = arith.cmpf oeq, %642, %649 : vector<8x128xf32>
    %c128_i32_227 = arith.constant 128 : i32
    %651 = vector.broadcast %c128_i32_227 : i32 to vector<8x128xi32>
    %652 = arith.select %650, %648, %651 : vector<8x128xi1>, vector<8x128xi32>
    %cst_228 = arith.constant dense<2147483647> : vector<8xi32>
    %653 = vector.multi_reduction <minsi>, %652, %cst_228 [1] : vector<8x128xi32> to vector<8xi32>
    %654 = vector.shape_cast %653 : vector<8xi32> to vector<8x1xi32>
    %655 = vector.broadcast %654 : vector<8x1xi32> to vector<8x128xi32>
    %656 = arith.cmpi eq, %648, %655 : vector<8x128xi32>
    %657 = arith.extui %656 : vector<8x128xi1> to vector<8x128xi32>
    %658 = arith.sitofp %657 : vector<8x128xi32> to vector<8x128xf32>
    %c0_229 = arith.constant 0 : index
    %c0_230 = arith.constant 0 : index
    %659 = vector.load %arg5[%c0_229, %c0_230] : memref<128x32xf32, #tpu.memory_space<vmem>>, vector<128x32xf32>
    %cst_231 = arith.constant dense<0.000000e+00> : vector<8x32xf32>
    %660 = tpu.matmul %658, %659, %cst_231 {dimension_numbers = #tpu.dot_dimension_numbers<[1], [0], [0], [1], [0, 0, 1, 1], [], []>} : vector<8x128xf32>, vector<128x32xf32>, vector<8x32xf32> -> vector<8x32xf32>
    %c2_232 = arith.constant 2 : index
    %661 = memref.load %arg0[%c2_232] : memref<8xi32, #tpu.memory_space<smem>>
    %c0_i32_233 = arith.constant 0 : i32
    %662 = arith.cmpi sgt, %661, %c0_i32_233 : i32
    %663 = arith.extui %662 : i1 to i32
    %664 = arith.sitofp %663 : i32 to f32
    %c2_234 = arith.constant 2 : index
    %c0_235 = arith.constant 0 : index
    %c0_236 = arith.constant 0 : index
    %665 = vector.load %arg2[%c2_234, %c0_235, %c0_236] : memref<8x8x32xf32, #tpu.memory_space<vmem>>, vector<1x8x32xf32>
    %666 = vector.shape_cast %665 : vector<1x8x32xf32> to vector<8x32xf32>
    %667 = vector.broadcast %664 : f32 to vector<8x32xf32>
    %668 = arith.mulf %667, %666 : vector<8x32xf32>
    %cst_237 = arith.constant 1.000000e+00 : f32
    %669 = arith.subf %cst_237, %664 : f32
    %670 = vector.broadcast %669 : f32 to vector<8x32xf32>
    %671 = arith.mulf %670, %660 : vector<8x32xf32>
    %672 = arith.addf %668, %671 : vector<8x32xf32>
    %673 = vector.broadcast %404 : vector<1x128xf32> to vector<8x128xf32>
    %674 = arith.mulf %636, %673 : vector<8x128xf32>
    %cst_238 = arith.constant dense<0.000000e+00> : vector<8xf32>
    %675 = vector.multi_reduction <add>, %674, %cst_238 [1] : vector<8x128xf32> to vector<8xf32>
    %676 = vector.shape_cast %675 : vector<8xf32> to vector<8x1xf32>
    %677 = vector.broadcast %676 : vector<8x1xf32> to vector<8x8xf32>
    %678 = arith.addf %399, %677 : vector<8x8xf32>
    %cst_239 = arith.constant 0.000000e+00 : f32
    %679 = vector.broadcast %cst_239 : f32 to vector<8x8xf32>
    %680 = arith.maximumf %678, %679 : vector<8x8xf32>
    %cst_240 = arith.constant dense<0xFF800000> : vector<8xf32>
    %681 = vector.multi_reduction <maximumf>, %680, %cst_240 [1] : vector<8x8xf32> to vector<8xf32>
    %682 = vector.shape_cast %681 : vector<8xf32> to vector<8x1xf32>
    %683 = vector.broadcast %682 : vector<8x1xf32> to vector<8x8xf32>
    %684 = arith.subf %680, %683 : vector<8x8xf32>
    %685 = math.exp %684 : vector<8x8xf32>
    %cst_241 = arith.constant dense<0.000000e+00> : vector<8xf32>
    %686 = vector.multi_reduction <add>, %685, %cst_241 [1] : vector<8x8xf32> to vector<8xf32>
    %687 = vector.shape_cast %686 : vector<8xf32> to vector<8x1xf32>
    %688 = tpu.reciprocal %687 {approx = true} : vector<8x1xf32> -> vector<8x1xf32>
    %689 = vector.broadcast %688 : vector<8x1xf32> to vector<8x8xf32>
    %690 = arith.mulf %685, %689 : vector<8x8xf32>
    %691 = vector.extract_strided_slice %690 {offsets = [0, 0], sizes = [8, 1], strides = [1, 1]} : vector<8x8xf32> to vector<8x1xf32>
    %c0_242 = arith.constant 0 : index
    %c0_243 = arith.constant 0 : index
    %c0_244 = arith.constant 0 : index
    %692 = vector.load %arg14[%c0_242, %c0_243, %c0_244] : memref<8x8x128xf32, #tpu.memory_space<vmem>>, vector<1x8x128xf32>
    %693 = vector.shape_cast %692 : vector<1x8x128xf32> to vector<8x128xf32>
    %694 = vector.broadcast %691 : vector<8x1xf32> to vector<8x128xf32>
    %695 = arith.mulf %694, %693 : vector<8x128xf32>
    %696 = vector.extract_strided_slice %690 {offsets = [0, 1], sizes = [8, 1], strides = [1, 1]} : vector<8x8xf32> to vector<8x1xf32>
    %c1_245 = arith.constant 1 : index
    %c0_246 = arith.constant 0 : index
    %c0_247 = arith.constant 0 : index
    %697 = vector.load %arg14[%c1_245, %c0_246, %c0_247] : memref<8x8x128xf32, #tpu.memory_space<vmem>>, vector<1x8x128xf32>
    %698 = vector.shape_cast %697 : vector<1x8x128xf32> to vector<8x128xf32>
    %699 = vector.broadcast %696 : vector<8x1xf32> to vector<8x128xf32>
    %700 = arith.mulf %699, %698 : vector<8x128xf32>
    %701 = arith.addf %695, %700 : vector<8x128xf32>
    %702 = vector.extract_strided_slice %690 {offsets = [0, 2], sizes = [8, 1], strides = [1, 1]} : vector<8x8xf32> to vector<8x1xf32>
    %c2_248 = arith.constant 2 : index
    %c0_249 = arith.constant 0 : index
    %c0_250 = arith.constant 0 : index
    %703 = vector.load %arg14[%c2_248, %c0_249, %c0_250] : memref<8x8x128xf32, #tpu.memory_space<vmem>>, vector<1x8x128xf32>
    %704 = vector.shape_cast %703 : vector<1x8x128xf32> to vector<8x128xf32>
    %705 = vector.broadcast %702 : vector<8x1xf32> to vector<8x128xf32>
    %706 = arith.mulf %705, %704 : vector<8x128xf32>
    %707 = arith.addf %701, %706 : vector<8x128xf32>
    %708 = vector.extract_strided_slice %690 {offsets = [0, 3], sizes = [8, 1], strides = [1, 1]} : vector<8x8xf32> to vector<8x1xf32>
    %c3_251 = arith.constant 3 : index
    %c0_252 = arith.constant 0 : index
    %c0_253 = arith.constant 0 : index
    %709 = vector.load %arg14[%c3_251, %c0_252, %c0_253] : memref<8x8x128xf32, #tpu.memory_space<vmem>>, vector<1x8x128xf32>
    %710 = vector.shape_cast %709 : vector<1x8x128xf32> to vector<8x128xf32>
    %711 = vector.broadcast %708 : vector<8x1xf32> to vector<8x128xf32>
    %712 = arith.mulf %711, %710 : vector<8x128xf32>
    %713 = arith.addf %707, %712 : vector<8x128xf32>
    %714 = vector.extract_strided_slice %690 {offsets = [0, 4], sizes = [8, 1], strides = [1, 1]} : vector<8x8xf32> to vector<8x1xf32>
    %c4_254 = arith.constant 4 : index
    %c0_255 = arith.constant 0 : index
    %c0_256 = arith.constant 0 : index
    %715 = vector.load %arg14[%c4_254, %c0_255, %c0_256] : memref<8x8x128xf32, #tpu.memory_space<vmem>>, vector<1x8x128xf32>
    %716 = vector.shape_cast %715 : vector<1x8x128xf32> to vector<8x128xf32>
    %717 = vector.broadcast %714 : vector<8x1xf32> to vector<8x128xf32>
    %718 = arith.mulf %717, %716 : vector<8x128xf32>
    %719 = arith.addf %713, %718 : vector<8x128xf32>
    %720 = vector.extract_strided_slice %690 {offsets = [0, 5], sizes = [8, 1], strides = [1, 1]} : vector<8x8xf32> to vector<8x1xf32>
    %c5_257 = arith.constant 5 : index
    %c0_258 = arith.constant 0 : index
    %c0_259 = arith.constant 0 : index
    %721 = vector.load %arg14[%c5_257, %c0_258, %c0_259] : memref<8x8x128xf32, #tpu.memory_space<vmem>>, vector<1x8x128xf32>
    %722 = vector.shape_cast %721 : vector<1x8x128xf32> to vector<8x128xf32>
    %723 = vector.broadcast %720 : vector<8x1xf32> to vector<8x128xf32>
    %724 = arith.mulf %723, %722 : vector<8x128xf32>
    %725 = arith.addf %719, %724 : vector<8x128xf32>
    %726 = vector.extract_strided_slice %690 {offsets = [0, 6], sizes = [8, 1], strides = [1, 1]} : vector<8x8xf32> to vector<8x1xf32>
    %c6_260 = arith.constant 6 : index
    %c0_261 = arith.constant 0 : index
    %c0_262 = arith.constant 0 : index
    %727 = vector.load %arg14[%c6_260, %c0_261, %c0_262] : memref<8x8x128xf32, #tpu.memory_space<vmem>>, vector<1x8x128xf32>
    %728 = vector.shape_cast %727 : vector<1x8x128xf32> to vector<8x128xf32>
    %729 = vector.broadcast %726 : vector<8x1xf32> to vector<8x128xf32>
    %730 = arith.mulf %729, %728 : vector<8x128xf32>
    %731 = arith.addf %725, %730 : vector<8x128xf32>
    %732 = vector.extract_strided_slice %690 {offsets = [0, 7], sizes = [8, 1], strides = [1, 1]} : vector<8x8xf32> to vector<8x1xf32>
    %c7_263 = arith.constant 7 : index
    %c0_264 = arith.constant 0 : index
    %c0_265 = arith.constant 0 : index
    %733 = vector.load %arg14[%c7_263, %c0_264, %c0_265] : memref<8x8x128xf32, #tpu.memory_space<vmem>>, vector<1x8x128xf32>
    %734 = vector.shape_cast %733 : vector<1x8x128xf32> to vector<8x128xf32>
    %735 = vector.broadcast %732 : vector<8x1xf32> to vector<8x128xf32>
    %736 = arith.mulf %735, %734 : vector<8x128xf32>
    %737 = arith.addf %731, %736 : vector<8x128xf32>
    %738 = tpu.concatenate %737, %636, %672 in 1 : vector<8x128xf32>, vector<8x128xf32>, vector<8x32xf32> -> vector<8x288xf32>
    %739 = arith.truncf %738 : vector<8x288xf32> to vector<8x288xbf16>
    %c0_266 = arith.constant 0 : index
    %c0_267 = arith.constant 0 : index
    %740 = vector.load %arg9[%c0_266, %c0_267] : memref<288x512xbf16, #tpu.memory_space<vmem>>, vector<288x512xbf16>
    %cst_268 = arith.constant dense<0.000000e+00> : vector<8x512xf32>
    %741 = tpu.matmul %739, %740, %cst_268 {dimension_numbers = #tpu.dot_dimension_numbers<[1], [0], [0], [1], [0, 0, 1, 1], [], []>} : vector<8x288xbf16>, vector<288x512xbf16>, vector<8x512xf32> -> vector<8x512xf32>
    %c0_269 = arith.constant 0 : index
    %c0_270 = arith.constant 0 : index
    %742 = vector.load %arg10[%c0_269, %c0_270] : memref<1x512xf32, #tpu.memory_space<vmem>>, vector<1x512xf32>
    %743 = vector.broadcast %742 : vector<1x512xf32> to vector<8x512xf32>
    %744 = arith.addf %741, %743 : vector<8x512xf32>
    %745 = vector.extract_strided_slice %744 {offsets = [0, 0], sizes = [8, 128], strides = [1, 1]} : vector<8x512xf32> to vector<8x128xf32>
    %746 = arith.negf %745 : vector<8x128xf32>
    %747 = math.exp %746 : vector<8x128xf32>
    %cst_271 = arith.constant 1.000000e+00 : f32
    %748 = vector.broadcast %cst_271 : f32 to vector<8x128xf32>
    %749 = arith.addf %748, %747 : vector<8x128xf32>
    %750 = arith.divf %748, %749 : vector<8x128xf32>
    %751 = vector.extract_strided_slice %744 {offsets = [0, 128], sizes = [8, 128], strides = [1, 1]} : vector<8x512xf32> to vector<8x128xf32>
    %752 = arith.negf %751 : vector<8x128xf32>
    %753 = math.exp %752 : vector<8x128xf32>
    %cst_272 = arith.constant 1.000000e+00 : f32
    %754 = vector.broadcast %cst_272 : f32 to vector<8x128xf32>
    %755 = arith.addf %754, %753 : vector<8x128xf32>
    %756 = arith.divf %754, %755 : vector<8x128xf32>
    %757 = vector.extract_strided_slice %744 {offsets = [0, 256], sizes = [8, 128], strides = [1, 1]} : vector<8x512xf32> to vector<8x128xf32>
    %758 = math.tanh %757 : vector<8x128xf32>
    %759 = vector.extract_strided_slice %744 {offsets = [0, 384], sizes = [8, 128], strides = [1, 1]} : vector<8x512xf32> to vector<8x128xf32>
    %760 = arith.negf %759 : vector<8x128xf32>
    %761 = math.exp %760 : vector<8x128xf32>
    %cst_273 = arith.constant 1.000000e+00 : f32
    %762 = vector.broadcast %cst_273 : f32 to vector<8x128xf32>
    %763 = arith.addf %762, %761 : vector<8x128xf32>
    %764 = arith.divf %762, %763 : vector<8x128xf32>
    %765 = arith.mulf %756, %634 : vector<8x128xf32>
    %766 = arith.mulf %750, %758 : vector<8x128xf32>
    %767 = arith.addf %765, %766 : vector<8x128xf32>
    %768 = math.tanh %767 : vector<8x128xf32>
    %769 = arith.mulf %764, %768 : vector<8x128xf32>
    %770 = arith.truncf %769 : vector<8x128xf32> to vector<8x128xbf16>
    %c0_274 = arith.constant 0 : index
    %c0_275 = arith.constant 0 : index
    %771 = vector.load %arg11[%c0_274, %c0_275] : memref<128x128xbf16, #tpu.memory_space<vmem>>, vector<128x128xbf16>
    %cst_276 = arith.constant dense<0.000000e+00> : vector<8x128xf32>
    %772 = tpu.matmul %770, %771, %cst_276 {dimension_numbers = #tpu.dot_dimension_numbers<[1], [0], [0], [1], [0, 0, 1, 1], [], []>} : vector<8x128xbf16>, vector<128x128xbf16>, vector<8x128xf32> -> vector<8x128xf32>
    %c0_277 = arith.constant 0 : index
    %c0_278 = arith.constant 0 : index
    %773 = vector.load %arg12[%c0_277, %c0_278] : memref<1x128xf32, #tpu.memory_space<vmem>>, vector<1x128xf32>
    %774 = vector.broadcast %773 : vector<1x128xf32> to vector<8x128xf32>
    %775 = arith.addf %772, %774 : vector<8x128xf32>
    %c3_279 = arith.constant 3 : index
    %c0_280 = arith.constant 0 : index
    %c0_281 = arith.constant 0 : index
    %776 = vector.load %arg13[%c3_279, %c0_280, %c0_281] : memref<8x8x128xf32, #tpu.memory_space<vmem>>, vector<1x8x128xf32>
    %777 = vector.shape_cast %776 : vector<1x8x128xf32> to vector<8x128xf32>
    %778 = vector.shape_cast %775 : vector<8x128xf32> to vector<1x8x128xf32>
    tpu.vector_store %arg13[%c3_279, %c0_280, %c0_281], %778 {strides = array<i32>} : memref<8x8x128xf32, #tpu.memory_space<vmem>>, vector<1x8x128xf32>,
    %cst_282 = arith.constant dense<0xFF800000> : vector<8xf32>
    %779 = vector.multi_reduction <maximumf>, %775, %cst_282 [1] : vector<8x128xf32> to vector<8xf32>
    %780 = vector.shape_cast %779 : vector<8xf32> to vector<8x1xf32>
    %781 = tpu.iota {dimensions = array<i32: 1>} : vector<8x128xi32>
    %782 = vector.broadcast %780 : vector<8x1xf32> to vector<8x128xf32>
    %783 = arith.cmpf oeq, %775, %782 : vector<8x128xf32>
    %c128_i32_283 = arith.constant 128 : i32
    %784 = vector.broadcast %c128_i32_283 : i32 to vector<8x128xi32>
    %785 = arith.select %783, %781, %784 : vector<8x128xi1>, vector<8x128xi32>
    %cst_284 = arith.constant dense<2147483647> : vector<8xi32>
    %786 = vector.multi_reduction <minsi>, %785, %cst_284 [1] : vector<8x128xi32> to vector<8xi32>
    %787 = vector.shape_cast %786 : vector<8xi32> to vector<8x1xi32>
    %788 = vector.broadcast %787 : vector<8x1xi32> to vector<8x128xi32>
    %789 = arith.cmpi eq, %781, %788 : vector<8x128xi32>
    %790 = arith.extui %789 : vector<8x128xi1> to vector<8x128xi32>
    %791 = arith.sitofp %790 : vector<8x128xi32> to vector<8x128xf32>
    %c0_285 = arith.constant 0 : index
    %c0_286 = arith.constant 0 : index
    %792 = vector.load %arg5[%c0_285, %c0_286] : memref<128x32xf32, #tpu.memory_space<vmem>>, vector<128x32xf32>
    %cst_287 = arith.constant dense<0.000000e+00> : vector<8x32xf32>
    %793 = tpu.matmul %791, %792, %cst_287 {dimension_numbers = #tpu.dot_dimension_numbers<[1], [0], [0], [1], [0, 0, 1, 1], [], []>} : vector<8x128xf32>, vector<128x32xf32>, vector<8x32xf32> -> vector<8x32xf32>
    %c3_288 = arith.constant 3 : index
    %794 = memref.load %arg0[%c3_288] : memref<8xi32, #tpu.memory_space<smem>>
    %c0_i32_289 = arith.constant 0 : i32
    %795 = arith.cmpi sgt, %794, %c0_i32_289 : i32
    %796 = arith.extui %795 : i1 to i32
    %797 = arith.sitofp %796 : i32 to f32
    %c3_290 = arith.constant 3 : index
    %c0_291 = arith.constant 0 : index
    %c0_292 = arith.constant 0 : index
    %798 = vector.load %arg2[%c3_290, %c0_291, %c0_292] : memref<8x8x32xf32, #tpu.memory_space<vmem>>, vector<1x8x32xf32>
    %799 = vector.shape_cast %798 : vector<1x8x32xf32> to vector<8x32xf32>
    %800 = vector.broadcast %797 : f32 to vector<8x32xf32>
    %801 = arith.mulf %800, %799 : vector<8x32xf32>
    %cst_293 = arith.constant 1.000000e+00 : f32
    %802 = arith.subf %cst_293, %797 : f32
    %803 = vector.broadcast %802 : f32 to vector<8x32xf32>
    %804 = arith.mulf %803, %793 : vector<8x32xf32>
    %805 = arith.addf %801, %804 : vector<8x32xf32>
    %806 = vector.broadcast %404 : vector<1x128xf32> to vector<8x128xf32>
    %807 = arith.mulf %769, %806 : vector<8x128xf32>
    %cst_294 = arith.constant dense<0.000000e+00> : vector<8xf32>
    %808 = vector.multi_reduction <add>, %807, %cst_294 [1] : vector<8x128xf32> to vector<8xf32>
    %809 = vector.shape_cast %808 : vector<8xf32> to vector<8x1xf32>
    %810 = vector.broadcast %809 : vector<8x1xf32> to vector<8x8xf32>
    %811 = arith.addf %399, %810 : vector<8x8xf32>
    %cst_295 = arith.constant 0.000000e+00 : f32
    %812 = vector.broadcast %cst_295 : f32 to vector<8x8xf32>
    %813 = arith.maximumf %811, %812 : vector<8x8xf32>
    %cst_296 = arith.constant dense<0xFF800000> : vector<8xf32>
    %814 = vector.multi_reduction <maximumf>, %813, %cst_296 [1] : vector<8x8xf32> to vector<8xf32>
    %815 = vector.shape_cast %814 : vector<8xf32> to vector<8x1xf32>
    %816 = vector.broadcast %815 : vector<8x1xf32> to vector<8x8xf32>
    %817 = arith.subf %813, %816 : vector<8x8xf32>
    %818 = math.exp %817 : vector<8x8xf32>
    %cst_297 = arith.constant dense<0.000000e+00> : vector<8xf32>
    %819 = vector.multi_reduction <add>, %818, %cst_297 [1] : vector<8x8xf32> to vector<8xf32>
    %820 = vector.shape_cast %819 : vector<8xf32> to vector<8x1xf32>
    %821 = tpu.reciprocal %820 {approx = true} : vector<8x1xf32> -> vector<8x1xf32>
    %822 = vector.broadcast %821 : vector<8x1xf32> to vector<8x8xf32>
    %823 = arith.mulf %818, %822 : vector<8x8xf32>
    %824 = vector.extract_strided_slice %823 {offsets = [0, 0], sizes = [8, 1], strides = [1, 1]} : vector<8x8xf32> to vector<8x1xf32>
    %c0_298 = arith.constant 0 : index
    %c0_299 = arith.constant 0 : index
    %c0_300 = arith.constant 0 : index
    %825 = vector.load %arg14[%c0_298, %c0_299, %c0_300] : memref<8x8x128xf32, #tpu.memory_space<vmem>>, vector<1x8x128xf32>
    %826 = vector.shape_cast %825 : vector<1x8x128xf32> to vector<8x128xf32>
    %827 = vector.broadcast %824 : vector<8x1xf32> to vector<8x128xf32>
    %828 = arith.mulf %827, %826 : vector<8x128xf32>
    %829 = vector.extract_strided_slice %823 {offsets = [0, 1], sizes = [8, 1], strides = [1, 1]} : vector<8x8xf32> to vector<8x1xf32>
    %c1_301 = arith.constant 1 : index
    %c0_302 = arith.constant 0 : index
    %c0_303 = arith.constant 0 : index
    %830 = vector.load %arg14[%c1_301, %c0_302, %c0_303] : memref<8x8x128xf32, #tpu.memory_space<vmem>>, vector<1x8x128xf32>
    %831 = vector.shape_cast %830 : vector<1x8x128xf32> to vector<8x128xf32>
    %832 = vector.broadcast %829 : vector<8x1xf32> to vector<8x128xf32>
    %833 = arith.mulf %832, %831 : vector<8x128xf32>
    %834 = arith.addf %828, %833 : vector<8x128xf32>
    %835 = vector.extract_strided_slice %823 {offsets = [0, 2], sizes = [8, 1], strides = [1, 1]} : vector<8x8xf32> to vector<8x1xf32>
    %c2_304 = arith.constant 2 : index
    %c0_305 = arith.constant 0 : index
    %c0_306 = arith.constant 0 : index
    %836 = vector.load %arg14[%c2_304, %c0_305, %c0_306] : memref<8x8x128xf32, #tpu.memory_space<vmem>>, vector<1x8x128xf32>
    %837 = vector.shape_cast %836 : vector<1x8x128xf32> to vector<8x128xf32>
    %838 = vector.broadcast %835 : vector<8x1xf32> to vector<8x128xf32>
    %839 = arith.mulf %838, %837 : vector<8x128xf32>
    %840 = arith.addf %834, %839 : vector<8x128xf32>
    %841 = vector.extract_strided_slice %823 {offsets = [0, 3], sizes = [8, 1], strides = [1, 1]} : vector<8x8xf32> to vector<8x1xf32>
    %c3_307 = arith.constant 3 : index
    %c0_308 = arith.constant 0 : index
    %c0_309 = arith.constant 0 : index
    %842 = vector.load %arg14[%c3_307, %c0_308, %c0_309] : memref<8x8x128xf32, #tpu.memory_space<vmem>>, vector<1x8x128xf32>
    %843 = vector.shape_cast %842 : vector<1x8x128xf32> to vector<8x128xf32>
    %844 = vector.broadcast %841 : vector<8x1xf32> to vector<8x128xf32>
    %845 = arith.mulf %844, %843 : vector<8x128xf32>
    %846 = arith.addf %840, %845 : vector<8x128xf32>
    %847 = vector.extract_strided_slice %823 {offsets = [0, 4], sizes = [8, 1], strides = [1, 1]} : vector<8x8xf32> to vector<8x1xf32>
    %c4_310 = arith.constant 4 : index
    %c0_311 = arith.constant 0 : index
    %c0_312 = arith.constant 0 : index
    %848 = vector.load %arg14[%c4_310, %c0_311, %c0_312] : memref<8x8x128xf32, #tpu.memory_space<vmem>>, vector<1x8x128xf32>
    %849 = vector.shape_cast %848 : vector<1x8x128xf32> to vector<8x128xf32>
    %850 = vector.broadcast %847 : vector<8x1xf32> to vector<8x128xf32>
    %851 = arith.mulf %850, %849 : vector<8x128xf32>
    %852 = arith.addf %846, %851 : vector<8x128xf32>
    %853 = vector.extract_strided_slice %823 {offsets = [0, 5], sizes = [8, 1], strides = [1, 1]} : vector<8x8xf32> to vector<8x1xf32>
    %c5_313 = arith.constant 5 : index
    %c0_314 = arith.constant 0 : index
    %c0_315 = arith.constant 0 : index
    %854 = vector.load %arg14[%c5_313, %c0_314, %c0_315] : memref<8x8x128xf32, #tpu.memory_space<vmem>>, vector<1x8x128xf32>
    %855 = vector.shape_cast %854 : vector<1x8x128xf32> to vector<8x128xf32>
    %856 = vector.broadcast %853 : vector<8x1xf32> to vector<8x128xf32>
    %857 = arith.mulf %856, %855 : vector<8x128xf32>
    %858 = arith.addf %852, %857 : vector<8x128xf32>
    %859 = vector.extract_strided_slice %823 {offsets = [0, 6], sizes = [8, 1], strides = [1, 1]} : vector<8x8xf32> to vector<8x1xf32>
    %c6_316 = arith.constant 6 : index
    %c0_317 = arith.constant 0 : index
    %c0_318 = arith.constant 0 : index
    %860 = vector.load %arg14[%c6_316, %c0_317, %c0_318] : memref<8x8x128xf32, #tpu.memory_space<vmem>>, vector<1x8x128xf32>
    %861 = vector.shape_cast %860 : vector<1x8x128xf32> to vector<8x128xf32>
    %862 = vector.broadcast %859 : vector<8x1xf32> to vector<8x128xf32>
    %863 = arith.mulf %862, %861 : vector<8x128xf32>
    %864 = arith.addf %858, %863 : vector<8x128xf32>
    %865 = vector.extract_strided_slice %823 {offsets = [0, 7], sizes = [8, 1], strides = [1, 1]} : vector<8x8xf32> to vector<8x1xf32>
    %c7_319 = arith.constant 7 : index
    %c0_320 = arith.constant 0 : index
    %c0_321 = arith.constant 0 : index
    %866 = vector.load %arg14[%c7_319, %c0_320, %c0_321] : memref<8x8x128xf32, #tpu.memory_space<vmem>>, vector<1x8x128xf32>
    %867 = vector.shape_cast %866 : vector<1x8x128xf32> to vector<8x128xf32>
    %868 = vector.broadcast %865 : vector<8x1xf32> to vector<8x128xf32>
    %869 = arith.mulf %868, %867 : vector<8x128xf32>
    %870 = arith.addf %864, %869 : vector<8x128xf32>
    %871 = tpu.concatenate %870, %769, %805 in 1 : vector<8x128xf32>, vector<8x128xf32>, vector<8x32xf32> -> vector<8x288xf32>
    %872 = arith.truncf %871 : vector<8x288xf32> to vector<8x288xbf16>
    %c0_322 = arith.constant 0 : index
    %c0_323 = arith.constant 0 : index
    %873 = vector.load %arg9[%c0_322, %c0_323] : memref<288x512xbf16, #tpu.memory_space<vmem>>, vector<288x512xbf16>
    %cst_324 = arith.constant dense<0.000000e+00> : vector<8x512xf32>
    %874 = tpu.matmul %872, %873, %cst_324 {dimension_numbers = #tpu.dot_dimension_numbers<[1], [0], [0], [1], [0, 0, 1, 1], [], []>} : vector<8x288xbf16>, vector<288x512xbf16>, vector<8x512xf32> -> vector<8x512xf32>
    %c0_325 = arith.constant 0 : index
    %c0_326 = arith.constant 0 : index
    %875 = vector.load %arg10[%c0_325, %c0_326] : memref<1x512xf32, #tpu.memory_space<vmem>>, vector<1x512xf32>
    %876 = vector.broadcast %875 : vector<1x512xf32> to vector<8x512xf32>
    %877 = arith.addf %874, %876 : vector<8x512xf32>
    %878 = vector.extract_strided_slice %877 {offsets = [0, 0], sizes = [8, 128], strides = [1, 1]} : vector<8x512xf32> to vector<8x128xf32>
    %879 = arith.negf %878 : vector<8x128xf32>
    %880 = math.exp %879 : vector<8x128xf32>
    %cst_327 = arith.constant 1.000000e+00 : f32
    %881 = vector.broadcast %cst_327 : f32 to vector<8x128xf32>
    %882 = arith.addf %881, %880 : vector<8x128xf32>
    %883 = arith.divf %881, %882 : vector<8x128xf32>
    %884 = vector.extract_strided_slice %877 {offsets = [0, 128], sizes = [8, 128], strides = [1, 1]} : vector<8x512xf32> to vector<8x128xf32>
    %885 = arith.negf %884 : vector<8x128xf32>
    %886 = math.exp %885 : vector<8x128xf32>
    %cst_328 = arith.constant 1.000000e+00 : f32
    %887 = vector.broadcast %cst_328 : f32 to vector<8x128xf32>
    %888 = arith.addf %887, %886 : vector<8x128xf32>
    %889 = arith.divf %887, %888 : vector<8x128xf32>
    %890 = vector.extract_strided_slice %877 {offsets = [0, 256], sizes = [8, 128], strides = [1, 1]} : vector<8x512xf32> to vector<8x128xf32>
    %891 = math.tanh %890 : vector<8x128xf32>
    %892 = vector.extract_strided_slice %877 {offsets = [0, 384], sizes = [8, 128], strides = [1, 1]} : vector<8x512xf32> to vector<8x128xf32>
    %893 = arith.negf %892 : vector<8x128xf32>
    %894 = math.exp %893 : vector<8x128xf32>
    %cst_329 = arith.constant 1.000000e+00 : f32
    %895 = vector.broadcast %cst_329 : f32 to vector<8x128xf32>
    %896 = arith.addf %895, %894 : vector<8x128xf32>
    %897 = arith.divf %895, %896 : vector<8x128xf32>
    %898 = arith.mulf %889, %767 : vector<8x128xf32>
    %899 = arith.mulf %883, %891 : vector<8x128xf32>
    %900 = arith.addf %898, %899 : vector<8x128xf32>
    %901 = math.tanh %900 : vector<8x128xf32>
    %902 = arith.mulf %897, %901 : vector<8x128xf32>
    %903 = arith.truncf %902 : vector<8x128xf32> to vector<8x128xbf16>
    %c0_330 = arith.constant 0 : index
    %c0_331 = arith.constant 0 : index
    %904 = vector.load %arg11[%c0_330, %c0_331] : memref<128x128xbf16, #tpu.memory_space<vmem>>, vector<128x128xbf16>
    %cst_332 = arith.constant dense<0.000000e+00> : vector<8x128xf32>
    %905 = tpu.matmul %903, %904, %cst_332 {dimension_numbers = #tpu.dot_dimension_numbers<[1], [0], [0], [1], [0, 0, 1, 1], [], []>} : vector<8x128xbf16>, vector<128x128xbf16>, vector<8x128xf32> -> vector<8x128xf32>
    %c0_333 = arith.constant 0 : index
    %c0_334 = arith.constant 0 : index
    %906 = vector.load %arg12[%c0_333, %c0_334] : memref<1x128xf32, #tpu.memory_space<vmem>>, vector<1x128xf32>
    %907 = vector.broadcast %906 : vector<1x128xf32> to vector<8x128xf32>
    %908 = arith.addf %905, %907 : vector<8x128xf32>
    %c4_335 = arith.constant 4 : index
    %c0_336 = arith.constant 0 : index
    %c0_337 = arith.constant 0 : index
    %909 = vector.load %arg13[%c4_335, %c0_336, %c0_337] : memref<8x8x128xf32, #tpu.memory_space<vmem>>, vector<1x8x128xf32>
    %910 = vector.shape_cast %909 : vector<1x8x128xf32> to vector<8x128xf32>
    %911 = vector.shape_cast %908 : vector<8x128xf32> to vector<1x8x128xf32>
    tpu.vector_store %arg13[%c4_335, %c0_336, %c0_337], %911 {strides = array<i32>} : memref<8x8x128xf32, #tpu.memory_space<vmem>>, vector<1x8x128xf32>,
    %cst_338 = arith.constant dense<0xFF800000> : vector<8xf32>
    %912 = vector.multi_reduction <maximumf>, %908, %cst_338 [1] : vector<8x128xf32> to vector<8xf32>
    %913 = vector.shape_cast %912 : vector<8xf32> to vector<8x1xf32>
    %914 = tpu.iota {dimensions = array<i32: 1>} : vector<8x128xi32>
    %915 = vector.broadcast %913 : vector<8x1xf32> to vector<8x128xf32>
    %916 = arith.cmpf oeq, %908, %915 : vector<8x128xf32>
    %c128_i32_339 = arith.constant 128 : i32
    %917 = vector.broadcast %c128_i32_339 : i32 to vector<8x128xi32>
    %918 = arith.select %916, %914, %917 : vector<8x128xi1>, vector<8x128xi32>
    %cst_340 = arith.constant dense<2147483647> : vector<8xi32>
    %919 = vector.multi_reduction <minsi>, %918, %cst_340 [1] : vector<8x128xi32> to vector<8xi32>
    %920 = vector.shape_cast %919 : vector<8xi32> to vector<8x1xi32>
    %921 = vector.broadcast %920 : vector<8x1xi32> to vector<8x128xi32>
    %922 = arith.cmpi eq, %914, %921 : vector<8x128xi32>
    %923 = arith.extui %922 : vector<8x128xi1> to vector<8x128xi32>
    %924 = arith.sitofp %923 : vector<8x128xi32> to vector<8x128xf32>
    %c0_341 = arith.constant 0 : index
    %c0_342 = arith.constant 0 : index
    %925 = vector.load %arg5[%c0_341, %c0_342] : memref<128x32xf32, #tpu.memory_space<vmem>>, vector<128x32xf32>
    %cst_343 = arith.constant dense<0.000000e+00> : vector<8x32xf32>
    %926 = tpu.matmul %924, %925, %cst_343 {dimension_numbers = #tpu.dot_dimension_numbers<[1], [0], [0], [1], [0, 0, 1, 1], [], []>} : vector<8x128xf32>, vector<128x32xf32>, vector<8x32xf32> -> vector<8x32xf32>
    %c4_344 = arith.constant 4 : index
    %927 = memref.load %arg0[%c4_344] : memref<8xi32, #tpu.memory_space<smem>>
    %c0_i32_345 = arith.constant 0 : i32
    %928 = arith.cmpi sgt, %927, %c0_i32_345 : i32
    %929 = arith.extui %928 : i1 to i32
    %930 = arith.sitofp %929 : i32 to f32
    %c4_346 = arith.constant 4 : index
    %c0_347 = arith.constant 0 : index
    %c0_348 = arith.constant 0 : index
    %931 = vector.load %arg2[%c4_346, %c0_347, %c0_348] : memref<8x8x32xf32, #tpu.memory_space<vmem>>, vector<1x8x32xf32>
    %932 = vector.shape_cast %931 : vector<1x8x32xf32> to vector<8x32xf32>
    %933 = vector.broadcast %930 : f32 to vector<8x32xf32>
    %934 = arith.mulf %933, %932 : vector<8x32xf32>
    %cst_349 = arith.constant 1.000000e+00 : f32
    %935 = arith.subf %cst_349, %930 : f32
    %936 = vector.broadcast %935 : f32 to vector<8x32xf32>
    %937 = arith.mulf %936, %926 : vector<8x32xf32>
    %938 = arith.addf %934, %937 : vector<8x32xf32>
    %939 = vector.broadcast %404 : vector<1x128xf32> to vector<8x128xf32>
    %940 = arith.mulf %902, %939 : vector<8x128xf32>
    %cst_350 = arith.constant dense<0.000000e+00> : vector<8xf32>
    %941 = vector.multi_reduction <add>, %940, %cst_350 [1] : vector<8x128xf32> to vector<8xf32>
    %942 = vector.shape_cast %941 : vector<8xf32> to vector<8x1xf32>
    %943 = vector.broadcast %942 : vector<8x1xf32> to vector<8x8xf32>
    %944 = arith.addf %399, %943 : vector<8x8xf32>
    %cst_351 = arith.constant 0.000000e+00 : f32
    %945 = vector.broadcast %cst_351 : f32 to vector<8x8xf32>
    %946 = arith.maximumf %944, %945 : vector<8x8xf32>
    %cst_352 = arith.constant dense<0xFF800000> : vector<8xf32>
    %947 = vector.multi_reduction <maximumf>, %946, %cst_352 [1] : vector<8x8xf32> to vector<8xf32>
    %948 = vector.shape_cast %947 : vector<8xf32> to vector<8x1xf32>
    %949 = vector.broadcast %948 : vector<8x1xf32> to vector<8x8xf32>
    %950 = arith.subf %946, %949 : vector<8x8xf32>
    %951 = math.exp %950 : vector<8x8xf32>
    %cst_353 = arith.constant dense<0.000000e+00> : vector<8xf32>
    %952 = vector.multi_reduction <add>, %951, %cst_353 [1] : vector<8x8xf32> to vector<8xf32>
    %953 = vector.shape_cast %952 : vector<8xf32> to vector<8x1xf32>
    %954 = tpu.reciprocal %953 {approx = true} : vector<8x1xf32> -> vector<8x1xf32>
    %955 = vector.broadcast %954 : vector<8x1xf32> to vector<8x8xf32>
    %956 = arith.mulf %951, %955 : vector<8x8xf32>
    %957 = vector.extract_strided_slice %956 {offsets = [0, 0], sizes = [8, 1], strides = [1, 1]} : vector<8x8xf32> to vector<8x1xf32>
    %c0_354 = arith.constant 0 : index
    %c0_355 = arith.constant 0 : index
    %c0_356 = arith.constant 0 : index
    %958 = vector.load %arg14[%c0_354, %c0_355, %c0_356] : memref<8x8x128xf32, #tpu.memory_space<vmem>>, vector<1x8x128xf32>
    %959 = vector.shape_cast %958 : vector<1x8x128xf32> to vector<8x128xf32>
    %960 = vector.broadcast %957 : vector<8x1xf32> to vector<8x128xf32>
    %961 = arith.mulf %960, %959 : vector<8x128xf32>
    %962 = vector.extract_strided_slice %956 {offsets = [0, 1], sizes = [8, 1], strides = [1, 1]} : vector<8x8xf32> to vector<8x1xf32>
    %c1_357 = arith.constant 1 : index
    %c0_358 = arith.constant 0 : index
    %c0_359 = arith.constant 0 : index
    %963 = vector.load %arg14[%c1_357, %c0_358, %c0_359] : memref<8x8x128xf32, #tpu.memory_space<vmem>>, vector<1x8x128xf32>
    %964 = vector.shape_cast %963 : vector<1x8x128xf32> to vector<8x128xf32>
    %965 = vector.broadcast %962 : vector<8x1xf32> to vector<8x128xf32>
    %966 = arith.mulf %965, %964 : vector<8x128xf32>
    %967 = arith.addf %961, %966 : vector<8x128xf32>
    %968 = vector.extract_strided_slice %956 {offsets = [0, 2], sizes = [8, 1], strides = [1, 1]} : vector<8x8xf32> to vector<8x1xf32>
    %c2_360 = arith.constant 2 : index
    %c0_361 = arith.constant 0 : index
    %c0_362 = arith.constant 0 : index
    %969 = vector.load %arg14[%c2_360, %c0_361, %c0_362] : memref<8x8x128xf32, #tpu.memory_space<vmem>>, vector<1x8x128xf32>
    %970 = vector.shape_cast %969 : vector<1x8x128xf32> to vector<8x128xf32>
    %971 = vector.broadcast %968 : vector<8x1xf32> to vector<8x128xf32>
    %972 = arith.mulf %971, %970 : vector<8x128xf32>
    %973 = arith.addf %967, %972 : vector<8x128xf32>
    %974 = vector.extract_strided_slice %956 {offsets = [0, 3], sizes = [8, 1], strides = [1, 1]} : vector<8x8xf32> to vector<8x1xf32>
    %c3_363 = arith.constant 3 : index
    %c0_364 = arith.constant 0 : index
    %c0_365 = arith.constant 0 : index
    %975 = vector.load %arg14[%c3_363, %c0_364, %c0_365] : memref<8x8x128xf32, #tpu.memory_space<vmem>>, vector<1x8x128xf32>
    %976 = vector.shape_cast %975 : vector<1x8x128xf32> to vector<8x128xf32>
    %977 = vector.broadcast %974 : vector<8x1xf32> to vector<8x128xf32>
    %978 = arith.mulf %977, %976 : vector<8x128xf32>
    %979 = arith.addf %973, %978 : vector<8x128xf32>
    %980 = vector.extract_strided_slice %956 {offsets = [0, 4], sizes = [8, 1], strides = [1, 1]} : vector<8x8xf32> to vector<8x1xf32>
    %c4_366 = arith.constant 4 : index
    %c0_367 = arith.constant 0 : index
    %c0_368 = arith.constant 0 : index
    %981 = vector.load %arg14[%c4_366, %c0_367, %c0_368] : memref<8x8x128xf32, #tpu.memory_space<vmem>>, vector<1x8x128xf32>
    %982 = vector.shape_cast %981 : vector<1x8x128xf32> to vector<8x128xf32>
    %983 = vector.broadcast %980 : vector<8x1xf32> to vector<8x128xf32>
    %984 = arith.mulf %983, %982 : vector<8x128xf32>
    %985 = arith.addf %979, %984 : vector<8x128xf32>
    %986 = vector.extract_strided_slice %956 {offsets = [0, 5], sizes = [8, 1], strides = [1, 1]} : vector<8x8xf32> to vector<8x1xf32>
    %c5_369 = arith.constant 5 : index
    %c0_370 = arith.constant 0 : index
    %c0_371 = arith.constant 0 : index
    %987 = vector.load %arg14[%c5_369, %c0_370, %c0_371] : memref<8x8x128xf32, #tpu.memory_space<vmem>>, vector<1x8x128xf32>
    %988 = vector.shape_cast %987 : vector<1x8x128xf32> to vector<8x128xf32>
    %989 = vector.broadcast %986 : vector<8x1xf32> to vector<8x128xf32>
    %990 = arith.mulf %989, %988 : vector<8x128xf32>
    %991 = arith.addf %985, %990 : vector<8x128xf32>
    %992 = vector.extract_strided_slice %956 {offsets = [0, 6], sizes = [8, 1], strides = [1, 1]} : vector<8x8xf32> to vector<8x1xf32>
    %c6_372 = arith.constant 6 : index
    %c0_373 = arith.constant 0 : index
    %c0_374 = arith.constant 0 : index
    %993 = vector.load %arg14[%c6_372, %c0_373, %c0_374] : memref<8x8x128xf32, #tpu.memory_space<vmem>>, vector<1x8x128xf32>
    %994 = vector.shape_cast %993 : vector<1x8x128xf32> to vector<8x128xf32>
    %995 = vector.broadcast %992 : vector<8x1xf32> to vector<8x128xf32>
    %996 = arith.mulf %995, %994 : vector<8x128xf32>
    %997 = arith.addf %991, %996 : vector<8x128xf32>
    %998 = vector.extract_strided_slice %956 {offsets = [0, 7], sizes = [8, 1], strides = [1, 1]} : vector<8x8xf32> to vector<8x1xf32>
    %c7_375 = arith.constant 7 : index
    %c0_376 = arith.constant 0 : index
    %c0_377 = arith.constant 0 : index
    %999 = vector.load %arg14[%c7_375, %c0_376, %c0_377] : memref<8x8x128xf32, #tpu.memory_space<vmem>>, vector<1x8x128xf32>
    %1000 = vector.shape_cast %999 : vector<1x8x128xf32> to vector<8x128xf32>
    %1001 = vector.broadcast %998 : vector<8x1xf32> to vector<8x128xf32>
    %1002 = arith.mulf %1001, %1000 : vector<8x128xf32>
    %1003 = arith.addf %997, %1002 : vector<8x128xf32>
    %1004 = tpu.concatenate %1003, %902, %938 in 1 : vector<8x128xf32>, vector<8x128xf32>, vector<8x32xf32> -> vector<8x288xf32>
    %1005 = arith.truncf %1004 : vector<8x288xf32> to vector<8x288xbf16>
    %c0_378 = arith.constant 0 : index
    %c0_379 = arith.constant 0 : index
    %1006 = vector.load %arg9[%c0_378, %c0_379] : memref<288x512xbf16, #tpu.memory_space<vmem>>, vector<288x512xbf16>
    %cst_380 = arith.constant dense<0.000000e+00> : vector<8x512xf32>
    %1007 = tpu.matmul %1005, %1006, %cst_380 {dimension_numbers = #tpu.dot_dimension_numbers<[1], [0], [0], [1], [0, 0, 1, 1], [], []>} : vector<8x288xbf16>, vector<288x512xbf16>, vector<8x512xf32> -> vector<8x512xf32>
    %c0_381 = arith.constant 0 : index
    %c0_382 = arith.constant 0 : index
    %1008 = vector.load %arg10[%c0_381, %c0_382] : memref<1x512xf32, #tpu.memory_space<vmem>>, vector<1x512xf32>
    %1009 = vector.broadcast %1008 : vector<1x512xf32> to vector<8x512xf32>
    %1010 = arith.addf %1007, %1009 : vector<8x512xf32>
    %1011 = vector.extract_strided_slice %1010 {offsets = [0, 0], sizes = [8, 128], strides = [1, 1]} : vector<8x512xf32> to vector<8x128xf32>
    %1012 = arith.negf %1011 : vector<8x128xf32>
    %1013 = math.exp %1012 : vector<8x128xf32>
    %cst_383 = arith.constant 1.000000e+00 : f32
    %1014 = vector.broadcast %cst_383 : f32 to vector<8x128xf32>
    %1015 = arith.addf %1014, %1013 : vector<8x128xf32>
    %1016 = arith.divf %1014, %1015 : vector<8x128xf32>
    %1017 = vector.extract_strided_slice %1010 {offsets = [0, 128], sizes = [8, 128], strides = [1, 1]} : vector<8x512xf32> to vector<8x128xf32>
    %1018 = arith.negf %1017 : vector<8x128xf32>
    %1019 = math.exp %1018 : vector<8x128xf32>
    %cst_384 = arith.constant 1.000000e+00 : f32
    %1020 = vector.broadcast %cst_384 : f32 to vector<8x128xf32>
    %1021 = arith.addf %1020, %1019 : vector<8x128xf32>
    %1022 = arith.divf %1020, %1021 : vector<8x128xf32>
    %1023 = vector.extract_strided_slice %1010 {offsets = [0, 256], sizes = [8, 128], strides = [1, 1]} : vector<8x512xf32> to vector<8x128xf32>
    %1024 = math.tanh %1023 : vector<8x128xf32>
    %1025 = vector.extract_strided_slice %1010 {offsets = [0, 384], sizes = [8, 128], strides = [1, 1]} : vector<8x512xf32> to vector<8x128xf32>
    %1026 = arith.negf %1025 : vector<8x128xf32>
    %1027 = math.exp %1026 : vector<8x128xf32>
    %cst_385 = arith.constant 1.000000e+00 : f32
    %1028 = vector.broadcast %cst_385 : f32 to vector<8x128xf32>
    %1029 = arith.addf %1028, %1027 : vector<8x128xf32>
    %1030 = arith.divf %1028, %1029 : vector<8x128xf32>
    %1031 = arith.mulf %1022, %900 : vector<8x128xf32>
    %1032 = arith.mulf %1016, %1024 : vector<8x128xf32>
    %1033 = arith.addf %1031, %1032 : vector<8x128xf32>
    %1034 = math.tanh %1033 : vector<8x128xf32>
    %1035 = arith.mulf %1030, %1034 : vector<8x128xf32>
    %1036 = arith.truncf %1035 : vector<8x128xf32> to vector<8x128xbf16>
    %c0_386 = arith.constant 0 : index
    %c0_387 = arith.constant 0 : index
    %1037 = vector.load %arg11[%c0_386, %c0_387] : memref<128x128xbf16, #tpu.memory_space<vmem>>, vector<128x128xbf16>
    %cst_388 = arith.constant dense<0.000000e+00> : vector<8x128xf32>
    %1038 = tpu.matmul %1036, %1037, %cst_388 {dimension_numbers = #tpu.dot_dimension_numbers<[1], [0], [0], [1], [0, 0, 1, 1], [], []>} : vector<8x128xbf16>, vector<128x128xbf16>, vector<8x128xf32> -> vector<8x128xf32>
    %c0_389 = arith.constant 0 : index
    %c0_390 = arith.constant 0 : index
    %1039 = vector.load %arg12[%c0_389, %c0_390] : memref<1x128xf32, #tpu.memory_space<vmem>>, vector<1x128xf32>
    %1040 = vector.broadcast %1039 : vector<1x128xf32> to vector<8x128xf32>
    %1041 = arith.addf %1038, %1040 : vector<8x128xf32>
    %c5_391 = arith.constant 5 : index
    %c0_392 = arith.constant 0 : index
    %c0_393 = arith.constant 0 : index
    %1042 = vector.load %arg13[%c5_391, %c0_392, %c0_393] : memref<8x8x128xf32, #tpu.memory_space<vmem>>, vector<1x8x128xf32>
    %1043 = vector.shape_cast %1042 : vector<1x8x128xf32> to vector<8x128xf32>
    %1044 = vector.shape_cast %1041 : vector<8x128xf32> to vector<1x8x128xf32>
    tpu.vector_store %arg13[%c5_391, %c0_392, %c0_393], %1044 {strides = array<i32>} : memref<8x8x128xf32, #tpu.memory_space<vmem>>, vector<1x8x128xf32>,
    %cst_394 = arith.constant dense<0xFF800000> : vector<8xf32>
    %1045 = vector.multi_reduction <maximumf>, %1041, %cst_394 [1] : vector<8x128xf32> to vector<8xf32>
    %1046 = vector.shape_cast %1045 : vector<8xf32> to vector<8x1xf32>
    %1047 = tpu.iota {dimensions = array<i32: 1>} : vector<8x128xi32>
    %1048 = vector.broadcast %1046 : vector<8x1xf32> to vector<8x128xf32>
    %1049 = arith.cmpf oeq, %1041, %1048 : vector<8x128xf32>
    %c128_i32_395 = arith.constant 128 : i32
    %1050 = vector.broadcast %c128_i32_395 : i32 to vector<8x128xi32>
    %1051 = arith.select %1049, %1047, %1050 : vector<8x128xi1>, vector<8x128xi32>
    %cst_396 = arith.constant dense<2147483647> : vector<8xi32>
    %1052 = vector.multi_reduction <minsi>, %1051, %cst_396 [1] : vector<8x128xi32> to vector<8xi32>
    %1053 = vector.shape_cast %1052 : vector<8xi32> to vector<8x1xi32>
    %1054 = vector.broadcast %1053 : vector<8x1xi32> to vector<8x128xi32>
    %1055 = arith.cmpi eq, %1047, %1054 : vector<8x128xi32>
    %1056 = arith.extui %1055 : vector<8x128xi1> to vector<8x128xi32>
    %1057 = arith.sitofp %1056 : vector<8x128xi32> to vector<8x128xf32>
    %c0_397 = arith.constant 0 : index
    %c0_398 = arith.constant 0 : index
    %1058 = vector.load %arg5[%c0_397, %c0_398] : memref<128x32xf32, #tpu.memory_space<vmem>>, vector<128x32xf32>
    %cst_399 = arith.constant dense<0.000000e+00> : vector<8x32xf32>
    %1059 = tpu.matmul %1057, %1058, %cst_399 {dimension_numbers = #tpu.dot_dimension_numbers<[1], [0], [0], [1], [0, 0, 1, 1], [], []>} : vector<8x128xf32>, vector<128x32xf32>, vector<8x32xf32> -> vector<8x32xf32>
    %c5_400 = arith.constant 5 : index
    %1060 = memref.load %arg0[%c5_400] : memref<8xi32, #tpu.memory_space<smem>>
    %c0_i32_401 = arith.constant 0 : i32
    %1061 = arith.cmpi sgt, %1060, %c0_i32_401 : i32
    %1062 = arith.extui %1061 : i1 to i32
    %1063 = arith.sitofp %1062 : i32 to f32
    %c5_402 = arith.constant 5 : index
    %c0_403 = arith.constant 0 : index
    %c0_404 = arith.constant 0 : index
    %1064 = vector.load %arg2[%c5_402, %c0_403, %c0_404] : memref<8x8x32xf32, #tpu.memory_space<vmem>>, vector<1x8x32xf32>
    %1065 = vector.shape_cast %1064 : vector<1x8x32xf32> to vector<8x32xf32>
    %1066 = vector.broadcast %1063 : f32 to vector<8x32xf32>
    %1067 = arith.mulf %1066, %1065 : vector<8x32xf32>
    %cst_405 = arith.constant 1.000000e+00 : f32
    %1068 = arith.subf %cst_405, %1063 : f32
    %1069 = vector.broadcast %1068 : f32 to vector<8x32xf32>
    %1070 = arith.mulf %1069, %1059 : vector<8x32xf32>
    %1071 = arith.addf %1067, %1070 : vector<8x32xf32>
    %1072 = vector.broadcast %404 : vector<1x128xf32> to vector<8x128xf32>
    %1073 = arith.mulf %1035, %1072 : vector<8x128xf32>
    %cst_406 = arith.constant dense<0.000000e+00> : vector<8xf32>
    %1074 = vector.multi_reduction <add>, %1073, %cst_406 [1] : vector<8x128xf32> to vector<8xf32>
    %1075 = vector.shape_cast %1074 : vector<8xf32> to vector<8x1xf32>
    %1076 = vector.broadcast %1075 : vector<8x1xf32> to vector<8x8xf32>
    %1077 = arith.addf %399, %1076 : vector<8x8xf32>
    %cst_407 = arith.constant 0.000000e+00 : f32
    %1078 = vector.broadcast %cst_407 : f32 to vector<8x8xf32>
    %1079 = arith.maximumf %1077, %1078 : vector<8x8xf32>
    %cst_408 = arith.constant dense<0xFF800000> : vector<8xf32>
    %1080 = vector.multi_reduction <maximumf>, %1079, %cst_408 [1] : vector<8x8xf32> to vector<8xf32>
    %1081 = vector.shape_cast %1080 : vector<8xf32> to vector<8x1xf32>
    %1082 = vector.broadcast %1081 : vector<8x1xf32> to vector<8x8xf32>
    %1083 = arith.subf %1079, %1082 : vector<8x8xf32>
    %1084 = math.exp %1083 : vector<8x8xf32>
    %cst_409 = arith.constant dense<0.000000e+00> : vector<8xf32>
    %1085 = vector.multi_reduction <add>, %1084, %cst_409 [1] : vector<8x8xf32> to vector<8xf32>
    %1086 = vector.shape_cast %1085 : vector<8xf32> to vector<8x1xf32>
    %1087 = tpu.reciprocal %1086 {approx = true} : vector<8x1xf32> -> vector<8x1xf32>
    %1088 = vector.broadcast %1087 : vector<8x1xf32> to vector<8x8xf32>
    %1089 = arith.mulf %1084, %1088 : vector<8x8xf32>
    %1090 = vector.extract_strided_slice %1089 {offsets = [0, 0], sizes = [8, 1], strides = [1, 1]} : vector<8x8xf32> to vector<8x1xf32>
    %c0_410 = arith.constant 0 : index
    %c0_411 = arith.constant 0 : index
    %c0_412 = arith.constant 0 : index
    %1091 = vector.load %arg14[%c0_410, %c0_411, %c0_412] : memref<8x8x128xf32, #tpu.memory_space<vmem>>, vector<1x8x128xf32>
    %1092 = vector.shape_cast %1091 : vector<1x8x128xf32> to vector<8x128xf32>
    %1093 = vector.broadcast %1090 : vector<8x1xf32> to vector<8x128xf32>
    %1094 = arith.mulf %1093, %1092 : vector<8x128xf32>
    %1095 = vector.extract_strided_slice %1089 {offsets = [0, 1], sizes = [8, 1], strides = [1, 1]} : vector<8x8xf32> to vector<8x1xf32>
    %c1_413 = arith.constant 1 : index
    %c0_414 = arith.constant 0 : index
    %c0_415 = arith.constant 0 : index
    %1096 = vector.load %arg14[%c1_413, %c0_414, %c0_415] : memref<8x8x128xf32, #tpu.memory_space<vmem>>, vector<1x8x128xf32>
    %1097 = vector.shape_cast %1096 : vector<1x8x128xf32> to vector<8x128xf32>
    %1098 = vector.broadcast %1095 : vector<8x1xf32> to vector<8x128xf32>
    %1099 = arith.mulf %1098, %1097 : vector<8x128xf32>
    %1100 = arith.addf %1094, %1099 : vector<8x128xf32>
    %1101 = vector.extract_strided_slice %1089 {offsets = [0, 2], sizes = [8, 1], strides = [1, 1]} : vector<8x8xf32> to vector<8x1xf32>
    %c2_416 = arith.constant 2 : index
    %c0_417 = arith.constant 0 : index
    %c0_418 = arith.constant 0 : index
    %1102 = vector.load %arg14[%c2_416, %c0_417, %c0_418] : memref<8x8x128xf32, #tpu.memory_space<vmem>>, vector<1x8x128xf32>
    %1103 = vector.shape_cast %1102 : vector<1x8x128xf32> to vector<8x128xf32>
    %1104 = vector.broadcast %1101 : vector<8x1xf32> to vector<8x128xf32>
    %1105 = arith.mulf %1104, %1103 : vector<8x128xf32>
    %1106 = arith.addf %1100, %1105 : vector<8x128xf32>
    %1107 = vector.extract_strided_slice %1089 {offsets = [0, 3], sizes = [8, 1], strides = [1, 1]} : vector<8x8xf32> to vector<8x1xf32>
    %c3_419 = arith.constant 3 : index
    %c0_420 = arith.constant 0 : index
    %c0_421 = arith.constant 0 : index
    %1108 = vector.load %arg14[%c3_419, %c0_420, %c0_421] : memref<8x8x128xf32, #tpu.memory_space<vmem>>, vector<1x8x128xf32>
    %1109 = vector.shape_cast %1108 : vector<1x8x128xf32> to vector<8x128xf32>
    %1110 = vector.broadcast %1107 : vector<8x1xf32> to vector<8x128xf32>
    %1111 = arith.mulf %1110, %1109 : vector<8x128xf32>
    %1112 = arith.addf %1106, %1111 : vector<8x128xf32>
    %1113 = vector.extract_strided_slice %1089 {offsets = [0, 4], sizes = [8, 1], strides = [1, 1]} : vector<8x8xf32> to vector<8x1xf32>
    %c4_422 = arith.constant 4 : index
    %c0_423 = arith.constant 0 : index
    %c0_424 = arith.constant 0 : index
    %1114 = vector.load %arg14[%c4_422, %c0_423, %c0_424] : memref<8x8x128xf32, #tpu.memory_space<vmem>>, vector<1x8x128xf32>
    %1115 = vector.shape_cast %1114 : vector<1x8x128xf32> to vector<8x128xf32>
    %1116 = vector.broadcast %1113 : vector<8x1xf32> to vector<8x128xf32>
    %1117 = arith.mulf %1116, %1115 : vector<8x128xf32>
    %1118 = arith.addf %1112, %1117 : vector<8x128xf32>
    %1119 = vector.extract_strided_slice %1089 {offsets = [0, 5], sizes = [8, 1], strides = [1, 1]} : vector<8x8xf32> to vector<8x1xf32>
    %c5_425 = arith.constant 5 : index
    %c0_426 = arith.constant 0 : index
    %c0_427 = arith.constant 0 : index
    %1120 = vector.load %arg14[%c5_425, %c0_426, %c0_427] : memref<8x8x128xf32, #tpu.memory_space<vmem>>, vector<1x8x128xf32>
    %1121 = vector.shape_cast %1120 : vector<1x8x128xf32> to vector<8x128xf32>
    %1122 = vector.broadcast %1119 : vector<8x1xf32> to vector<8x128xf32>
    %1123 = arith.mulf %1122, %1121 : vector<8x128xf32>
    %1124 = arith.addf %1118, %1123 : vector<8x128xf32>
    %1125 = vector.extract_strided_slice %1089 {offsets = [0, 6], sizes = [8, 1], strides = [1, 1]} : vector<8x8xf32> to vector<8x1xf32>
    %c6_428 = arith.constant 6 : index
    %c0_429 = arith.constant 0 : index
    %c0_430 = arith.constant 0 : index
    %1126 = vector.load %arg14[%c6_428, %c0_429, %c0_430] : memref<8x8x128xf32, #tpu.memory_space<vmem>>, vector<1x8x128xf32>
    %1127 = vector.shape_cast %1126 : vector<1x8x128xf32> to vector<8x128xf32>
    %1128 = vector.broadcast %1125 : vector<8x1xf32> to vector<8x128xf32>
    %1129 = arith.mulf %1128, %1127 : vector<8x128xf32>
    %1130 = arith.addf %1124, %1129 : vector<8x128xf32>
    %1131 = vector.extract_strided_slice %1089 {offsets = [0, 7], sizes = [8, 1], strides = [1, 1]} : vector<8x8xf32> to vector<8x1xf32>
    %c7_431 = arith.constant 7 : index
    %c0_432 = arith.constant 0 : index
    %c0_433 = arith.constant 0 : index
    %1132 = vector.load %arg14[%c7_431, %c0_432, %c0_433] : memref<8x8x128xf32, #tpu.memory_space<vmem>>, vector<1x8x128xf32>
    %1133 = vector.shape_cast %1132 : vector<1x8x128xf32> to vector<8x128xf32>
    %1134 = vector.broadcast %1131 : vector<8x1xf32> to vector<8x128xf32>
    %1135 = arith.mulf %1134, %1133 : vector<8x128xf32>
    %1136 = arith.addf %1130, %1135 : vector<8x128xf32>
    %1137 = tpu.concatenate %1136, %1035, %1071 in 1 : vector<8x128xf32>, vector<8x128xf32>, vector<8x32xf32> -> vector<8x288xf32>
    %1138 = arith.truncf %1137 : vector<8x288xf32> to vector<8x288xbf16>
    %c0_434 = arith.constant 0 : index
    %c0_435 = arith.constant 0 : index
    %1139 = vector.load %arg9[%c0_434, %c0_435] : memref<288x512xbf16, #tpu.memory_space<vmem>>, vector<288x512xbf16>
    %cst_436 = arith.constant dense<0.000000e+00> : vector<8x512xf32>
    %1140 = tpu.matmul %1138, %1139, %cst_436 {dimension_numbers = #tpu.dot_dimension_numbers<[1], [0], [0], [1], [0, 0, 1, 1], [], []>} : vector<8x288xbf16>, vector<288x512xbf16>, vector<8x512xf32> -> vector<8x512xf32>
    %c0_437 = arith.constant 0 : index
    %c0_438 = arith.constant 0 : index
    %1141 = vector.load %arg10[%c0_437, %c0_438] : memref<1x512xf32, #tpu.memory_space<vmem>>, vector<1x512xf32>
    %1142 = vector.broadcast %1141 : vector<1x512xf32> to vector<8x512xf32>
    %1143 = arith.addf %1140, %1142 : vector<8x512xf32>
    %1144 = vector.extract_strided_slice %1143 {offsets = [0, 0], sizes = [8, 128], strides = [1, 1]} : vector<8x512xf32> to vector<8x128xf32>
    %1145 = arith.negf %1144 : vector<8x128xf32>
    %1146 = math.exp %1145 : vector<8x128xf32>
    %cst_439 = arith.constant 1.000000e+00 : f32
    %1147 = vector.broadcast %cst_439 : f32 to vector<8x128xf32>
    %1148 = arith.addf %1147, %1146 : vector<8x128xf32>
    %1149 = arith.divf %1147, %1148 : vector<8x128xf32>
    %1150 = vector.extract_strided_slice %1143 {offsets = [0, 128], sizes = [8, 128], strides = [1, 1]} : vector<8x512xf32> to vector<8x128xf32>
    %1151 = arith.negf %1150 : vector<8x128xf32>
    %1152 = math.exp %1151 : vector<8x128xf32>
    %cst_440 = arith.constant 1.000000e+00 : f32
    %1153 = vector.broadcast %cst_440 : f32 to vector<8x128xf32>
    %1154 = arith.addf %1153, %1152 : vector<8x128xf32>
    %1155 = arith.divf %1153, %1154 : vector<8x128xf32>
    %1156 = vector.extract_strided_slice %1143 {offsets = [0, 256], sizes = [8, 128], strides = [1, 1]} : vector<8x512xf32> to vector<8x128xf32>
    %1157 = math.tanh %1156 : vector<8x128xf32>
    %1158 = vector.extract_strided_slice %1143 {offsets = [0, 384], sizes = [8, 128], strides = [1, 1]} : vector<8x512xf32> to vector<8x128xf32>
    %1159 = arith.negf %1158 : vector<8x128xf32>
    %1160 = math.exp %1159 : vector<8x128xf32>
    %cst_441 = arith.constant 1.000000e+00 : f32
    %1161 = vector.broadcast %cst_441 : f32 to vector<8x128xf32>
    %1162 = arith.addf %1161, %1160 : vector<8x128xf32>
    %1163 = arith.divf %1161, %1162 : vector<8x128xf32>
    %1164 = arith.mulf %1155, %1033 : vector<8x128xf32>
    %1165 = arith.mulf %1149, %1157 : vector<8x128xf32>
    %1166 = arith.addf %1164, %1165 : vector<8x128xf32>
    %1167 = math.tanh %1166 : vector<8x128xf32>
    %1168 = arith.mulf %1163, %1167 : vector<8x128xf32>
    %1169 = arith.truncf %1168 : vector<8x128xf32> to vector<8x128xbf16>
    %c0_442 = arith.constant 0 : index
    %c0_443 = arith.constant 0 : index
    %1170 = vector.load %arg11[%c0_442, %c0_443] : memref<128x128xbf16, #tpu.memory_space<vmem>>, vector<128x128xbf16>
    %cst_444 = arith.constant dense<0.000000e+00> : vector<8x128xf32>
    %1171 = tpu.matmul %1169, %1170, %cst_444 {dimension_numbers = #tpu.dot_dimension_numbers<[1], [0], [0], [1], [0, 0, 1, 1], [], []>} : vector<8x128xbf16>, vector<128x128xbf16>, vector<8x128xf32> -> vector<8x128xf32>
    %c0_445 = arith.constant 0 : index
    %c0_446 = arith.constant 0 : index
    %1172 = vector.load %arg12[%c0_445, %c0_446] : memref<1x128xf32, #tpu.memory_space<vmem>>, vector<1x128xf32>
    %1173 = vector.broadcast %1172 : vector<1x128xf32> to vector<8x128xf32>
    %1174 = arith.addf %1171, %1173 : vector<8x128xf32>
    %c6_447 = arith.constant 6 : index
    %c0_448 = arith.constant 0 : index
    %c0_449 = arith.constant 0 : index
    %1175 = vector.load %arg13[%c6_447, %c0_448, %c0_449] : memref<8x8x128xf32, #tpu.memory_space<vmem>>, vector<1x8x128xf32>
    %1176 = vector.shape_cast %1175 : vector<1x8x128xf32> to vector<8x128xf32>
    %1177 = vector.shape_cast %1174 : vector<8x128xf32> to vector<1x8x128xf32>
    tpu.vector_store %arg13[%c6_447, %c0_448, %c0_449], %1177 {strides = array<i32>} : memref<8x8x128xf32, #tpu.memory_space<vmem>>, vector<1x8x128xf32>,
    %cst_450 = arith.constant dense<0xFF800000> : vector<8xf32>
    %1178 = vector.multi_reduction <maximumf>, %1174, %cst_450 [1] : vector<8x128xf32> to vector<8xf32>
    %1179 = vector.shape_cast %1178 : vector<8xf32> to vector<8x1xf32>
    %1180 = tpu.iota {dimensions = array<i32: 1>} : vector<8x128xi32>
    %1181 = vector.broadcast %1179 : vector<8x1xf32> to vector<8x128xf32>
    %1182 = arith.cmpf oeq, %1174, %1181 : vector<8x128xf32>
    %c128_i32_451 = arith.constant 128 : i32
    %1183 = vector.broadcast %c128_i32_451 : i32 to vector<8x128xi32>
    %1184 = arith.select %1182, %1180, %1183 : vector<8x128xi1>, vector<8x128xi32>
    %cst_452 = arith.constant dense<2147483647> : vector<8xi32>
    %1185 = vector.multi_reduction <minsi>, %1184, %cst_452 [1] : vector<8x128xi32> to vector<8xi32>
    %1186 = vector.shape_cast %1185 : vector<8xi32> to vector<8x1xi32>
    %1187 = vector.broadcast %1186 : vector<8x1xi32> to vector<8x128xi32>
    %1188 = arith.cmpi eq, %1180, %1187 : vector<8x128xi32>
    %1189 = arith.extui %1188 : vector<8x128xi1> to vector<8x128xi32>
    %1190 = arith.sitofp %1189 : vector<8x128xi32> to vector<8x128xf32>
    %c0_453 = arith.constant 0 : index
    %c0_454 = arith.constant 0 : index
    %1191 = vector.load %arg5[%c0_453, %c0_454] : memref<128x32xf32, #tpu.memory_space<vmem>>, vector<128x32xf32>
    %cst_455 = arith.constant dense<0.000000e+00> : vector<8x32xf32>
    %1192 = tpu.matmul %1190, %1191, %cst_455 {dimension_numbers = #tpu.dot_dimension_numbers<[1], [0], [0], [1], [0, 0, 1, 1], [], []>} : vector<8x128xf32>, vector<128x32xf32>, vector<8x32xf32> -> vector<8x32xf32>
    %c6_456 = arith.constant 6 : index
    %1193 = memref.load %arg0[%c6_456] : memref<8xi32, #tpu.memory_space<smem>>
    %c0_i32_457 = arith.constant 0 : i32
    %1194 = arith.cmpi sgt, %1193, %c0_i32_457 : i32
    %1195 = arith.extui %1194 : i1 to i32
    %1196 = arith.sitofp %1195 : i32 to f32
    %c6_458 = arith.constant 6 : index
    %c0_459 = arith.constant 0 : index
    %c0_460 = arith.constant 0 : index
    %1197 = vector.load %arg2[%c6_458, %c0_459, %c0_460] : memref<8x8x32xf32, #tpu.memory_space<vmem>>, vector<1x8x32xf32>
    %1198 = vector.shape_cast %1197 : vector<1x8x32xf32> to vector<8x32xf32>
    %1199 = vector.broadcast %1196 : f32 to vector<8x32xf32>
    %1200 = arith.mulf %1199, %1198 : vector<8x32xf32>
    %cst_461 = arith.constant 1.000000e+00 : f32
    %1201 = arith.subf %cst_461, %1196 : f32
    %1202 = vector.broadcast %1201 : f32 to vector<8x32xf32>
    %1203 = arith.mulf %1202, %1192 : vector<8x32xf32>
    %1204 = arith.addf %1200, %1203 : vector<8x32xf32>
    %1205 = vector.broadcast %404 : vector<1x128xf32> to vector<8x128xf32>
    %1206 = arith.mulf %1168, %1205 : vector<8x128xf32>
    %cst_462 = arith.constant dense<0.000000e+00> : vector<8xf32>
    %1207 = vector.multi_reduction <add>, %1206, %cst_462 [1] : vector<8x128xf32> to vector<8xf32>
    %1208 = vector.shape_cast %1207 : vector<8xf32> to vector<8x1xf32>
    %1209 = vector.broadcast %1208 : vector<8x1xf32> to vector<8x8xf32>
    %1210 = arith.addf %399, %1209 : vector<8x8xf32>
    %cst_463 = arith.constant 0.000000e+00 : f32
    %1211 = vector.broadcast %cst_463 : f32 to vector<8x8xf32>
    %1212 = arith.maximumf %1210, %1211 : vector<8x8xf32>
    %cst_464 = arith.constant dense<0xFF800000> : vector<8xf32>
    %1213 = vector.multi_reduction <maximumf>, %1212, %cst_464 [1] : vector<8x8xf32> to vector<8xf32>
    %1214 = vector.shape_cast %1213 : vector<8xf32> to vector<8x1xf32>
    %1215 = vector.broadcast %1214 : vector<8x1xf32> to vector<8x8xf32>
    %1216 = arith.subf %1212, %1215 : vector<8x8xf32>
    %1217 = math.exp %1216 : vector<8x8xf32>
    %cst_465 = arith.constant dense<0.000000e+00> : vector<8xf32>
    %1218 = vector.multi_reduction <add>, %1217, %cst_465 [1] : vector<8x8xf32> to vector<8xf32>
    %1219 = vector.shape_cast %1218 : vector<8xf32> to vector<8x1xf32>
    %1220 = tpu.reciprocal %1219 {approx = true} : vector<8x1xf32> -> vector<8x1xf32>
    %1221 = vector.broadcast %1220 : vector<8x1xf32> to vector<8x8xf32>
    %1222 = arith.mulf %1217, %1221 : vector<8x8xf32>
    %1223 = vector.extract_strided_slice %1222 {offsets = [0, 0], sizes = [8, 1], strides = [1, 1]} : vector<8x8xf32> to vector<8x1xf32>
    %c0_466 = arith.constant 0 : index
    %c0_467 = arith.constant 0 : index
    %c0_468 = arith.constant 0 : index
    %1224 = vector.load %arg14[%c0_466, %c0_467, %c0_468] : memref<8x8x128xf32, #tpu.memory_space<vmem>>, vector<1x8x128xf32>
    %1225 = vector.shape_cast %1224 : vector<1x8x128xf32> to vector<8x128xf32>
    %1226 = vector.broadcast %1223 : vector<8x1xf32> to vector<8x128xf32>
    %1227 = arith.mulf %1226, %1225 : vector<8x128xf32>
    %1228 = vector.extract_strided_slice %1222 {offsets = [0, 1], sizes = [8, 1], strides = [1, 1]} : vector<8x8xf32> to vector<8x1xf32>
    %c1_469 = arith.constant 1 : index
    %c0_470 = arith.constant 0 : index
    %c0_471 = arith.constant 0 : index
    %1229 = vector.load %arg14[%c1_469, %c0_470, %c0_471] : memref<8x8x128xf32, #tpu.memory_space<vmem>>, vector<1x8x128xf32>
    %1230 = vector.shape_cast %1229 : vector<1x8x128xf32> to vector<8x128xf32>
    %1231 = vector.broadcast %1228 : vector<8x1xf32> to vector<8x128xf32>
    %1232 = arith.mulf %1231, %1230 : vector<8x128xf32>
    %1233 = arith.addf %1227, %1232 : vector<8x128xf32>
    %1234 = vector.extract_strided_slice %1222 {offsets = [0, 2], sizes = [8, 1], strides = [1, 1]} : vector<8x8xf32> to vector<8x1xf32>
    %c2_472 = arith.constant 2 : index
    %c0_473 = arith.constant 0 : index
    %c0_474 = arith.constant 0 : index
    %1235 = vector.load %arg14[%c2_472, %c0_473, %c0_474] : memref<8x8x128xf32, #tpu.memory_space<vmem>>, vector<1x8x128xf32>
    %1236 = vector.shape_cast %1235 : vector<1x8x128xf32> to vector<8x128xf32>
    %1237 = vector.broadcast %1234 : vector<8x1xf32> to vector<8x128xf32>
    %1238 = arith.mulf %1237, %1236 : vector<8x128xf32>
    %1239 = arith.addf %1233, %1238 : vector<8x128xf32>
    %1240 = vector.extract_strided_slice %1222 {offsets = [0, 3], sizes = [8, 1], strides = [1, 1]} : vector<8x8xf32> to vector<8x1xf32>
    %c3_475 = arith.constant 3 : index
    %c0_476 = arith.constant 0 : index
    %c0_477 = arith.constant 0 : index
    %1241 = vector.load %arg14[%c3_475, %c0_476, %c0_477] : memref<8x8x128xf32, #tpu.memory_space<vmem>>, vector<1x8x128xf32>
    %1242 = vector.shape_cast %1241 : vector<1x8x128xf32> to vector<8x128xf32>
    %1243 = vector.broadcast %1240 : vector<8x1xf32> to vector<8x128xf32>
    %1244 = arith.mulf %1243, %1242 : vector<8x128xf32>
    %1245 = arith.addf %1239, %1244 : vector<8x128xf32>
    %1246 = vector.extract_strided_slice %1222 {offsets = [0, 4], sizes = [8, 1], strides = [1, 1]} : vector<8x8xf32> to vector<8x1xf32>
    %c4_478 = arith.constant 4 : index
    %c0_479 = arith.constant 0 : index
    %c0_480 = arith.constant 0 : index
    %1247 = vector.load %arg14[%c4_478, %c0_479, %c0_480] : memref<8x8x128xf32, #tpu.memory_space<vmem>>, vector<1x8x128xf32>
    %1248 = vector.shape_cast %1247 : vector<1x8x128xf32> to vector<8x128xf32>
    %1249 = vector.broadcast %1246 : vector<8x1xf32> to vector<8x128xf32>
    %1250 = arith.mulf %1249, %1248 : vector<8x128xf32>
    %1251 = arith.addf %1245, %1250 : vector<8x128xf32>
    %1252 = vector.extract_strided_slice %1222 {offsets = [0, 5], sizes = [8, 1], strides = [1, 1]} : vector<8x8xf32> to vector<8x1xf32>
    %c5_481 = arith.constant 5 : index
    %c0_482 = arith.constant 0 : index
    %c0_483 = arith.constant 0 : index
    %1253 = vector.load %arg14[%c5_481, %c0_482, %c0_483] : memref<8x8x128xf32, #tpu.memory_space<vmem>>, vector<1x8x128xf32>
    %1254 = vector.shape_cast %1253 : vector<1x8x128xf32> to vector<8x128xf32>
    %1255 = vector.broadcast %1252 : vector<8x1xf32> to vector<8x128xf32>
    %1256 = arith.mulf %1255, %1254 : vector<8x128xf32>
    %1257 = arith.addf %1251, %1256 : vector<8x128xf32>
    %1258 = vector.extract_strided_slice %1222 {offsets = [0, 6], sizes = [8, 1], strides = [1, 1]} : vector<8x8xf32> to vector<8x1xf32>
    %c6_484 = arith.constant 6 : index
    %c0_485 = arith.constant 0 : index
    %c0_486 = arith.constant 0 : index
    %1259 = vector.load %arg14[%c6_484, %c0_485, %c0_486] : memref<8x8x128xf32, #tpu.memory_space<vmem>>, vector<1x8x128xf32>
    %1260 = vector.shape_cast %1259 : vector<1x8x128xf32> to vector<8x128xf32>
    %1261 = vector.broadcast %1258 : vector<8x1xf32> to vector<8x128xf32>
    %1262 = arith.mulf %1261, %1260 : vector<8x128xf32>
    %1263 = arith.addf %1257, %1262 : vector<8x128xf32>
    %1264 = vector.extract_strided_slice %1222 {offsets = [0, 7], sizes = [8, 1], strides = [1, 1]} : vector<8x8xf32> to vector<8x1xf32>
    %c7_487 = arith.constant 7 : index
    %c0_488 = arith.constant 0 : index
    %c0_489 = arith.constant 0 : index
    %1265 = vector.load %arg14[%c7_487, %c0_488, %c0_489] : memref<8x8x128xf32, #tpu.memory_space<vmem>>, vector<1x8x128xf32>
    %1266 = vector.shape_cast %1265 : vector<1x8x128xf32> to vector<8x128xf32>
    %1267 = vector.broadcast %1264 : vector<8x1xf32> to vector<8x128xf32>
    %1268 = arith.mulf %1267, %1266 : vector<8x128xf32>
    %1269 = arith.addf %1263, %1268 : vector<8x128xf32>
    %1270 = tpu.concatenate %1269, %1168, %1204 in 1 : vector<8x128xf32>, vector<8x128xf32>, vector<8x32xf32> -> vector<8x288xf32>
    %1271 = arith.truncf %1270 : vector<8x288xf32> to vector<8x288xbf16>
    %c0_490 = arith.constant 0 : index
    %c0_491 = arith.constant 0 : index
    %1272 = vector.load %arg9[%c0_490, %c0_491] : memref<288x512xbf16, #tpu.memory_space<vmem>>, vector<288x512xbf16>
    %cst_492 = arith.constant dense<0.000000e+00> : vector<8x512xf32>
    %1273 = tpu.matmul %1271, %1272, %cst_492 {dimension_numbers = #tpu.dot_dimension_numbers<[1], [0], [0], [1], [0, 0, 1, 1], [], []>} : vector<8x288xbf16>, vector<288x512xbf16>, vector<8x512xf32> -> vector<8x512xf32>
    %c0_493 = arith.constant 0 : index
    %c0_494 = arith.constant 0 : index
    %1274 = vector.load %arg10[%c0_493, %c0_494] : memref<1x512xf32, #tpu.memory_space<vmem>>, vector<1x512xf32>
    %1275 = vector.broadcast %1274 : vector<1x512xf32> to vector<8x512xf32>
    %1276 = arith.addf %1273, %1275 : vector<8x512xf32>
    %1277 = vector.extract_strided_slice %1276 {offsets = [0, 0], sizes = [8, 128], strides = [1, 1]} : vector<8x512xf32> to vector<8x128xf32>
    %1278 = arith.negf %1277 : vector<8x128xf32>
    %1279 = math.exp %1278 : vector<8x128xf32>
    %cst_495 = arith.constant 1.000000e+00 : f32
    %1280 = vector.broadcast %cst_495 : f32 to vector<8x128xf32>
    %1281 = arith.addf %1280, %1279 : vector<8x128xf32>
    %1282 = arith.divf %1280, %1281 : vector<8x128xf32>
    %1283 = vector.extract_strided_slice %1276 {offsets = [0, 128], sizes = [8, 128], strides = [1, 1]} : vector<8x512xf32> to vector<8x128xf32>
    %1284 = arith.negf %1283 : vector<8x128xf32>
    %1285 = math.exp %1284 : vector<8x128xf32>
    %cst_496 = arith.constant 1.000000e+00 : f32
    %1286 = vector.broadcast %cst_496 : f32 to vector<8x128xf32>
    %1287 = arith.addf %1286, %1285 : vector<8x128xf32>
    %1288 = arith.divf %1286, %1287 : vector<8x128xf32>
    %1289 = vector.extract_strided_slice %1276 {offsets = [0, 256], sizes = [8, 128], strides = [1, 1]} : vector<8x512xf32> to vector<8x128xf32>
    %1290 = math.tanh %1289 : vector<8x128xf32>
    %1291 = vector.extract_strided_slice %1276 {offsets = [0, 384], sizes = [8, 128], strides = [1, 1]} : vector<8x512xf32> to vector<8x128xf32>
    %1292 = arith.negf %1291 : vector<8x128xf32>
    %1293 = math.exp %1292 : vector<8x128xf32>
    %cst_497 = arith.constant 1.000000e+00 : f32
    %1294 = vector.broadcast %cst_497 : f32 to vector<8x128xf32>
    %1295 = arith.addf %1294, %1293 : vector<8x128xf32>
    %1296 = arith.divf %1294, %1295 : vector<8x128xf32>
    %1297 = arith.mulf %1288, %1166 : vector<8x128xf32>
    %1298 = arith.mulf %1282, %1290 : vector<8x128xf32>
    %1299 = arith.addf %1297, %1298 : vector<8x128xf32>
    %1300 = math.tanh %1299 : vector<8x128xf32>
    %1301 = arith.mulf %1296, %1300 : vector<8x128xf32>
    %1302 = arith.truncf %1301 : vector<8x128xf32> to vector<8x128xbf16>
    %c0_498 = arith.constant 0 : index
    %c0_499 = arith.constant 0 : index
    %1303 = vector.load %arg11[%c0_498, %c0_499] : memref<128x128xbf16, #tpu.memory_space<vmem>>, vector<128x128xbf16>
    %cst_500 = arith.constant dense<0.000000e+00> : vector<8x128xf32>
    %1304 = tpu.matmul %1302, %1303, %cst_500 {dimension_numbers = #tpu.dot_dimension_numbers<[1], [0], [0], [1], [0, 0, 1, 1], [], []>} : vector<8x128xbf16>, vector<128x128xbf16>, vector<8x128xf32> -> vector<8x128xf32>
    %c0_501 = arith.constant 0 : index
    %c0_502 = arith.constant 0 : index
    %1305 = vector.load %arg12[%c0_501, %c0_502] : memref<1x128xf32, #tpu.memory_space<vmem>>, vector<1x128xf32>
    %1306 = vector.broadcast %1305 : vector<1x128xf32> to vector<8x128xf32>
    %1307 = arith.addf %1304, %1306 : vector<8x128xf32>
    %c7_503 = arith.constant 7 : index
    %c0_504 = arith.constant 0 : index
    %c0_505 = arith.constant 0 : index
    %1308 = vector.load %arg13[%c7_503, %c0_504, %c0_505] : memref<8x8x128xf32, #tpu.memory_space<vmem>>, vector<1x8x128xf32>
    %1309 = vector.shape_cast %1308 : vector<1x8x128xf32> to vector<8x128xf32>
    %1310 = vector.shape_cast %1307 : vector<8x128xf32> to vector<1x8x128xf32>
    tpu.vector_store %arg13[%c7_503, %c0_504, %c0_505], %1310 {strides = array<i32>} : memref<8x8x128xf32, #tpu.memory_space<vmem>>, vector<1x8x128xf32>,
    return
  }
}

</mosaic_0001>

<bundles_post_ra>
// kernel: _lambda_.1
= control target key start
LH: loop header
LB: loop body
LE: loop exit
PB: predicated region body
PF: predicated region fallthrough
CT: control target
= control target key end

     0   :  { %s16386_s0 = inlined_call_operand.vmem [shape: s32[8], index: 0, kind: input, shape index: {}]   ;;  %s16387_s1 = inlined_call_operand.vmem [shape: f32[8,8,32], index: 1, kind: input, shape index: {}]   ;;  %s16388_s2 = inlined_call_operand.vmem [shape: f32[8,8,32], index: 2, kind: input, shape index: {}]   ;;  %s16389_s3 = inlined_call_operand.vmem [shape: bf16[160,512], index: 3, kind: input, shape index: {}]   ;;  %s16390_s4 = inlined_call_operand.vmem [shape: f32[1,512], index: 4, kind: input, shape index: {}]   ;;  %s16391_s5 = inlined_call_operand.vmem [shape: f32[128,32], index: 5, kind: input, shape index: {}]   ;;  %s16392_s6 = inlined_call_operand.vmem [shape: f32[1,128], index: 6, kind: input, shape index: {}]   ;;  %s16393_s7 = inlined_call_operand.vmem [shape: f32[1,128], index: 7, kind: input, shape index: {}]   ;;  %s16394_s8 = inlined_call_operand.<no memory space> [shape: f32[1,1], index: 8, kind: input, shape index: {}]   ;;  %s16395_s9 = inlined_call_operand.vmem [shape: bf16[288,512], index: 9, kind: input, shape index: {}]   ;;  %s16396_s10 = inlined_call_operand.vmem [shape: f32[1,512], index: 10, kind: input, shape index: {}]   ;;  %s16397_s11 = inlined_call_operand.vmem [shape: bf16[128,128], index: 11, kind: input, shape index: {}]   ;;  %s16398_s12 = inlined_call_operand.vmem [shape: f32[1,128], index: 12, kind: input, shape index: {}]   ;;  %s16399_s13 = inlined_call_operand.hbm [shape: f32[8,8,128], index: 13, kind: output, shape index: {}]  }
   0x1   :  { %v18_v0 = vstv %s16394_s8 }
   0x2   :  { %19 = vst [vmem:[#allocation3] sm:$0x1] %v18_v0 }
   0x3   :  { %20 = vsyncpa [#allocation6], 0 }
   0x4   :  { %21 = vsyncpa [#allocation5], 0  ;;  %s28_s29 = sshll.u32 %s16386_s0, 4  ;;  %s29_s29 = int_to_ptr.vmem [resolvable:$true] %s28_s29 }
   0x5   :  { %s12499_s30 = scalar_lea.vmem %s29_s29, 16  ;;  %p12504_p1 = scmp.lt.s32.totalorder %s29_s29, %s29_s29 }
   0x6   :  { %p12500_p0 = scmp.ne.s32.totalorder %s29_s29, %s12499_s30  ;;  %p12505_p2 = scmp.lt.s32.totalorder %s12499_s30, %s12499_s30 }
   0x8   :  { %p12506_p3 = por %p12505_p2, %p12504_p1 }
   0xa   :  { %p12507_p4 = pnand %p12506_p3, %p12500_p0 }
   0xc   :  { %12510 = shalt.err (!%p12507_p4)
}
   0xd   :  { %s12537_s14 = smov [#allocation4]  }
   0xe   :  { %31 = dma.vmem_to_smem %s29_s29, 16, %s12537_s14, [#allocation6]  }
   0xf   :  { %12533 = dma.done.wait [#allocation6], 16  }
  0x10   :  { %12534 = vsyncadd [#allocation6], 4294967280 }
  0x11   :  { %59 = sfence }
  0x12   :  { %v12632_v1 = vld [vmem:[%s16389_s3 + $0x4] ss:$16 sps:$4 sm:$0xff]   ;;  %v12637_v2 = vld [vmem:[%s16389_s3] ss:$16 sps:$4 sm:$0xff]   ;;  %v12660_v6 = vld [vmem:[%s16389_s3 + $0xc] ss:$16 sps:$4 sm:$0xff]   ;;  %v16402_v47 = vlaneseq }
  0x13   :  { %333 = vmatprep.subr.bf16.mxu0 %v12632_v1  ;;  %v12643_v3 = vld [vmem:[%s16389_s3 + $0x24] ss:$16 sps:$4 sm:$0xff]   ;;  %v12649_v4 = vld [vmem:[%s16389_s3 + $0x20] ss:$16 sps:$4 sm:$0xff]   ;;  %v12665_v7 = vld [vmem:[%s16389_s3 + $0x8] ss:$16 sps:$4 sm:$0xff]   ;;  %374 = vmatprep.subr.bf16.mxu1 %v12660_v6 }
  0x14   :  { %334 = vmatpush1.bf16.msra.mxu0 %v12637_v2  ;;  %v12655_v5 = vld [vmem:[%s16389_s3 + $0x44] ss:$16 sps:$4 sm:$0xff]   ;;  %v12671_v8 = vld [vmem:[%s16389_s3 + $0x40] ss:$16 sps:$4 sm:$0xff]   ;;  %375 = vmatpush1.bf16.msra.mxu1 %v12665_v7  ;;  %v12684_v10 = vld [vmem:[%s16389_s3 + $0x2c] ss:$16 sps:$4 sm:$0xff]  }
  0x15   :  { %335 = vmatprep.subr.bf16.mxu0 %v12643_v3  ;;  %v12678_v9 = vld [vmem:[%s16389_s3 + $0x64] ss:$16 sps:$4 sm:$0xff]   ;;  %v12689_v11 = vld [vmem:[%s16389_s3 + $0x28] ss:$16 sps:$4 sm:$0xff]   ;;  %376 = vmatprep.subr.bf16.mxu1 %v12684_v10  ;;  %v12696_v12 = vld [vmem:[%s16389_s3 + $0x60] ss:$16 sps:$4 sm:$0xff]  }
  0x16   :  { %v12701_v13 = vld [vmem:[%s16389_s3 + $0x84] ss:$16 sps:$4 sm:$0xff]   ;;  %v12706_v14 = vld [vmem:[%s16389_s3 + $0x4c] ss:$16 sps:$4 sm:$0xff]   ;;  %v12713_v15 = vld [vmem:[%s16389_s3 + $0x48] ss:$16 sps:$4 sm:$0xff]  }
  0x17   :  { %v12719_v16 = vld [vmem:[%s16389_s3 + $0x6c] ss:$16 sps:$4 sm:$0xff]   ;;  %v12725_v17 = vld [vmem:[%s16389_s3 + $0x80] ss:$16 sps:$4 sm:$0xff]   ;;  %v12731_v18 = vld [vmem:[%s16389_s3 + $0xa4] ss:$16 sps:$4 sm:$0xff]  }
  0x18   :  { %336 = vmatpush1.bf16.msra.mxu0 %v12649_v4  ;;  %377 = vmatpush1.bf16.msra.mxu1 %v12689_v11  ;;  %v12737_v19 = vld [vmem:[%s16389_s3 + $0x68] ss:$16 sps:$4 sm:$0xff]   ;;  %v12743_v20 = vld [vmem:[%s16389_s3 + $0x8c] ss:$16 sps:$4 sm:$0xff]   ;;  %v12749_v21 = vld [vmem:[%s16389_s3 + $0xa0] ss:$16 sps:$4 sm:$0xff]  }
  0x19   :  { %337 = vmatprep.subr.bf16.mxu0 %v12655_v5  ;;  %378 = vmatprep.subr.bf16.mxu1 %v12706_v14  ;;  %v12754_v22 = vld [vmem:[%s16389_s3 + $0xc4] ss:$16 sps:$4 sm:$0xff]   ;;  %v12761_v23 = vld [vmem:[%s16389_s3 + $0x88] ss:$16 sps:$4 sm:$0xff]   ;;  %v12767_v24 = vld [vmem:[%s16389_s3 + $0xac] ss:$16 sps:$4 sm:$0xff]  }
  0x1a   :  { %v12772_v25 = vld [vmem:[%s16389_s3 + $0xc0] ss:$16 sps:$4 sm:$0xff]   ;;  %vm329_vm0 = vcmask 261120   ;;  %v12781_v27 = vld [vmem:[%s16389_s3 + $0xe4] ss:$16 sps:$4 sm:$0xff]   ;;  %v16400_v43 = vmov 0.0|0.0  }
  0x1b   :  { %v64_v26 = vld [vmem:[%s16387_s1] sm:$0xff]  ;;  %v11592_v29 = vld [vmem:[%s16389_s3 + $0xa8] ss:$16 sps:$4 sm:$0xff]   ;;  %v11595_v31 = vld [vmem:[%s16389_s3 + $0xcc] ss:$16 sps:$4 sm:$0xff]   ;;  %v12539_v46 = vmov 0.0  }
  0x1c   :  { %338 = vmatpush1.bf16.msra.mxu0 %v12671_v8  ;;  %379 = vmatpush1.bf16.msra.mxu1 %v12713_v15  ;;  %v66_v28 = vpack.c.bf16 %v64_v26, %v64_v26  ;;  %v11585_v30 = vld [vmem:[%s16389_s3 + $0xe0] ss:$16 sps:$4 sm:$0xff]   ;;  %v11587_v32 = vld [vmem:[%s16389_s3 + $0x104] ss:$16 sps:$4 sm:$0xff]   ;;  %v11598_v33 = vld [vmem:[%s16389_s3 + $0xc8] ss:$16 sps:$4 sm:$0xff]  }
  0x1d   :  { %339 = vmatprep.subr.bf16.mxu0 %v12678_v9  ;;  %380 = vmatprep.subr.bf16.mxu1 %v12719_v16  ;;  %v11599_v34 = vld [vmem:[%s16389_s3 + $0xec] ss:$16 sps:$4 sm:$0xff]   ;;  %v11591_v35 = vld [vmem:[%s16389_s3 + $0x100] ss:$16 sps:$4 sm:$0xff]   ;;  %v11593_v36 = vld [vmem:[%s16389_s3 + $0x124] ss:$16 sps:$4 sm:$0xff]  }
  0x1e   :  { %9773 = vmatprep.mubr.msk.bf16.mxu0 %vm329_vm0, %v66_v28  ;;  %9774 = vmatprep.mubr.msk.bf16.mxu1 %vm329_vm0, %v66_v28  ;;  %v11601_v37 = vld [vmem:[%s16389_s3 + $0xe8] ss:$16 sps:$4 sm:$0xff]   ;;  %v11602_v38 = vld [vmem:[%s16389_s3 + $0x10c] ss:$16 sps:$4 sm:$0xff]   ;;  %v11597_v39 = vld [vmem:[%s16389_s3 + $0x120] ss:$16 sps:$4 sm:$0xff]  }
  0x1f   :  { %v11604_v40 = vld [vmem:[%s16389_s3 + $0x108] ss:$16 sps:$4 sm:$0xff]   ;;  %v11605_v41 = vld [vmem:[%s16389_s3 + $0x12c] ss:$16 sps:$4 sm:$0xff]   ;;  %3160 = vst [vmem:[#allocation7] sm:$0xff] %v12539_v46  ;;  %v110_v48 = vshrl.u32 %v16402_v47, 7 }
  0x20   :  { %340 = vmatpush1.bf16.msra.mxu0 %v12696_v12  ;;  %381 = vmatpush1.bf16.msra.mxu1 %v12737_v19  ;;  %v11607_v42 = vld [vmem:[%s16389_s3 + $0x128] ss:$16 sps:$4 sm:$0xff]   ;;  %v107_v50 = vld [vmem:[%s16390_s4] sm:$0xf]  ;;  %v12469_v46 = vld [vmem:[%s16389_s3 + $0xa4] ss:$16 sps:$4 sm:$0xff]  }
  0x21   :  { %341 = vmatprep.subr.bf16.mxu0 %v12701_v13  ;;  %382 = vmatprep.subr.bf16.mxu1 %v12743_v20  ;;  %v9780_v44 = vld [vmem:[%s16387_s1 + $0x8] sm:$0xff]  ;;  %v12868_v49 = vsub.s32 0, %v110_v48  ;;  %v12873_v51 = vsub.s32 1, %v110_v48  ;;  %v12877_v54 = vsub.s32 3, %v110_v48  ;;  %v12880_v0 = vsub.s32 2, %v110_v48  ;;  %s10199_s15 = sld [smem:[#allocation4 + $0x1]] }
  0x22   :  { %v457_v45 = vpack.c.bf16 %v9780_v44, %v9780_v44  ;;  %v12906_v28 = vld [vmem:[%s16389_s3 + $0x8] ss:$16 sps:$4 sm:$0xff]   ;;  %v12467_v44 = vld [vmem:[%s16389_s3 + $0x80] ss:$16 sps:$4 sm:$0xff]   ;;  %v12987_v48 = vld [vmem:[%s16389_s3 + $0xac] ss:$16 sps:$4 sm:$0xff]  }
  0x23   :  { %16588 = vst [vmem:[#allocation10_spill] sm:$0xff] %v12868_v49  ;;  %16589 = vst [vmem:[#allocation11_spill] sm:$0xff] %v12873_v51  ;;  %v112_v52 = vrot.slane %v107_v50, %v12868_v49  ;;  %v116_v53 = vrot.slane %v107_v50, %v12873_v51  ;;  %v124_v62 = vrot.slane %v107_v50, %v12877_v54  ;;  %vm3174_vm9 = vcmask 64512   ;;  %s10289_s30 = sld [smem:[#allocation4 + $0x2]]  ;;  %s10469_s19 = sld [smem:[#allocation4 + $0x4]] }
  0x24   :  { %342 = vmatpush1.bf16.msra.mxu0 %v12725_v17  ;;  %383 = vmatpush1.bf16.msra.mxu1 %v12761_v23  ;;  %vm12548_vm10 = vmmov 0   ;;  %s12550_s23 = smov [#allocation7]  }
  0x25   :  { %343 = vmatprep.subr.bf16.mxu0 %v12731_v18  ;;  %384 = vmatprep.subr.bf16.mxu1 %v12767_v24  ;;  %s9721_s24 = sshll.u32 %s12550_s23, 4  ;;  %s9722_s24 = int_to_ptr.vmem [resolvable:$true] %s9721_s24 }
  0x26   :  { %s12511_s25 = scalar_lea.vmem %s9722_s24, 1024  ;;  %p12516_p12 = scmp.lt.s32.totalorder %s9722_s24, %s9722_s24 }
  0x27   :  { %p4112_p5 = scmp.gt.s32.totalorder %s10199_s15, 0  ;;  %p12512_p11 = scmp.ne.s32.totalorder %s9722_s24, %s12511_s25 }
  0x28   :  { %344 = vmatpush1.bf16.msra.mxu0 %v12749_v21  ;;  %385 = vmatpush1.bf16.msra.mxu1 %v11592_v29  ;;  %p12517_p13 = scmp.lt.s32.totalorder %s12511_s25, %s12511_s25 }
  0x29   :  { %345 = vmatprep.subr.bf16.mxu0 %v12754_v22  ;;  %386 = vmatprep.subr.bf16.mxu1 %v11595_v31  ;;  %s4113_s16 = scalar_select %p4112_p5, 1, 0 }
  0x2a   :  { %p5064_p6 = scmp.gt.s32.totalorder %s10289_s30, 0  ;;  %p6968_p8 = scmp.gt.s32.totalorder %s10469_s19, 0 }
  0x2b   :  { %s4114_s0 = scvt.s32.f32 %s4113_s16  ;;  %p12518_p0 = por %p12517_p13, %p12516_p12 }
  0x2c   :  { %346 = vmatpush1.bf16.msra.mxu0 %v12772_v25  ;;  %387 = vmatpush1.bf16.msra.mxu1 %v11598_v33  ;;  %s5065_s14 = scalar_select %p5064_p6, 1, 0 }
  0x2d   :  { %347 = vmatprep.subr.bf16.mxu0 %v12781_v27  ;;  %388 = vmatprep.subr.bf16.mxu1 %v11599_v34  ;;  %s6969_s20 = scalar_select %p6968_p8, 1, 0 }
  0x2e   :  { %s5066_s8 = scvt.s32.f32 %s5065_s14  ;;  %s10379_s14 = sld [smem:[#allocation4 + $0x3]] }
  0x2f   :  { %p12519_p1 = pnand %p12518_p0, %p12512_p11 }
  0x30   :  { %348 = vmatpush1.bf16.msra.mxu0 %v11585_v30  ;;  %389 = vmatpush1.bf16.msra.mxu1 %v11601_v37  ;;  %s5071_s15 = ssub.f32 1.0, %s5066_s8 }
  0x31   :  { %349 = vmatprep.subr.bf16.mxu0 %v11587_v32  ;;  %390 = vmatprep.subr.bf16.mxu1 %v11602_v38 }
  0x34   :  { %350 = vmatpush1.bf16.msra.mxu0 %v11591_v35  ;;  %391 = vmatpush1.bf16.msra.mxu1 %v11604_v40  ;;  %p6016_p7 = scmp.gt.s32.totalorder %s10379_s14, 0 }
  0x35   :  { %351 = vmatprep.subr.bf16.mxu0 %v11593_v36  ;;  %392 = vmatprep.subr.bf16.mxu1 %v11605_v41 }
  0x38   :  { %352 = vmatpush1.bf16.msra.mxu0 %v11597_v39  ;;  %393 = vmatpush1.bf16.msra.mxu1 %v11607_v42 }
  0x39   :  { %723 = vmatprep.subr.bf16.mxu0 %v12632_v1  ;;  %764 = vmatprep.subr.bf16.mxu1 %v12660_v6 }
  0x3b   :  { %366 = vmatmul.mubr.bf16.vlgmr.msra.gmra.mrb[0].mxu0 %v16400_v43  ;;  %407 = vmatmul.mubr.bf16.vlgmr.msra.gmra.mrb[0].mxu1 %v16400_v43 }
  0x3c   :  { %724 = vmatpush1.bf16.msra.mxu0 %v12637_v2  ;;  %765 = vmatpush1.bf16.msra.mxu1 %v12665_v7 }
  0x3d   :  { %725 = vmatprep.subr.bf16.mxu0 %v12643_v3  ;;  %766 = vmatprep.subr.bf16.mxu1 %v12684_v10 }
  0x3e   :  { %9821 = vmatprep.mubr.msk.bf16.mxu0 %vm329_vm0, %v457_v45  ;;  %9822 = vmatprep.mubr.msk.bf16.mxu1 %vm329_vm0, %v457_v45  ;;  %v12978_v45 = vld [vmem:[%s16389_s3 + $0x88] ss:$16 sps:$4 sm:$0xff]  }
  0x40   :  { %726 = vmatpush1.bf16.msra.mxu0 %v12649_v4  ;;  %767 = vmatpush1.bf16.msra.mxu1 %v12689_v11 }
  0x41   :  { %727 = vmatprep.subr.bf16.mxu0 %v12655_v5  ;;  %768 = vmatprep.subr.bf16.mxu1 %v12706_v14  ;;  %v120_v5 = vrot.slane %v107_v50, %v12880_v0  ;;  %v12471_v50 = vld [vmem:[%s16389_s3 + $0xa0] ss:$16 sps:$4 sm:$0xff]  }
  0x44   :  { %728 = vmatpush1.bf16.msra.mxu0 %v12671_v8  ;;  %769 = vmatpush1.bf16.msra.mxu1 %v12713_v15 }
  0x45   :  { %729 = vmatprep.subr.bf16.mxu0 %v12678_v9  ;;  %770 = vmatprep.subr.bf16.mxu1 %v12719_v16 }
  0x48   :  { %730 = vmatpush1.bf16.msra.mxu0 %v12696_v12  ;;  %771 = vmatpush1.bf16.msra.mxu1 %v12737_v19 }
  0x49   :  { %731 = vmatprep.subr.bf16.mxu0 %v12701_v13  ;;  %772 = vmatprep.subr.bf16.mxu1 %v12743_v20 }
  0x4c   :  { %732 = vmatpush1.bf16.msra.mxu0 %v12725_v17  ;;  %773 = vmatpush1.bf16.msra.mxu1 %v12761_v23  ;;  %v12889_v23 = vld [vmem:[%s16393_s7] ss:$0 sm:$0xff] }
  0x4d   :  { %733 = vmatprep.subr.bf16.mxu0 %v12731_v18  ;;  %774 = vmatprep.subr.bf16.mxu1 %v12767_v24 }
  0x50   :  { %734 = vmatpush1.bf16.msra.mxu0 %v12749_v21  ;;  %775 = vmatpush1.bf16.msra.mxu1 %v11592_v29  ;;  %v12453_v29 = vld [vmem:[%s16389_s3 + $0x24] ss:$16 sps:$4 sm:$0xff]  }
  0x51   :  { %735 = vmatprep.subr.bf16.mxu0 %v12754_v22  ;;  %776 = vmatprep.subr.bf16.mxu1 %v11595_v31  ;;  %v12455_v31 = vld [vmem:[%s16389_s3 + $0x20] ss:$16 sps:$4 sm:$0xff]  }
  0x54   :  { %736 = vmatpush1.bf16.msra.mxu0 %v12772_v25  ;;  %777 = vmatpush1.bf16.msra.mxu1 %v11598_v33  ;;  %v12457_v33 = vld [vmem:[%s16389_s3 + $0x44] ss:$16 sps:$4 sm:$0xff]  }
  0x55   :  { %737 = vmatprep.subr.bf16.mxu0 %v12781_v27  ;;  %778 = vmatprep.subr.bf16.mxu1 %v11599_v34  ;;  %v12900_v27 = vld [vmem:[%s16389_s3] ss:$16 sps:$4 sm:$0xff]   ;;  %v12933_v34 = vld [vmem:[%s16389_s3 + $0x4c] ss:$16 sps:$4 sm:$0xff]  }
  0x58   :  { %738 = vmatpush1.bf16.msra.mxu0 %v11585_v30  ;;  %779 = vmatpush1.bf16.msra.mxu1 %v11601_v37  ;;  %v12915_v30 = vld [vmem:[%s16389_s3 + $0x2c] ss:$16 sps:$4 sm:$0xff]   ;;  %v12461_v37 = vld [vmem:[%s16389_s3 + $0x64] ss:$16 sps:$4 sm:$0xff]  }
  0x59   :  { %739 = vmatprep.subr.bf16.mxu0 %v11587_v32  ;;  %780 = vmatprep.subr.bf16.mxu1 %v11602_v38  ;;  %v12924_v32 = vld [vmem:[%s16389_s3 + $0x28] ss:$16 sps:$4 sm:$0xff]   ;;  %v12951_v38 = vld [vmem:[%s16389_s3 + $0x6c] ss:$16 sps:$4 sm:$0xff]  }
  0x5c   :  { %740 = vmatpush1.bf16.msra.mxu0 %v11591_v35  ;;  %781 = vmatpush1.bf16.msra.mxu1 %v11604_v40  ;;  %v12459_v35 = vld [vmem:[%s16389_s3 + $0x40] ss:$16 sps:$4 sm:$0xff]   ;;  %v12960_v40 = vld [vmem:[%s16389_s3 + $0x68] ss:$16 sps:$4 sm:$0xff]  }
  0x5d   :  { %741 = vmatprep.subr.bf16.mxu0 %v11593_v36  ;;  %782 = vmatprep.subr.bf16.mxu1 %v11605_v41  ;;  %v12942_v36 = vld [vmem:[%s16389_s3 + $0x48] ss:$16 sps:$4 sm:$0xff]   ;;  %v12465_v41 = vld [vmem:[%s16389_s3 + $0x84] ss:$16 sps:$4 sm:$0xff]  }
  0x60   :  { %742 = vmatpush1.bf16.msra.mxu0 %v11597_v39  ;;  %783 = vmatpush1.bf16.msra.mxu1 %v11607_v42  ;;  %v12463_v39 = vld [vmem:[%s16389_s3 + $0x60] ss:$16 sps:$4 sm:$0xff]   ;;  %v12969_v42 = vld [vmem:[%s16389_s3 + $0x8c] ss:$16 sps:$4 sm:$0xff]  }
  0x61   :  { %1108 = vmatprep.subr.bf16.mxu0 %v12632_v1  ;;  %1149 = vmatprep.subr.bf16.mxu1 %v12660_v6 }
 0x10e   :  { %v367_v55 = vpop.f32.mrb[0].mxu0  ;;  %v408_v1 = vpop.f32.mrb[0].mxu1 }
 0x10f   :  { %v368_v56 = vadd.f32 %v367_v55, %v112_v52  ;;  %v369_v57 = vpop.f32.mrb[1].mxu0  ;;  %v410_v2 = vpop.f32.mrb[1].mxu1  ;;  %v409_v8 = vadd.f32 %v408_v1, %v120_v5  ;;  %v12996_v52 = vld [vmem:[%s16389_s3 + $0xa8] ss:$16 sps:$4 sm:$0xff]   ;;  %v13005_v55 = vld [vmem:[%s16389_s3 + $0xcc] ss:$16 sps:$4 sm:$0xff]  }
 0x110   :  { %v370_v58 = vadd.f32 %v369_v57, %v116_v53  ;;  %v371_v59 = vpop.f32.mrb[2].mxu0  ;;  %v411_v3 = vadd.f32 %v410_v2, %v124_v62  ;;  %v412_v4 = vpop.f32.mrb[2].mxu1  ;;  %v12473_v53 = vld [vmem:[%s16389_s3 + $0xc4] ss:$16 sps:$4 sm:$0xff]   ;;  %v13014_v57 = vld [vmem:[%s16389_s3 + $0xc8] ss:$16 sps:$4 sm:$0xff]  }
 0x111   :  { %v9775_v60 = vmul.f32 -1.442695, %v368_v56  ;;  %v372_v61 = vpop.f32.mrb[3].mxu0  ;;  %v413_v6 = vpop.f32.mrb[3].mxu1  ;;  %v12475_v56 = vld [vmem:[%s16389_s3 + $0xc0] ss:$16 sps:$4 sm:$0xff]  }
 0x112   :  { %v9776_v63 = vmul.f32 -1.442695, %v370_v58  ;;  %v9777_v7 = vmul.f32 -1.442695, %v411_v3  ;;  %v12477_v58 = vld [vmem:[%s16389_s3 + $0xe4] ss:$16 sps:$4 sm:$0xff]  }
 0x113   :  { %12183 = vpow2.f32 %v9775_v60  ;;  %v13023_v59 = vld [vmem:[%s16389_s3 + $0xec] ss:$16 sps:$4 sm:$0xff]   ;;  %v12479_v60 = vld [vmem:[%s16389_s3 + $0xe0] ss:$16 sps:$4 sm:$0xff]   ;;  %v13032_v61 = vld [vmem:[%s16389_s3 + $0xe8] ss:$16 sps:$4 sm:$0xff]  }
 0x114   :  { %12185 = vpow2.f32 %v9776_v63  ;;  %v12481_v62 = vld [vmem:[%s16389_s3 + $0x104] ss:$16 sps:$4 sm:$0xff]   ;;  %v13041_v63 = vld [vmem:[%s16389_s3 + $0x10c] ss:$16 sps:$4 sm:$0xff]   ;;  %v12483_v1 = vld [vmem:[%s16389_s3 + $0x100] ss:$16 sps:$4 sm:$0xff]  }
 0x115   :  { %12187 = vpow2.f32 %v9777_v7  ;;  %v13050_v2 = vld [vmem:[%s16389_s3 + $0x108] ss:$16 sps:$4 sm:$0xff]   ;;  %v12485_v3 = vld [vmem:[%s16389_s3 + $0x124] ss:$16 sps:$4 sm:$0xff]   ;;  %v13059_v4 = vld [vmem:[%s16389_s3 + $0x12c] ss:$16 sps:$4 sm:$0xff]  }
 0x116   :  { %12189 = vtanh.f32 %v409_v8  ;;  %v12487_v5 = vld [vmem:[%s16389_s3 + $0x120] ss:$16 sps:$4 sm:$0xff]   ;;  %v13068_v6 = vld [vmem:[%s16389_s3 + $0x128] ss:$16 sps:$4 sm:$0xff]   ;;  %v12489_v7 = vld [vmem:[%s16389_s3 + $0x4] ss:$16 sps:$4 sm:$0xff]  }
 0x117   :  { %v12490_v8 = vld [vmem:[%s16389_s3 + $0xc] ss:$16 sps:$4 sm:$0xff]  }
 0x11d   :  { %v12184_v9 = vpop.eup %12183 }
 0x11e   :  { %v12186_v10 = vpop.eup %12185  ;;  %v418_v11 = vadd.f32 1.0, %v12184_v9  ;;  %v9827_v9 = vld [vmem:[%s16387_s1 + $0x10] sm:$0xff] }
 0x11f   :  { %v424_v12 = vadd.f32 1.0, %v12186_v10  ;;  %v12188_v13 = vpop.eup %12187  ;;  %v842_v10 = vpack.c.bf16 %v9827_v9, %v9827_v9 }
 0x120   :  { %12191 = vrcp.f32 %v418_v11  ;;  %v12190_v14 = vpop.eup %12189  ;;  %v431_v16 = vadd.f32 1.0, %v12188_v13  ;;  %v498_v11 = vld [vmem:[%s16390_s4] sm:$0xf] }
 0x121   :  { %12193 = vrcp.f32 %v424_v12  ;;  %v503_v12 = vrot.slane %v498_v11, %v12868_v49  ;;  %v507_v13 = vrot.slane %v498_v11, %v12873_v51 }
 0x122   :  { %12195 = vrcp.f32 %v431_v16 }
 0x12a   :  { %v12192_v15 = vpop.eup %12191 }
 0x12b   :  { %v12194_v17 = vpop.eup %12193  ;;  %v435_v18 = vmul.f32 %v12192_v15, %v12190_v14 }
 0x12c   :  { %v434_v19 = vmul.f32 0.0, %v12194_v17  ;;  %v12196_v21 = vpop.eup %12195 }
 0x12e   :  { %v12883_v20 = vadd.f32 %v435_v18, %v434_v19 }
 0x130   :  { %12197 = vtanh.f32 %v12883_v20 }
 0x13a   :  { %v12198_v22 = vpop.eup %12197 }
 0x13b   :  { %v12891_v24 = vmul.f32 %v12198_v22, %v12196_v21 }
 0x13d   :  { %16590 = vst [vmem:[#allocation12_spill] sm:$0xff] %v12891_v24  ;;  %v456_v25 = vpack.c.bf16 %v12891_v24, %v12891_v24  ;;  %v446_v26 = vmul.f32 %v12889_v23, %v12891_v24 }
 0x13f   :  { %756 = vmatmul.mubr.bf16.vlgmr.msra.gmra.mrb[4].mxu0 %v456_v25  ;;  %797 = vmatmul.mubr.bf16.vlgmr.msra.gmra.mrb[4].mxu1 %v456_v25 }
 0x140   :  { %447 = vadd.xlane.f32.xlu0 %v446_v26  ;;  %1109 = vmatpush1.bf16.msra.mxu0 %v12900_v27 }
 0x141   :  { %1150 = vmatpush1.bf16.msra.mxu1 %v12906_v28  ;;  %1110 = vmatprep.subr.bf16.mxu0 %v12453_v29 }
 0x142   :  { %1151 = vmatprep.subr.bf16.mxu1 %v12915_v30  ;;  %9868 = vmatprep.mubr.msk.bf16.mxu0 %vm329_vm0, %v842_v10 }
 0x143   :  { %9869 = vmatprep.mubr.msk.bf16.mxu1 %vm329_vm0, %v842_v10 }
 0x144   :  { %1111 = vmatpush1.bf16.msra.mxu0 %v12455_v31 }
 0x145   :  { %1152 = vmatpush1.bf16.msra.mxu1 %v12924_v32  ;;  %1112 = vmatprep.subr.bf16.mxu0 %v12457_v33  ;;  %v515_v33 = vrot.slane %v498_v11, %v12877_v54 }
 0x146   :  { %1153 = vmatprep.subr.bf16.mxu1 %v12933_v34 }
 0x148   :  { %1113 = vmatpush1.bf16.msra.mxu0 %v12459_v35 }
 0x149   :  { %1154 = vmatpush1.bf16.msra.mxu1 %v12942_v36  ;;  %1114 = vmatprep.subr.bf16.mxu0 %v12461_v37  ;;  %v511_v37 = vrot.slane %v498_v11, %v12880_v0 }
 0x14a   :  { %1155 = vmatprep.subr.bf16.mxu1 %v12951_v38 }
 0x14c   :  { %1115 = vmatpush1.bf16.msra.mxu0 %v12463_v39 }
 0x14d   :  { %1156 = vmatpush1.bf16.msra.mxu1 %v12960_v40  ;;  %1116 = vmatprep.subr.bf16.mxu0 %v12465_v41 }
 0x14e   :  { %1157 = vmatprep.subr.bf16.mxu1 %v12969_v42 }
 0x150   :  { %1117 = vmatpush1.bf16.msra.mxu0 %v12467_v44 }
 0x151   :  { %1158 = vmatpush1.bf16.msra.mxu1 %v12978_v45  ;;  %1118 = vmatprep.subr.bf16.mxu0 %v12469_v46 }
 0x152   :  { %1159 = vmatprep.subr.bf16.mxu1 %v12987_v48 }
 0x154   :  { %1119 = vmatpush1.bf16.msra.mxu0 %v12471_v50 }
 0x155   :  { %1160 = vmatpush1.bf16.msra.mxu1 %v12996_v52  ;;  %1120 = vmatprep.subr.bf16.mxu0 %v12473_v53 }
 0x156   :  { %1161 = vmatprep.subr.bf16.mxu1 %v13005_v55 }
 0x158   :  { %1121 = vmatpush1.bf16.msra.mxu0 %v12475_v56 }
 0x159   :  { %1162 = vmatpush1.bf16.msra.mxu1 %v13014_v57  ;;  %1122 = vmatprep.subr.bf16.mxu0 %v12477_v58 }
 0x15a   :  { %1163 = vmatprep.subr.bf16.mxu1 %v13023_v59 }
 0x15c   :  { %1123 = vmatpush1.bf16.msra.mxu0 %v12479_v60 }
 0x15d   :  { %1164 = vmatpush1.bf16.msra.mxu1 %v13032_v61  ;;  %1124 = vmatprep.subr.bf16.mxu0 %v12481_v62 }
 0x15e   :  { %1165 = vmatprep.subr.bf16.mxu1 %v13041_v63 }
 0x160   :  { %1125 = vmatpush1.bf16.msra.mxu0 %v12483_v1 }
 0x161   :  { %1166 = vmatpush1.bf16.msra.mxu1 %v13050_v2  ;;  %1126 = vmatprep.subr.bf16.mxu0 %v12485_v3 }
 0x162   :  { %1167 = vmatprep.subr.bf16.mxu1 %v13059_v4 }
 0x164   :  { %1127 = vmatpush1.bf16.msra.mxu0 %v12487_v5 }
 0x165   :  { %1168 = vmatpush1.bf16.msra.mxu1 %v13068_v6  ;;  %1493 = vmatprep.subr.bf16.mxu0 %v12489_v7 }
 0x166   :  { %1534 = vmatprep.subr.bf16.mxu1 %v12490_v8 }
 0x212   :  { %v757_v14 = vpop.f32.mrb[4].mxu0  ;;  %v798_v15 = vpop.f32.mrb[4].mxu1 }
 0x213   :  { %v758_v16 = vadd.f32 %v757_v14, %v503_v12  ;;  %v759_v17 = vpop.f32.mrb[5].mxu0  ;;  %v800_v18 = vpop.f32.mrb[5].mxu1  ;;  %v799_v41 = vadd.f32 %v798_v15, %v511_v37 }
 0x214   :  { %v760_v19 = vadd.f32 %v759_v17, %v507_v13  ;;  %v761_v21 = vpop.f32.mrb[6].mxu0  ;;  %v802_v22 = vpop.f32.mrb[6].mxu1  ;;  %v801_v35 = vadd.f32 %v800_v18, %v515_v33 }
 0x215   :  { %v9823_v25 = vmul.f32 -1.442695, %v758_v16  ;;  %v762_v26 = vpop.f32.mrb[7].mxu0  ;;  %v803_v29 = vpop.f32.mrb[7].mxu1 }
 0x216   :  { %v9824_v31 = vmul.f32 -1.442695, %v760_v19  ;;  %v9825_v39 = vmul.f32 -1.442695, %v801_v35 }
 0x217   :  { %12199 = vpow2.f32 %v9823_v25 }
 0x218   :  { %12201 = vpow2.f32 %v9824_v31 }
 0x219   :  { %12203 = vpow2.f32 %v9825_v39 }
 0x21a   :  { %12205 = vtanh.f32 %v799_v41 }
 0x221   :  { %v12200_v44 = vpop.eup %12199 }
 0x222   :  { %v12202_v46 = vpop.eup %12201  ;;  %v808_v50 = vadd.f32 1.0, %v12200_v44 }
 0x223   :  { %v814_v53 = vadd.f32 1.0, %v12202_v46  ;;  %v12204_v56 = vpop.eup %12203 }
 0x224   :  { %12207 = vrcp.f32 %v808_v50  ;;  %v12206_v58 = vpop.eup %12205  ;;  %v821_v3 = vadd.f32 1.0, %v12204_v56 }
 0x225   :  { %12209 = vrcp.f32 %v814_v53 }
 0x226   :  { %12211 = vrcp.f32 %v821_v3 }
 0x22e   :  { %v12208_v60 = vpop.eup %12207 }
 0x22f   :  { %v12210_v62 = vpop.eup %12209  ;;  %v825_v1 = vmul.f32 %v12208_v60, %v12206_v58 }
 0x230   :  { %v824_v5 = vmul.f32 %v12210_v62, %v12883_v20  ;;  %v12212_v8 = vpop.eup %12211  ;;  %v13122_v20 = vld [vmem:[%s16389_s3 + $0x24] ss:$16 sps:$4 sm:$0xff]  }
 0x232   :  { %v13090_v7 = vadd.f32 %v825_v1, %v824_v5 }
 0x234   :  { %12213 = vtanh.f32 %v13090_v7 }
 0x23e   :  { %v12214_v9 = vpop.eup %12213 }
 0x23f   :  { %v13093_v10 = vmul.f32 %v12214_v9, %v12212_v8 }
 0x241   :  { %16591 = vst [vmem:[#allocation13_spill] sm:$0xff] %v13093_v10  ;;  %v841_v11 = vpack.c.bf16 %v13093_v10, %v13093_v10  ;;  %v831_v12 = vmul.f32 %v12889_v23, %v13093_v10 }
 0x243   :  { %1141 = vmatmul.mubr.bf16.vlgmr.msra.gmra.mrb[8].mxu0 %v841_v11  ;;  %1182 = vmatmul.mubr.bf16.vlgmr.msra.gmra.mrb[8].mxu1 %v841_v11 }
 0x244   :  { %832 = vadd.xlane.f32.xlu0 %v831_v12  ;;  %1494 = vmatpush1.bf16.msra.mxu0 %v12900_v27  ;;  %v13127_v27 = vld [vmem:[%s16389_s3 + $0x20] ss:$16 sps:$4 sm:$0xff]  }
 0x245   :  { %1535 = vmatpush1.bf16.msra.mxu1 %v12906_v28  ;;  %1495 = vmatprep.subr.bf16.mxu0 %v13122_v20  ;;  %v13134_v28 = vld [vmem:[%s16389_s3 + $0x44] ss:$16 sps:$4 sm:$0xff]  }
 0x246   :  { %1536 = vmatprep.subr.bf16.mxu1 %v12915_v30  ;;  %v13139_v30 = vld [vmem:[%s16389_s3 + $0x40] ss:$16 sps:$4 sm:$0xff]  }
 0x248   :  { %1496 = vmatpush1.bf16.msra.mxu0 %v13127_v27 }
 0x249   :  { %1537 = vmatpush1.bf16.msra.mxu1 %v12924_v32  ;;  %1497 = vmatprep.subr.bf16.mxu0 %v13134_v28  ;;  %v13146_v32 = vld [vmem:[%s16389_s3 + $0x64] ss:$16 sps:$4 sm:$0xff]  }
 0x24a   :  { %1538 = vmatprep.subr.bf16.mxu1 %v12933_v34  ;;  %v13151_v34 = vld [vmem:[%s16389_s3 + $0x60] ss:$16 sps:$4 sm:$0xff]  }
 0x24c   :  { %1498 = vmatpush1.bf16.msra.mxu0 %v13139_v30 }
 0x24d   :  { %1539 = vmatpush1.bf16.msra.mxu1 %v12942_v36  ;;  %1499 = vmatprep.subr.bf16.mxu0 %v13146_v32  ;;  %v13158_v36 = vld [vmem:[%s16389_s3 + $0x84] ss:$16 sps:$4 sm:$0xff]  }
 0x24e   :  { %1540 = vmatprep.subr.bf16.mxu1 %v12951_v38  ;;  %v13163_v38 = vld [vmem:[%s16389_s3 + $0x80] ss:$16 sps:$4 sm:$0xff]  }
 0x250   :  { %1500 = vmatpush1.bf16.msra.mxu0 %v13151_v34 }
 0x251   :  { %1541 = vmatpush1.bf16.msra.mxu1 %v12960_v40  ;;  %1501 = vmatprep.subr.bf16.mxu0 %v13158_v36  ;;  %v13170_v40 = vld [vmem:[%s16389_s3 + $0xa4] ss:$16 sps:$4 sm:$0xff]  }
 0x252   :  { %1542 = vmatprep.subr.bf16.mxu1 %v12969_v42  ;;  %v13175_v42 = vld [vmem:[%s16389_s3 + $0xa0] ss:$16 sps:$4 sm:$0xff]  }
 0x254   :  { %1502 = vmatpush1.bf16.msra.mxu0 %v13163_v38 }
 0x255   :  { %1543 = vmatpush1.bf16.msra.mxu1 %v12978_v45  ;;  %1503 = vmatprep.subr.bf16.mxu0 %v13170_v40  ;;  %v13182_v45 = vld [vmem:[%s16389_s3 + $0xc4] ss:$16 sps:$4 sm:$0xff]  }
 0x256   :  { %1544 = vmatprep.subr.bf16.mxu1 %v12987_v48  ;;  %v13187_v48 = vld [vmem:[%s16389_s3 + $0xc0] ss:$16 sps:$4 sm:$0xff]  }
 0x258   :  { %1504 = vmatpush1.bf16.msra.mxu0 %v13175_v42 }
 0x259   :  { %1545 = vmatpush1.bf16.msra.mxu1 %v12996_v52  ;;  %1505 = vmatprep.subr.bf16.mxu0 %v13182_v45  ;;  %v13194_v52 = vld [vmem:[%s16389_s3 + $0xe4] ss:$16 sps:$4 sm:$0xff]  }
 0x25a   :  { %1546 = vmatprep.subr.bf16.mxu1 %v13005_v55  ;;  %v13199_v55 = vld [vmem:[%s16389_s3 + $0xe0] ss:$16 sps:$4 sm:$0xff]  }
 0x25c   :  { %1506 = vmatpush1.bf16.msra.mxu0 %v13187_v48 }
 0x25d   :  { %1547 = vmatpush1.bf16.msra.mxu1 %v13014_v57  ;;  %1507 = vmatprep.subr.bf16.mxu0 %v13194_v52  ;;  %v13206_v57 = vld [vmem:[%s16389_s3 + $0x104] ss:$16 sps:$4 sm:$0xff]  }
 0x25e   :  { %1548 = vmatprep.subr.bf16.mxu1 %v13023_v59  ;;  %v13211_v59 = vld [vmem:[%s16389_s3 + $0x100] ss:$16 sps:$4 sm:$0xff]  }
 0x260   :  { %1508 = vmatpush1.bf16.msra.mxu0 %v13199_v55 }
 0x261   :  { %1549 = vmatpush1.bf16.msra.mxu1 %v13032_v61  ;;  %1509 = vmatprep.subr.bf16.mxu0 %v13206_v57  ;;  %v13218_v61 = vld [vmem:[%s16389_s3 + $0x124] ss:$16 sps:$4 sm:$0xff]  }
 0x262   :  { %1550 = vmatprep.subr.bf16.mxu1 %v13041_v63  ;;  %v13223_v63 = vld [vmem:[%s16389_s3 + $0x120] ss:$16 sps:$4 sm:$0xff]  }
 0x264   :  { %1510 = vmatpush1.bf16.msra.mxu0 %v13211_v59 }
 0x265   :  { %1551 = vmatpush1.bf16.msra.mxu1 %v13050_v2  ;;  %v9874_v2 = vld [vmem:[%s16387_s1 + $0x18] sm:$0xff]  ;;  %1511 = vmatprep.subr.bf16.mxu0 %v13218_v61 }
 0x266   :  { %1552 = vmatprep.subr.bf16.mxu1 %v13059_v4  ;;  %v1227_v4 = vpack.c.bf16 %v9874_v2, %v9874_v2 }
 0x268   :  { %1512 = vmatpush1.bf16.msra.mxu0 %v13223_v63  ;;  %9915 = vmatprep.mubr.msk.bf16.mxu0 %vm329_vm0, %v1227_v4 }
 0x269   :  { %1553 = vmatpush1.bf16.msra.mxu1 %v13068_v6  ;;  %9916 = vmatprep.mubr.msk.bf16.mxu1 %vm329_vm0, %v1227_v4  ;;  %v883_v6 = vld [vmem:[%s16390_s4] sm:$0xf] }
 0x26a   :  { %v888_v13 = vrot.slane %v883_v6, %v12868_v49  ;;  %v892_v14 = vrot.slane %v883_v6, %v12873_v51  ;;  %v900_v35 = vrot.slane %v883_v6, %v12877_v54  ;;  %v896_v39 = vrot.slane %v883_v6, %v12880_v0 }
 0x316   :  { %v1142_v15 = vpop.f32.mrb[8].mxu0  ;;  %v1183_v16 = vpop.f32.mrb[8].mxu1 }
 0x317   :  { %v1143_v17 = vadd.f32 %v1142_v15, %v888_v13  ;;  %v1144_v18 = vpop.f32.mrb[9].mxu0  ;;  %v1185_v19 = vpop.f32.mrb[9].mxu1  ;;  %v1184_v44 = vadd.f32 %v1183_v16, %v896_v39  ;;  %v13257_v13 = vld [vmem:[%s16389_s3 + $0xc] ss:$16 sps:$4 sm:$0xff]   ;;  %v13267_v15 = vld [vmem:[%s16389_s3 + $0x8] ss:$16 sps:$4 sm:$0xff]  }
 0x318   :  { %v1145_v21 = vadd.f32 %v1144_v18, %v892_v14  ;;  %v1146_v22 = vpop.f32.mrb[10].mxu0  ;;  %v1187_v25 = vpop.f32.mrb[10].mxu1  ;;  %v1186_v37 = vadd.f32 %v1185_v19, %v900_v35  ;;  %16593 = vst [vmem:[#allocation15_spill] sm:$0xff] %v13257_v13  ;;  %v13262_v14 = vld [vmem:[%s16389_s3] ss:$16 sps:$4 sm:$0xff]   ;;  %1919 = vmatprep.subr.bf16.mxu1 %v13257_v13 }
 0x319   :  { %v9870_v26 = vmul.f32 -1.442695, %v1143_v17  ;;  %v1147_v29 = vpop.f32.mrb[11].mxu0  ;;  %v1188_v31 = vpop.f32.mrb[11].mxu1  ;;  %v13277_v16 = vld [vmem:[%s16389_s3 + $0x2c] ss:$16 sps:$4 sm:$0xff]  }
 0x31a   :  { %v9871_v33 = vmul.f32 -1.442695, %v1145_v21  ;;  %v9872_v41 = vmul.f32 -1.442695, %v1186_v37  ;;  %v13282_v17 = vld [vmem:[%s16389_s3 + $0x28] ss:$16 sps:$4 sm:$0xff]  }
 0x31b   :  { %12215 = vpow2.f32 %v9870_v26  ;;  %v13291_v18 = vld [vmem:[%s16389_s3 + $0x4c] ss:$16 sps:$4 sm:$0xff]   ;;  %v13296_v19 = vld [vmem:[%s16389_s3 + $0x48] ss:$16 sps:$4 sm:$0xff]  }
 0x31c   :  { %12217 = vpow2.f32 %v9871_v33  ;;  %v13305_v21 = vld [vmem:[%s16389_s3 + $0x6c] ss:$16 sps:$4 sm:$0xff]   ;;  %v13310_v22 = vld [vmem:[%s16389_s3 + $0x68] ss:$16 sps:$4 sm:$0xff]  }
 0x31d   :  { %12219 = vpow2.f32 %v9872_v41  ;;  %v13319_v25 = vld [vmem:[%s16389_s3 + $0x8c] ss:$16 sps:$4 sm:$0xff]   ;;  %v13324_v26 = vld [vmem:[%s16389_s3 + $0x88] ss:$16 sps:$4 sm:$0xff]  }
 0x31e   :  { %12221 = vtanh.f32 %v1184_v44  ;;  %v13333_v29 = vld [vmem:[%s16389_s3 + $0xac] ss:$16 sps:$4 sm:$0xff]   ;;  %v13338_v31 = vld [vmem:[%s16389_s3 + $0xa8] ss:$16 sps:$4 sm:$0xff]  }
 0x31f   :  { %v13347_v33 = vld [vmem:[%s16389_s3 + $0xcc] ss:$16 sps:$4 sm:$0xff]   ;;  %v13352_v35 = vld [vmem:[%s16389_s3 + $0xc8] ss:$16 sps:$4 sm:$0xff]  }
 0x320   :  { %v13361_v37 = vld [vmem:[%s16389_s3 + $0xec] ss:$16 sps:$4 sm:$0xff]   ;;  %v13366_v39 = vld [vmem:[%s16389_s3 + $0xe8] ss:$16 sps:$4 sm:$0xff]  }
 0x321   :  { %v13375_v41 = vld [vmem:[%s16389_s3 + $0x10c] ss:$16 sps:$4 sm:$0xff]   ;;  %v13380_v44 = vld [vmem:[%s16389_s3 + $0x108] ss:$16 sps:$4 sm:$0xff]  }
 0x325   :  { %v12216_v46 = vpop.eup %12215 }
 0x326   :  { %v12218_v50 = vpop.eup %12217  ;;  %v1193_v53 = vadd.f32 1.0, %v12216_v46  ;;  %v13389_v46 = vld [vmem:[%s16389_s3 + $0x12c] ss:$16 sps:$4 sm:$0xff]  }
 0x327   :  { %v1199_v56 = vadd.f32 1.0, %v12218_v50  ;;  %v12220_v58 = vpop.eup %12219  ;;  %v13394_v50 = vld [vmem:[%s16389_s3 + $0x128] ss:$16 sps:$4 sm:$0xff]  }
 0x328   :  { %12223 = vrcp.f32 %v1193_v53  ;;  %v12222_v60 = vpop.eup %12221  ;;  %v1206_v5 = vadd.f32 1.0, %v12220_v58  ;;  %v9921_v53 = vld [vmem:[%s16387_s1 + $0x20] sm:$0xff] }
 0x329   :  { %12225 = vrcp.f32 %v1199_v56  ;;  %v1612_v56 = vpack.c.bf16 %v9921_v53, %v9921_v53  ;;  %v1268_v58 = vld [vmem:[%s16390_s4] sm:$0xf] }
 0x32a   :  { %12227 = vrcp.f32 %v1206_v5  ;;  %v1281_v10 = vrot.slane %v1268_v58, %v12880_v0 }
 0x332   :  { %v12224_v62 = vpop.eup %12223 }
 0x333   :  { %v12226_v1 = vpop.eup %12225  ;;  %v1210_v3 = vmul.f32 %v12224_v62, %v12222_v60  ;;  %v1273_v60 = vrot.slane %v1268_v58, %v12868_v49  ;;  %v1277_v62 = vrot.slane %v1268_v58, %v12873_v51 }
 0x334   :  { %v1209_v8 = vmul.f32 %v12226_v1, %v13090_v7  ;;  %v12228_v11 = vpop.eup %12227  ;;  %v13252_v7 = vld [vmem:[%s16389_s3 + $0x4] ss:$16 sps:$4 sm:$0xff]  }
 0x335   :  { %1878 = vmatprep.subr.bf16.mxu0 %v13252_v7 }
 0x336   :  { %v13240_v9 = vadd.f32 %v1210_v3, %v1209_v8 }
 0x338   :  { %12229 = vtanh.f32 %v13240_v9 }
 0x342   :  { %v12230_v12 = vpop.eup %12229 }
 0x343   :  { %v13243_v2 = vmul.f32 %v12230_v12, %v12228_v11 }
 0x345   :  { %16592 = vst [vmem:[#allocation14_spill] sm:$0xff] %v13243_v2  ;;  %v1226_v4 = vpack.c.bf16 %v13243_v2, %v13243_v2  ;;  %v1216_v6 = vmul.f32 %v12889_v23, %v13243_v2  ;;  %v1285_v2 = vrot.slane %v1268_v58, %v12877_v54  ;;  %v9968_v58 = vld [vmem:[%s16387_s1 + $0x28] sm:$0xff] }
 0x347   :  { %1526 = vmatmul.mubr.bf16.vlgmr.msra.gmra.mrb[12].mxu0 %v1226_v4  ;;  %1567 = vmatmul.mubr.bf16.vlgmr.msra.gmra.mrb[12].mxu1 %v1226_v4 }
 0x348   :  { %1217 = vadd.xlane.f32.xlu1 %v1216_v6  ;;  %1879 = vmatpush1.bf16.msra.mxu0 %v13262_v14 }
 0x349   :  { %1920 = vmatpush1.bf16.msra.mxu1 %v13267_v15  ;;  %1880 = vmatprep.subr.bf16.mxu0 %v13122_v20 }
 0x34a   :  { %1921 = vmatprep.subr.bf16.mxu1 %v13277_v16  ;;  %9962 = vmatprep.mubr.msk.bf16.mxu0 %vm329_vm0, %v1612_v56 }
 0x34b   :  { %9963 = vmatprep.mubr.msk.bf16.mxu1 %vm329_vm0, %v1612_v56 }
 0x34c   :  { %1881 = vmatpush1.bf16.msra.mxu0 %v13127_v27 }
 0x34d   :  { %1922 = vmatpush1.bf16.msra.mxu1 %v13282_v17  ;;  %1882 = vmatprep.subr.bf16.mxu0 %v13134_v28 }
 0x34e   :  { %1923 = vmatprep.subr.bf16.mxu1 %v13291_v18 }
 0x350   :  { %1883 = vmatpush1.bf16.msra.mxu0 %v13139_v30 }
 0x351   :  { %1924 = vmatpush1.bf16.msra.mxu1 %v13296_v19  ;;  %1884 = vmatprep.subr.bf16.mxu0 %v13146_v32 }
 0x352   :  { %1925 = vmatprep.subr.bf16.mxu1 %v13305_v21 }
 0x354   :  { %1885 = vmatpush1.bf16.msra.mxu0 %v13151_v34 }
 0x355   :  { %1926 = vmatpush1.bf16.msra.mxu1 %v13310_v22  ;;  %1886 = vmatprep.subr.bf16.mxu0 %v13158_v36 }
 0x356   :  { %1927 = vmatprep.subr.bf16.mxu1 %v13319_v25 }
 0x358   :  { %1887 = vmatpush1.bf16.msra.mxu0 %v13163_v38 }
 0x359   :  { %1928 = vmatpush1.bf16.msra.mxu1 %v13324_v26  ;;  %1888 = vmatprep.subr.bf16.mxu0 %v13170_v40 }
 0x35a   :  { %1929 = vmatprep.subr.bf16.mxu1 %v13333_v29 }
 0x35c   :  { %1889 = vmatpush1.bf16.msra.mxu0 %v13175_v42 }
 0x35d   :  { %1930 = vmatpush1.bf16.msra.mxu1 %v13338_v31  ;;  %1890 = vmatprep.subr.bf16.mxu0 %v13182_v45 }
 0x35e   :  { %1931 = vmatprep.subr.bf16.mxu1 %v13347_v33 }
 0x360   :  { %1891 = vmatpush1.bf16.msra.mxu0 %v13187_v48 }
 0x361   :  { %1932 = vmatpush1.bf16.msra.mxu1 %v13352_v35  ;;  %1892 = vmatprep.subr.bf16.mxu0 %v13194_v52 }
 0x362   :  { %1933 = vmatprep.subr.bf16.mxu1 %v13361_v37 }
 0x364   :  { %1893 = vmatpush1.bf16.msra.mxu0 %v13199_v55 }
 0x365   :  { %1934 = vmatpush1.bf16.msra.mxu1 %v13366_v39  ;;  %1894 = vmatprep.subr.bf16.mxu0 %v13206_v57 }
 0x366   :  { %1935 = vmatprep.subr.bf16.mxu1 %v13375_v41 }
 0x368   :  { %1895 = vmatpush1.bf16.msra.mxu0 %v13211_v59 }
 0x369   :  { %1936 = vmatpush1.bf16.msra.mxu1 %v13380_v44  ;;  %1896 = vmatprep.subr.bf16.mxu0 %v13218_v61 }
 0x36a   :  { %1937 = vmatprep.subr.bf16.mxu1 %v13389_v46 }
 0x36c   :  { %1897 = vmatpush1.bf16.msra.mxu0 %v13223_v63 }
 0x36d   :  { %1938 = vmatpush1.bf16.msra.mxu1 %v13394_v50  ;;  %2263 = vmatprep.subr.bf16.mxu0 %v13252_v7 }
 0x36e   :  { %2304 = vmatprep.subr.bf16.mxu1 %v13257_v13 }
 0x41a   :  { %v1527_v1 = vpop.f32.mrb[12].mxu0  ;;  %v1568_v3 = vpop.f32.mrb[12].mxu1 }
 0x41b   :  { %v1528_v5 = vadd.f32 %v1527_v1, %v1273_v60  ;;  %v1529_v8 = vpop.f32.mrb[13].mxu0  ;;  %v1570_v11 = vpop.f32.mrb[13].mxu1  ;;  %v1569_v49 = vadd.f32 %v1568_v3, %v1281_v10  ;;  %v1997_v3 = vpack.c.bf16 %v9968_v58, %v9968_v58 }
 0x41c   :  { %v1530_v12 = vadd.f32 %v1529_v8, %v1277_v62  ;;  %v1531_v4 = vpop.f32.mrb[14].mxu0  ;;  %v1572_v6 = vpop.f32.mrb[14].mxu1  ;;  %v1571_v24 = vadd.f32 %v1570_v11, %v1285_v2  ;;  %v1653_v11 = vld [vmem:[%s16390_s4] sm:$0xf] }
 0x41d   :  { %v9917_v53 = vmul.f32 -1.442695, %v1528_v5  ;;  %v1532_v56 = vpop.f32.mrb[15].mxu0  ;;  %v1573_v43 = vpop.f32.mrb[15].mxu1  ;;  %v1670_v58 = vrot.slane %v1653_v11, %v12877_v54 }
 0x41e   :  { %v9918_v47 = vmul.f32 -1.442695, %v1530_v12  ;;  %v9919_v51 = vmul.f32 -1.442695, %v1571_v24 }
 0x41f   :  { %12231 = vpow2.f32 %v9917_v53  ;;  %v16596_v53 = vld [vmem:[#allocation10_spill] sm:$0xff] }
 0x420   :  { %12233 = vpow2.f32 %v9918_v47  ;;  %v1658_v56 = vrot.slane %v1653_v11, %v16596_v53 }
 0x421   :  { %12235 = vpow2.f32 %v9919_v51 }
 0x422   :  { %12237 = vtanh.f32 %v1569_v49 }
 0x429   :  { %v12232_v13 = vpop.eup %12231 }
 0x42a   :  { %v12234_v60 = vpop.eup %12233  ;;  %v1578_v1 = vadd.f32 1.0, %v12232_v13 }
 0x42b   :  { %v1584_v62 = vadd.f32 1.0, %v12234_v60  ;;  %v12236_v5 = vpop.eup %12235  ;;  %v16597_v60 = vld [vmem:[#allocation11_spill] sm:$0xff] }
 0x42c   :  { %12239 = vrcp.f32 %v1578_v1  ;;  %v12238_v43 = vpop.eup %12237  ;;  %v1591_v6 = vadd.f32 1.0, %v12236_v5  ;;  %v1662_v1 = vrot.slane %v1653_v11, %v16597_v60 }
 0x42d   :  { %12241 = vrcp.f32 %v1584_v62 }
 0x42e   :  { %12243 = vrcp.f32 %v1591_v6 }
 0x436   :  { %v12240_v8 = vpop.eup %12239 }
 0x437   :  { %v12242_v12 = vpop.eup %12241  ;;  %v1595_v4 = vmul.f32 %v12240_v8, %v12238_v43 }
 0x438   :  { %v1594_v47 = vmul.f32 %v12242_v12, %v13240_v9  ;;  %v12244_v24 = vpop.eup %12243  ;;  %v16595_v9 = vld [vmem:[#allocation15_spill] sm:$0xff] }
 0x43a   :  { %v13414_v2 = vadd.f32 %v1595_v4, %v1594_v47 }
 0x43c   :  { %12245 = vtanh.f32 %v13414_v2 }
 0x446   :  { %v12246_v10 = vpop.eup %12245 }
 0x447   :  { %v13417_v51 = vmul.f32 %v12246_v10, %v12244_v24 }
 0x449   :  { %16594 = vst [vmem:[#allocation16_spill] sm:$0xff] %v13417_v51  ;;  %v1611_v49 = vpack.c.bf16 %v13417_v51, %v13417_v51  ;;  %v1601_v13 = vmul.f32 %v12889_v23, %v13417_v51  ;;  %v1666_v51 = vrot.slane %v1653_v11, %v12880_v0 }
 0x44b   :  { %1911 = vmatmul.mubr.bf16.vlgmr.msra.gmra.mrb[16].mxu0 %v1611_v49  ;;  %1952 = vmatmul.mubr.bf16.vlgmr.msra.gmra.mrb[16].mxu1 %v1611_v49 }
 0x44c   :  { %1602 = vadd.xlane.f32.xlu1 %v1601_v13  ;;  %2264 = vmatpush1.bf16.msra.mxu0 %v13262_v14 }
 0x44d   :  { %2305 = vmatpush1.bf16.msra.mxu1 %v13267_v15  ;;  %2265 = vmatprep.subr.bf16.mxu0 %v13122_v20 }
 0x44e   :  { %2306 = vmatprep.subr.bf16.mxu1 %v13277_v16  ;;  %10009 = vmatprep.mubr.msk.bf16.mxu0 %vm329_vm0, %v1997_v3 }
 0x44f   :  { %10010 = vmatprep.mubr.msk.bf16.mxu1 %vm329_vm0, %v1997_v3 }
 0x450   :  { %2266 = vmatpush1.bf16.msra.mxu0 %v13127_v27 }
 0x451   :  { %2307 = vmatpush1.bf16.msra.mxu1 %v13282_v17  ;;  %2267 = vmatprep.subr.bf16.mxu0 %v13134_v28 }
 0x452   :  { %2308 = vmatprep.subr.bf16.mxu1 %v13291_v18 }
 0x454   :  { %2268 = vmatpush1.bf16.msra.mxu0 %v13139_v30 }
 0x455   :  { %2309 = vmatpush1.bf16.msra.mxu1 %v13296_v19  ;;  %2269 = vmatprep.subr.bf16.mxu0 %v13146_v32 }
 0x456   :  { %2310 = vmatprep.subr.bf16.mxu1 %v13305_v21 }
 0x458   :  { %2270 = vmatpush1.bf16.msra.mxu0 %v13151_v34 }
 0x459   :  { %2311 = vmatpush1.bf16.msra.mxu1 %v13310_v22  ;;  %2271 = vmatprep.subr.bf16.mxu0 %v13158_v36 }
 0x45a   :  { %2312 = vmatprep.subr.bf16.mxu1 %v13319_v25 }
 0x45c   :  { %2272 = vmatpush1.bf16.msra.mxu0 %v13163_v38 }
 0x45d   :  { %2313 = vmatpush1.bf16.msra.mxu1 %v13324_v26  ;;  %2273 = vmatprep.subr.bf16.mxu0 %v13170_v40 }
 0x45e   :  { %2314 = vmatprep.subr.bf16.mxu1 %v13333_v29 }
 0x460   :  { %2274 = vmatpush1.bf16.msra.mxu0 %v13175_v42 }
 0x461   :  { %2315 = vmatpush1.bf16.msra.mxu1 %v13338_v31  ;;  %2275 = vmatprep.subr.bf16.mxu0 %v13182_v45 }
 0x462   :  { %2316 = vmatprep.subr.bf16.mxu1 %v13347_v33 }
 0x464   :  { %2276 = vmatpush1.bf16.msra.mxu0 %v13187_v48 }
 0x465   :  { %2317 = vmatpush1.bf16.msra.mxu1 %v13352_v35  ;;  %2277 = vmatprep.subr.bf16.mxu0 %v13194_v52 }
 0x466   :  { %2318 = vmatprep.subr.bf16.mxu1 %v13361_v37 }
 0x468   :  { %2278 = vmatpush1.bf16.msra.mxu0 %v13199_v55 }
 0x469   :  { %2319 = vmatpush1.bf16.msra.mxu1 %v13366_v39  ;;  %2279 = vmatprep.subr.bf16.mxu0 %v13206_v57 }
 0x46a   :  { %2320 = vmatprep.subr.bf16.mxu1 %v13375_v41 }
 0x46c   :  { %2280 = vmatpush1.bf16.msra.mxu0 %v13211_v59 }
 0x46d   :  { %2321 = vmatpush1.bf16.msra.mxu1 %v13380_v44  ;;  %2281 = vmatprep.subr.bf16.mxu0 %v13218_v61 }
 0x46e   :  { %2322 = vmatprep.subr.bf16.mxu1 %v13389_v46 }
 0x470   :  { %2282 = vmatpush1.bf16.msra.mxu0 %v13223_v63 }
 0x471   :  { %2323 = vmatpush1.bf16.msra.mxu1 %v13394_v50  ;;  %2648 = vmatprep.subr.bf16.mxu0 %v13252_v7 }
 0x472   :  { %2689 = vmatprep.subr.bf16.mxu1 %v16595_v9 }
 0x51e   :  { %v1912_v62 = vpop.f32.mrb[16].mxu0  ;;  %v1953_v5 = vpop.f32.mrb[16].mxu1 }
 0x51f   :  { %v1913_v43 = vadd.f32 %v1912_v62, %v1658_v56  ;;  %v1914_v8 = vpop.f32.mrb[17].mxu0  ;;  %v1955_v12 = vpop.f32.mrb[17].mxu1  ;;  %v1954_v53 = vadd.f32 %v1953_v5, %v1666_v51 }
 0x520   :  { %v1915_v4 = vadd.f32 %v1914_v8, %v1662_v1  ;;  %v1916_v6 = vpop.f32.mrb[18].mxu0  ;;  %v1957_v47 = vpop.f32.mrb[18].mxu1  ;;  %v1956_v3 = vadd.f32 %v1955_v12, %v1670_v58 }
 0x521   :  { %v9964_v24 = vmul.f32 -1.442695, %v1913_v43  ;;  %v1917_v10 = vpop.f32.mrb[19].mxu0  ;;  %v1958_v49 = vpop.f32.mrb[19].mxu1 }
 0x522   :  { %v9965_v13 = vmul.f32 -1.442695, %v1915_v4  ;;  %v9966_v60 = vmul.f32 -1.442695, %v1956_v3 }
 0x523   :  { %12247 = vpow2.f32 %v9964_v24 }
 0x524   :  { %12249 = vpow2.f32 %v9965_v13 }
 0x525   :  { %12251 = vpow2.f32 %v9966_v60 }
 0x526   :  { %12253 = vtanh.f32 %v1954_v53 }
 0x52d   :  { %v12248_v9 = vpop.eup %12247 }
 0x52e   :  { %v12250_v56 = vpop.eup %12249  ;;  %v1963_v62 = vadd.f32 1.0, %v12248_v9 }
 0x52f   :  { %v1969_v1 = vadd.f32 1.0, %v12250_v56  ;;  %v12252_v43 = vpop.eup %12251 }
 0x530   :  { %12255 = vrcp.f32 %v1963_v62  ;;  %v12254_v8 = vpop.eup %12253  ;;  %v1976_v24 = vadd.f32 1.0, %v12252_v43 }
 0x531   :  { %12257 = vrcp.f32 %v1969_v1 }
 0x532   :  { %12259 = vrcp.f32 %v1976_v24 }
 0x53a   :  { %v12256_v4 = vpop.eup %12255 }
 0x53b   :  { %v12258_v6 = vpop.eup %12257  ;;  %v1980_v47 = vmul.f32 %v12256_v4, %v12254_v8 }
 0x53c   :  { %v1979_v12 = vmul.f32 %v12258_v6, %v13414_v2  ;;  %v12260_v51 = vpop.eup %12259 }
 0x53e   :  { %v13476_v10 = vadd.f32 %v1980_v47, %v1979_v12 }
 0x540   :  { %12261 = vtanh.f32 %v13476_v10 }
 0x54a   :  { %v12262_v9 = vpop.eup %12261 }
 0x54b   :  { %v13479_v11 = vmul.f32 %v12262_v9, %v12260_v51 }
 0x54d   :  { %v1996_v53 = vpack.c.bf16 %v13479_v11, %v13479_v11  ;;  %v1986_v60 = vmul.f32 %v12889_v23, %v13479_v11 }
 0x54f   :  { %2296 = vmatmul.mubr.bf16.vlgmr.msra.gmra.mrb[20].mxu0 %v1996_v53  ;;  %2337 = vmatmul.mubr.bf16.vlgmr.msra.gmra.mrb[20].mxu1 %v1996_v53 }
 0x550   :  { %1987 = vadd.xlane.f32.xlu0 %v1986_v60  ;;  %2649 = vmatpush1.bf16.msra.mxu0 %v13262_v14 }
 0x551   :  { %2690 = vmatpush1.bf16.msra.mxu1 %v13267_v15  ;;  %2650 = vmatprep.subr.bf16.mxu0 %v13122_v20  ;;  %v16598_v20 = vld [vmem:[#allocation15_spill] sm:$0xff] }
 0x552   :  { %2691 = vmatprep.subr.bf16.mxu1 %v13277_v16 }
 0x554   :  { %2651 = vmatpush1.bf16.msra.mxu0 %v13127_v27  ;;  %v10015_v27 = vld [vmem:[%s16387_s1 + $0x30] sm:$0xff] }
 0x555   :  { %2692 = vmatpush1.bf16.msra.mxu1 %v13282_v17  ;;  %2652 = vmatprep.subr.bf16.mxu0 %v13134_v28  ;;  %v2382_v28 = vpack.c.bf16 %v10015_v27, %v10015_v27 }
 0x556   :  { %2693 = vmatprep.subr.bf16.mxu1 %v13291_v18 }
 0x557   :  { %10056 = vmatprep.mubr.msk.bf16.mxu0 %vm329_vm0, %v2382_v28  ;;  %10057 = vmatprep.mubr.msk.bf16.mxu1 %vm329_vm0, %v2382_v28 }
 0x558   :  { %2653 = vmatpush1.bf16.msra.mxu0 %v13139_v30  ;;  %v2038_v30 = vld [vmem:[%s16390_s4] sm:$0xf] }
 0x559   :  { %2694 = vmatpush1.bf16.msra.mxu1 %v13296_v19  ;;  %2654 = vmatprep.subr.bf16.mxu0 %v13146_v32  ;;  %v16599_v32 = vld [vmem:[#allocation10_spill] sm:$0xff]  ;;  %v2055_v5 = vrot.slane %v2038_v30, %v12877_v54  ;;  %v2051_v13 = vrot.slane %v2038_v30, %v12880_v0 }
 0x55a   :  { %2695 = vmatprep.subr.bf16.mxu1 %v13305_v21 }
 0x55c   :  { %2655 = vmatpush1.bf16.msra.mxu0 %v13151_v34  ;;  %v2043_v34 = vrot.slane %v2038_v30, %v16599_v32 }
 0x55d   :  { %2696 = vmatpush1.bf16.msra.mxu1 %v13310_v22  ;;  %2656 = vmatprep.subr.bf16.mxu0 %v13158_v36  ;;  %v16600_v36 = vld [vmem:[#allocation11_spill] sm:$0xff] }
 0x55e   :  { %2697 = vmatprep.subr.bf16.mxu1 %v13319_v25 }
 0x560   :  { %2657 = vmatpush1.bf16.msra.mxu0 %v13163_v38  ;;  %v2047_v38 = vrot.slane %v2038_v30, %v16600_v36 }
 0x561   :  { %2698 = vmatpush1.bf16.msra.mxu1 %v13324_v26  ;;  %2658 = vmatprep.subr.bf16.mxu0 %v13170_v40 }
 0x562   :  { %2699 = vmatprep.subr.bf16.mxu1 %v13333_v29 }
 0x564   :  { %2659 = vmatpush1.bf16.msra.mxu0 %v13175_v42 }
 0x565   :  { %2700 = vmatpush1.bf16.msra.mxu1 %v13338_v31  ;;  %2660 = vmatprep.subr.bf16.mxu0 %v13182_v45 }
 0x566   :  { %2701 = vmatprep.subr.bf16.mxu1 %v13347_v33 }
 0x568   :  { %2661 = vmatpush1.bf16.msra.mxu0 %v13187_v48 }
 0x569   :  { %2702 = vmatpush1.bf16.msra.mxu1 %v13352_v35  ;;  %2662 = vmatprep.subr.bf16.mxu0 %v13194_v52 }
 0x56a   :  { %2703 = vmatprep.subr.bf16.mxu1 %v13361_v37 }
 0x56c   :  { %2663 = vmatpush1.bf16.msra.mxu0 %v13199_v55 }
 0x56d   :  { %2704 = vmatpush1.bf16.msra.mxu1 %v13366_v39  ;;  %2664 = vmatprep.subr.bf16.mxu0 %v13206_v57 }
 0x56e   :  { %2705 = vmatprep.subr.bf16.mxu1 %v13375_v41 }
 0x570   :  { %2665 = vmatpush1.bf16.msra.mxu0 %v13211_v59 }
 0x571   :  { %2706 = vmatpush1.bf16.msra.mxu1 %v13380_v44  ;;  %2666 = vmatprep.subr.bf16.mxu0 %v13218_v61 }
 0x572   :  { %2707 = vmatprep.subr.bf16.mxu1 %v13389_v46 }
 0x574   :  { %2667 = vmatpush1.bf16.msra.mxu0 %v13223_v63 }
 0x575   :  { %2708 = vmatpush1.bf16.msra.mxu1 %v13394_v50  ;;  %3033 = vmatprep.subr.bf16.mxu0 %v13252_v7 }
 0x576   :  { %3074 = vmatprep.subr.bf16.mxu1 %v16598_v20 }
 0x622   :  { %v2297_v40 = vpop.f32.mrb[20].mxu0  ;;  %v2338_v42 = vpop.f32.mrb[20].mxu1 }
 0x623   :  { %v2298_v45 = vadd.f32 %v2297_v40, %v2043_v34  ;;  %v2299_v48 = vpop.f32.mrb[21].mxu0  ;;  %v2340_v52 = vpop.f32.mrb[21].mxu1  ;;  %v2339_v3 = vadd.f32 %v2338_v42, %v2051_v13 }
 0x624   :  { %v2300_v55 = vadd.f32 %v2299_v48, %v2047_v38  ;;  %v2301_v57 = vpop.f32.mrb[22].mxu0  ;;  %v2342_v59 = vpop.f32.mrb[22].mxu1  ;;  %v2341_v49 = vadd.f32 %v2340_v52, %v2055_v5 }
 0x625   :  { %v10011_v61 = vmul.f32 -1.442695, %v2298_v45  ;;  %v2302_v63 = vpop.f32.mrb[23].mxu0  ;;  %v2343_v7 = vpop.f32.mrb[23].mxu1 }
 0x626   :  { %v10012_v2 = vmul.f32 -1.442695, %v2300_v55  ;;  %v10013_v58 = vmul.f32 -1.442695, %v2341_v49 }
 0x627   :  { %12263 = vpow2.f32 %v10011_v61 }
 0x628   :  { %12265 = vpow2.f32 %v10012_v2 }
 0x629   :  { %12267 = vpow2.f32 %v10013_v58 }
 0x62a   :  { %12269 = vtanh.f32 %v2339_v3 }
 0x631   :  { %v12264_v56 = vpop.eup %12263 }
 0x632   :  { %v12266_v62 = vpop.eup %12265  ;;  %v2348_v1 = vadd.f32 1.0, %v12264_v56 }
 0x633   :  { %v2354_v43 = vadd.f32 1.0, %v12266_v62  ;;  %v12268_v8 = vpop.eup %12267 }
 0x634   :  { %12271 = vrcp.f32 %v2348_v1  ;;  %v12270_v4 = vpop.eup %12269  ;;  %v2361_v12 = vadd.f32 1.0, %v12268_v8 }
 0x635   :  { %12273 = vrcp.f32 %v2354_v43 }
 0x636   :  { %12275 = vrcp.f32 %v2361_v12 }
 0x63e   :  { %v12272_v6 = vpop.eup %12271 }
 0x63f   :  { %v12274_v47 = vpop.eup %12273  ;;  %v2365_v24 = vmul.f32 %v12272_v6, %v12270_v4 }
 0x640   :  { %v2364_v51 = vmul.f32 %v12274_v47, %v13476_v10  ;;  %v12276_v53 = vpop.eup %12275 }
 0x642   :  { %v13538_v9 = vadd.f32 %v2365_v24, %v2364_v51 }
 0x644   :  { %12277 = vtanh.f32 %v13538_v9 }
 0x64e   :  { %v12278_v60 = vpop.eup %12277 }
 0x64f   :  { %v13541_v20 = vmul.f32 %v12278_v60, %v12276_v53 }
 0x651   :  { %v2381_v27 = vpack.c.bf16 %v13541_v20, %v13541_v20  ;;  %v2371_v28 = vmul.f32 %v12889_v23, %v13541_v20  ;;  %v11670_v23 = vld [vmem:[%s16389_s3 + $0x24] ss:$16 sps:$4 sm:$0xff]  }
 0x653   :  { %2681 = vmatmul.mubr.bf16.vlgmr.msra.gmra.mrb[24].mxu0 %v2381_v27  ;;  %2722 = vmatmul.mubr.bf16.vlgmr.msra.gmra.mrb[24].mxu1 %v2381_v27 }
 0x654   :  { %2372 = vadd.xlane.f32.xlu1 %v2371_v28  ;;  %3034 = vmatpush1.bf16.msra.mxu0 %v13262_v14  ;;  %v11668_v14 = vld [vmem:[%s16389_s3 + $0x20] ss:$16 sps:$4 sm:$0xff]  }
 0x655   :  { %3075 = vmatpush1.bf16.msra.mxu1 %v13267_v15  ;;  %3035 = vmatprep.subr.bf16.mxu0 %v11670_v23  ;;  %v11673_v15 = vld [vmem:[%s16389_s3 + $0x44] ss:$16 sps:$4 sm:$0xff]   ;;  %v13644_v28 = vld [vmem:[%s16393_s7] ss:$0 sm:$0xff]  ;;  %s6970_s7 = scvt.s32.f32 %s6969_s20 }
 0x656   :  { %3076 = vmatprep.subr.bf16.mxu1 %v13277_v16  ;;  %v11671_v16 = vld [vmem:[%s16389_s3 + $0x40] ss:$16 sps:$4 sm:$0xff]   ;;  %v13651_v23 = vld [vmem:[%s16395_s9 + $0x204] ss:$16 sps:$4 sm:$0xff]  }
 0x657   :  { %16601 = vst [vmem:[#allocation15_spill] sm:$0xff] %v13651_v23  ;;  %s6975_s21 = ssub.f32 1.0, %s6970_s7 }
 0x658   :  { %3036 = vmatpush1.bf16.msra.mxu0 %v11668_v14  ;;  %v13656_v14 = vld [vmem:[%s16395_s9 + $0x200] ss:$16 sps:$4 sm:$0xff]  }
 0x659   :  { %3077 = vmatpush1.bf16.msra.mxu1 %v13282_v17  ;;  %3037 = vmatprep.subr.bf16.mxu0 %v11673_v15  ;;  %v11676_v17 = vld [vmem:[%s16389_s3 + $0x64] ss:$16 sps:$4 sm:$0xff]   ;;  %16602 = vst [vmem:[#allocation17_spill] sm:$0xff] %v13656_v14 }
 0x65a   :  { %3078 = vmatprep.subr.bf16.mxu1 %v13291_v18  ;;  %v11674_v18 = vld [vmem:[%s16389_s3 + $0x60] ss:$16 sps:$4 sm:$0xff]   ;;  %v13663_v15 = vld [vmem:[%s16395_s9 + $0x224] ss:$16 sps:$4 sm:$0xff]  }
 0x65b   :  { %16603 = vst [vmem:[#allocation18_spill] sm:$0xff] %v13663_v15 }
 0x65c   :  { %3038 = vmatpush1.bf16.msra.mxu0 %v11671_v16  ;;  %v13668_v16 = vld [vmem:[%s16395_s9 + $0x220] ss:$16 sps:$4 sm:$0xff]  }
 0x65d   :  { %3079 = vmatpush1.bf16.msra.mxu1 %v13296_v19  ;;  %3039 = vmatprep.subr.bf16.mxu0 %v11676_v17  ;;  %v11679_v19 = vld [vmem:[%s16389_s3 + $0x84] ss:$16 sps:$4 sm:$0xff]   ;;  %16604 = vst [vmem:[#allocation19_spill] sm:$0xff] %v13668_v16 }
 0x65e   :  { %3080 = vmatprep.subr.bf16.mxu1 %v13305_v21  ;;  %v11677_v21 = vld [vmem:[%s16389_s3 + $0x80] ss:$16 sps:$4 sm:$0xff]  }
 0x65f   :  { %v3162_v17 = vld [vmem:[%s16388_s2] sm:$0xff] }
 0x660   :  { %3040 = vmatpush1.bf16.msra.mxu0 %v11674_v18  ;;  %v16421_v18 = vmov 0  }
 0x661   :  { %3081 = vmatpush1.bf16.msra.mxu1 %v13310_v22  ;;  %3041 = vmatprep.subr.bf16.mxu0 %v11679_v19  ;;  %v11682_v22 = vld [vmem:[%s16389_s3 + $0xa4] ss:$16 sps:$4 sm:$0xff]   ;;  %v13676_v19 = vpack.c.bf16 %v3162_v17, %v3162_v17 }
 0x662   :  { %3082 = vmatprep.subr.bf16.mxu1 %v13319_v25  ;;  %v11680_v25 = vld [vmem:[%s16389_s3 + $0xa0] ss:$16 sps:$4 sm:$0xff]   ;;  %11492 = vset.pattern.permute.xlu1 %v16421_v18 }
 0x663   :  { %11493 = vset.pattern.permute.xlu0 %v16421_v18 }
 0x664   :  { %3042 = vmatpush1.bf16.msra.mxu0 %v11677_v21  ;;  %v2808_v21 = vld [vmem:[%s16390_s4] sm:$0xf] }
 0x665   :  { %3083 = vmatpush1.bf16.msra.mxu1 %v13324_v26  ;;  %3043 = vmatprep.subr.bf16.mxu0 %v11682_v22  ;;  %v11685_v26 = vld [vmem:[%s16389_s3 + $0xc4] ss:$16 sps:$4 sm:$0xff]   ;;  %v2813_v22 = vrot.slane %v2808_v21, %v16599_v32 }
 0x666   :  { %3084 = vmatprep.subr.bf16.mxu1 %v13333_v29  ;;  %v11683_v29 = vld [vmem:[%s16389_s3 + $0xc0] ss:$16 sps:$4 sm:$0xff]  }
 0x668   :  { %3044 = vmatpush1.bf16.msra.mxu0 %v11680_v25  ;;  %v2817_v25 = vrot.slane %v2808_v21, %v16600_v36 }
 0x669   :  { %3085 = vmatpush1.bf16.msra.mxu1 %v13338_v31  ;;  %3045 = vmatprep.subr.bf16.mxu0 %v11685_v26  ;;  %v11688_v31 = vld [vmem:[%s16389_s3 + $0xe4] ss:$16 sps:$4 sm:$0xff]  }
 0x66a   :  { %3086 = vmatprep.subr.bf16.mxu1 %v13347_v33  ;;  %v11686_v33 = vld [vmem:[%s16389_s3 + $0xe0] ss:$16 sps:$4 sm:$0xff]  }
 0x66c   :  { %3046 = vmatpush1.bf16.msra.mxu0 %v11683_v29 }
 0x66d   :  { %3087 = vmatpush1.bf16.msra.mxu1 %v13352_v35  ;;  %3047 = vmatprep.subr.bf16.mxu0 %v11688_v31  ;;  %v11691_v35 = vld [vmem:[%s16389_s3 + $0x104] ss:$16 sps:$4 sm:$0xff]  }
 0x66e   :  { %3088 = vmatprep.subr.bf16.mxu1 %v13361_v37  ;;  %v11689_v37 = vld [vmem:[%s16389_s3 + $0x100] ss:$16 sps:$4 sm:$0xff]  }
 0x670   :  { %3048 = vmatpush1.bf16.msra.mxu0 %v11686_v33 }
 0x671   :  { %3089 = vmatpush1.bf16.msra.mxu1 %v13366_v39  ;;  %3049 = vmatprep.subr.bf16.mxu0 %v11691_v35  ;;  %v11694_v39 = vld [vmem:[%s16389_s3 + $0x124] ss:$16 sps:$4 sm:$0xff]  }
 0x672   :  { %3090 = vmatprep.subr.bf16.mxu1 %v13375_v41  ;;  %v11692_v41 = vld [vmem:[%s16389_s3 + $0x120] ss:$16 sps:$4 sm:$0xff]  }
 0x674   :  { %3050 = vmatpush1.bf16.msra.mxu0 %v11689_v37 }
 0x675   :  { %3091 = vmatpush1.bf16.msra.mxu1 %v13380_v44  ;;  %v10062_v44 = vld [vmem:[%s16387_s1 + $0x38] sm:$0xff]  ;;  %3051 = vmatprep.subr.bf16.mxu0 %v11694_v39  ;;  %s4119_s1 = ssub.f32 1.0, %s4114_s0 }
 0x676   :  { %3092 = vmatprep.subr.bf16.mxu1 %v13389_v46  ;;  %v2767_v46 = vpack.c.bf16 %v10062_v44, %v10062_v44 }
 0x678   :  { %3052 = vmatpush1.bf16.msra.mxu0 %v11692_v41  ;;  %10103 = vmatprep.mubr.msk.bf16.mxu0 %vm329_vm0, %v2767_v46 }
 0x679   :  { %3093 = vmatpush1.bf16.msra.mxu1 %v13394_v50  ;;  %10104 = vmatprep.mubr.msk.bf16.mxu1 %vm329_vm0, %v2767_v46  ;;  %v2423_v50 = vld [vmem:[%s16390_s4] sm:$0xf] }
 0x67a   :  { %v2428_v10 = vrot.slane %v2423_v50, %v16599_v32  ;;  %v2432_v30 = vrot.slane %v2423_v50, %v16600_v36  ;;  %v2440_v7 = vrot.slane %v2423_v50, %v12877_v54  ;;  %v2436_v5 = vrot.slane %v2423_v50, %v12880_v0  ;;  %3743 = vmatprep.subr.bf16.mxu1 %v13651_v23 }
 0x726   :  { %v2682_v34 = vpop.f32.mrb[24].mxu0  ;;  %v2723_v38 = vpop.f32.mrb[24].mxu1 }
 0x727   :  { %v2683_v40 = vadd.f32 %v2682_v34, %v2428_v10  ;;  %v2684_v42 = vpop.f32.mrb[25].mxu0  ;;  %v2725_v45 = vpop.f32.mrb[25].mxu1  ;;  %v2724_v13 = vadd.f32 %v2723_v38, %v2436_v5  ;;  %v2821_v38 = vrot.slane %v2808_v21, %v12880_v0 }
 0x728   :  { %v2685_v48 = vadd.f32 %v2684_v42, %v2432_v30  ;;  %v2686_v52 = vpop.f32.mrb[26].mxu0  ;;  %v2727_v55 = vpop.f32.mrb[26].mxu1  ;;  %v2726_v2 = vadd.f32 %v2725_v45, %v2440_v7  ;;  %v2825_v30 = vrot.slane %v2808_v21, %v12877_v54 }
 0x729   :  { %v10058_v57 = vmul.f32 -1.442695, %v2683_v40  ;;  %v2687_v59 = vpop.f32.mrb[27].mxu0  ;;  %v2728_v61 = vpop.f32.mrb[27].mxu1 }
 0x72a   :  { %v10059_v63 = vmul.f32 -1.442695, %v2685_v48  ;;  %v10060_v49 = vmul.f32 -1.442695, %v2726_v2 }
 0x72b   :  { %12279 = vpow2.f32 %v10058_v57 }
 0x72c   :  { %12281 = vpow2.f32 %v10059_v63 }
 0x72d   :  { %12283 = vpow2.f32 %v10060_v49 }
 0x72e   :  { %12285 = vtanh.f32 %v2724_v13 }
 0x735   :  { %v12280_v58 = vpop.eup %12279 }
 0x736   :  { %v12282_v3 = vpop.eup %12281  ;;  %v2733_v56 = vadd.f32 1.0, %v12280_v58 }
 0x737   :  { %v2739_v62 = vadd.f32 1.0, %v12282_v3  ;;  %v12284_v1 = vpop.eup %12283  ;;  %v13696_v3 = vld [vmem:[%s16392_s6] ss:$0 sm:$0xff] }
 0x738   :  { %12287 = vrcp.f32 %v2733_v56  ;;  %v12286_v43 = vpop.eup %12285  ;;  %v2746_v47 = vadd.f32 1.0, %v12284_v1  ;;  %16605 = vst [vmem:[#allocation20_spill] sm:$0xff] %v13696_v3 }
 0x739   :  { %12289 = vrcp.f32 %v2739_v62 }
 0x73a   :  { %12291 = vrcp.f32 %v2746_v47  ;;  %v448_v47 = vpop.xlane.xlu0 %447 }
 0x742   :  { %v12288_v8 = vpop.eup %12287 }
 0x743   :  { %v12290_v4 = vpop.eup %12289  ;;  %v2750_v6 = vmul.f32 %v12288_v8, %v12286_v43  ;;  %v10109_v8 = vld [vmem:[#allocation3] ss:$0 sm:$0xff] }
 0x744   :  { %v2749_v24 = vmul.f32 %v12290_v4, %v13538_v9  ;;  %v12292_v51 = vpop.eup %12291  ;;  %v16606_v4 = vlaneseq }
 0x746   :  { %v13634_v12 = vadd.f32 %v2750_v6, %v2749_v24  ;;  %v13707_v6 = vand.u32 127, %v16606_v4  ;;  %v833_v24 = vpop.xlane.xlu0 %832  ;;  %v13749_v4 = vld [vmem:[%s16395_s9 + $0x8] ss:$16 sps:$4 sm:$0xff]  }
 0x747   :  { %16609 = vst [vmem:[#allocation23_spill] sm:$0xff] %v13749_v4 }
 0x748   :  { %12293 = vtanh.f32 %v13634_v12  ;;  %16607 = vst [vmem:[#allocation21_spill] sm:$0xff] %v13707_v6  ;;  %vm834_vm1 = vcmp.eq.s32.totalorder %v13707_v6, 1  ;;  %vm449_vm2 = vcmp.eq.s32.totalorder %v13707_v6, 0  ;;  %vm1219_vm3 = vcmp.eq.s32.totalorder %v13707_v6, 2 }
 0x749   :  { %vm1604_vm4 = vcmp.eq.s32.totalorder %v13707_v6, 3  ;;  %vm1989_vm5 = vcmp.eq.s32.totalorder %v13707_v6, 4  ;;  %vm2374_vm6 = vcmp.eq.s32.totalorder %v13707_v6, 5  ;;  %vm2759_vm7 = vcmp.eq.s32.totalorder %v13707_v6, 6 }
 0x74a   :  { %vm3144_vm8 = vcmp.eq.s32.totalorder %v13707_v6, 7 }
 0x752   :  { %v12294_v53 = vpop.eup %12293 }
 0x753   :  { %v13637_v60 = vmul.f32 %v12294_v53, %v12292_v51  ;;  %v1218_v53 = vpop.xlane.xlu1 %1217 }
 0x755   :  { %v2766_v27 = vpack.c.bf16 %v13637_v60, %v13637_v60  ;;  %v2756_v9 = vmul.f32 %v13644_v28, %v13637_v60 }
 0x757   :  { %3066 = vmatmul.mubr.bf16.vlgmr.msra.gmra.mrb[28].mxu0 %v2766_v27  ;;  %3107 = vmatmul.mubr.bf16.vlgmr.msra.gmra.mrb[28].mxu1 %v2766_v27  ;;  %v1603_v17 = vpop.xlane.xlu1 %1602 }
 0x758   :  { %2757 = vadd.xlane.f32.xlu0 %v2756_v9  ;;  %3744 = vmatpush1.bf16.msra.mxu1 %v13656_v14 }
 0x759   :  { %3745 = vmatprep.subr.bf16.mxu1 %v13663_v15  ;;  %3775 = vmatprep.mubr.bf16.mxu1 %v16421_v18  ;;  %v14003_v18 = vld [vmem:[%s16395_s9 + $0x148] ss:$16 sps:$4 sm:$0xff]  }
 0x75a   :  { %16630 = vst [vmem:[#allocation44_spill] sm:$0xff] %v14003_v18 }
 0x75c   :  { %3746 = vmatpush1.bf16.msra.mxu1 %v13668_v16  ;;  %v16649_v16 = vld [vmem:[#allocation14_spill] sm:$0xff] }
 0x75f   :  { %10183 = vmatmul.mubr.msk.bf16.vlgmr.msra.gmra.mrb[32].mxu1 %vm329_vm0, %v13676_v19 }
 0x82a   :  { %v3067_v26 = vpop.f32.mrb[28].mxu0  ;;  %v3108_v29 = vpop.f32.mrb[28].mxu1 }
 0x82b   :  { %v3068_v31 = vadd.f32 %v3067_v26, %v2813_v22  ;;  %v3069_v33 = vpop.f32.mrb[29].mxu0  ;;  %v3110_v35 = vpop.f32.mrb[29].mxu1  ;;  %v3109_v42 = vadd.f32 %v3108_v29, %v2821_v38 }
 0x82c   :  { %v3070_v37 = vadd.f32 %v3069_v33, %v2817_v25  ;;  %v3071_v39 = vpop.f32.mrb[30].mxu0  ;;  %v3112_v41 = vpop.f32.mrb[30].mxu1  ;;  %v3111_v34 = vadd.f32 %v3110_v35, %v2825_v30 }
 0x82d   :  { %v10105_v44 = vmul.f32 -1.442695, %v3068_v31  ;;  %v3072_v46 = vpop.f32.mrb[31].mxu0  ;;  %v3113_v50 = vpop.f32.mrb[31].mxu1 }
 0x82e   :  { %v10106_v10 = vmul.f32 -1.442695, %v3070_v37  ;;  %v10107_v40 = vmul.f32 -1.442695, %v3111_v34  ;;  %v1988_v26 = vpop.xlane.xlu0 %1987  ;;  %v2373_v35 = vpop.xlane.xlu1 %2372 }
 0x82f   :  { %12295 = vpow2.f32 %v10105_v44 }
 0x830   :  { %12297 = vpow2.f32 %v10106_v10 }
 0x831   :  { %12299 = vpow2.f32 %v10107_v40 }
 0x832   :  { %12301 = vtanh.f32 %v3109_v42  ;;  %v2758_v44 = vpop.xlane.xlu0 %2757 }
 0x839   :  { %v12296_v45 = vpop.eup %12295 }
 0x83a   :  { %v12298_v48 = vpop.eup %12297  ;;  %v3118_v52 = vadd.f32 1.0, %v12296_v45 }
 0x83b   :  { %v3124_v55 = vadd.f32 1.0, %v12298_v48  ;;  %v12300_v57 = vpop.eup %12299 }
 0x83c   :  { %12303 = vrcp.f32 %v3118_v52  ;;  %v12302_v59 = vpop.eup %12301  ;;  %v3131_v2 = vadd.f32 1.0, %v12300_v57 }
 0x83d   :  { %12305 = vrcp.f32 %v3124_v55 }
 0x83e   :  { %12307 = vrcp.f32 %v3131_v2 }
 0x846   :  { %v12304_v61 = vpop.eup %12303 }
 0x847   :  { %v12306_v63 = vpop.eup %12305  ;;  %v3135_v7 = vmul.f32 %v12304_v61, %v12302_v59 }
 0x848   :  { %v3134_v5 = vmul.f32 %v12306_v63, %v13634_v12  ;;  %v12308_v13 = vpop.eup %12307  ;;  %v13712_v12 = vld [vmem:[#allocation7] sm:$0xff] }
 0x849   :  { %v9826_v51 = vsel %vm834_vm1, 1.0, %v13712_v12  ;;  %v9779_v27 = vsel %vm449_vm2, 1.0, %v13712_v12  ;;  %v9920_v21 = vsel %vm1604_vm4, 1.0, %v13712_v12  ;;  %v9967_v29 = vsel %vm1989_vm5, 1.0, %v13712_v12 }
 0x84a   :  { %v13690_v49 = vadd.f32 %v3135_v7, %v3134_v5  ;;  %v837_v9 = vmul.f32 %v9826_v51, %v833_v24  ;;  %v452_v22 = vmul.f32 %v9779_v27, %v448_v47  ;;  %v1607_v33 = vmul.f32 %v9920_v21, %v1603_v17  ;;  %v13754_v47 = vld [vmem:[%s16395_s9 + $0xc] ss:$16 sps:$4 sm:$0xff]   ;;  %v13759_v24 = vld [vmem:[%s16395_s9 + $0x24] ss:$16 sps:$4 sm:$0xff]   ;;  %v13779_v27 = vld [vmem:[%s16395_s9 + $0x28] ss:$16 sps:$4 sm:$0xff]  }
 0x84b   :  { %v10014_v37 = vsel %vm2374_vm6, 1.0, %v13712_v12  ;;  %v1992_v41 = vmul.f32 %v9967_v29, %v1988_v26  ;;  %v10061_v46 = vsel %vm2759_vm7, 1.0, %v13712_v12  ;;  %v10108_v38 = vsel %vm3144_vm8, 1.0, %v13712_v12  ;;  %16610 = vst [vmem:[#allocation24_spill] sm:$0xff] %v13754_v47  ;;  %v13765_v51 = vld [vmem:[%s16395_s9 + $0x2c] ss:$16 sps:$4 sm:$0xff]   ;;  %3784 = vmatprep.subr.bf16.mxu1 %v13754_v47 }
 0x84c   :  { %12309 = vtanh.f32 %v13690_v49  ;;  %v838_v31 = vadd.f32 %v837_v9, %v452_v22  ;;  %v2377_v10 = vmul.f32 %v10014_v37, %v2373_v35  ;;  %v2762_v34 = vmul.f32 %v10061_v46, %v2758_v44  ;;  %16611 = vst [vmem:[#allocation25_spill] sm:$0xff] %v13765_v51  ;;  %3785 = vmatpush1.bf16.msra.mxu1 %v13749_v4  ;;  %v13790_v9 = vld [vmem:[%s16395_s9 + $0x4c] ss:$16 sps:$4 sm:$0xff]   ;;  %v13796_v17 = vld [vmem:[%s16395_s9 + $0x40] ss:$16 sps:$4 sm:$0xff]  }
 0x84d   :  { %16612 = vst [vmem:[#allocation26_spill] sm:$0xff] %v13779_v27  ;;  %3786 = vmatprep.subr.bf16.mxu1 %v13765_v51  ;;  %16613 = vst [vmem:[#allocation27_spill] sm:$0xff] %v13790_v9  ;;  %v13803_v21 = vld [vmem:[%s16395_s9 + $0x48] ss:$16 sps:$4 sm:$0xff]   ;;  %v13808_v22 = vld [vmem:[%s16395_s9 + $0x64] ss:$16 sps:$4 sm:$0xff]  }
 0x84e   :  { %16614 = vst [vmem:[#allocation28_spill] sm:$0xff] %v13803_v21  ;;  %v13820_v26 = vld [vmem:[%s16395_s9 + $0x60] ss:$16 sps:$4 sm:$0xff]   ;;  %v13827_v29 = vld [vmem:[%s16395_s9 + $0x68] ss:$16 sps:$4 sm:$0xff]  }
 0x84f   :  { %16616 = vst [vmem:[#allocation30_spill] sm:$0xff] %v13827_v29  ;;  %v13844_v35 = vld [vmem:[%s16395_s9 + $0x80] ss:$16 sps:$4 sm:$0xff]   ;;  %v13851_v37 = vld [vmem:[%s16395_s9 + $0x88] ss:$16 sps:$4 sm:$0xff]  }
 0x850   :  { %3787 = vmatpush1.bf16.msra.mxu1 %v13779_v27  ;;  %16618 = vst [vmem:[#allocation32_spill] sm:$0xff] %v13851_v37  ;;  %v13868_v44 = vld [vmem:[%s16395_s9 + $0xa0] ss:$16 sps:$4 sm:$0xff]   ;;  %v13875_v46 = vld [vmem:[%s16395_s9 + $0xa8] ss:$16 sps:$4 sm:$0xff]  }
 0x851   :  { %3788 = vmatprep.subr.bf16.mxu1 %v13790_v9  ;;  %16620 = vst [vmem:[#allocation34_spill] sm:$0xff] %v13875_v46  ;;  %v16647_v27 = vld [vmem:[#allocation13_spill] sm:$0xff]  ;;  %v16648_v4 = vld [vmem:[#allocation12_spill] sm:$0xff] }
 0x854   :  { %3789 = vmatpush1.bf16.msra.mxu1 %v13803_v21 }
 0x856   :  { %v12310_v58 = vpop.eup %12309 }
 0x857   :  { %v13698_v56 = vmul.f32 %v12310_v58, %v12308_v13 }
 0x859   :  { %v3243_v62 = vpack.c.bf16 %v13698_v56, %v13698_v56  ;;  %v3141_v1 = vmul.f32 %v13644_v28, %v13698_v56  ;;  %v3169_v43 = vmul.f32 %v13696_v3, %v13698_v56  ;;  %v9873_v28 = vsel %vm1219_vm3, 1.0, %v13712_v12 }
 0x85a   :  { %v1222_v25 = vmul.f32 %v9873_v28, %v1218_v53  ;;  %v13772_v53 = vld [vmem:[%s16395_s9 + $0x20] ss:$16 sps:$4 sm:$0xff]   ;;  %v13784_v28 = vld [vmem:[%s16395_s9 + $0x44] ss:$16 sps:$4 sm:$0xff]  }
 0x85b   :  { %3734 = vmatprep.mubr.bf16.mxu0 %v3243_v62  ;;  %3816 = vmatprep.mubr.bf16.mxu1 %v3243_v62 }
 0x85c   :  { %3142 = vadd.xlane.f32.xlu1 %v3141_v1  ;;  %3170 = vadd.xlane.f32.xlu0 %v3169_v43  ;;  %v1223_v39 = vadd.f32 %v1222_v25, %v838_v31  ;;  %v16423_v1 = vmov 1   ;;  %v13739_v43 = vld [vmem:[%s16395_s9] ss:$16 sps:$4 sm:$0xff]   ;;  %v13814_v25 = vld [vmem:[%s16395_s9 + $0x6c] ss:$16 sps:$4 sm:$0xff]  }
 0x85d   :  { %16615 = vst [vmem:[#allocation29_spill] sm:$0xff] %v13814_v25  ;;  %v13832_v31 = vld [vmem:[%s16395_s9 + $0x84] ss:$16 sps:$4 sm:$0xff]   ;;  %3790 = vmatprep.subr.bf16.mxu1 %v13814_v25 }
 0x85e   :  { %v1608_v50 = vadd.f32 %v1607_v33, %v1223_v39  ;;  %v13838_v33 = vld [vmem:[%s16395_s9 + $0x8c] ss:$16 sps:$4 sm:$0xff]   ;;  %3791 = vmatpush1.bf16.msra.mxu1 %v13827_v29  ;;  %v13856_v39 = vld [vmem:[%s16395_s9 + $0xa4] ss:$16 sps:$4 sm:$0xff]  }
 0x85f   :  { %16617 = vst [vmem:[#allocation31_spill] sm:$0xff] %v13838_v33  ;;  %3792 = vmatprep.subr.bf16.mxu1 %v13838_v33 }
 0x860   :  { %v1993_v30 = vadd.f32 %v1992_v41, %v1608_v50  ;;  %v13862_v41 = vld [vmem:[%s16395_s9 + $0xac] ss:$16 sps:$4 sm:$0xff]   ;;  %v13880_v50 = vld [vmem:[%s16395_s9 + $0xc4] ss:$16 sps:$4 sm:$0xff]  }
 0x861   :  { %16619 = vst [vmem:[#allocation33_spill] sm:$0xff] %v13862_v41 }
 0x862   :  { %v2378_v40 = vadd.f32 %v2377_v10, %v1993_v30  ;;  %3793 = vmatpush1.bf16.msra.mxu1 %v13851_v37  ;;  %v13886_v10 = vld [vmem:[%s16395_s9 + $0xcc] ss:$16 sps:$4 sm:$0xff]   ;;  %v13892_v30 = vld [vmem:[%s16395_s9 + $0xc0] ss:$16 sps:$4 sm:$0xff]   ;;  %v14145_v37 = vpop.f32.mrb[32].mxu1 }
 0x863   :  { %3794 = vmatprep.subr.bf16.mxu1 %v13862_v41  ;;  %16621 = vst [vmem:[#allocation35_spill] sm:$0xff] %v13886_v10  ;;  %v14120_v41 = vld [vmem:[%s16395_s9 + $0x1ec] ss:$16 sps:$4 sm:$0xff]   ;;  %v14147_v33 = vpop.f32.mrb[33].mxu1 }
 0x864   :  { %v2763_v45 = vadd.f32 %v2762_v34, %v2378_v40  ;;  %v13899_v34 = vld [vmem:[%s16395_s9 + $0xc8] ss:$16 sps:$4 sm:$0xff]   ;;  %16642 = vst [vmem:[#allocation56_spill] sm:$0xff] %v14120_v41 }
 0x865   :  { %16622 = vst [vmem:[#allocation36_spill] sm:$0xff] %v13899_v34 }
 0x866   :  { %3795 = vmatpush1.bf16.msra.mxu1 %v13875_v46  ;;  %v16449_v46 = vmov 7  }
 0x867   :  { %3796 = vmatprep.subr.bf16.mxu1 %v13886_v10  ;;  %v14094_v10 = vld [vmem:[%s16395_s9 + $0x1cc] ss:$16 sps:$4 sm:$0xff]  }
 0x868   :  { %16638 = vst [vmem:[#allocation52_spill] sm:$0xff] %v14094_v10 }
 0x86a   :  { %3797 = vmatpush1.bf16.msra.mxu1 %v13899_v34  ;;  %v16443_v34 = vmov 6  }
 0x86d   :  { %3156 = vperm.xlu1 %11492, %v10109_v8   ;;  %v13744_v8 = vld [vmem:[%s16395_s9 + $0x4] ss:$16 sps:$4 sm:$0xff]  }
 0x86e   :  { %3702 = vmatprep.subr.bf16.mxu0 %v13744_v8 }
 0x86f   :  { %3703 = vmatpush1.bf16.msra.mxu0 %v13739_v43 }
 0x870   :  { %3704 = vmatprep.subr.bf16.mxu0 %v13759_v24 }
 0x871   :  { %11494 = vset.pattern.permute.xlu1 %v16423_v1  ;;  %v16427_v1 = vmov 4  }
 0x873   :  { %3705 = vmatpush1.bf16.msra.mxu0 %v13772_v53 }
 0x874   :  { %3706 = vmatprep.subr.bf16.mxu0 %v13784_v28 }
 0x877   :  { %3707 = vmatpush1.bf16.msra.mxu0 %v13796_v17 }
 0x878   :  { %3708 = vmatprep.subr.bf16.mxu0 %v13808_v22 }
 0x87b   :  { %3709 = vmatpush1.bf16.msra.mxu0 %v13820_v26 }
 0x87c   :  { %3710 = vmatprep.subr.bf16.mxu0 %v13832_v31 }
 0x87f   :  { %3711 = vmatpush1.bf16.msra.mxu0 %v13844_v35 }
 0x880   :  { %3712 = vmatprep.subr.bf16.mxu0 %v13856_v39 }
 0x883   :  { %3713 = vmatpush1.bf16.msra.mxu0 %v13868_v44 }
 0x884   :  { %3714 = vmatprep.subr.bf16.mxu0 %v13880_v50 }
 0x887   :  { %3715 = vmatpush1.bf16.msra.mxu0 %v13892_v30 }
 0x8e9   :  { %v3143_v42 = vpop.xlane.xlu1 %3142  ;;  %v3171_v59 = vpop.xlane.xlu0 %3170 }
 0x8ea   :  { %v3147_v48 = vmul.f32 %v10108_v38, %v3143_v42 }
 0x8ec   :  { %v3148_v52 = vadd.f32 %v3147_v48, %v2763_v45  ;;  %v13910_v45 = vld [vmem:[%s16395_s9 + $0xe4] ss:$16 sps:$4 sm:$0xff]   ;;  %v13915_v48 = vld [vmem:[%s16395_s9 + $0xec] ss:$16 sps:$4 sm:$0xff]  }
 0x8ed   :  { %v3157_v55 = vpop.permute.xlu1 %3156  ;;  %16623 = vst [vmem:[#allocation37_spill] sm:$0xff] %v13915_v48  ;;  %3716 = vmatprep.subr.bf16.mxu0 %v13910_v45  ;;  %3798 = vmatprep.subr.bf16.mxu1 %v13915_v48  ;;  %v14074_v48 = vld [vmem:[%s16395_s9 + $0x1a8] ss:$16 sps:$4 sm:$0xff]  }
 0x8ee   :  { %v13727_v57 = vadd.f32 %v3157_v55, %v3148_v52  ;;  %v13920_v52 = vld [vmem:[%s16395_s9 + $0xe0] ss:$16 sps:$4 sm:$0xff]   ;;  %v13925_v55 = vld [vmem:[%s16395_s9 + $0xe8] ss:$16 sps:$4 sm:$0xff]   ;;  %16635 = vst [vmem:[#allocation49_spill] sm:$0xff] %v14074_v48 }
 0x8ef   :  { %16624 = vst [vmem:[#allocation38_spill] sm:$0xff] %v13925_v55  ;;  %3717 = vmatpush1.bf16.msra.mxu0 %v13920_v52  ;;  %3799 = vmatpush1.bf16.msra.mxu1 %v13925_v55  ;;  %v14054_v55 = vld [vmem:[%s16395_s9 + $0x188] ss:$16 sps:$4 sm:$0xff]  }
 0x8f0   :  { %16608 = vst [vmem:[#allocation22_spill] sm:$0xff] %v13727_v57  ;;  %v3172_v61 = vadd.f32 %v3171_v59, %v13727_v57  ;;  %v13936_v59 = vld [vmem:[%s16395_s9 + $0x100] ss:$16 sps:$4 sm:$0xff]   ;;  %16634 = vst [vmem:[#allocation48_spill] sm:$0xff] %v14054_v55 }
 0x8f2   :  { %v3173_v63 = vmax.f32 %v3172_v61, 0.0  ;;  %v13941_v61 = vld [vmem:[%s16395_s9 + $0x104] ss:$16 sps:$4 sm:$0xff]  }
 0x8f3   :  { %3718 = vmatprep.subr.bf16.mxu0 %v13941_v61 }
 0x8f4   :  { %v3175_v7 = vsel %vm3174_vm9, %v3173_v63, -inf  ;;  %3719 = vmatpush1.bf16.msra.mxu0 %v13936_v59 }
 0x8f5   :  { %3176 = vmax.xlane.f32.xlu0 %v3175_v7  ;;  %v13951_v7 = vld [vmem:[%s16395_s9 + $0x10c] ss:$16 sps:$4 sm:$0xff]  }
 0x8f6   :  { %16626 = vst [vmem:[#allocation40_spill] sm:$0xff] %v13951_v7  ;;  %3800 = vmatprep.subr.bf16.mxu1 %v13951_v7  ;;  %v16435_v7 = vmov 5  }
 0x982   :  { %v3177_v2 = vpop.xlane.xlu0 %3176 }
 0x983   :  { %v3178_v5 = vsub.f32 %v3173_v63, %v3177_v2  ;;  %v13946_v63 = vld [vmem:[%s16395_s9 + $0x108] ss:$16 sps:$4 sm:$0xff]   ;;  %v16417_v2 = vmov 2  }
 0x984   :  { %16625 = vst [vmem:[#allocation39_spill] sm:$0xff] %v13946_v63  ;;  %3801 = vmatpush1.bf16.msra.mxu1 %v13946_v63  ;;  %v14042_v63 = vld [vmem:[%s16395_s9 + $0x18c] ss:$16 sps:$4 sm:$0xff]  }
 0x985   :  { %v3179_v13 = vmul.f32 1.442695, %v3178_v5  ;;  %v13962_v5 = vld [vmem:[%s16395_s9 + $0x124] ss:$16 sps:$4 sm:$0xff]   ;;  %16633 = vst [vmem:[#allocation47_spill] sm:$0xff] %v14042_v63 }
 0x986   :  { %3720 = vmatprep.subr.bf16.mxu0 %v13962_v5 }
 0x987   :  { %12311 = vpow2.f32 %v3179_v13  ;;  %v13967_v13 = vld [vmem:[%s16395_s9 + $0x12c] ss:$16 sps:$4 sm:$0xff]  }
 0x988   :  { %16627 = vst [vmem:[#allocation41_spill] sm:$0xff] %v13967_v13  ;;  %3802 = vmatprep.subr.bf16.mxu1 %v13967_v13  ;;  %v14017_v13 = vld [vmem:[%s16395_s9 + $0x16c] ss:$16 sps:$4 sm:$0xff]  }
 0x989   :  { %16631 = vst [vmem:[#allocation45_spill] sm:$0xff] %v14017_v13 }
 0x991   :  { %v13731_v58 = vpop.eup %12311 }
 0x992   :  { %v3181_v62 = vsel %vm3174_vm9, %v13731_v58, 0.0 }
 0x993   :  { %3182 = vadd.xlane.f32.xlu0 %v3181_v62  ;;  %v13977_v62 = vld [vmem:[%s16395_s9 + $0x128] ss:$16 sps:$4 sm:$0xff]  }
 0x994   :  { %16628 = vst [vmem:[#allocation42_spill] sm:$0xff] %v13977_v62  ;;  %3803 = vmatpush1.bf16.msra.mxu1 %v13977_v62  ;;  %v14012_v62 = vld [vmem:[%s16395_s9 + $0x164] ss:$16 sps:$4 sm:$0xff]  }
 0xa20   :  { %v3183_v38 = vpop.xlane.xlu0 %3182 }
 0xa21   :  { %12313 = vrcp.f32 %v3183_v38  ;;  %v16419_v38 = vmov 3  }
 0xa2b   :  { %v12314_v40 = vpop.eup %12313 }
 0xa2c   :  { %v13905_v42 = vmul.f32 %v12314_v40, %v13731_v58  ;;  %v13972_v58 = vld [vmem:[%s16395_s9 + $0x120] ss:$16 sps:$4 sm:$0xff]   ;;  %v13987_v40 = vld [vmem:[%s16395_s9 + $0x144] ss:$16 sps:$4 sm:$0xff]  }
 0xa2d   :  { %3721 = vmatpush1.bf16.msra.mxu0 %v13972_v58 }
 0xa2e   :  { %3195 = vperm.xlu1 %11494, %v13905_v42   ;;  %3189 = vperm.xlu0 %11493, %v13905_v42  }
 0xa2f   :  { %3722 = vmatprep.subr.bf16.mxu0 %v13987_v40 }
 0xa32   :  { %11495 = vset.pattern.permute.xlu1 %v16417_v2  ;;  %v13992_v2 = vld [vmem:[%s16395_s9 + $0x14c] ss:$16 sps:$4 sm:$0xff]  }
 0xa33   :  { %3202 = vperm.xlu1 %11495, %v13905_v42   ;;  %16629 = vst [vmem:[#allocation43_spill] sm:$0xff] %v13992_v2  ;;  %3804 = vmatprep.subr.bf16.mxu1 %v13992_v2  ;;  %v14029_v2 = vld [vmem:[%s16395_s9 + $0x168] ss:$16 sps:$4 sm:$0xff]  }
 0xa34   :  { %3805 = vmatpush1.bf16.msra.mxu1 %v14003_v18  ;;  %16632 = vst [vmem:[#allocation46_spill] sm:$0xff] %v14029_v2  ;;  %v14037_v18 = vld [vmem:[%s16395_s9 + $0x184] ss:$16 sps:$4 sm:$0xff]  }
 0xa35   :  { %3806 = vmatprep.subr.bf16.mxu1 %v14017_v13  ;;  %v14049_v13 = vld [vmem:[%s16395_s9 + $0x180] ss:$16 sps:$4 sm:$0xff]  }
 0xa37   :  { %11496 = vset.pattern.permute.xlu1 %v16419_v38  ;;  %v13998_v38 = vld [vmem:[%s16395_s9 + $0x140] ss:$16 sps:$4 sm:$0xff]  }
 0xa38   :  { %3209 = vperm.xlu1 %11496, %v13905_v42   ;;  %3723 = vmatpush1.bf16.msra.mxu0 %v13998_v38 }
 0xa39   :  { %3724 = vmatprep.subr.bf16.mxu0 %v14012_v62  ;;  %3807 = vmatpush1.bf16.msra.mxu1 %v14029_v2  ;;  %v14068_v2 = vld [vmem:[%s16395_s9 + $0x1a4] ss:$16 sps:$4 sm:$0xff]  }
 0xa3a   :  { %3808 = vmatprep.subr.bf16.mxu1 %v14042_v63  ;;  %v14079_v63 = vld [vmem:[%s16395_s9 + $0x1ac] ss:$16 sps:$4 sm:$0xff]  }
 0xa3b   :  { %16636 = vst [vmem:[#allocation50_spill] sm:$0xff] %v14079_v63 }
 0xa3c   :  { %11497 = vset.pattern.permute.xlu1 %v16427_v1  ;;  %v14024_v1 = vld [vmem:[%s16395_s9 + $0x160] ss:$16 sps:$4 sm:$0xff]  }
 0xa3d   :  { %3216 = vperm.xlu1 %11497, %v13905_v42   ;;  %3725 = vmatpush1.bf16.msra.mxu0 %v14024_v1 }
 0xa3e   :  { %3726 = vmatprep.subr.bf16.mxu0 %v14037_v18  ;;  %3809 = vmatpush1.bf16.msra.mxu1 %v14054_v55  ;;  %v14089_v55 = vld [vmem:[%s16395_s9 + $0x1c4] ss:$16 sps:$4 sm:$0xff]  }
 0xa3f   :  { %3810 = vmatprep.subr.bf16.mxu1 %v14079_v63  ;;  %16637 = vst [vmem:[#allocation51_spill] sm:$0xff] %v14089_v55  ;;  %v14105_v63 = vld [vmem:[%s16395_s9 + $0x1c8] ss:$16 sps:$4 sm:$0xff]  }
 0xa40   :  { %16640 = vst [vmem:[#allocation54_spill] sm:$0xff] %v14105_v63 }
 0xa41   :  { %11498 = vset.pattern.permute.xlu1 %v16435_v7  ;;  %3727 = vmatpush1.bf16.msra.mxu0 %v14049_v13  ;;  %v14063_v7 = vld [vmem:[%s16395_s9 + $0x1a0] ss:$16 sps:$4 sm:$0xff]  }
 0xa42   :  { %3223 = vperm.xlu1 %11498, %v13905_v42   ;;  %3728 = vmatprep.subr.bf16.mxu0 %v14068_v2 }
 0xa43   :  { %3811 = vmatpush1.bf16.msra.mxu1 %v14074_v48  ;;  %v14115_v48 = vld [vmem:[%s16395_s9 + $0x1e4] ss:$16 sps:$4 sm:$0xff]  }
 0xa44   :  { %3812 = vmatprep.subr.bf16.mxu1 %v14094_v10  ;;  %16641 = vst [vmem:[#allocation55_spill] sm:$0xff] %v14115_v48  ;;  %v16645_v10 = vmov 1  }
 0xa45   :  { %3729 = vmatpush1.bf16.msra.mxu0 %v14063_v7 }
 0xa46   :  { %11499 = vset.pattern.permute.xlu1 %v16443_v34  ;;  %v14100_v34 = vld [vmem:[%s16395_s9 + $0x1c0] ss:$16 sps:$4 sm:$0xff]   ;;  %3730 = vmatprep.subr.bf16.mxu0 %v14089_v55 }
 0xa47   :  { %3230 = vperm.xlu1 %11499, %v13905_v42   ;;  %16639 = vst [vmem:[#allocation53_spill] sm:$0xff] %v14100_v34  ;;  %3813 = vmatpush1.bf16.msra.mxu1 %v14105_v63  ;;  %v14142_v63 = vld [vmem:[%s16395_s9 + $0x20c] ss:$16 sps:$4 sm:$0xff]  }
 0xa48   :  { %3814 = vmatprep.subr.bf16.mxu1 %v14120_v41  ;;  %16646 = vst [vmem:[#allocation59_spill] sm:$0xff] %v14142_v63  ;;  %v3781_v41 = vpop.f32.mrb[34].mxu1 }
 0xa49   :  { %3731 = vmatpush1.bf16.msra.mxu0 %v14100_v34  ;;  %v3782_v29 = vpop.f32.mrb[35].mxu1 }
 0xa4a   :  { %3732 = vmatprep.subr.bf16.mxu0 %v14115_v48 }
 0xa4b   :  { %11500 = vset.pattern.permute.xlu1 %v16449_v46  ;;  %v14126_v46 = vld [vmem:[%s16395_s9 + $0x1e0] ss:$16 sps:$4 sm:$0xff]  }
 0xa4c   :  { %3237 = vperm.xlu1 %11500, %v13905_v42   ;;  %16643 = vst [vmem:[#allocation57_spill] sm:$0xff] %v14126_v46  ;;  %v14131_v42 = vld [vmem:[%s16395_s9 + $0x1e8] ss:$16 sps:$4 sm:$0xff]  }
 0xa4d   :  { %16644 = vst [vmem:[#allocation58_spill] sm:$0xff] %v14131_v42  ;;  %3733 = vmatpush1.bf16.msra.mxu0 %v14126_v46  ;;  %3815 = vmatpush1.bf16.msra.mxu1 %v14131_v42 }
 0xa4e   :  { %10902 = vmatprep.subr.bf16.mxu0 %v13712_v12  ;;  %3825 = vmatprep.subr.bf16.mxu1 %v14142_v63  ;;  %v16650_v63 = vld [vmem:[#allocation16_spill] sm:$0xff] }
 0xa50   :  { %11501 = vset.pattern.permute.xlu1 %v16645_v10 }
 0xaad   :  { %v3196_v25 = vpop.permute.xlu1 %3195  ;;  %v3190_v9 = vpop.permute.xlu0 %3189 }
 0xaae   :  { %v3198_v51 = vmul.f32 %v3196_v25, %v16647_v27  ;;  %v3192_v47 = vmul.f32 %v3190_v9, %v16648_v4 }
 0xab0   :  { %v3199_v57 = vadd.f32 %v3198_v51, %v3192_v47  ;;  %v14160_v47 = vld [vmem:[%s16395_s9 + $0x208] ss:$16 sps:$4 sm:$0xff]  }
 0xab1   :  { %v11804_v51 = vld [vmem:[%s16397_s11 + $0x8] sm:$0xff]  }
 0xab2   :  { %v3203_v21 = vpop.permute.xlu1 %3202 }
 0xab3   :  { %v3205_v15 = vmul.f32 %v3203_v21, %v16649_v16 }
 0xab5   :  { %v3206_v3 = vadd.f32 %v3205_v15, %v3199_v57  ;;  %v11803_v57 = vld [vmem:[%s16397_s11] sm:$0xff]  }
 0xab7   :  { %v3210_v10 = vpop.permute.xlu1 %3209 }
 0xab8   :  { %v3212_v23 = vmul.f32 %v3210_v10, %v16650_v63  ;;  %v11808_v10 = vld [vmem:[%s16397_s11 + $0x28] sm:$0xff]  }
 0xaba   :  { %v3213_v41 = vadd.f32 %v3212_v23, %v3206_v3  ;;  %v14165_v23 = vld [vmem:[%s16395_s9 + $0x22c] ss:$16 sps:$4 sm:$0xff]   ;;  %v16651_v3 = vmov 0  }
 0xabc   :  { %v3217_v42 = vpop.permute.xlu1 %3216 }
 0xabd   :  { %v3219_v6 = vmul.f32 %v3217_v42, %v13479_v11 }
 0xabf   :  { %v3220_v48 = vadd.f32 %v3219_v6, %v3213_v41  ;;  %v16652_v6 = vmov 0.0|0.0  }
 0xac1   :  { %v3224_v14 = vpop.permute.xlu1 %3223 }
 0xac2   :  { %v3226_v29 = vmul.f32 %v3224_v14, %v13541_v20  ;;  %v14171_v14 = vld [vmem:[%s16395_s9 + $0x228] ss:$16 sps:$4 sm:$0xff]  }
 0xac4   :  { %v3227_v55 = vadd.f32 %v3226_v29, %v3220_v48  ;;  %v11810_v48 = vld [vmem:[%s16397_s11 + $0x38] sm:$0xff]  }
 0xac6   :  { %v3231_v46 = vpop.permute.xlu1 %3230 }
 0xac7   :  { %v3233_v34 = vmul.f32 %v3231_v46, %v13637_v60  ;;  %v11807_v46 = vld [vmem:[%s16397_s11 + $0x20] sm:$0xff]  }
 0xac9   :  { %v3234_v27 = vadd.f32 %v3233_v34, %v3227_v55  ;;  %v11809_v34 = vld [vmem:[%s16397_s11 + $0x30] sm:$0xff]   ;;  %v3317_v55 = vld [vmem:[%s16396_s10] sm:$0xf] }
 0xaca   :  { %v3322_v42 = vrot.slane %v3317_v55, %v16599_v32  ;;  %v3326_v41 = vrot.slane %v3317_v55, %v16600_v36 }
 0xacb   :  { %v3238_v25 = vpop.permute.xlu1 %3237 }
 0xacc   :  { %v3240_v9 = vmul.f32 %v3238_v25, %v13698_v56 }
 0xace   :  { %v3241_v21 = vadd.f32 %v3240_v9, %v3234_v27  ;;  %v11805_v27 = vld [vmem:[%s16397_s11 + $0x10] sm:$0xff]  }
 0xad0   :  { %v3242_v15 = vpack.c.bf16 %v3241_v21, %v3241_v21 }
 0xad2   :  { %3735 = vmatmul.mubr.bf16.vlgmr.msra.gmra.mrb[32].mxu0 %v3242_v15  ;;  %3817 = vmatmul.mubr.bf16.vlgmr.msra.gmra.mrb[36].mxu1 %v3242_v15 }
 0xad3   :  { %3826 = vmatpush1.bf16.msra.mxu1 %v14160_v47  ;;  %3857 = vmatprep.mubr.bf16.mxu1 %v16651_v3 }
 0xad4   :  { %3827 = vmatprep.subr.bf16.mxu1 %v14165_v23  ;;  %10903 = vmatpush3.bf16.msra.mxu0 %v11803_v57 }
 0xad5   :  { %10904 = vmatprep.subr.bf16.mxu0 %v13712_v12  ;;  %10918 = vmatprep.mubr.msk.bf16.mxu0 %vm12548_vm10, %v13712_v12 }
 0xad7   :  { %3828 = vmatpush1.bf16.msra.mxu1 %v14171_v14 }
 0xad8   :  { %11252 = vmatprep.subr.bf16.mxu1 %v16652_v6  ;;  %10905 = vmatpush3.bf16.msra.mxu0 %v11804_v51 }
 0xad9   :  { %10906 = vmatprep.subr.bf16.mxu0 %v13712_v12 }
 0xadc   :  { %10907 = vmatpush3.bf16.msra.mxu0 %v11805_v27 }
 0xadd   :  { %10908 = vmatprep.subr.bf16.mxu0 %v13712_v12 }
 0xade   :  { %10184 = vmatmul.mubr.msk.bf16.vlgmr.msra.gmra.mrb[36].mxu1 %vm329_vm0, %v13676_v19  ;;  %v11806_v19 = vld [vmem:[%s16397_s11 + $0x18] sm:$0xff]  }
 0xadf   :  { %10954 = vmatprep.mubr.msk.f32.mxu1 %vm12548_vm10, %v13712_v12 }
 0xae0   :  { %10909 = vmatpush3.bf16.msra.mxu0 %v11806_v19 }
 0xae1   :  { %10910 = vmatprep.subr.bf16.mxu0 %v13712_v12 }
 0xae4   :  { %10911 = vmatpush3.bf16.msra.mxu0 %v11807_v46  ;;  %v3334_v46 = vrot.slane %v3317_v55, %v12877_v54 }
 0xae5   :  { %10912 = vmatprep.subr.bf16.mxu0 %v13712_v12 }
 0xae8   :  { %10913 = vmatpush3.bf16.msra.mxu0 %v11808_v10  ;;  %v3330_v10 = vrot.slane %v3317_v55, %v12880_v0 }
 0xae9   :  { %10914 = vmatprep.subr.bf16.mxu0 %v13712_v12 }
 0xaec   :  { %10915 = vmatpush3.bf16.msra.mxu0 %v11809_v34 }
 0xaed   :  { %10916 = vmatprep.subr.bf16.mxu0 %v13712_v12 }
 0xaf0   :  { %10917 = vmatpush3.bf16.msra.mxu0 %v11810_v48 }
 0xaf1   :  { %4654 = vmatprep.subr.bf16.mxu0 %v13744_v8 }
 0xba5   :  { %v3736_v29 = vpop.f32.mrb[32].mxu0 }
 0xba6   :  { %v3737_v25 = vadd.f32 %v3736_v29, %v3322_v42  ;;  %v3738_v9 = vpop.f32.mrb[33].mxu0 }
 0xba7   :  { %v3739_v21 = vadd.f32 %v3738_v9, %v3326_v41  ;;  %v3740_v15 = vpop.f32.mrb[34].mxu0 }
 0xba8   :  { %v3778_v57 = vadd.f32 %v14145_v37, %v3737_v25  ;;  %v3741_v51 = vpop.f32.mrb[35].mxu0 }
 0xba9   :  { %v3780_v27 = vadd.f32 %v14147_v33, %v3739_v21 }
 0xbaa   :  { %v10185_v19 = vmul.f32 -1.442695, %v3778_v57 }
 0xbab   :  { %v10186_v8 = vmul.f32 -1.442695, %v3780_v27 }
 0xbac   :  { %12315 = vpow2.f32 %v10185_v19 }
 0xbad   :  { %12317 = vpow2.f32 %v10186_v8 }
 0xbb1   :  { %v3859_v34 = vpop.f32.mrb[36].mxu1 }
 0xbb2   :  { %v3861_v48 = vpop.f32.mrb[37].mxu1  ;;  %v11400_v29 = vadd.f32 %v3859_v34, %v3330_v10 }
 0xbb3   :  { %v11401_v36 = vadd.f32 %v3861_v48, %v3334_v46  ;;  %v3863_v42 = vpop.f32.mrb[38].mxu1 }
 0xbb4   :  { %v3864_v41 = vpop.f32.mrb[39].mxu1 }
 0xbb5   :  { %v10187_v9 = vmul.f32 -1.442695, %v11401_v36  ;;  %v4036_v41 = vld [vmem:[%s16391_s5 + $0x58] sm:$0xff] }
 0xbb6   :  { %v12316_v15 = vpop.eup %12315 }
 0xbb7   :  { %v12318_v37 = vpop.eup %12317  ;;  %v3869_v25 = vadd.f32 1.0, %v12316_v15  ;;  %12319 = vpow2.f32 %v10187_v9  ;;  %v4037_v15 = vld [vmem:[%s16391_s5 + $0x60] sm:$0xff] }
 0xbb8   :  { %v3875_v33 = vadd.f32 1.0, %v12318_v37  ;;  %12321 = vtanh.f32 %v11400_v29  ;;  %v4035_v29 = vld [vmem:[%s16391_s5 + $0x50] sm:$0xff]  ;;  %v4038_v37 = vld [vmem:[%s16391_s5 + $0x68] sm:$0xff] }
 0xbb9   :  { %12323 = vrcp.f32 %v3869_v25  ;;  %v14330_v9 = vpack.c.bf16 %v4036_v41, %v4035_v29  ;;  %v14340_v25 = vpack.c.bf16 %v4038_v37, %v4037_v15 }
 0xbba   :  { %12325 = vrcp.f32 %v3875_v33 }
 0xbc1   :  { %v12320_v21 = vpop.eup %12319 }
 0xbc2   :  { %v12322_v57 = vpop.eup %12321  ;;  %v3882_v19 = vadd.f32 1.0, %v12320_v21 }
 0xbc3   :  { %v12324_v51 = vpop.eup %12323 }
 0xbc4   :  { %v12326_v27 = vpop.eup %12325  ;;  %v3886_v55 = vmul.f32 %v12324_v51, %v12322_v57  ;;  %12327 = vrcp.f32 %v3882_v19  ;;  %v4039_v19 = vld [vmem:[%s16391_s5 + $0x70] sm:$0xff] }
 0xbc5   :  { %v3885_v8 = vmul.f32 %v12326_v27, %v13690_v49  ;;  %v16653_v49 = vld [vmem:[#allocation51_spill] sm:$0xff]  ;;  %v16658_v27 = vld [vmem:[#allocation20_spill] sm:$0xff] }
 0xbc7   :  { %v14225_v46 = vadd.f32 %v3886_v55, %v3885_v8  ;;  %v4040_v8 = vld [vmem:[%s16391_s5 + $0x78] sm:$0xff] }
 0xbc9   :  { %12329 = vtanh.f32 %v14225_v46 }
 0xbce   :  { %v12328_v36 = vpop.eup %12327 }
 0xbd3   :  { %v12330_v10 = vpop.eup %12329 }
 0xbd4   :  { %v14228_v34 = vmul.f32 %v12330_v10, %v12328_v36  ;;  %v14353_v36 = vpack.c.bf16 %v4040_v8, %v4039_v19  ;;  %v16659_v10 = vld [vmem:[#allocation15_spill] sm:$0xff]  ;;  %v16670_v19 = vld [vmem:[#allocation29_spill] sm:$0xff]  ;;  %v16671_v8 = vld [vmem:[#allocation30_spill] sm:$0xff] }
 0xbd6   :  { %v14232_v48 = vpack.c.bf16 %v14228_v34, %v14228_v34  ;;  %v4123_v55 = vmul.f32 %v16658_v27, %v14228_v34  ;;  %v16668_v27 = vld [vmem:[#allocation27_spill] sm:$0xff] }
 0xbd8   :  { %10919 = vmatmul.mubr.bf16.vlgmr.msra.gmra.mrb[36].mxu0 %v14232_v48 }
 0xbd9   :  { %4686 = vmatprep.mubr.bf16.mxu0 %v14232_v48  ;;  %4655 = vmatpush1.bf16.msra.mxu0 %v13739_v43  ;;  %v16654_v43 = vld [vmem:[#allocation53_spill] sm:$0xff] }
 0xbda   :  { %4656 = vmatprep.subr.bf16.mxu0 %v13759_v24  ;;  %v16655_v24 = vld [vmem:[#allocation55_spill] sm:$0xff] }
 0xbdd   :  { %4657 = vmatpush1.bf16.msra.mxu0 %v13772_v53  ;;  %v16656_v53 = vld [vmem:[#allocation57_spill] sm:$0xff] }
 0xbde   :  { %4658 = vmatprep.subr.bf16.mxu0 %v13784_v28 }
 0xbe1   :  { %4659 = vmatpush1.bf16.msra.mxu0 %v13796_v17 }
 0xbe2   :  { %4660 = vmatprep.subr.bf16.mxu0 %v13808_v22 }
 0xbe5   :  { %4661 = vmatpush1.bf16.msra.mxu0 %v13820_v26 }
 0xbe6   :  { %4662 = vmatprep.subr.bf16.mxu0 %v13832_v31 }
 0xbe9   :  { %4663 = vmatpush1.bf16.msra.mxu0 %v13844_v35  ;;  %v16657_v35 = vld [vmem:[#allocation21_spill] sm:$0xff] }
 0xbea   :  { %4664 = vmatprep.subr.bf16.mxu0 %v13856_v39 }
 0xbed   :  { %4665 = vmatpush1.bf16.msra.mxu0 %v13868_v44 }
 0xbee   :  { %4666 = vmatprep.subr.bf16.mxu0 %v13880_v50 }
 0xbf1   :  { %4667 = vmatpush1.bf16.msra.mxu0 %v13892_v30  ;;  %v4026_v30 = vld [vmem:[%s16391_s5 + $0x8] sm:$0xff] }
 0xbf2   :  { %4668 = vmatprep.subr.bf16.mxu0 %v13910_v45  ;;  %v4027_v45 = vld [vmem:[%s16391_s5 + $0x10] sm:$0xff] }
 0xbf5   :  { %4669 = vmatpush1.bf16.msra.mxu0 %v13920_v52 }
 0xbf6   :  { %4670 = vmatprep.subr.bf16.mxu0 %v13941_v61 }
 0xbf9   :  { %4671 = vmatpush1.bf16.msra.mxu0 %v13936_v59  ;;  %v4028_v59 = vld [vmem:[%s16391_s5 + $0x18] sm:$0xff] }
 0xbfa   :  { %4672 = vmatprep.subr.bf16.mxu0 %v13962_v5  ;;  %v14290_v61 = vpack.c.bf16 %v4028_v59, %v4027_v45 }
 0xbfd   :  { %4673 = vmatpush1.bf16.msra.mxu0 %v13972_v58  ;;  %v4032_v58 = vld [vmem:[%s16391_s5 + $0x38] sm:$0xff] }
 0xbfe   :  { %4674 = vmatprep.subr.bf16.mxu0 %v13987_v40  ;;  %v4034_v40 = vld [vmem:[%s16391_s5 + $0x48] sm:$0xff] }
 0xc01   :  { %4675 = vmatpush1.bf16.msra.mxu0 %v13998_v38  ;;  %v4033_v38 = vld [vmem:[%s16391_s5 + $0x40] sm:$0xff] }
 0xc02   :  { %4676 = vmatprep.subr.bf16.mxu0 %v14012_v62  ;;  %v14320_v42 = vpack.c.bf16 %v4034_v40, %v4033_v38  ;;  %v4120_v38 = vstv %s4119_s1  ;;  %s10649_s1 = sld [smem:[#allocation4 + $0x6]] }
 0xc05   :  { %4677 = vmatpush1.bf16.msra.mxu0 %v14024_v1 }
 0xc06   :  { %4678 = vmatprep.subr.bf16.mxu0 %v14037_v18  ;;  %v14271_v18 = vld [vmem:[%s16398_s12] ss:$0 sm:$0xff] }
 0xc08   :  { %p8872_p10 = scmp.gt.s32.totalorder %s10649_s1, 0 }
 0xc09   :  { %4679 = vmatpush1.bf16.msra.mxu0 %v14049_v13  ;;  %v4031_v13 = vld [vmem:[%s16391_s5 + $0x30] sm:$0xff] }
 0xc0a   :  { %4680 = vmatprep.subr.bf16.mxu0 %v14068_v2  ;;  %v4030_v2 = vld [vmem:[%s16391_s5 + $0x28] sm:$0xff]  ;;  %v14310_v62 = vpack.c.bf16 %v4032_v58, %v4031_v13  ;;  %v4117_v58 = vstv %s4114_s0  ;;  %s8873_s3 = scalar_select %p8872_p10, 1, 0 }
 0xc0b   :  { %v10200_v13 = vld [vmem:[%s16388_s2 + $0x8] sm:$0xff] }
 0xc0c   :  { %v4118_v40 = vmul.f32 %v10200_v13, %v4117_v58  ;;  %v16691_v13 = vld [vmem:[#allocation49_spill] sm:$0xff]  ;;  %v16692_v58 = vld [vmem:[#allocation52_spill] sm:$0xff]  ;;  %s8874_s17 = scvt.s32.f32 %s8873_s3 }
 0xc0d   :  { %4681 = vmatpush1.bf16.msra.mxu0 %v14063_v7  ;;  %v4029_v7 = vld [vmem:[%s16391_s5 + $0x20] sm:$0xff] }
 0xc0e   :  { %4682 = vmatprep.subr.bf16.mxu0 %v16653_v49  ;;  %v14300_v5 = vpack.c.bf16 %v4030_v2, %v4029_v7  ;;  %s8879_s18 = ssub.f32 1.0, %s8874_s17 }
 0xc11   :  { %4683 = vmatpush1.bf16.msra.mxu0 %v16654_v43 }
 0xc12   :  { %4684 = vmatprep.subr.bf16.mxu0 %v16655_v24 }
 0xc15   :  { %4685 = vmatpush1.bf16.msra.mxu0 %v16656_v53 }
 0xc16   :  { %10957 = vmatprep.subr.bf16.mxu0 %v13712_v12  ;;  %v4025_v12 = vld [vmem:[%s16391_s5] sm:$0xff] }
 0xc17   :  { %v14284_v52 = vpack.c.bf16 %v4026_v30, %v4025_v12  ;;  %v16664_v12 = vld [vmem:[#allocation24_spill] sm:$0xff] }
 0xc19   :  { %11254 = vmatpush3.bf16.msra.mxu1 %v14284_v52 }
 0xc1a   :  { %11255 = vmatprep.subr.bf16.mxu1 %v16652_v6 }
 0xc1d   :  { %11257 = vmatpush3.bf16.msra.mxu1 %v14290_v61 }
 0xc1e   :  { %11258 = vmatprep.subr.bf16.mxu1 %v16652_v6 }
 0xc21   :  { %11260 = vmatpush3.bf16.msra.mxu1 %v14300_v5 }
 0xc22   :  { %11261 = vmatprep.subr.bf16.mxu1 %v16652_v6 }
 0xc25   :  { %11263 = vmatpush3.bf16.msra.mxu1 %v14310_v62 }
 0xc26   :  { %11264 = vmatprep.subr.bf16.mxu1 %v16652_v6 }
 0xc29   :  { %11266 = vmatpush3.bf16.msra.mxu1 %v14320_v42 }
 0xc2a   :  { %11267 = vmatprep.subr.bf16.mxu1 %v16652_v6 }
 0xc2d   :  { %11269 = vmatpush3.bf16.msra.mxu1 %v14330_v9 }
 0xc2e   :  { %11270 = vmatprep.subr.bf16.mxu1 %v16652_v6 }
 0xc31   :  { %11272 = vmatpush3.bf16.msra.mxu1 %v14340_v25 }
 0xc32   :  { %11273 = vmatprep.subr.bf16.mxu1 %v16652_v6 }
 0xc35   :  { %11275 = vmatpush3.bf16.msra.mxu1 %v14353_v36 }
 0xc36   :  { %4695 = vmatprep.subr.bf16.mxu1 %v16659_v10  ;;  %v16672_v10 = vld [vmem:[#allocation31_spill] sm:$0xff] }
 0xcab   :  { %v3996_v1 = vpop.f32.mrb[36].mxu0 }
 0xcac   :  { %v3997_v28 = vadd.f32 %v14271_v18, %v3996_v1  ;;  %v10920_v17 = vpop.f32.mrb[37].mxu0 }
 0xcad   :  { %v3999_v22 = vpop.f32.mrb[38].mxu0 }
 0xcae   :  { %4003 = vst [vmem:[#allocation7 + $0x8] sm:$0xff] %v3997_v28  ;;  %4004 = vmax.xlane.f32.xlu1 %v3997_v28  ;;  %v10921_v26 = vpop.f32.mrb[39].mxu0  ;;  %v16480_v22 = vmov 1.0  }
 0xd3b   :  { %v4005_v31 = vpop.xlane.xlu1 %4004 }
 0xd3c   :  { %vm4006_vm11 = vcmp.eq.f32.partialorder %v3997_v28, %v4005_v31  ;;  %v16660_v28 = vld [vmem:[#allocation22_spill] sm:$0xff]  ;;  %v16661_v31 = vld [vmem:[#allocation17_spill] sm:$0xff] }
 0xd3d   :  { %v4007_v39 = vsel %vm4006_vm11, %v16657_v35, 128 }
 0xd3e   :  { %v4009_v44 = vshra.s32 %v4007_v39, 16  ;;  %v4008_v33 = vand.u32 65535, %v4007_v39  ;;  %v16662_v39 = vld [vmem:[#allocation18_spill] sm:$0xff] }
 0xd40   :  { %v4011_v50 = vcvt.s32.f32 %v4009_v44  ;;  %v4010_v57 = vcvt.s32.f32 %v4008_v33 }
 0xd42   :  { %4012 = vmin.xlane.f32.xlu0 %v4011_v50 }
 0xdcf   :  { %v4013_v21 = vpop.xlane.xlu0 %4012 }
 0xdd0   :  { %vm4014_vm12 = vcmp.eq.f32.partialorder %v4011_v50, %v4013_v21  ;;  %v4019_v49 = vcvt.f32.s32 %v4013_v21  ;;  %v16663_v50 = vld [vmem:[#allocation19_spill] sm:$0xff] }
 0xdd1   :  { %v4015_v51 = vsel %vm4014_vm12, %v4010_v57, inf  ;;  %v16665_v21 = vld [vmem:[#allocation23_spill] sm:$0xff]  ;;  %v16666_v57 = vld [vmem:[#allocation25_spill] sm:$0xff] }
 0xdd2   :  { %4016 = vmin.xlane.f32.xlu1 %v4015_v51  ;;  %v4020_v24 = vshll.u32 %v4019_v49, 16  ;;  %v16667_v51 = vld [vmem:[#allocation26_spill] sm:$0xff]  ;;  %v16673_v49 = vld [vmem:[#allocation32_spill] sm:$0xff] }
 0xdd6   :  { %4124 = vadd.xlane.f32.xlu1 %v4123_v55  ;;  %v16669_v55 = vld [vmem:[#allocation28_spill] sm:$0xff] }
 0xe5f   :  { %v4017_v43 = vpop.xlane.xlu1 %4016 }
 0xe60   :  { %v4018_v53 = vcvt.f32.s32 %v4017_v43  ;;  %v16674_v43 = vld [vmem:[#allocation33_spill] sm:$0xff] }
 0xe62   :  { %v4021_v34 = vadd.s32 %v4020_v24, %v4018_v53  ;;  %v16676_v24 = vld [vmem:[#allocation35_spill] sm:$0xff]  ;;  %v16677_v53 = vld [vmem:[#allocation36_spill] sm:$0xff] }
 0xe63   :  { %v4125_v1 = vpop.xlane.xlu1 %4124 }
 0xe64   :  { %v4126_v17 = vadd.f32 %v4125_v1, %v16660_v28  ;;  %vm4022_vm13 = vcmp.eq.s32.totalorder %v16657_v35, %v4021_v34  ;;  %v16678_v34 = vld [vmem:[#allocation37_spill] sm:$0xff]  ;;  %v16679_v1 = vld [vmem:[#allocation38_spill] sm:$0xff] }
 0xe65   :  { %10955 = vmatmul.mubr.msk.f32.vlgmr.msra.gmra.mrb[40].mxu1 %vm4022_vm13, %v16480_v22 }
 0xe66   :  { %v4127_v26 = vmax.f32 %v4126_v17, 0.0  ;;  %4696 = vmatpush1.bf16.msra.mxu1 %v16661_v31  ;;  %4727 = vmatprep.mubr.bf16.mxu1 %v16651_v3  ;;  %v16680_v17 = vld [vmem:[#allocation40_spill] sm:$0xff]  ;;  %v16682_v31 = vld [vmem:[#allocation41_spill] sm:$0xff] }
 0xe67   :  { %4697 = vmatprep.subr.bf16.mxu1 %v16662_v39  ;;  %v16683_v39 = vld [vmem:[#allocation42_spill] sm:$0xff] }
 0xe68   :  { %v4128_v44 = vsel %vm3174_vm9, %v4127_v26, -inf }
 0xe69   :  { %4129 = vmax.xlane.f32.xlu0 %v4128_v44  ;;  %v16684_v44 = vld [vmem:[#allocation43_spill] sm:$0xff] }
 0xe6a   :  { %4698 = vmatpush1.bf16.msra.mxu1 %v16663_v50  ;;  %v16685_v50 = vld [vmem:[#allocation44_spill] sm:$0xff] }
 0xe6b   :  { %4736 = vmatprep.subr.bf16.mxu1 %v16664_v12  ;;  %v16686_v12 = vld [vmem:[#allocation45_spill] sm:$0xff] }
 0xef6   :  { %v4130_v30 = vpop.xlane.xlu0 %4129 }
 0xef7   :  { %v4131_v45 = vsub.f32 %v4127_v26, %v4130_v30  ;;  %v16681_v26 = vld [vmem:[#allocation39_spill] sm:$0xff]  ;;  %v16687_v30 = vld [vmem:[#allocation46_spill] sm:$0xff] }
 0xef9   :  { %v4132_v59 = vmul.f32 1.442695, %v4131_v45  ;;  %v16688_v45 = vld [vmem:[#allocation47_spill] sm:$0xff] }
 0xefb   :  { %12331 = vpow2.f32 %v4132_v59  ;;  %v16689_v59 = vld [vmem:[#allocation48_spill] sm:$0xff] }
 0xf05   :  { %v12332_v7 = vpop.eup %12331 }
 0xf06   :  { %v4134_v2 = vsel %vm3174_vm9, %v12332_v7, 0.0 }
 0xf07   :  { %4135 = vadd.xlane.f32.xlu1 %v4134_v2  ;;  %v16690_v2 = vld [vmem:[#allocation50_spill] sm:$0xff] }
 0xf38   :  { %v4107_v29 = vpop.f32.mrb[40].mxu1 }
 0xf39   :  { %v4121_v41 = vmul.f32 %v4120_v38, %v4107_v29  ;;  %v10956_v15 = vpop.f32.mrb[41].mxu1  ;;  %v16693_v38 = vld [vmem:[#allocation54_spill] sm:$0xff] }
 0xf3a   :  { %v16695_v29 = vld [vmem:[#allocation58_spill] sm:$0xff] }
 0xf3b   :  { %v4122_v37 = vadd.f32 %v4121_v41, %v4118_v40  ;;  %v16694_v40 = vld [vmem:[#allocation56_spill] sm:$0xff]  ;;  %v16696_v41 = vld [vmem:[#allocation59_spill] sm:$0xff] }
 0xf3d   :  { %v14370_v33 = vpack.c.bf16 %v4122_v37, %v4122_v37 }
 0xf3f   :  { %10273 = vmatmul.mubr.msk.bf16.vlgmr.msra.gmra.mrb[44].mxu1 %vm329_vm0, %v14370_v33 }
 0xf40   :  { %4768 = vmatprep.mubr.bf16.mxu1 %v14232_v48  ;;  %4737 = vmatpush1.bf16.msra.mxu1 %v16665_v21  ;;  %v16675_v48 = vld [vmem:[#allocation34_spill] sm:$0xff] }
 0xf41   :  { %4738 = vmatprep.subr.bf16.mxu1 %v16666_v57  ;;  %v16697_v57 = vmov 2  }
 0xf44   :  { %4739 = vmatpush1.bf16.msra.mxu1 %v16667_v51  ;;  %v16698_v51 = vmov 3  }
 0xf45   :  { %4740 = vmatprep.subr.bf16.mxu1 %v16668_v27  ;;  %v16699_v27 = vmov 4  }
 0xf48   :  { %4741 = vmatpush1.bf16.msra.mxu1 %v16669_v55  ;;  %v16700_v55 = vmov 6  }
 0xf49   :  { %4742 = vmatprep.subr.bf16.mxu1 %v16670_v19  ;;  %v16701_v19 = vmov 5  }
 0xf4c   :  { %4743 = vmatpush1.bf16.msra.mxu1 %v16671_v8  ;;  %v16703_v8 = vmov 1  }
 0xf4d   :  { %4744 = vmatprep.subr.bf16.mxu1 %v16672_v10 }
 0xf50   :  { %4745 = vmatpush1.bf16.msra.mxu1 %v16673_v49 }
 0xf51   :  { %4746 = vmatprep.subr.bf16.mxu1 %v16674_v43 }
 0xf54   :  { %4747 = vmatpush1.bf16.msra.mxu1 %v16675_v48 }
 0xf55   :  { %4748 = vmatprep.subr.bf16.mxu1 %v16676_v24 }
 0xf58   :  { %4749 = vmatpush1.bf16.msra.mxu1 %v16677_v53 }
 0xf59   :  { %4750 = vmatprep.subr.bf16.mxu1 %v16678_v34  ;;  %v16704_v34 = vld [vmem:[#allocation13_spill] sm:$0xff] }
 0xf5c   :  { %4751 = vmatpush1.bf16.msra.mxu1 %v16679_v1 }
 0xf5d   :  { %4752 = vmatprep.subr.bf16.mxu1 %v16680_v17 }
 0xf60   :  { %4753 = vmatpush1.bf16.msra.mxu1 %v16681_v26 }
 0xf61   :  { %4754 = vmatprep.subr.bf16.mxu1 %v16682_v31 }
 0xf64   :  { %4755 = vmatpush1.bf16.msra.mxu1 %v16683_v39 }
 0xf65   :  { %4756 = vmatprep.subr.bf16.mxu1 %v16684_v44 }
 0xf68   :  { %4757 = vmatpush1.bf16.msra.mxu1 %v16685_v50 }
 0xf69   :  { %4758 = vmatprep.subr.bf16.mxu1 %v16686_v12 }
 0xf6c   :  { %4759 = vmatpush1.bf16.msra.mxu1 %v16687_v30 }
 0xf6d   :  { %4760 = vmatprep.subr.bf16.mxu1 %v16688_v45 }
 0xf70   :  { %4761 = vmatpush1.bf16.msra.mxu1 %v16689_v59 }
 0xf71   :  { %4762 = vmatprep.subr.bf16.mxu1 %v16690_v2 }
 0xf74   :  { %4763 = vmatpush1.bf16.msra.mxu1 %v16691_v13 }
 0xf75   :  { %4764 = vmatprep.subr.bf16.mxu1 %v16692_v58 }
 0xf78   :  { %4765 = vmatpush1.bf16.msra.mxu1 %v16693_v38 }
 0xf79   :  { %4766 = vmatprep.subr.bf16.mxu1 %v16694_v40 }
 0xf7c   :  { %4767 = vmatpush1.bf16.msra.mxu1 %v16695_v29 }
 0xf7d   :  { %4777 = vmatprep.subr.bf16.mxu1 %v16696_v41 }
 0xf94   :  { %v4136_v15 = vpop.xlane.xlu1 %4135 }
 0xf95   :  { %12333 = vrcp.f32 %v4136_v15 }
 0xf9f   :  { %v12334_v37 = vpop.eup %12333 }
 0xfa0   :  { %v4138_v21 = vmul.f32 %v12334_v37, %v12332_v7  ;;  %v16702_v7 = vmov 7  }
 0xfa2   :  { %4148 = vperm.xlu1 %11501, %v4138_v21   ;;  %4142 = vperm.xlu0 %11493, %v4138_v21  }
 0xfa6   :  { %11502 = vset.pattern.permute.xlu1 %v16697_v57  ;;  %11503 = vset.pattern.permute.xlu0 %v16698_v51 }
 0xfa7   :  { %4155 = vperm.xlu1 %11502, %v4138_v21   ;;  %4162 = vperm.xlu0 %11503, %v4138_v21  }
 0xfab   :  { %11504 = vset.pattern.permute.xlu1 %v16699_v27  ;;  %11506 = vset.pattern.permute.xlu0 %v16700_v55 }
 0xfac   :  { %4169 = vperm.xlu1 %11504, %v4138_v21   ;;  %4183 = vperm.xlu0 %11506, %v4138_v21  }
 0xfb0   :  { %11505 = vset.pattern.permute.xlu1 %v16701_v19  ;;  %11508 = vset.pattern.permute.xlu0 %v16651_v3 }
 0xfb1   :  { %4176 = vperm.xlu1 %11505, %v4138_v21  }
 0xfb5   :  { %11507 = vset.pattern.permute.xlu1 %v16702_v7 }
 0xfb6   :  { %4190 = vperm.xlu1 %11507, %v4138_v21  }
 0xfba   :  { %11509 = vset.pattern.permute.xlu1 %v16703_v8 }
0x1012   :  { %v14415_v10 = vpop.f32.mrb[44].mxu1 }
0x1013   :  { %v14417_v49 = vpop.f32.mrb[45].mxu1 }
0x1014   :  { %v4733_v43 = vpop.f32.mrb[46].mxu1 }
0x1015   :  { %v4734_v48 = vpop.f32.mrb[47].mxu1 }
0x1016   :  { %v14430_v48 = vld [vmem:[#allocation7] sm:$0xff] }
0x1021   :  { %v4149_v24 = vpop.permute.xlu1 %4148  ;;  %v4143_v53 = vpop.permute.xlu0 %4142 }
0x1022   :  { %v4151_v1 = vmul.f32 %v4149_v24, %v16704_v34  ;;  %v4145_v17 = vmul.f32 %v4143_v53, %v16648_v4 }
0x1024   :  { %v4152_v31 = vadd.f32 %v4151_v1, %v4145_v17 }
0x1026   :  { %v4156_v26 = vpop.permute.xlu1 %4155  ;;  %v4163_v44 = vpop.permute.xlu0 %4162 }
0x1027   :  { %v4158_v39 = vmul.f32 %v4156_v26, %v16649_v16  ;;  %v4165_v12 = vmul.f32 %v4163_v44, %v16650_v63 }
0x1029   :  { %v4159_v50 = vadd.f32 %v4158_v39, %v4152_v31 }
0x102b   :  { %v4170_v30 = vpop.permute.xlu1 %4169  ;;  %v4166_v45 = vadd.f32 %v4165_v12, %v4159_v50  ;;  %v4184_v2 = vpop.permute.xlu0 %4183 }
0x102c   :  { %v4172_v59 = vmul.f32 %v4170_v30, %v13479_v11  ;;  %v4186_v40 = vmul.f32 %v4184_v2, %v13637_v60 }
0x102e   :  { %v4173_v58 = vadd.f32 %v4172_v59, %v4166_v45 }
0x1030   :  { %v4177_v13 = vpop.permute.xlu1 %4176 }
0x1031   :  { %v4179_v38 = vmul.f32 %v4177_v13, %v13541_v20 }
0x1033   :  { %v4180_v29 = vadd.f32 %v4179_v38, %v4173_v58 }
0x1035   :  { %v4191_v41 = vpop.permute.xlu1 %4190  ;;  %v4187_v15 = vadd.f32 %v4186_v40, %v4180_v29 }
0x1036   :  { %v4193_v37 = vmul.f32 %v4191_v41, %v13698_v56 }
0x1038   :  { %v4194_v21 = vadd.f32 %v4193_v37, %v4187_v15 }
0x103a   :  { %v4195_v43 = vpack.c.bf16 %v4194_v21, %v4194_v21 }
0x103c   :  { %4687 = vmatmul.mubr.bf16.vlgmr.msra.gmra.mrb[40].mxu0 %v4195_v43  ;;  %4769 = vmatmul.mubr.bf16.vlgmr.msra.gmra.mrb[48].mxu1 %v4195_v43 }
0x103d   :  { %4778 = vmatpush1.bf16.msra.mxu1 %v14160_v47  ;;  %4809 = vmatprep.mubr.bf16.mxu1 %v16651_v3  ;;  %v11811_v47 = vld [vmem:[%s16397_s11] sm:$0xff]  }
0x103e   :  { %4779 = vmatprep.subr.bf16.mxu1 %v14165_v23  ;;  %10973 = vmatprep.mubr.msk.bf16.mxu0 %vm12548_vm10, %v14430_v48  ;;  %v11812_v23 = vld [vmem:[%s16397_s11 + $0x8] sm:$0xff]  }
0x103f   :  { %10958 = vmatpush3.bf16.msra.mxu0 %v11811_v47 }
0x1040   :  { %10959 = vmatprep.subr.bf16.mxu0 %v14430_v48 }
0x1041   :  { %4780 = vmatpush1.bf16.msra.mxu1 %v14171_v14  ;;  %v11813_v14 = vld [vmem:[%s16397_s11 + $0x10] sm:$0xff]  }
0x1042   :  { %11276 = vmatprep.subr.bf16.mxu1 %v16652_v6 }
0x1043   :  { %10960 = vmatpush3.bf16.msra.mxu0 %v11812_v23 }
0x1044   :  { %10961 = vmatprep.subr.bf16.mxu0 %v14430_v48 }
0x1047   :  { %10962 = vmatpush3.bf16.msra.mxu0 %v11813_v14 }
0x1048   :  { %10274 = vmatmul.mubr.msk.bf16.vlgmr.msra.gmra.mrb[48].mxu1 %vm329_vm0, %v14370_v33  ;;  %10963 = vmatprep.subr.bf16.mxu0 %v14430_v48 }
0x1049   :  { %11278 = vmatpush3.bf16.msra.mxu1 %v14284_v52  ;;  %11009 = vmatprep.mubr.msk.f32.mxu1 %vm12548_vm10, %v14430_v48  ;;  %v11814_v52 = vld [vmem:[%s16397_s11 + $0x18] sm:$0xff]  }
0x104a   :  { %11279 = vmatprep.subr.bf16.mxu1 %v16652_v6 }
0x104b   :  { %10964 = vmatpush3.bf16.msra.mxu0 %v11814_v52 }
0x104c   :  { %10965 = vmatprep.subr.bf16.mxu0 %v14430_v48 }
0x104d   :  { %11281 = vmatpush3.bf16.msra.mxu1 %v14290_v61  ;;  %v11815_v61 = vld [vmem:[%s16397_s11 + $0x20] sm:$0xff]  }
0x104e   :  { %11282 = vmatprep.subr.bf16.mxu1 %v16652_v6 }
0x104f   :  { %10966 = vmatpush3.bf16.msra.mxu0 %v11815_v61 }
0x1050   :  { %10967 = vmatprep.subr.bf16.mxu0 %v14430_v48 }
0x1051   :  { %11284 = vmatpush3.bf16.msra.mxu1 %v14300_v5  ;;  %v11816_v5 = vld [vmem:[%s16397_s11 + $0x28] sm:$0xff]  }
0x1052   :  { %11285 = vmatprep.subr.bf16.mxu1 %v16652_v6 }
0x1053   :  { %10968 = vmatpush3.bf16.msra.mxu0 %v11816_v5 }
0x1054   :  { %10969 = vmatprep.subr.bf16.mxu0 %v14430_v48 }
0x1055   :  { %11287 = vmatpush3.bf16.msra.mxu1 %v14310_v62  ;;  %v11817_v62 = vld [vmem:[%s16397_s11 + $0x30] sm:$0xff]  }
0x1056   :  { %11288 = vmatprep.subr.bf16.mxu1 %v16652_v6 }
0x1057   :  { %10970 = vmatpush3.bf16.msra.mxu0 %v11817_v62 }
0x1058   :  { %10971 = vmatprep.subr.bf16.mxu0 %v14430_v48 }
0x1059   :  { %11290 = vmatpush3.bf16.msra.mxu1 %v14320_v42  ;;  %v11818_v42 = vld [vmem:[%s16397_s11 + $0x38] sm:$0xff]  }
0x105a   :  { %11291 = vmatprep.subr.bf16.mxu1 %v16652_v6 }
0x105b   :  { %10972 = vmatpush3.bf16.msra.mxu0 %v11818_v42 }
0x105d   :  { %11293 = vmatpush3.bf16.msra.mxu1 %v14330_v9  ;;  %v4269_v9 = vld [vmem:[%s16396_s10] sm:$0xf] }
0x105e   :  { %11294 = vmatprep.subr.bf16.mxu1 %v16652_v6  ;;  %v4286_v30 = vrot.slane %v4269_v9, %v12877_v54  ;;  %v4282_v45 = vrot.slane %v4269_v9, %v12880_v0 }
0x1061   :  { %11296 = vmatpush3.bf16.msra.mxu1 %v14340_v25  ;;  %v4274_v25 = vrot.slane %v4269_v9, %v16599_v32 }
0x1062   :  { %11297 = vmatprep.subr.bf16.mxu1 %v16652_v6 }
0x1065   :  { %11299 = vmatpush3.bf16.msra.mxu1 %v14353_v36  ;;  %v16705_v36 = vld [vmem:[#allocation11_spill] sm:$0xff] }
0x1066   :  { %v4278_v33 = vrot.slane %v4269_v9, %v16705_v36 }
0x110f   :  { %v4688_v24 = vpop.f32.mrb[40].mxu0 }
0x1110   :  { %v4689_v53 = vadd.f32 %v4688_v24, %v4274_v25  ;;  %v4690_v1 = vpop.f32.mrb[41].mxu0 }
0x1111   :  { %v4691_v17 = vadd.f32 %v4690_v1, %v4278_v33  ;;  %v4692_v26 = vpop.f32.mrb[42].mxu0 }
0x1112   :  { %v4730_v31 = vadd.f32 %v14415_v10, %v4689_v53  ;;  %v4693_v39 = vpop.f32.mrb[43].mxu0 }
0x1113   :  { %v4732_v44 = vadd.f32 %v14417_v49, %v4691_v17  ;;  %v14504_v39 = vld [vmem:[%s16392_s6] ss:$0 sm:$0xff] }
0x1114   :  { %v10275_v50 = vmul.f32 -1.442695, %v4730_v31  ;;  %16706 = vst [vmem:[#allocation16_spill] sm:$0xff] %v14504_v39 }
0x1115   :  { %v10276_v12 = vmul.f32 -1.442695, %v4732_v44 }
0x1116   :  { %12335 = vpow2.f32 %v10275_v50 }
0x1117   :  { %12337 = vpow2.f32 %v10276_v12 }
0x111b   :  { %v4811_v59 = vpop.f32.mrb[48].mxu1 }
0x111c   :  { %v4813_v2 = vpop.f32.mrb[49].mxu1  ;;  %v11406_v38 = vadd.f32 %v4811_v59, %v4282_v45 }
0x111d   :  { %v11407_v13 = vadd.f32 %v4813_v2, %v4286_v30  ;;  %v4815_v58 = vpop.f32.mrb[50].mxu1 }
0x111e   :  { %v4816_v40 = vpop.f32.mrb[51].mxu1 }
0x111f   :  { %v10277_v29 = vmul.f32 -1.442695, %v11407_v13 }
0x1120   :  { %v12336_v41 = vpop.eup %12335 }
0x1121   :  { %v12338_v10 = vpop.eup %12337  ;;  %v4821_v15 = vadd.f32 1.0, %v12336_v41  ;;  %12339 = vpow2.f32 %v10277_v29 }
0x1122   :  { %v4827_v49 = vadd.f32 1.0, %v12338_v10  ;;  %12341 = vtanh.f32 %v11406_v38 }
0x1123   :  { %12343 = vrcp.f32 %v4821_v15 }
0x1124   :  { %12345 = vrcp.f32 %v4827_v49 }
0x112b   :  { %v12340_v37 = vpop.eup %12339 }
0x112c   :  { %v12342_v21 = vpop.eup %12341  ;;  %v4834_v14 = vadd.f32 1.0, %v12340_v37 }
0x112d   :  { %v12344_v43 = vpop.eup %12343 }
0x112e   :  { %v12346_v47 = vpop.eup %12345  ;;  %v4838_v23 = vmul.f32 %v12344_v43, %v12342_v21  ;;  %12347 = vrcp.f32 %v4834_v14  ;;  %v14518_v43 = vld [vmem:[%s16395_s9] ss:$16 sps:$4 sm:$0xff]   ;;  %v14533_v14 = vld [vmem:[%s16395_s9 + $0xc] ss:$16 sps:$4 sm:$0xff]  }
0x112f   :  { %v4837_v52 = vmul.f32 %v12346_v47, %v14225_v46  ;;  %v14523_v47 = vld [vmem:[%s16395_s9 + $0x4] ss:$16 sps:$4 sm:$0xff]   ;;  %16708 = vst [vmem:[#allocation53_spill] sm:$0xff] %v14533_v14  ;;  %5688 = vmatprep.subr.bf16.mxu1 %v14533_v14 }
0x1130   :  { %5606 = vmatprep.subr.bf16.mxu0 %v14523_v47 }
0x1131   :  { %v14496_v61 = vadd.f32 %v4838_v23, %v4837_v52  ;;  %v14528_v23 = vld [vmem:[%s16395_s9 + $0x8] ss:$16 sps:$4 sm:$0xff]   ;;  %v14538_v52 = vld [vmem:[%s16395_s9 + $0x24] ss:$16 sps:$4 sm:$0xff]  }
0x1132   :  { %16707 = vst [vmem:[#allocation51_spill] sm:$0xff] %v14528_v23 }
0x1133   :  { %12349 = vtanh.f32 %v14496_v61 }
0x1138   :  { %v12348_v5 = vpop.eup %12347 }
0x113d   :  { %v12350_v62 = vpop.eup %12349 }
0x113e   :  { %v4841_v42 = vmul.f32 %v12350_v62, %v12348_v5  ;;  %v14544_v5 = vld [vmem:[%s16395_s9 + $0x2c] ss:$16 sps:$4 sm:$0xff]   ;;  %v14551_v62 = vld [vmem:[%s16395_s9 + $0x20] ss:$16 sps:$4 sm:$0xff]  }
0x113f   :  { %16709 = vst [vmem:[#allocation55_spill] sm:$0xff] %v14544_v5 }
0x1140   :  { %v4842_v9 = vpack.c.bf16 %v4841_v42, %v4841_v42  ;;  %v5075_v44 = vmul.f32 %v14504_v39, %v4841_v42  ;;  %v14558_v42 = vld [vmem:[%s16395_s9 + $0x28] ss:$16 sps:$4 sm:$0xff]  }
0x1141   :  { %16710 = vst [vmem:[#allocation57_spill] sm:$0xff] %v14558_v42 }
0x1142   :  { %10974 = vmatmul.mubr.bf16.vlgmr.msra.gmra.mrb[44].mxu0 %v4842_v9 }
0x1143   :  { %5638 = vmatprep.mubr.bf16.mxu0 %v4842_v9  ;;  %5607 = vmatpush1.bf16.msra.mxu0 %v14518_v43 }
0x1144   :  { %5608 = vmatprep.subr.bf16.mxu0 %v14538_v52 }
0x1147   :  { %5609 = vmatpush1.bf16.msra.mxu0 %v14551_v62 }
0x1215   :  { %v4948_v25 = vpop.f32.mrb[44].mxu0 }
0x1216   :  { %v4949_v33 = vadd.f32 %v14271_v18, %v4948_v25  ;;  %v10975_v24 = vpop.f32.mrb[45].mxu0  ;;  %v14569_v25 = vld [vmem:[%s16395_s9 + $0x4c] ss:$16 sps:$4 sm:$0xff]  }
0x1217   :  { %v4951_v53 = vpop.f32.mrb[46].mxu0  ;;  %16711 = vst [vmem:[#allocation20_spill] sm:$0xff] %v14569_v25  ;;  %v14582_v24 = vld [vmem:[%s16395_s9 + $0x48] ss:$16 sps:$4 sm:$0xff]  }
0x1218   :  { %4955 = vst [vmem:[#allocation7 + $0x10] sm:$0xff] %v4949_v33  ;;  %4956 = vmax.xlane.f32.xlu1 %v4949_v33  ;;  %v10976_v1 = vpop.f32.mrb[47].mxu0  ;;  %16712 = vst [vmem:[#allocation15_spill] sm:$0xff] %v14582_v24  ;;  %v14587_v53 = vld [vmem:[%s16395_s9 + $0x64] ss:$16 sps:$4 sm:$0xff]  }
0x1219   :  { %v14593_v1 = vld [vmem:[%s16395_s9 + $0x6c] ss:$16 sps:$4 sm:$0xff]  }
0x121a   :  { %16713 = vst [vmem:[#allocation17_spill] sm:$0xff] %v14593_v1 }
0x12a5   :  { %v4957_v46 = vpop.xlane.xlu1 %4956 }
0x12a6   :  { %vm4958_vm14 = vcmp.eq.f32.partialorder %v4949_v33, %v4957_v46  ;;  %v14575_v33 = vld [vmem:[%s16395_s9 + $0x40] ss:$16 sps:$4 sm:$0xff]  }
0x12a7   :  { %v4959_v17 = vsel %vm4958_vm14, %v16657_v35, 128  ;;  %v14599_v46 = vld [vmem:[%s16395_s9 + $0x60] ss:$16 sps:$4 sm:$0xff]  }
0x12a8   :  { %v4961_v26 = vshra.s32 %v4959_v17, 16  ;;  %v4960_v18 = vand.u32 65535, %v4959_v17  ;;  %v14606_v17 = vld [vmem:[%s16395_s9 + $0x68] ss:$16 sps:$4 sm:$0xff]  }
0x12a9   :  { %16714 = vst [vmem:[#allocation18_spill] sm:$0xff] %v14606_v17 }
0x12aa   :  { %v4963_v31 = vcvt.s32.f32 %v4961_v26  ;;  %v4962_v12 = vcvt.s32.f32 %v4960_v18  ;;  %v14611_v26 = vld [vmem:[%s16395_s9 + $0x84] ss:$16 sps:$4 sm:$0xff]   ;;  %v14630_v18 = vld [vmem:[%s16395_s9 + $0x88] ss:$16 sps:$4 sm:$0xff]  }
0x12ab   :  { %16716 = vst [vmem:[#allocation24_spill] sm:$0xff] %v14630_v18 }
0x12ac   :  { %4964 = vmin.xlane.f32.xlu0 %v4963_v31 }
0x12b0   :  { %5076 = vadd.xlane.f32.xlu0 %v5075_v44  ;;  %v14623_v44 = vld [vmem:[%s16395_s9 + $0x80] ss:$16 sps:$4 sm:$0xff]  }
0x1339   :  { %v4965_v50 = vpop.xlane.xlu0 %4964 }
0x133a   :  { %vm4966_vm15 = vcmp.eq.f32.partialorder %v4963_v31, %v4965_v50  ;;  %v4971_v58 = vcvt.f32.s32 %v4965_v50  ;;  %v14617_v31 = vld [vmem:[%s16395_s9 + $0x8c] ss:$16 sps:$4 sm:$0xff]   ;;  %v14635_v50 = vld [vmem:[%s16395_s9 + $0xa4] ss:$16 sps:$4 sm:$0xff]  }
0x133b   :  { %v4967_v30 = vsel %vm4966_vm15, %v4962_v12, inf  ;;  %16715 = vst [vmem:[#allocation19_spill] sm:$0xff] %v14617_v31  ;;  %v14641_v12 = vld [vmem:[%s16395_s9 + $0xac] ss:$16 sps:$4 sm:$0xff]  }
0x133c   :  { %4968 = vmin.xlane.f32.xlu1 %v4967_v30  ;;  %v4972_v40 = vshll.u32 %v4971_v58, 16  ;;  %16717 = vst [vmem:[#allocation23_spill] sm:$0xff] %v14641_v12  ;;  %v14647_v30 = vld [vmem:[%s16395_s9 + $0xa0] ss:$16 sps:$4 sm:$0xff]   ;;  %v14678_v58 = vld [vmem:[%s16395_s9 + $0xc8] ss:$16 sps:$4 sm:$0xff]  }
0x133d   :  { %v5077_v45 = vpop.xlane.xlu0 %5076  ;;  %16720 = vst [vmem:[#allocation27_spill] sm:$0xff] %v14678_v58 }
0x133e   :  { %v5078_v59 = vadd.f32 %v5077_v45, %v16660_v28  ;;  %v14654_v45 = vld [vmem:[%s16395_s9 + $0xa8] ss:$16 sps:$4 sm:$0xff]  }
0x133f   :  { %16718 = vst [vmem:[#allocation25_spill] sm:$0xff] %v14654_v45 }
0x1340   :  { %v5079_v2 = vmax.f32 %v5078_v59, 0.0  ;;  %v14659_v59 = vld [vmem:[%s16395_s9 + $0xc4] ss:$16 sps:$4 sm:$0xff]  }
0x1342   :  { %v5080_v13 = vsel %vm3174_vm9, %v5079_v2, -inf }
0x1343   :  { %5081 = vmax.xlane.f32.xlu0 %v5080_v13  ;;  %v14671_v13 = vld [vmem:[%s16395_s9 + $0xc0] ss:$16 sps:$4 sm:$0xff]  }
0x13c9   :  { %v4969_v38 = vpop.xlane.xlu1 %4968 }
0x13ca   :  { %v4970_v29 = vcvt.f32.s32 %v4969_v38  ;;  %v14683_v38 = vld [vmem:[%s16395_s9 + $0xe4] ss:$16 sps:$4 sm:$0xff]  }
0x13cc   :  { %v4973_v41 = vadd.s32 %v4972_v40, %v4970_v29  ;;  %v14690_v40 = vld [vmem:[%s16395_s9 + $0xe0] ss:$16 sps:$4 sm:$0xff]  }
0x13ce   :  { %vm4974_vm1 = vcmp.eq.s32.totalorder %v16657_v35, %v4973_v41 }
0x13cf   :  { %11010 = vmatmul.mubr.msk.f32.vlgmr.msra.gmra.mrb[42].mxu1 %vm4974_vm1, %v16480_v22  ;;  %v14740_v22 = vld [vmem:[%s16395_s9 + $0x124] ss:$16 sps:$4 sm:$0xff]  }
0x13d0   :  { %v5082_v10 = vpop.xlane.xlu0 %5081  ;;  %5720 = vmatprep.mubr.bf16.mxu1 %v4842_v9  ;;  %5689 = vmatpush1.bf16.msra.mxu1 %v14528_v23  ;;  %v14563_v9 = vld [vmem:[%s16395_s9 + $0x44] ss:$16 sps:$4 sm:$0xff]  }
0x13d1   :  { %v5083_v15 = vsub.f32 %v5079_v2, %v5082_v10  ;;  %5690 = vmatprep.subr.bf16.mxu1 %v14544_v5  ;;  %5610 = vmatprep.subr.bf16.mxu0 %v14563_v9  ;;  %v14665_v2 = vld [vmem:[%s16395_s9 + $0xcc] ss:$16 sps:$4 sm:$0xff]  }
0x13d2   :  { %5611 = vmatpush1.bf16.msra.mxu0 %v14575_v33  ;;  %16719 = vst [vmem:[#allocation26_spill] sm:$0xff] %v14665_v2 }
0x13d3   :  { %v5084_v49 = vmul.f32 1.442695, %v5083_v15  ;;  %5612 = vmatprep.subr.bf16.mxu0 %v14587_v53  ;;  %v14701_v15 = vld [vmem:[%s16395_s9 + $0xec] ss:$16 sps:$4 sm:$0xff]  }
0x13d4   :  { %5691 = vmatpush1.bf16.msra.mxu1 %v14558_v42  ;;  %16721 = vst [vmem:[#allocation28_spill] sm:$0xff] %v14701_v15 }
0x13d5   :  { %12351 = vpow2.f32 %v5084_v49  ;;  %5692 = vmatprep.subr.bf16.mxu1 %v14569_v25  ;;  %v14706_v49 = vld [vmem:[%s16395_s9 + $0xe8] ss:$16 sps:$4 sm:$0xff]  }
0x13d6   :  { %5613 = vmatpush1.bf16.msra.mxu0 %v14599_v46  ;;  %16722 = vst [vmem:[#allocation29_spill] sm:$0xff] %v14706_v49 }
0x13d7   :  { %5614 = vmatprep.subr.bf16.mxu0 %v14611_v26 }
0x13d8   :  { %5693 = vmatpush1.bf16.msra.mxu1 %v14582_v24 }
0x13d9   :  { %5694 = vmatprep.subr.bf16.mxu1 %v14593_v1 }
0x13da   :  { %5615 = vmatpush1.bf16.msra.mxu0 %v14623_v44 }
0x13db   :  { %5616 = vmatprep.subr.bf16.mxu0 %v14635_v50 }
0x13dc   :  { %5695 = vmatpush1.bf16.msra.mxu1 %v14606_v17 }
0x13dd   :  { %5696 = vmatprep.subr.bf16.mxu1 %v14617_v31 }
0x13de   :  { %5617 = vmatpush1.bf16.msra.mxu0 %v14647_v30 }
0x13df   :  { %v14511_v37 = vpop.eup %12351  ;;  %5618 = vmatprep.subr.bf16.mxu0 %v14659_v59 }
0x13e0   :  { %v5086_v21 = vsel %vm3174_vm9, %v14511_v37, 0.0  ;;  %5697 = vmatpush1.bf16.msra.mxu1 %v14630_v18  ;;  %v14900_v18 = vld [vmem:[%s16395_s9 + $0x1ec] ss:$16 sps:$4 sm:$0xff]  }
0x13e1   :  { %5087 = vadd.xlane.f32.xlu1 %v5086_v21  ;;  %5698 = vmatprep.subr.bf16.mxu1 %v14641_v12  ;;  %v14720_v21 = vld [vmem:[%s16395_s9 + $0x104] ss:$16 sps:$4 sm:$0xff]   ;;  %v14874_v12 = vld [vmem:[%s16395_s9 + $0x1cc] ss:$16 sps:$4 sm:$0xff]   ;;  %16738 = vst [vmem:[#allocation45_spill] sm:$0xff] %v14900_v18 }
0x13e2   :  { %5619 = vmatpush1.bf16.msra.mxu0 %v14671_v13  ;;  %16735 = vst [vmem:[#allocation42_spill] sm:$0xff] %v14874_v12 }
0x13e3   :  { %5620 = vmatprep.subr.bf16.mxu0 %v14683_v38 }
0x13e4   :  { %5699 = vmatpush1.bf16.msra.mxu1 %v14654_v45  ;;  %v14843_v45 = vld [vmem:[%s16395_s9 + $0x1a0] ss:$16 sps:$4 sm:$0xff]  }
0x13e5   :  { %5700 = vmatprep.subr.bf16.mxu1 %v14665_v2  ;;  %v14827_v2 = vld [vmem:[%s16395_s9 + $0x18c] ss:$16 sps:$4 sm:$0xff]  }
0x13e6   :  { %5621 = vmatpush1.bf16.msra.mxu0 %v14690_v40  ;;  %16731 = vst [vmem:[#allocation38_spill] sm:$0xff] %v14827_v2 }
0x13e7   :  { %5622 = vmatprep.subr.bf16.mxu0 %v14720_v21 }
0x13e8   :  { %5701 = vmatpush1.bf16.msra.mxu1 %v14678_v58  ;;  %v14822_v58 = vld [vmem:[%s16395_s9 + $0x184] ss:$16 sps:$4 sm:$0xff]  }
0x13e9   :  { %5702 = vmatprep.subr.bf16.mxu1 %v14701_v15  ;;  %v14797_v15 = vld [vmem:[%s16395_s9 + $0x16c] ss:$16 sps:$4 sm:$0xff]  }
0x13ea   :  { %16729 = vst [vmem:[#allocation36_spill] sm:$0xff] %v14797_v15 }
0x13ec   :  { %5703 = vmatpush1.bf16.msra.mxu1 %v14706_v49  ;;  %v14745_v49 = vld [vmem:[%s16395_s9 + $0x12c] ss:$16 sps:$4 sm:$0xff]  }
0x13ed   :  { %16725 = vst [vmem:[#allocation32_spill] sm:$0xff] %v14745_v49 }
0x146e   :  { %v5088_v29 = vpop.xlane.xlu1 %5087 }
0x146f   :  { %12353 = vrcp.f32 %v5088_v29  ;;  %v14725_v29 = vld [vmem:[%s16395_s9 + $0x108] ss:$16 sps:$4 sm:$0xff]  }
0x1470   :  { %16723 = vst [vmem:[#allocation30_spill] sm:$0xff] %v14725_v29 }
0x1479   :  { %v12354_v41 = vpop.eup %12353 }
0x147a   :  { %v14696_v10 = vmul.f32 %v12354_v41, %v14511_v37  ;;  %v14715_v37 = vld [vmem:[%s16395_s9 + $0x100] ss:$16 sps:$4 sm:$0xff]   ;;  %v14730_v41 = vld [vmem:[%s16395_s9 + $0x10c] ss:$16 sps:$4 sm:$0xff]  }
0x147b   :  { %16724 = vst [vmem:[#allocation31_spill] sm:$0xff] %v14730_v41  ;;  %5623 = vmatpush1.bf16.msra.mxu0 %v14715_v37  ;;  %5704 = vmatprep.subr.bf16.mxu1 %v14730_v41  ;;  %v14757_v41 = vld [vmem:[%s16395_s9 + $0x128] ss:$16 sps:$4 sm:$0xff]  }
0x147c   :  { %5100 = vperm.xlu1 %11509, %v14696_v10   ;;  %5094 = vperm.xlu0 %11508, %v14696_v10   ;;  %16726 = vst [vmem:[#allocation33_spill] sm:$0xff] %v14757_v41 }
0x147d   :  { %5705 = vmatpush1.bf16.msra.mxu1 %v14725_v29  ;;  %5624 = vmatprep.subr.bf16.mxu0 %v14740_v22  ;;  %v14772_v29 = vld [vmem:[%s16395_s9 + $0x14c] ss:$16 sps:$4 sm:$0xff]  }
0x147e   :  { %5706 = vmatprep.subr.bf16.mxu1 %v14745_v49  ;;  %16727 = vst [vmem:[#allocation34_spill] sm:$0xff] %v14772_v29  ;;  %v14783_v49 = vld [vmem:[%s16395_s9 + $0x148] ss:$16 sps:$4 sm:$0xff]  }
0x147f   :  { %16728 = vst [vmem:[#allocation35_spill] sm:$0xff] %v14783_v49 }
0x1480   :  { %11510 = vset.pattern.permute.xlu1 %v16697_v57  ;;  %11517 = vset.pattern.permute.xlu0 %v16703_v8  ;;  %v14752_v57 = vld [vmem:[%s16395_s9 + $0x120] ss:$16 sps:$4 sm:$0xff]   ;;  %v14767_v8 = vld [vmem:[%s16395_s9 + $0x144] ss:$16 sps:$4 sm:$0xff]  }
0x1481   :  { %5107 = vperm.xlu1 %11510, %v14696_v10   ;;  %5625 = vmatpush1.bf16.msra.mxu0 %v14752_v57 }
0x1482   :  { %5707 = vmatpush1.bf16.msra.mxu1 %v14757_v41  ;;  %5626 = vmatprep.subr.bf16.mxu0 %v14767_v8  ;;  %v14792_v41 = vld [vmem:[%s16395_s9 + $0x164] ss:$16 sps:$4 sm:$0xff]  }
0x1483   :  { %5708 = vmatprep.subr.bf16.mxu1 %v14772_v29  ;;  %v14804_v29 = vld [vmem:[%s16395_s9 + $0x160] ss:$16 sps:$4 sm:$0xff]  }
0x1485   :  { %11511 = vset.pattern.permute.xlu1 %v16698_v51  ;;  %v14778_v51 = vld [vmem:[%s16395_s9 + $0x140] ss:$16 sps:$4 sm:$0xff]  }
0x1486   :  { %5114 = vperm.xlu1 %11511, %v14696_v10   ;;  %5627 = vmatpush1.bf16.msra.mxu0 %v14778_v51 }
0x1487   :  { %5709 = vmatpush1.bf16.msra.mxu1 %v14783_v49  ;;  %5628 = vmatprep.subr.bf16.mxu0 %v14792_v41  ;;  %v14817_v49 = vld [vmem:[%s16395_s9 + $0x180] ss:$16 sps:$4 sm:$0xff]  }
0x1488   :  { %5710 = vmatprep.subr.bf16.mxu1 %v14797_v15  ;;  %v14834_v15 = vld [vmem:[%s16395_s9 + $0x188] ss:$16 sps:$4 sm:$0xff]  }
0x1489   :  { %16732 = vst [vmem:[#allocation40_spill] sm:$0xff] %v14834_v15 }
0x148a   :  { %11512 = vset.pattern.permute.xlu1 %v16699_v27  ;;  %v14809_v27 = vld [vmem:[%s16395_s9 + $0x168] ss:$16 sps:$4 sm:$0xff]   ;;  %5629 = vmatpush1.bf16.msra.mxu0 %v14804_v29 }
0x148b   :  { %5121 = vperm.xlu1 %11512, %v14696_v10   ;;  %16730 = vst [vmem:[#allocation37_spill] sm:$0xff] %v14809_v27  ;;  %5711 = vmatpush1.bf16.msra.mxu1 %v14809_v27  ;;  %v14854_v27 = vld [vmem:[%s16395_s9 + $0x1a8] ss:$16 sps:$4 sm:$0xff]  }
0x148c   :  { %5630 = vmatprep.subr.bf16.mxu0 %v14822_v58  ;;  %5712 = vmatprep.subr.bf16.mxu1 %v14827_v2  ;;  %16733 = vst [vmem:[#allocation39_spill] sm:$0xff] %v14854_v27  ;;  %v14859_v2 = vld [vmem:[%s16395_s9 + $0x1ac] ss:$16 sps:$4 sm:$0xff]  }
0x148d   :  { %16734 = vst [vmem:[#allocation41_spill] sm:$0xff] %v14859_v2 }
0x148e   :  { %5631 = vmatpush1.bf16.msra.mxu0 %v14817_v49 }
0x148f   :  { %11513 = vset.pattern.permute.xlu1 %v16701_v19  ;;  %v14848_v19 = vld [vmem:[%s16395_s9 + $0x1a4] ss:$16 sps:$4 sm:$0xff]   ;;  %5713 = vmatpush1.bf16.msra.mxu1 %v14834_v15 }
0x1490   :  { %5128 = vperm.xlu1 %11513, %v14696_v10   ;;  %5632 = vmatprep.subr.bf16.mxu0 %v14848_v19  ;;  %v14869_v15 = vld [vmem:[%s16395_s9 + $0x1c4] ss:$16 sps:$4 sm:$0xff]  }
0x1491   :  { %5714 = vmatprep.subr.bf16.mxu1 %v14859_v2  ;;  %v14885_v2 = vld [vmem:[%s16395_s9 + $0x1c8] ss:$16 sps:$4 sm:$0xff]  }
0x1492   :  { %5633 = vmatpush1.bf16.msra.mxu0 %v14843_v45  ;;  %16736 = vst [vmem:[#allocation43_spill] sm:$0xff] %v14885_v2 }
0x1493   :  { %5715 = vmatpush1.bf16.msra.mxu1 %v14854_v27  ;;  %5634 = vmatprep.subr.bf16.mxu0 %v14869_v15  ;;  %v14895_v27 = vld [vmem:[%s16395_s9 + $0x1e4] ss:$16 sps:$4 sm:$0xff]  }
0x1494   :  { %11514 = vset.pattern.permute.xlu1 %v16700_v55  ;;  %v14880_v55 = vld [vmem:[%s16395_s9 + $0x1c0] ss:$16 sps:$4 sm:$0xff]   ;;  %5716 = vmatprep.subr.bf16.mxu1 %v14874_v12  ;;  %16737 = vst [vmem:[#allocation44_spill] sm:$0xff] %v14895_v27  ;;  %v14927_v12 = vld [vmem:[%s16395_s9 + $0x20c] ss:$16 sps:$4 sm:$0xff]  }
0x1495   :  { %5135 = vperm.xlu1 %11514, %v14696_v10   ;;  %16742 = vst [vmem:[#allocation50_spill] sm:$0xff] %v14927_v12 }
0x1496   :  { %5635 = vmatpush1.bf16.msra.mxu0 %v14880_v55 }
0x1497   :  { %5717 = vmatpush1.bf16.msra.mxu1 %v14885_v2  ;;  %5636 = vmatprep.subr.bf16.mxu0 %v14895_v27  ;;  %v14919_v2 = vld [vmem:[%s16395_s9 + $0x204] ss:$16 sps:$4 sm:$0xff]  }
0x1498   :  { %5718 = vmatprep.subr.bf16.mxu1 %v14900_v18  ;;  %16741 = vst [vmem:[#allocation48_spill] sm:$0xff] %v14919_v2 }
0x1499   :  { %11515 = vset.pattern.permute.xlu1 %v16702_v7  ;;  %v14906_v7 = vld [vmem:[%s16395_s9 + $0x1e0] ss:$16 sps:$4 sm:$0xff]  }
0x149a   :  { %5142 = vperm.xlu1 %11515, %v14696_v10   ;;  %16739 = vst [vmem:[#allocation46_spill] sm:$0xff] %v14906_v7  ;;  %v14911_v10 = vld [vmem:[%s16395_s9 + $0x1e8] ss:$16 sps:$4 sm:$0xff]   ;;  %5637 = vmatpush1.bf16.msra.mxu0 %v14906_v7 }
0x149b   :  { %16740 = vst [vmem:[#allocation47_spill] sm:$0xff] %v14911_v10  ;;  %5719 = vmatpush1.bf16.msra.mxu1 %v14911_v10  ;;  %5647 = vmatprep.subr.bf16.mxu0 %v14919_v2 }
0x149c   :  { %5729 = vmatprep.subr.bf16.mxu1 %v14927_v12 }
0x149e   :  { %11516 = vset.pattern.permute.xlu1 %v16651_v3 }
0x14a2   :  { %v5059_v31 = vpop.f32.mrb[42].mxu1 }
0x14a3   :  { %v11011_v18 = vpop.f32.mrb[43].mxu1 }
0x14fb   :  { %v5101_v17 = vpop.permute.xlu1 %5100  ;;  %v5095_v25 = vpop.permute.xlu0 %5094 }
0x14fc   :  { %v5103_v5 = vmul.f32 %v5101_v17, %v16704_v34  ;;  %v5097_v10 = vmul.f32 %v5095_v25, %v16648_v4 }
0x14fe   :  { %v5104_v28 = vadd.f32 %v5103_v5, %v5097_v10 }
0x1500   :  { %v5108_v1 = vpop.permute.xlu1 %5107 }
0x1501   :  { %v5110_v23 = vmul.f32 %v5108_v1, %v16649_v16 }
0x1503   :  { %v5111_v18 = vadd.f32 %v5110_v23, %v5104_v28  ;;  %v14941_v28 = vld [vmem:[%s16395_s9 + $0x200] ss:$16 sps:$4 sm:$0xff]   ;;  %v5072_v23 = vstv %s5071_s15 }
0x1505   :  { %v5115_v24 = vpop.permute.xlu1 %5114 }
0x1506   :  { %v5117_v39 = vmul.f32 %v5115_v24, %v16650_v63 }
0x1508   :  { %v5118_v35 = vadd.f32 %v5117_v39, %v5111_v18  ;;  %v14946_v39 = vld [vmem:[%s16395_s9 + $0x208] ss:$16 sps:$4 sm:$0xff]  }
0x1509   :  { %v11928_v18 = vld [vmem:[%s16397_s11 + $0x8] sm:$0xff]  }
0x150a   :  { %v5122_v42 = vpop.permute.xlu1 %5121 }
0x150b   :  { %v5124_v12 = vmul.f32 %v5122_v42, %v13479_v11  ;;  %v14971_v42 = vld [vmem:[%s16395_s9 + $0x228] ss:$16 sps:$4 sm:$0xff]  }
0x150c   :  { %16745 = vst [vmem:[#allocation54_spill] sm:$0xff] %v14971_v42 }
0x150d   :  { %v5125_v27 = vadd.f32 %v5124_v12, %v5118_v35  ;;  %v5073_v12 = vmul.f32 %v5072_v23, %v5059_v31  ;;  %v11927_v31 = vld [vmem:[%s16397_s11] sm:$0xff]  }
0x150f   :  { %v5129_v14 = vpop.permute.xlu1 %5128 }
0x1510   :  { %v5131_v2 = vmul.f32 %v5129_v14, %v13541_v20  ;;  %v14965_v14 = vld [vmem:[%s16395_s9 + $0x220] ss:$16 sps:$4 sm:$0xff]  }
0x1511   :  { %16744 = vst [vmem:[#allocation52_spill] sm:$0xff] %v14965_v14 }
0x1512   :  { %v5132_v25 = vadd.f32 %v5131_v2, %v5125_v27  ;;  %v14951_v27 = vld [vmem:[%s16395_s9 + $0x224] ss:$16 sps:$4 sm:$0xff]  }
0x1514   :  { %v5136_v7 = vpop.permute.xlu1 %5135 }
0x1515   :  { %v5138_v17 = vmul.f32 %v5136_v7, %v13637_v60  ;;  %v5069_v7 = vstv %s5066_s8  ;;  %s6017_s8 = scalar_select %p6016_p7, 1, 0 }
0x1517   :  { %v5139_v1 = vadd.f32 %v5138_v17, %v5132_v25  ;;  %v11929_v17 = vld [vmem:[%s16397_s11 + $0x10] sm:$0xff]   ;;  %v11930_v25 = vld [vmem:[%s16397_s11 + $0x18] sm:$0xff]   ;;  %s6018_s15 = scvt.s32.f32 %s6017_s8 }
0x1519   :  { %v5143_v4 = vpop.permute.xlu1 %5142  ;;  %s6023_s16 = ssub.f32 1.0, %s6018_s15 }
0x151a   :  { %v5145_v16 = vmul.f32 %v5143_v4, %v13698_v56  ;;  %v10290_v4 = vld [vmem:[%s16388_s2 + $0x10] sm:$0xff] }
0x151b   :  { %v5070_v24 = vmul.f32 %v10290_v4, %v5069_v7  ;;  %v11934_v4 = vld [vmem:[%s16397_s11 + $0x38] sm:$0xff]   ;;  %v5221_v7 = vld [vmem:[%s16396_s10] sm:$0xf] }
0x151c   :  { %v5146_v5 = vadd.f32 %v5145_v16, %v5139_v1  ;;  %v14956_v16 = vld [vmem:[%s16395_s9 + $0x22c] ss:$16 sps:$4 sm:$0xff]   ;;  %v11931_v1 = vld [vmem:[%s16397_s11 + $0x20] sm:$0xff]   ;;  %v5226_v23 = vrot.slane %v5221_v7, %v16599_v32  ;;  %v5234_v32 = vrot.slane %v5221_v7, %v12880_v0 }
0x151d   :  { %16743 = vst [vmem:[#allocation49_spill] sm:$0xff] %v14956_v16  ;;  %v5074_v2 = vadd.f32 %v5073_v12, %v5070_v24  ;;  %v5230_v24 = vrot.slane %v5221_v7, %v16705_v36 }
0x151e   :  { %v5147_v35 = vpack.c.bf16 %v5146_v5, %v5146_v5  ;;  %v11932_v5 = vld [vmem:[%s16397_s11 + $0x28] sm:$0xff]  }
0x151f   :  { %v5148_v10 = vpack.c.bf16 %v5074_v2, %v5074_v2 }
0x1520   :  { %5639 = vmatmul.mubr.bf16.vlgmr.msra.gmra.mrb[48].mxu0 %v5147_v35  ;;  %5721 = vmatmul.mubr.bf16.vlgmr.msra.gmra.mrb[52].mxu1 %v5147_v35  ;;  %v11933_v35 = vld [vmem:[%s16397_s11 + $0x30] sm:$0xff]  }
0x1521   :  { %5648 = vmatpush1.bf16.msra.mxu0 %v14941_v28  ;;  %5730 = vmatpush1.bf16.msra.mxu1 %v14946_v39 }
0x1522   :  { %5649 = vmatprep.subr.bf16.mxu0 %v14951_v27  ;;  %5731 = vmatprep.subr.bf16.mxu1 %v14956_v16 }
0x1523   :  { %5679 = vmatprep.mubr.bf16.mxu0 %v16651_v3  ;;  %5761 = vmatprep.mubr.bf16.mxu1 %v16651_v3 }
0x1525   :  { %5650 = vmatpush1.bf16.msra.mxu0 %v14965_v14  ;;  %5732 = vmatpush1.bf16.msra.mxu1 %v14971_v42 }
0x1526   :  { %11012 = vmatprep.subr.bf16.mxu0 %v14430_v48  ;;  %11300 = vmatprep.subr.bf16.mxu1 %v16652_v6 }
0x152c   :  { %10363 = vmatmul.mubr.msk.bf16.vlgmr.msra.gmra.mrb[48].mxu0 %vm329_vm0, %v5148_v10  ;;  %10364 = vmatmul.mubr.msk.bf16.vlgmr.msra.gmra.mrb[52].mxu1 %vm329_vm0, %v5148_v10 }
0x152d   :  { %11028 = vmatprep.mubr.msk.bf16.mxu0 %vm12548_vm10, %v14430_v48  ;;  %11064 = vmatprep.mubr.msk.f32.mxu1 %vm12548_vm10, %v14430_v48 }
0x152e   :  { %11013 = vmatpush3.bf16.msra.mxu0 %v11927_v31 }
0x152f   :  { %11014 = vmatprep.subr.bf16.mxu0 %v14430_v48 }
0x1532   :  { %11015 = vmatpush3.bf16.msra.mxu0 %v11928_v18 }
0x1533   :  { %11016 = vmatprep.subr.bf16.mxu0 %v14430_v48 }
0x1536   :  { %11017 = vmatpush3.bf16.msra.mxu0 %v11929_v17 }
0x1537   :  { %11018 = vmatprep.subr.bf16.mxu0 %v14430_v48 }
0x153a   :  { %11019 = vmatpush3.bf16.msra.mxu0 %v11930_v25 }
0x153b   :  { %11020 = vmatprep.subr.bf16.mxu0 %v14430_v48 }
0x153e   :  { %11021 = vmatpush3.bf16.msra.mxu0 %v11931_v1 }
0x153f   :  { %11022 = vmatprep.subr.bf16.mxu0 %v14430_v48 }
0x1542   :  { %11023 = vmatpush3.bf16.msra.mxu0 %v11932_v5 }
0x1543   :  { %11024 = vmatprep.subr.bf16.mxu0 %v14430_v48 }
0x1546   :  { %11025 = vmatpush3.bf16.msra.mxu0 %v11933_v35 }
0x1547   :  { %11026 = vmatprep.subr.bf16.mxu0 %v14430_v48 }
0x154a   :  { %11027 = vmatpush3.bf16.msra.mxu0 %v11934_v4  ;;  %v5238_v4 = vrot.slane %v5221_v7, %v12877_v54  ;;  %v5939_v7 = vld [vmem:[%s16391_s5 + $0x50] sm:$0xff] }
0x154b   :  { %6558 = vmatprep.subr.bf16.mxu0 %v14523_v47 }
0x15ff   :  { %v5681_v12 = vpop.f32.mrb[48].mxu0  ;;  %v5763_v2 = vpop.f32.mrb[52].mxu1 }
0x1600   :  { %v11408_v10 = vadd.f32 %v5681_v12, %v5226_v23  ;;  %v5683_v31 = vpop.f32.mrb[49].mxu0  ;;  %v5765_v18 = vpop.f32.mrb[53].mxu1  ;;  %v11410_v14 = vadd.f32 %v5763_v2, %v5234_v32  ;;  %v5940_v2 = vld [vmem:[%s16391_s5 + $0x58] sm:$0xff] }
0x1601   :  { %v11409_v17 = vadd.f32 %v5683_v31, %v5230_v24  ;;  %v5685_v25 = vpop.f32.mrb[50].mxu0  ;;  %v5767_v1 = vpop.f32.mrb[54].mxu1  ;;  %v11411_v42 = vadd.f32 %v5765_v18, %v5238_v4  ;;  %v5942_v4 = vld [vmem:[%s16391_s5 + $0x68] sm:$0xff] }
0x1602   :  { %v10365_v48 = vmul.f32 -1.442695, %v11408_v10  ;;  %v5686_v5 = vpop.f32.mrb[51].mxu0  ;;  %v5768_v35 = vpop.f32.mrb[55].mxu1 }
0x1603   :  { %v10366_v47 = vmul.f32 -1.442695, %v11409_v17  ;;  %v10367_v36 = vmul.f32 -1.442695, %v11411_v42  ;;  %v15129_v35 = vpack.c.bf16 %v5940_v2, %v5939_v7  ;;  %v16767_v7 = vld [vmem:[#allocation28_spill] sm:$0xff]  ;;  %v16768_v2 = vld [vmem:[#allocation29_spill] sm:$0xff] }
0x1604   :  { %12355 = vpow2.f32 %v10365_v48 }
0x1605   :  { %12357 = vpow2.f32 %v10366_v47  ;;  %v5941_v47 = vld [vmem:[%s16391_s5 + $0x60] sm:$0xff] }
0x1606   :  { %12359 = vpow2.f32 %v10367_v36 }
0x1607   :  { %12361 = vtanh.f32 %v11410_v14 }
0x160e   :  { %v12356_v16 = vpop.eup %12355 }
0x160f   :  { %v12358_v23 = vpop.eup %12357  ;;  %v5773_v12 = vadd.f32 1.0, %v12356_v16 }
0x1610   :  { %v5779_v24 = vadd.f32 1.0, %v12358_v23  ;;  %v12360_v10 = vpop.eup %12359  ;;  %v15139_v23 = vpack.c.bf16 %v5942_v4, %v5941_v47  ;;  %v16769_v47 = vld [vmem:[#allocation31_spill] sm:$0xff]  ;;  %v16770_v4 = vld [vmem:[#allocation30_spill] sm:$0xff] }
0x1611   :  { %12363 = vrcp.f32 %v5773_v12  ;;  %v12362_v31 = vpop.eup %12361  ;;  %v5786_v48 = vadd.f32 1.0, %v12360_v10 }
0x1612   :  { %12365 = vrcp.f32 %v5779_v24 }
0x1613   :  { %12367 = vrcp.f32 %v5786_v48 }
0x161b   :  { %v12364_v17 = vpop.eup %12363 }
0x161c   :  { %v12366_v25 = vpop.eup %12365  ;;  %v5790_v1 = vmul.f32 %v12364_v17, %v12362_v31 }
0x161d   :  { %v5789_v18 = vmul.f32 %v12366_v25, %v14496_v61  ;;  %v12368_v32 = vpop.eup %12367  ;;  %v16751_v25 = vld [vmem:[#allocation22_spill] sm:$0xff] }
0x161f   :  { %v15027_v5 = vadd.f32 %v5790_v1, %v5789_v18 }
0x1621   :  { %12369 = vtanh.f32 %v15027_v5 }
0x162b   :  { %v12370_v16 = vpop.eup %12369 }
0x162c   :  { %v5793_v36 = vmul.f32 %v12370_v16, %v12368_v32  ;;  %v5943_v32 = vld [vmem:[%s16391_s5 + $0x70] sm:$0xff]  ;;  %v5944_v16 = vld [vmem:[%s16391_s5 + $0x78] sm:$0xff] }
0x162e   :  { %v15030_v14 = vpack.c.bf16 %v5793_v36, %v5793_v36 }
0x1630   :  { %11029 = vmatmul.mubr.bf16.vlgmr.msra.gmra.mrb[52].mxu0 %v15030_v14 }
0x1631   :  { %6590 = vmatprep.mubr.bf16.mxu0 %v15030_v14  ;;  %6559 = vmatpush1.bf16.msra.mxu0 %v14518_v43 }
0x1632   :  { %6560 = vmatprep.subr.bf16.mxu0 %v14538_v52 }
0x1635   :  { %6561 = vmatpush1.bf16.msra.mxu0 %v14551_v62 }
0x1636   :  { %6562 = vmatprep.subr.bf16.mxu0 %v14563_v9  ;;  %v16749_v9 = vld [vmem:[#allocation21_spill] sm:$0xff] }
0x1639   :  { %6563 = vmatpush1.bf16.msra.mxu0 %v14575_v33 }
0x163a   :  { %6564 = vmatprep.subr.bf16.mxu0 %v14587_v53 }
0x163d   :  { %6565 = vmatpush1.bf16.msra.mxu0 %v14599_v46 }
0x163e   :  { %6566 = vmatprep.subr.bf16.mxu0 %v14611_v26  ;;  %v16750_v26 = vld [vmem:[#allocation16_spill] sm:$0xff] }
0x1641   :  { %6567 = vmatpush1.bf16.msra.mxu0 %v14623_v44  ;;  %v6027_v44 = vmul.f32 %v16750_v26, %v5793_v36  ;;  %v15152_v36 = vpack.c.bf16 %v5944_v16, %v5943_v32  ;;  %v16756_v26 = vld [vmem:[#allocation57_spill] sm:$0xff]  ;;  %v16780_v16 = vld [vmem:[#allocation39_spill] sm:$0xff] }
0x1642   :  { %6568 = vmatprep.subr.bf16.mxu0 %v14635_v50  ;;  %v5929_v50 = vld [vmem:[%s16391_s5] sm:$0xff] }
0x1643   :  { %v16779_v32 = vld [vmem:[#allocation41_spill] sm:$0xff] }
0x1645   :  { %6569 = vmatpush1.bf16.msra.mxu0 %v14647_v30  ;;  %v5930_v30 = vld [vmem:[%s16391_s5 + $0x8] sm:$0xff] }
0x1646   :  { %6570 = vmatprep.subr.bf16.mxu0 %v14659_v59  ;;  %v15083_v59 = vpack.c.bf16 %v5930_v30, %v5929_v50  ;;  %v16758_v50 = vld [vmem:[#allocation15_spill] sm:$0xff]  ;;  %v16759_v30 = vld [vmem:[#allocation17_spill] sm:$0xff] }
0x1648   :  { %11302 = vmatpush3.bf16.msra.mxu1 %v15083_v59 }
0x1649   :  { %6571 = vmatpush1.bf16.msra.mxu0 %v14671_v13  ;;  %v5932_v13 = vld [vmem:[%s16391_s5 + $0x18] sm:$0xff]  ;;  %11303 = vmatprep.subr.bf16.mxu1 %v16652_v6 }
0x164a   :  { %6572 = vmatprep.subr.bf16.mxu0 %v14683_v38  ;;  %v5933_v38 = vld [vmem:[%s16391_s5 + $0x20] sm:$0xff] }
0x164d   :  { %6573 = vmatpush1.bf16.msra.mxu0 %v14690_v40  ;;  %v5934_v40 = vld [vmem:[%s16391_s5 + $0x28] sm:$0xff] }
0x164e   :  { %6574 = vmatprep.subr.bf16.mxu0 %v14720_v21 }
0x1651   :  { %6575 = vmatpush1.bf16.msra.mxu0 %v14715_v37  ;;  %v5936_v37 = vld [vmem:[%s16391_s5 + $0x38] sm:$0xff] }
0x1652   :  { %6576 = vmatprep.subr.bf16.mxu0 %v14740_v22  ;;  %v16746_v22 = vld [vmem:[#allocation44_spill] sm:$0xff] }
0x1655   :  { %6577 = vmatpush1.bf16.msra.mxu0 %v14752_v57  ;;  %v16747_v57 = vld [vmem:[#allocation46_spill] sm:$0xff] }
0x1656   :  { %6578 = vmatprep.subr.bf16.mxu0 %v14767_v8  ;;  %v15069_v8 = vld [vmem:[%s16398_s12] ss:$0 sm:$0xff] }
0x1659   :  { %6579 = vmatpush1.bf16.msra.mxu0 %v14778_v51  ;;  %v16748_v51 = vld [vmem:[#allocation48_spill] sm:$0xff] }
0x165a   :  { %6580 = vmatprep.subr.bf16.mxu0 %v14792_v41  ;;  %v5938_v41 = vld [vmem:[%s16391_s5 + $0x48] sm:$0xff] }
0x165d   :  { %6581 = vmatpush1.bf16.msra.mxu0 %v14804_v29  ;;  %v5937_v29 = vld [vmem:[%s16391_s5 + $0x40] sm:$0xff] }
0x165e   :  { %6582 = vmatprep.subr.bf16.mxu0 %v14822_v58  ;;  %v15119_v42 = vpack.c.bf16 %v5938_v41, %v5937_v29  ;;  %v16765_v29 = vld [vmem:[#allocation26_spill] sm:$0xff]  ;;  %v16766_v41 = vld [vmem:[#allocation27_spill] sm:$0xff] }
0x1661   :  { %6583 = vmatpush1.bf16.msra.mxu0 %v14817_v49  ;;  %v5935_v49 = vld [vmem:[%s16391_s5 + $0x30] sm:$0xff] }
0x1662   :  { %6584 = vmatprep.subr.bf16.mxu0 %v14848_v19  ;;  %v15109_v21 = vpack.c.bf16 %v5936_v37, %v5935_v49  ;;  %v16763_v49 = vld [vmem:[#allocation23_spill] sm:$0xff]  ;;  %v16764_v37 = vld [vmem:[#allocation25_spill] sm:$0xff] }
0x1665   :  { %6585 = vmatpush1.bf16.msra.mxu0 %v14843_v45  ;;  %v5931_v45 = vld [vmem:[%s16391_s5 + $0x10] sm:$0xff] }
0x1666   :  { %6586 = vmatprep.subr.bf16.mxu0 %v14869_v15  ;;  %v15089_v58 = vpack.c.bf16 %v5932_v13, %v5931_v45  ;;  %v15099_v15 = vpack.c.bf16 %v5934_v40, %v5933_v38  ;;  %v16760_v45 = vld [vmem:[#allocation18_spill] sm:$0xff]  ;;  %v16761_v13 = vld [vmem:[#allocation19_spill] sm:$0xff]  ;;  %v16762_v40 = vld [vmem:[#allocation24_spill] sm:$0xff] }
0x1668   :  { %11305 = vmatpush3.bf16.msra.mxu1 %v15089_v58 }
0x1669   :  { %6587 = vmatpush1.bf16.msra.mxu0 %v14880_v55  ;;  %11306 = vmatprep.subr.bf16.mxu1 %v16652_v6 }
0x166a   :  { %6588 = vmatprep.subr.bf16.mxu0 %v16746_v22  ;;  %v16752_v22 = vld [vmem:[#allocation53_spill] sm:$0xff] }
0x166c   :  { %11308 = vmatpush3.bf16.msra.mxu1 %v15099_v15 }
0x166d   :  { %6589 = vmatpush1.bf16.msra.mxu0 %v16747_v57  ;;  %11309 = vmatprep.subr.bf16.mxu1 %v16652_v6 }
0x166e   :  { %6599 = vmatprep.subr.bf16.mxu0 %v16748_v51 }
0x1670   :  { %11311 = vmatpush3.bf16.msra.mxu1 %v15109_v21 }
0x1671   :  { %11312 = vmatprep.subr.bf16.mxu1 %v16652_v6 }
0x1674   :  { %11314 = vmatpush3.bf16.msra.mxu1 %v15119_v42 }
0x1675   :  { %11315 = vmatprep.subr.bf16.mxu1 %v16652_v6 }
0x1678   :  { %11317 = vmatpush3.bf16.msra.mxu1 %v15129_v35 }
0x1679   :  { %11318 = vmatprep.subr.bf16.mxu1 %v16652_v6 }
0x167c   :  { %11320 = vmatpush3.bf16.msra.mxu1 %v15139_v23 }
0x167d   :  { %11321 = vmatprep.subr.bf16.mxu1 %v16652_v6 }
0x1680   :  { %11323 = vmatpush3.bf16.msra.mxu1 %v15152_v36 }
0x1681   :  { %6640 = vmatprep.subr.bf16.mxu1 %v16752_v22  ;;  %v16781_v22 = vld [vmem:[#allocation42_spill] sm:$0xff] }
0x1703   :  { %v5900_v61 = vpop.f32.mrb[52].mxu0 }
0x1704   :  { %v5901_v19 = vadd.f32 %v15069_v8, %v5900_v61  ;;  %v11030_v43 = vpop.f32.mrb[53].mxu0 }
0x1705   :  { %v5903_v52 = vpop.f32.mrb[54].mxu0 }
0x1706   :  { %5907 = vst [vmem:[#allocation7 + $0x18] sm:$0xff] %v5901_v19  ;;  %5908 = vmax.xlane.f32.xlu1 %v5901_v19  ;;  %v11031_v62 = vpop.f32.mrb[55].mxu0  ;;  %v16753_v52 = vmov 1.0  }
0x1793   :  { %v5909_v55 = vpop.xlane.xlu1 %5908 }
0x1794   :  { %vm5910_vm2 = vcmp.eq.f32.partialorder %v5901_v19, %v5909_v55  ;;  %v16754_v55 = vld [vmem:[#allocation51_spill] sm:$0xff] }
0x1795   :  { %v5911_v33 = vsel %vm5910_vm2, %v16749_v9, 128 }
0x1796   :  { %v5913_v53 = vshra.s32 %v5911_v33, 16  ;;  %v5912_v12 = vand.u32 65535, %v5911_v33 }
0x1798   :  { %v5915_v46 = vcvt.s32.f32 %v5913_v53  ;;  %v5914_v10 = vcvt.s32.f32 %v5912_v12  ;;  %v16755_v53 = vld [vmem:[#allocation55_spill] sm:$0xff]  ;;  %v16771_v12 = vld [vmem:[#allocation32_spill] sm:$0xff] }
0x179a   :  { %5916 = vmin.xlane.f32.xlu0 %v5915_v46 }
0x179e   :  { %6028 = vadd.xlane.f32.xlu0 %v6027_v44  ;;  %v16757_v44 = vld [vmem:[#allocation20_spill] sm:$0xff] }
0x1827   :  { %v5917_v24 = vpop.xlane.xlu0 %5916 }
0x1828   :  { %vm5918_vm3 = vcmp.eq.f32.partialorder %v5915_v46, %v5917_v24  ;;  %v5923_v57 = vcvt.f32.s32 %v5917_v24  ;;  %v16772_v24 = vld [vmem:[#allocation33_spill] sm:$0xff] }
0x1829   :  { %v5919_v31 = vsel %vm5918_vm3, %v5914_v10, inf  ;;  %v16773_v10 = vld [vmem:[#allocation34_spill] sm:$0xff] }
0x182a   :  { %5920 = vmin.xlane.f32.xlu0 %v5919_v31  ;;  %v5924_v61 = vshll.u32 %v5923_v57, 16  ;;  %v16774_v31 = vld [vmem:[#allocation35_spill] sm:$0xff] }
0x182b   :  { %v6029_v17 = vpop.xlane.xlu0 %6028  ;;  %v16782_v57 = vld [vmem:[#allocation43_spill] sm:$0xff] }
0x182c   :  { %v6030_v1 = vadd.f32 %v6029_v17, %v16751_v25  ;;  %v16775_v17 = vld [vmem:[#allocation36_spill] sm:$0xff] }
0x182e   :  { %v6031_v48 = vmax.f32 %v6030_v1, 0.0  ;;  %v16776_v1 = vld [vmem:[#allocation37_spill] sm:$0xff] }
0x1830   :  { %v6032_v18 = vsel %vm3174_vm9, %v6031_v48, -inf }
0x1831   :  { %6033 = vmax.xlane.f32.xlu1 %v6032_v18  ;;  %v16778_v18 = vld [vmem:[#allocation40_spill] sm:$0xff] }
0x18b7   :  { %v5921_v51 = vpop.xlane.xlu0 %5920 }
0x18b8   :  { %v5922_v19 = vcvt.f32.s32 %v5921_v51  ;;  %v16783_v51 = vld [vmem:[#allocation45_spill] sm:$0xff] }
0x18ba   :  { %v5925_v43 = vadd.s32 %v5924_v61, %v5922_v19  ;;  %v16784_v61 = vld [vmem:[#allocation47_spill] sm:$0xff]  ;;  %v16785_v19 = vld [vmem:[#allocation50_spill] sm:$0xff] }
0x18bc   :  { %vm5926_vm4 = vcmp.eq.s32.totalorder %v16749_v9, %v5925_v43 }
0x18bd   :  { %11065 = vmatmul.mubr.msk.f32.vlgmr.msra.gmra.mrb[56].mxu1 %vm5926_vm4, %v16753_v52 }
0x18be   :  { %v6034_v62 = vpop.xlane.xlu1 %6033  ;;  %6672 = vmatprep.mubr.bf16.mxu1 %v15030_v14  ;;  %6641 = vmatpush1.bf16.msra.mxu1 %v16754_v55 }
0x18bf   :  { %v6035_v33 = vsub.f32 %v6031_v48, %v6034_v62  ;;  %6642 = vmatprep.subr.bf16.mxu1 %v16755_v53  ;;  %v16777_v48 = vld [vmem:[#allocation38_spill] sm:$0xff]  ;;  %v16787_v53 = vmov 3  }
0x18c1   :  { %v6036_v46 = vmul.f32 1.442695, %v6035_v33  ;;  %v16786_v33 = vmov 2  }
0x18c2   :  { %6643 = vmatpush1.bf16.msra.mxu1 %v16756_v26  ;;  %v16789_v26 = vmov 5  }
0x18c3   :  { %12371 = vpow2.f32 %v6036_v46  ;;  %6644 = vmatprep.subr.bf16.mxu1 %v16757_v44  ;;  %v16788_v46 = vmov 4   ;;  %v16790_v44 = vmov 6  }
0x18c6   :  { %6645 = vmatpush1.bf16.msra.mxu1 %v16758_v50  ;;  %v16791_v50 = vmov 7  }
0x18c7   :  { %6646 = vmatprep.subr.bf16.mxu1 %v16759_v30 }
0x18ca   :  { %6647 = vmatpush1.bf16.msra.mxu1 %v16760_v45 }
0x18cb   :  { %6648 = vmatprep.subr.bf16.mxu1 %v16761_v13 }
0x18cd   :  { %v12372_v14 = vpop.eup %12371 }
0x18ce   :  { %v6038_v38 = vsel %vm3174_vm9, %v12372_v14, 0.0  ;;  %6649 = vmatpush1.bf16.msra.mxu1 %v16762_v40 }
0x18cf   :  { %6039 = vadd.xlane.f32.xlu0 %v6038_v38  ;;  %6650 = vmatprep.subr.bf16.mxu1 %v16763_v49 }
0x18d2   :  { %6651 = vmatpush1.bf16.msra.mxu1 %v16764_v37 }
0x18d3   :  { %6652 = vmatprep.subr.bf16.mxu1 %v16765_v29  ;;  %v16792_v29 = vld [vmem:[#allocation12_spill] sm:$0xff] }
0x18d6   :  { %6653 = vmatpush1.bf16.msra.mxu1 %v16766_v41 }
0x18d7   :  { %6654 = vmatprep.subr.bf16.mxu1 %v16767_v7  ;;  %v16793_v7 = vld [vmem:[#allocation14_spill] sm:$0xff] }
0x18da   :  { %6655 = vmatpush1.bf16.msra.mxu1 %v16768_v2 }
0x18db   :  { %6656 = vmatprep.subr.bf16.mxu1 %v16769_v47 }
0x18de   :  { %6657 = vmatpush1.bf16.msra.mxu1 %v16770_v4 }
0x18df   :  { %6658 = vmatprep.subr.bf16.mxu1 %v16771_v12 }
0x18e2   :  { %6659 = vmatpush1.bf16.msra.mxu1 %v16772_v24 }
0x18e3   :  { %6660 = vmatprep.subr.bf16.mxu1 %v16773_v10 }
0x18e6   :  { %6661 = vmatpush1.bf16.msra.mxu1 %v16774_v31 }
0x18e7   :  { %6662 = vmatprep.subr.bf16.mxu1 %v16775_v17 }
0x18ea   :  { %6663 = vmatpush1.bf16.msra.mxu1 %v16776_v1 }
0x18eb   :  { %6664 = vmatprep.subr.bf16.mxu1 %v16777_v48 }
0x18ee   :  { %6665 = vmatpush1.bf16.msra.mxu1 %v16778_v18 }
0x18ef   :  { %6666 = vmatprep.subr.bf16.mxu1 %v16779_v32 }
0x18f2   :  { %6667 = vmatpush1.bf16.msra.mxu1 %v16780_v16 }
0x18f3   :  { %6668 = vmatprep.subr.bf16.mxu1 %v16781_v22 }
0x18f6   :  { %6669 = vmatpush1.bf16.msra.mxu1 %v16782_v57 }
0x18f7   :  { %6670 = vmatprep.subr.bf16.mxu1 %v16783_v51 }
0x18fa   :  { %6671 = vmatpush1.bf16.msra.mxu1 %v16784_v61 }
0x18fb   :  { %6681 = vmatprep.subr.bf16.mxu1 %v16785_v19  ;;  %v10380_v19 = vld [vmem:[%s16388_s2 + $0x18] sm:$0xff] }
0x195c   :  { %v6040_v43 = vpop.xlane.xlu0 %6039 }
0x195d   :  { %12373 = vrcp.f32 %v6040_v43  ;;  %v6021_v43 = vstv %s6018_s15 }
0x1967   :  { %v12374_v62 = vpop.eup %12373 }
0x1968   :  { %v6042_v55 = vmul.f32 %v12374_v62, %v12372_v14  ;;  %v6024_v62 = vstv %s6023_s16 }
0x196a   :  { %6052 = vperm.xlu0 %11517, %v6042_v55   ;;  %6046 = vperm.xlu1 %11516, %v6042_v55  }
0x196e   :  { %11518 = vset.pattern.permute.xlu1 %v16786_v33 }
0x196f   :  { %6059 = vperm.xlu1 %11518, %v6042_v55  }
0x1973   :  { %11519 = vset.pattern.permute.xlu1 %v16787_v53 }
0x1974   :  { %6066 = vperm.xlu1 %11519, %v6042_v55  }
0x1978   :  { %11520 = vset.pattern.permute.xlu1 %v16788_v46 }
0x1979   :  { %6073 = vperm.xlu1 %11520, %v6042_v55  }
0x197d   :  { %11521 = vset.pattern.permute.xlu1 %v16789_v26 }
0x197e   :  { %6080 = vperm.xlu1 %11521, %v6042_v55  }
0x1982   :  { %11522 = vset.pattern.permute.xlu1 %v16790_v44 }
0x1983   :  { %6087 = vperm.xlu1 %11522, %v6042_v55  }
0x1987   :  { %11523 = vset.pattern.permute.xlu1 %v16791_v50 }
0x1988   :  { %6094 = vperm.xlu1 %11523, %v6042_v55   ;;  %v6022_v55 = vmul.f32 %v10380_v19, %v6021_v43 }
0x198c   :  { %11524 = vset.pattern.permute.xlu1 %v16651_v3 }
0x1990   :  { %v6011_v30 = vpop.f32.mrb[56].mxu1 }
0x1991   :  { %v11066_v45 = vpop.f32.mrb[57].mxu1 }
0x1992   :  { %v6025_v45 = vmul.f32 %v6024_v62, %v6011_v30 }
0x19e9   :  { %v6047_v13 = vpop.permute.xlu1 %6046  ;;  %v6053_v40 = vpop.permute.xlu0 %6052 }
0x19ea   :  { %v6055_v37 = vmul.f32 %v6053_v40, %v16704_v34  ;;  %v6049_v41 = vmul.f32 %v6047_v13, %v16792_v29  ;;  %v16794_v13 = vld [vmem:[#allocation49_spill] sm:$0xff]  ;;  %v6026_v40 = vadd.f32 %v6025_v45, %v6022_v55 }
0x19ec   :  { %v6056_v4 = vadd.f32 %v6055_v37, %v6049_v41  ;;  %v16798_v37 = vld [vmem:[#allocation11_spill] sm:$0xff] }
0x19ee   :  { %v6060_v14 = vpop.permute.xlu1 %6059 }
0x19ef   :  { %v6062_v2 = vmul.f32 %v6060_v14, %v16793_v7  ;;  %v16795_v14 = vld [vmem:[#allocation52_spill] sm:$0xff] }
0x19f1   :  { %v6063_v24 = vadd.f32 %v6062_v2, %v6056_v4 }
0x19f3   :  { %v6067_v38 = vpop.permute.xlu1 %6066 }
0x19f4   :  { %v6069_v12 = vmul.f32 %v6067_v38, %v16650_v63  ;;  %v16796_v38 = vld [vmem:[#allocation54_spill] sm:$0xff] }
0x19f6   :  { %v6070_v31 = vadd.f32 %v6069_v12, %v6063_v24 }
0x19f8   :  { %v6074_v49 = vpop.permute.xlu1 %6073 }
0x19f9   :  { %v6076_v10 = vmul.f32 %v6074_v49, %v13479_v11  ;;  %v15218_v49 = vld [vmem:[#allocation7] sm:$0xff] }
0x19fb   :  { %v6077_v48 = vadd.f32 %v6076_v10, %v6070_v31 }
0x19fd   :  { %v6081_v47 = vpop.permute.xlu1 %6080 }
0x19fe   :  { %v6083_v17 = vmul.f32 %v6081_v47, %v13541_v20 }
0x1a00   :  { %v6084_v32 = vadd.f32 %v6083_v17, %v6077_v48 }
0x1a02   :  { %v6088_v1 = vpop.permute.xlu1 %6087 }
0x1a03   :  { %v6090_v18 = vmul.f32 %v6088_v1, %v13637_v60 }
0x1a05   :  { %v6091_v22 = vadd.f32 %v6090_v18, %v6084_v32 }
0x1a07   :  { %v6095_v16 = vpop.permute.xlu1 %6094 }
0x1a08   :  { %v6097_v57 = vmul.f32 %v6095_v16, %v13698_v56 }
0x1a0a   :  { %v6098_v51 = vadd.f32 %v6097_v57, %v6091_v22 }
0x1a0c   :  { %v6099_v61 = vpack.c.bf16 %v6098_v51, %v6098_v51 }
0x1a0e   :  { %6591 = vmatmul.mubr.bf16.vlgmr.msra.gmra.mrb[56].mxu0 %v6099_v61  ;;  %6673 = vmatmul.mubr.bf16.vlgmr.msra.gmra.mrb[60].mxu1 %v6099_v61 }
0x1a0f   :  { %6600 = vmatpush1.bf16.msra.mxu0 %v14941_v28  ;;  %6682 = vmatpush1.bf16.msra.mxu1 %v14946_v39  ;;  %v6100_v28 = vpack.c.bf16 %v6026_v40, %v6026_v40  ;;  %v11935_v39 = vld [vmem:[%s16397_s11] sm:$0xff]  }
0x1a10   :  { %6601 = vmatprep.subr.bf16.mxu0 %v14951_v27  ;;  %6683 = vmatprep.subr.bf16.mxu1 %v16794_v13  ;;  %v11936_v27 = vld [vmem:[%s16397_s11 + $0x8] sm:$0xff]  }
0x1a11   :  { %6631 = vmatprep.mubr.bf16.mxu0 %v16651_v3  ;;  %6713 = vmatprep.mubr.bf16.mxu1 %v16651_v3 }
0x1a13   :  { %6602 = vmatpush1.bf16.msra.mxu0 %v16795_v14  ;;  %6684 = vmatpush1.bf16.msra.mxu1 %v16796_v38 }
0x1a14   :  { %11067 = vmatprep.subr.bf16.mxu0 %v15218_v49  ;;  %11324 = vmatprep.subr.bf16.mxu1 %v16652_v6 }
0x1a1a   :  { %10453 = vmatmul.mubr.msk.bf16.vlgmr.msra.gmra.mrb[56].mxu0 %vm329_vm0, %v6100_v28  ;;  %10454 = vmatmul.mubr.msk.bf16.vlgmr.msra.gmra.mrb[60].mxu1 %vm329_vm0, %v6100_v28 }
0x1a1b   :  { %11083 = vmatprep.mubr.msk.bf16.mxu0 %vm12548_vm10, %v15218_v49  ;;  %11326 = vmatpush3.bf16.msra.mxu1 %v15083_v59  ;;  %v11937_v59 = vld [vmem:[%s16397_s11 + $0x10] sm:$0xff]  }
0x1a1c   :  { %11327 = vmatprep.subr.bf16.mxu1 %v16652_v6  ;;  %11119 = vmatprep.mubr.msk.f32.mxu1 %vm12548_vm10, %v15218_v49 }
0x1a1d   :  { %11068 = vmatpush3.bf16.msra.mxu0 %v11935_v39 }
0x1a1e   :  { %11069 = vmatprep.subr.bf16.mxu0 %v15218_v49 }
0x1a1f   :  { %11329 = vmatpush3.bf16.msra.mxu1 %v15089_v58  ;;  %v11938_v58 = vld [vmem:[%s16397_s11 + $0x18] sm:$0xff]  }
0x1a20   :  { %11330 = vmatprep.subr.bf16.mxu1 %v16652_v6 }
0x1a21   :  { %11070 = vmatpush3.bf16.msra.mxu0 %v11936_v27 }
0x1a22   :  { %11071 = vmatprep.subr.bf16.mxu0 %v15218_v49 }
0x1a23   :  { %11332 = vmatpush3.bf16.msra.mxu1 %v15099_v15  ;;  %v11939_v15 = vld [vmem:[%s16397_s11 + $0x20] sm:$0xff]  }
0x1a24   :  { %11333 = vmatprep.subr.bf16.mxu1 %v16652_v6 }
0x1a25   :  { %11072 = vmatpush3.bf16.msra.mxu0 %v11937_v59 }
0x1a26   :  { %11073 = vmatprep.subr.bf16.mxu0 %v15218_v49 }
0x1a27   :  { %11335 = vmatpush3.bf16.msra.mxu1 %v15109_v21  ;;  %v11940_v21 = vld [vmem:[%s16397_s11 + $0x28] sm:$0xff]  }
0x1a28   :  { %11336 = vmatprep.subr.bf16.mxu1 %v16652_v6 }
0x1a29   :  { %11074 = vmatpush3.bf16.msra.mxu0 %v11938_v58 }
0x1a2a   :  { %11075 = vmatprep.subr.bf16.mxu0 %v15218_v49 }
0x1a2b   :  { %11338 = vmatpush3.bf16.msra.mxu1 %v15119_v42  ;;  %v11941_v42 = vld [vmem:[%s16397_s11 + $0x30] sm:$0xff]  }
0x1a2c   :  { %11339 = vmatprep.subr.bf16.mxu1 %v16652_v6 }
0x1a2d   :  { %11076 = vmatpush3.bf16.msra.mxu0 %v11939_v15 }
0x1a2e   :  { %11077 = vmatprep.subr.bf16.mxu0 %v15218_v49 }
0x1a2f   :  { %11341 = vmatpush3.bf16.msra.mxu1 %v15129_v35  ;;  %v11942_v35 = vld [vmem:[%s16397_s11 + $0x38] sm:$0xff]  }
0x1a30   :  { %11342 = vmatprep.subr.bf16.mxu1 %v16652_v6 }
0x1a31   :  { %11078 = vmatpush3.bf16.msra.mxu0 %v11940_v21 }
0x1a32   :  { %11079 = vmatprep.subr.bf16.mxu0 %v15218_v49 }
0x1a33   :  { %11344 = vmatpush3.bf16.msra.mxu1 %v15139_v23  ;;  %v6173_v23 = vld [vmem:[%s16396_s10] sm:$0xf] }
0x1a34   :  { %11345 = vmatprep.subr.bf16.mxu1 %v16652_v6  ;;  %v6182_v41 = vrot.slane %v6173_v23, %v16798_v37  ;;  %v6190_v16 = vrot.slane %v6173_v23, %v12877_v54  ;;  %v6186_v57 = vrot.slane %v6173_v23, %v12880_v0 }
0x1a35   :  { %11080 = vmatpush3.bf16.msra.mxu0 %v11941_v42 }
0x1a36   :  { %11081 = vmatprep.subr.bf16.mxu0 %v15218_v49 }
0x1a37   :  { %11347 = vmatpush3.bf16.msra.mxu1 %v15152_v36  ;;  %v16797_v36 = vld [vmem:[#allocation10_spill] sm:$0xff] }
0x1a38   :  { %v6178_v30 = vrot.slane %v6173_v23, %v16797_v36 }
0x1a39   :  { %11082 = vmatpush3.bf16.msra.mxu0 %v11942_v35 }
0x1aed   :  { %v6633_v2 = vpop.f32.mrb[56].mxu0  ;;  %v6715_v47 = vpop.f32.mrb[60].mxu1 }
0x1aee   :  { %v11412_v4 = vadd.f32 %v6633_v2, %v6178_v30  ;;  %v6635_v12 = vpop.f32.mrb[57].mxu0  ;;  %v6717_v24 = vpop.f32.mrb[61].mxu1  ;;  %v11414_v61 = vadd.f32 %v6715_v47, %v6186_v57 }
0x1aef   :  { %v11413_v10 = vadd.f32 %v6635_v12, %v6182_v41  ;;  %v6637_v31 = vpop.f32.mrb[58].mxu0  ;;  %v6719_v17 = vpop.f32.mrb[62].mxu1  ;;  %v11415_v22 = vadd.f32 %v6717_v24, %v6190_v16  ;;  %v15293_v41 = vld [vmem:[%s16392_s6] ss:$0 sm:$0xff] }
0x1af0   :  { %v10455_v1 = vmul.f32 -1.442695, %v11412_v4  ;;  %v6638_v48 = vpop.f32.mrb[59].mxu0  ;;  %v6720_v18 = vpop.f32.mrb[63].mxu1  ;;  %16799 = vst [vmem:[#allocation56_spill] sm:$0xff] %v15293_v41 }
0x1af1   :  { %v10456_v32 = vmul.f32 -1.442695, %v11413_v10  ;;  %v10457_v51 = vmul.f32 -1.442695, %v11415_v22 }
0x1af2   :  { %12375 = vpow2.f32 %v10455_v1 }
0x1af3   :  { %12377 = vpow2.f32 %v10456_v32 }
0x1af4   :  { %12379 = vpow2.f32 %v10457_v51 }
0x1af5   :  { %12381 = vtanh.f32 %v11414_v61 }
0x1afc   :  { %v12376_v19 = vpop.eup %12375 }
0x1afd   :  { %v12378_v43 = vpop.eup %12377  ;;  %v6725_v62 = vadd.f32 1.0, %v12376_v19  ;;  %v15306_v19 = vld [vmem:[%s16395_s9] ss:$16 sps:$4 sm:$0xff]  }
0x1afe   :  { %v6731_v55 = vadd.f32 1.0, %v12378_v43  ;;  %v12380_v45 = vpop.eup %12379  ;;  %v15311_v43 = vld [vmem:[%s16395_s9 + $0x4] ss:$16 sps:$4 sm:$0xff]  }
0x1aff   :  { %12383 = vrcp.f32 %v6725_v62  ;;  %v12382_v13 = vpop.eup %12381  ;;  %v6738_v28 = vadd.f32 1.0, %v12380_v45  ;;  %v15316_v62 = vld [vmem:[%s16395_s9 + $0xc] ss:$16 sps:$4 sm:$0xff]   ;;  %7510 = vmatprep.subr.bf16.mxu0 %v15311_v43  ;;  %v15329_v45 = vld [vmem:[%s16395_s9 + $0x20] ss:$16 sps:$4 sm:$0xff]  }
0x1b00   :  { %12385 = vrcp.f32 %v6731_v55  ;;  %16800 = vst [vmem:[#allocation58_spill] sm:$0xff] %v15316_v62  ;;  %v15321_v55 = vld [vmem:[%s16395_s9 + $0x24] ss:$16 sps:$4 sm:$0xff]   ;;  %7592 = vmatprep.subr.bf16.mxu1 %v15316_v62 }
0x1b01   :  { %12387 = vrcp.f32 %v6738_v28  ;;  %v15359_v28 = vld [vmem:[%s16395_s9 + $0x84] ss:$16 sps:$4 sm:$0xff]  }
0x1b09   :  { %v12384_v14 = vpop.eup %12383 }
0x1b0a   :  { %v12386_v38 = vpop.eup %12385  ;;  %v6742_v40 = vmul.f32 %v12384_v14, %v12382_v13  ;;  %v15335_v13 = vld [vmem:[%s16395_s9 + $0x44] ss:$16 sps:$4 sm:$0xff]   ;;  %v15341_v14 = vld [vmem:[%s16395_s9 + $0x40] ss:$16 sps:$4 sm:$0xff]  }
0x1b0b   :  { %v6741_v39 = vmul.f32 %v12386_v38, %v15027_v5  ;;  %v12388_v59 = vpop.eup %12387  ;;  %v15347_v38 = vld [vmem:[%s16395_s9 + $0x64] ss:$16 sps:$4 sm:$0xff]  }
0x1b0d   :  { %v15282_v27 = vadd.f32 %v6742_v40, %v6741_v39  ;;  %v15353_v40 = vld [vmem:[%s16395_s9 + $0x60] ss:$16 sps:$4 sm:$0xff]  }
0x1b0e   :  { %v15365_v39 = vld [vmem:[%s16395_s9 + $0x80] ss:$16 sps:$4 sm:$0xff]  }
0x1b0f   :  { %12389 = vtanh.f32 %v15282_v27 }
0x1b19   :  { %v12390_v58 = vpop.eup %12389 }
0x1b1a   :  { %v6745_v15 = vmul.f32 %v12390_v58, %v12388_v59  ;;  %v15371_v59 = vld [vmem:[%s16395_s9 + $0xa4] ss:$16 sps:$4 sm:$0xff]   ;;  %v15377_v58 = vld [vmem:[%s16395_s9 + $0xa0] ss:$16 sps:$4 sm:$0xff]  }
0x1b1c   :  { %v15285_v21 = vpack.c.bf16 %v6745_v15, %v6745_v15  ;;  %v6979_v2 = vmul.f32 %v15293_v41, %v6745_v15  ;;  %v15383_v15 = vld [vmem:[%s16395_s9 + $0xc4] ss:$16 sps:$4 sm:$0xff]  }
0x1b1e   :  { %11084 = vmatmul.mubr.bf16.vlgmr.msra.gmra.mrb[60].mxu0 %v15285_v21 }
0x1b1f   :  { %7542 = vmatprep.mubr.bf16.mxu0 %v15285_v21  ;;  %7511 = vmatpush1.bf16.msra.mxu0 %v15306_v19 }
0x1b20   :  { %7512 = vmatprep.subr.bf16.mxu0 %v15321_v55 }
0x1b23   :  { %7513 = vmatpush1.bf16.msra.mxu0 %v15329_v45 }
0x1b24   :  { %7514 = vmatprep.subr.bf16.mxu0 %v15335_v13 }
0x1b27   :  { %7515 = vmatpush1.bf16.msra.mxu0 %v15341_v14 }
0x1b28   :  { %7516 = vmatprep.subr.bf16.mxu0 %v15347_v38 }
0x1b2b   :  { %7517 = vmatpush1.bf16.msra.mxu0 %v15353_v40 }
0x1b2c   :  { %7518 = vmatprep.subr.bf16.mxu0 %v15359_v28 }
0x1b2f   :  { %7519 = vmatpush1.bf16.msra.mxu0 %v15365_v39 }
0x1b30   :  { %7520 = vmatprep.subr.bf16.mxu0 %v15371_v59 }
0x1b33   :  { %7521 = vmatpush1.bf16.msra.mxu0 %v15377_v58 }
0x1b34   :  { %7522 = vmatprep.subr.bf16.mxu0 %v15383_v15 }
0x1bf1   :  { %v6852_v42 = vpop.f32.mrb[60].mxu0 }
0x1bf2   :  { %v6853_v35 = vadd.f32 %v15069_v8, %v6852_v42  ;;  %v11085_v23 = vpop.f32.mrb[61].mxu0  ;;  %v15389_v42 = vld [vmem:[%s16395_s9 + $0xc0] ss:$16 sps:$4 sm:$0xff]  }
0x1bf3   :  { %v6855_v30 = vpop.f32.mrb[62].mxu0  ;;  %7523 = vmatpush1.bf16.msra.mxu0 %v15389_v42  ;;  %v15401_v23 = vld [vmem:[%s16395_s9 + $0xe0] ss:$16 sps:$4 sm:$0xff]  }
0x1bf4   :  { %6859 = vst [vmem:[#allocation7 + $0x20] sm:$0xff] %v6853_v35  ;;  %6860 = vmax.xlane.f32.xlu1 %v6853_v35  ;;  %v11086_v5 = vpop.f32.mrb[63].mxu0  ;;  %v15407_v30 = vld [vmem:[%s16395_s9 + $0x104] ss:$16 sps:$4 sm:$0xff]  }
0x1bf5   :  { %v15413_v5 = vld [vmem:[%s16395_s9 + $0x100] ss:$16 sps:$4 sm:$0xff]  }
0x1bf8   :  { %6980 = vadd.xlane.f32.xlu1 %v6979_v2 }
0x1c81   :  { %v6861_v47 = vpop.xlane.xlu1 %6860 }
0x1c82   :  { %vm6862_vm5 = vcmp.eq.f32.partialorder %v6853_v35, %v6861_v47  ;;  %v15395_v35 = vld [vmem:[%s16395_s9 + $0xe4] ss:$16 sps:$4 sm:$0xff]  }
0x1c83   :  { %v6863_v4 = vsel %vm6862_vm5, %v16749_v9, 128  ;;  %7524 = vmatprep.subr.bf16.mxu0 %v15395_v35 }
0x1c84   :  { %v6865_v12 = vshra.s32 %v6863_v4, 16  ;;  %v6864_v1 = vand.u32 65535, %v6863_v4  ;;  %7525 = vmatpush1.bf16.msra.mxu0 %v15401_v23 }
0x1c85   :  { %v6981_v24 = vpop.xlane.xlu1 %6980  ;;  %7526 = vmatprep.subr.bf16.mxu0 %v15407_v30 }
0x1c86   :  { %v6982_v8 = vadd.f32 %v6981_v24, %v16751_v25  ;;  %v6867_v10 = vcvt.s32.f32 %v6865_v12  ;;  %v6866_v18 = vcvt.s32.f32 %v6864_v1  ;;  %v15452_v1 = vld [vmem:[%s16395_s9 + $0x6c] ss:$16 sps:$4 sm:$0xff]  }
0x1c87   :  { %16806 = vst [vmem:[#allocation53_spill] sm:$0xff] %v15452_v1 }
0x1c88   :  { %v6983_v31 = vmax.f32 %v6982_v8, 0.0  ;;  %6868 = vmin.xlane.f32.xlu0 %v6867_v10  ;;  %7527 = vmatpush1.bf16.msra.mxu0 %v15413_v5  ;;  %v15420_v8 = vld [vmem:[%s16395_s9 + $0x8] ss:$16 sps:$4 sm:$0xff]  }
0x1c89   :  { %16801 = vst [vmem:[#allocation59_spill] sm:$0xff] %v15420_v8 }
0x1c8a   :  { %v6984_v17 = vsel %vm3174_vm9, %v6983_v31, -inf }
0x1c8b   :  { %6985 = vmax.xlane.f32.xlu1 %v6984_v17  ;;  %v15440_v17 = vld [vmem:[%s16395_s9 + $0x4c] ss:$16 sps:$4 sm:$0xff]  }
0x1c8c   :  { %16804 = vst [vmem:[#allocation48_spill] sm:$0xff] %v15440_v17 }
0x1d15   :  { %v6869_v48 = vpop.xlane.xlu0 %6868 }
0x1d16   :  { %vm6870_vm6 = vcmp.eq.f32.partialorder %v6867_v10, %v6869_v48  ;;  %v6875_v2 = vcvt.f32.s32 %v6869_v48  ;;  %v15425_v10 = vld [vmem:[%s16395_s9 + $0x2c] ss:$16 sps:$4 sm:$0xff]   ;;  %v15458_v48 = vld [vmem:[%s16395_s9 + $0x68] ss:$16 sps:$4 sm:$0xff]  }
0x1d17   :  { %v6871_v32 = vsel %vm6870_vm6, %v6866_v18, inf  ;;  %16802 = vst [vmem:[#allocation44_spill] sm:$0xff] %v15425_v10  ;;  %16807 = vst [vmem:[#allocation51_spill] sm:$0xff] %v15458_v48  ;;  %v15464_v18 = vld [vmem:[%s16395_s9 + $0x8c] ss:$16 sps:$4 sm:$0xff]  }
0x1d18   :  { %6872 = vmin.xlane.f32.xlu0 %v6871_v32  ;;  %v6986_v16 = vpop.xlane.xlu1 %6985  ;;  %v6876_v4 = vshll.u32 %v6875_v2, 16  ;;  %16808 = vst [vmem:[#allocation55_spill] sm:$0xff] %v15464_v18 }
0x1d19   :  { %v6987_v22 = vsub.f32 %v6983_v31, %v6986_v16  ;;  %v15434_v31 = vld [vmem:[%s16395_s9 + $0x28] ss:$16 sps:$4 sm:$0xff]  }
0x1d1a   :  { %16803 = vst [vmem:[#allocation46_spill] sm:$0xff] %v15434_v31  ;;  %v15470_v16 = vld [vmem:[%s16395_s9 + $0x88] ss:$16 sps:$4 sm:$0xff]  }
0x1d1b   :  { %v6988_v57 = vmul.f32 1.442695, %v6987_v22  ;;  %16809 = vst [vmem:[#allocation57_spill] sm:$0xff] %v15470_v16  ;;  %v15476_v22 = vld [vmem:[%s16395_s9 + $0xac] ss:$16 sps:$4 sm:$0xff]  }
0x1d1c   :  { %16810 = vst [vmem:[#allocation20_spill] sm:$0xff] %v15476_v22 }
0x1d1d   :  { %12391 = vpow2.f32 %v6988_v57  ;;  %v15482_v57 = vld [vmem:[%s16395_s9 + $0xa8] ss:$16 sps:$4 sm:$0xff]  }
0x1d1e   :  { %16811 = vst [vmem:[#allocation15_spill] sm:$0xff] %v15482_v57 }
0x1d27   :  { %v15299_v51 = vpop.eup %12391 }
0x1d28   :  { %v6990_v61 = vsel %vm3174_vm9, %v15299_v51, 0.0 }
0x1d29   :  { %6991 = vadd.xlane.f32.xlu0 %v6990_v61  ;;  %v15488_v61 = vld [vmem:[%s16395_s9 + $0xcc] ss:$16 sps:$4 sm:$0xff]  }
0x1d2a   :  { %16812 = vst [vmem:[#allocation17_spill] sm:$0xff] %v15488_v61 }
0x1da5   :  { %v6873_v47 = vpop.xlane.xlu0 %6872 }
0x1da6   :  { %v6874_v12 = vcvt.f32.s32 %v6873_v47  ;;  %v15494_v47 = vld [vmem:[%s16395_s9 + $0xc8] ss:$16 sps:$4 sm:$0xff]  }
0x1da7   :  { %16813 = vst [vmem:[#allocation18_spill] sm:$0xff] %v15494_v47 }
0x1da8   :  { %v6877_v24 = vadd.s32 %v6876_v4, %v6874_v12  ;;  %v15501_v12 = vld [vmem:[%s16395_s9 + $0xec] ss:$16 sps:$4 sm:$0xff]  }
0x1da9   :  { %16814 = vst [vmem:[#allocation19_spill] sm:$0xff] %v15501_v12 }
0x1daa   :  { %vm6878_vm7 = vcmp.eq.s32.totalorder %v16749_v9, %v6877_v24  ;;  %v15506_v24 = vld [vmem:[%s16395_s9 + $0x124] ss:$16 sps:$4 sm:$0xff]  }
0x1dab   :  { %11120 = vmatmul.mubr.msk.f32.vlgmr.msra.gmra.mrb[58].mxu1 %vm6878_vm7, %v16753_v52  ;;  %7528 = vmatprep.subr.bf16.mxu0 %v15506_v24 }
0x1dac   :  { %7624 = vmatprep.mubr.bf16.mxu1 %v15285_v21  ;;  %7593 = vmatpush1.bf16.msra.mxu1 %v15420_v8  ;;  %v15446_v21 = vld [vmem:[%s16395_s9 + $0x48] ss:$16 sps:$4 sm:$0xff]  }
0x1dad   :  { %7594 = vmatprep.subr.bf16.mxu1 %v15425_v10  ;;  %16805 = vst [vmem:[#allocation16_spill] sm:$0xff] %v15446_v21 }
0x1db0   :  { %7595 = vmatpush1.bf16.msra.mxu1 %v15434_v31 }
0x1db1   :  { %7596 = vmatprep.subr.bf16.mxu1 %v15440_v17 }
0x1db4   :  { %7597 = vmatpush1.bf16.msra.mxu1 %v15446_v21 }
0x1db5   :  { %7598 = vmatprep.subr.bf16.mxu1 %v15452_v1  ;;  %v15701_v1 = vld [vmem:[%s16395_s9 + $0x1e8] ss:$16 sps:$4 sm:$0xff]  }
0x1db6   :  { %v6992_v32 = vpop.xlane.xlu0 %6991  ;;  %16834 = vst [vmem:[#allocation39_spill] sm:$0xff] %v15701_v1 }
0x1db7   :  { %12393 = vrcp.f32 %v6992_v32  ;;  %v15511_v32 = vld [vmem:[%s16395_s9 + $0x120] ss:$16 sps:$4 sm:$0xff]  }
0x1db8   :  { %7599 = vmatpush1.bf16.msra.mxu1 %v15458_v48  ;;  %7529 = vmatpush1.bf16.msra.mxu0 %v15511_v32  ;;  %v15681_v48 = vld [vmem:[%s16395_s9 + $0x204] ss:$16 sps:$4 sm:$0xff]  }
0x1db9   :  { %7600 = vmatprep.subr.bf16.mxu1 %v15464_v18  ;;  %v15676_v18 = vld [vmem:[%s16395_s9 + $0x1cc] ss:$16 sps:$4 sm:$0xff]   ;;  %16831 = vst [vmem:[#allocation38_spill] sm:$0xff] %v15681_v48 }
0x1dba   :  { %16830 = vst [vmem:[#allocation37_spill] sm:$0xff] %v15676_v18 }
0x1dbc   :  { %7601 = vmatpush1.bf16.msra.mxu1 %v15470_v16  ;;  %v15632_v16 = vld [vmem:[%s16395_s9 + $0x18c] ss:$16 sps:$4 sm:$0xff]  }
0x1dbd   :  { %7602 = vmatprep.subr.bf16.mxu1 %v15476_v22  ;;  %v15601_v22 = vld [vmem:[%s16395_s9 + $0x1a4] ss:$16 sps:$4 sm:$0xff]   ;;  %16825 = vst [vmem:[#allocation32_spill] sm:$0xff] %v15632_v16 }
0x1dc0   :  { %7603 = vmatpush1.bf16.msra.mxu1 %v15482_v57  ;;  %v15575_v57 = vld [vmem:[%s16395_s9 + $0x184] ss:$16 sps:$4 sm:$0xff]  }
0x1dc1   :  { %v12394_v2 = vpop.eup %12393  ;;  %7604 = vmatprep.subr.bf16.mxu1 %v15488_v61  ;;  %v15535_v61 = vld [vmem:[%s16395_s9 + $0x140] ss:$16 sps:$4 sm:$0xff]  }
0x1dc2   :  { %v6994_v4 = vmul.f32 %v12394_v2, %v15299_v51  ;;  %v15518_v51 = vld [vmem:[%s16395_s9 + $0xe8] ss:$16 sps:$4 sm:$0xff]   ;;  %v15525_v2 = vld [vmem:[%s16395_s9 + $0x144] ss:$16 sps:$4 sm:$0xff]  }
0x1dc3   :  { %16815 = vst [vmem:[#allocation24_spill] sm:$0xff] %v15518_v51  ;;  %7530 = vmatprep.subr.bf16.mxu0 %v15525_v2 }
0x1dc4   :  { %7004 = vperm.xlu0 %11517, %v6994_v4   ;;  %6998 = vperm.xlu1 %11524, %v6994_v4  }
0x1dc5   :  { %7605 = vmatpush1.bf16.msra.mxu1 %v15494_v47  ;;  %v15530_v47 = vld [vmem:[%s16395_s9 + $0x10c] ss:$16 sps:$4 sm:$0xff]   ;;  %7531 = vmatpush1.bf16.msra.mxu0 %v15535_v61 }
0x1dc6   :  { %7606 = vmatprep.subr.bf16.mxu1 %v15501_v12  ;;  %16816 = vst [vmem:[#allocation23_spill] sm:$0xff] %v15530_v47  ;;  %v15544_v12 = vld [vmem:[%s16395_s9 + $0x108] ss:$16 sps:$4 sm:$0xff]  }
0x1dc7   :  { %16817 = vst [vmem:[#allocation25_spill] sm:$0xff] %v15544_v12 }
0x1dc8   :  { %11527 = vset.pattern.permute.xlu0 %v16788_v46  ;;  %11525 = vset.pattern.permute.xlu1 %v16786_v33  ;;  %v15551_v46 = vld [vmem:[%s16395_s9 + $0x164] ss:$16 sps:$4 sm:$0xff]   ;;  %v15561_v33 = vld [vmem:[%s16395_s9 + $0x160] ss:$16 sps:$4 sm:$0xff]  }
0x1dc9   :  { %7025 = vperm.xlu0 %11527, %v6994_v4   ;;  %7011 = vperm.xlu1 %11525, %v6994_v4  }
0x1dca   :  { %7607 = vmatpush1.bf16.msra.mxu1 %v15518_v51  ;;  %v15556_v51 = vld [vmem:[%s16395_s9 + $0x12c] ss:$16 sps:$4 sm:$0xff]   ;;  %7532 = vmatprep.subr.bf16.mxu0 %v15551_v46 }
0x1dcb   :  { %7608 = vmatprep.subr.bf16.mxu1 %v15530_v47  ;;  %16818 = vst [vmem:[#allocation26_spill] sm:$0xff] %v15556_v51  ;;  %v15569_v47 = vld [vmem:[%s16395_s9 + $0x128] ss:$16 sps:$4 sm:$0xff]   ;;  %7533 = vmatpush1.bf16.msra.mxu0 %v15561_v33 }
0x1dcc   :  { %16819 = vst [vmem:[#allocation27_spill] sm:$0xff] %v15569_v47  ;;  %7534 = vmatprep.subr.bf16.mxu0 %v15575_v57 }
0x1dcd   :  { %11530 = vset.pattern.permute.xlu0 %v16791_v50  ;;  %11526 = vset.pattern.permute.xlu1 %v16787_v53  ;;  %v15581_v50 = vld [vmem:[%s16395_s9 + $0x14c] ss:$16 sps:$4 sm:$0xff]   ;;  %v16821_v53 = vmov 1  }
0x1dce   :  { %7046 = vperm.xlu0 %11530, %v6994_v4   ;;  %7018 = vperm.xlu1 %11526, %v6994_v4   ;;  %16820 = vst [vmem:[#allocation28_spill] sm:$0xff] %v15581_v50 }
0x1dcf   :  { %7609 = vmatpush1.bf16.msra.mxu1 %v15544_v12  ;;  %v15587_v12 = vld [vmem:[%s16395_s9 + $0x180] ss:$16 sps:$4 sm:$0xff]  }
0x1dd0   :  { %7610 = vmatprep.subr.bf16.mxu1 %v15556_v51  ;;  %v15596_v51 = vld [vmem:[%s16395_s9 + $0x148] ss:$16 sps:$4 sm:$0xff]   ;;  %7535 = vmatpush1.bf16.msra.mxu0 %v15587_v12 }
0x1dd1   :  { %16822 = vst [vmem:[#allocation29_spill] sm:$0xff] %v15596_v51  ;;  %7536 = vmatprep.subr.bf16.mxu0 %v15601_v22 }
0x1dd2   :  { %11528 = vset.pattern.permute.xlu1 %v16789_v26  ;;  %11532 = vset.pattern.permute.xlu0 %v16821_v53  ;;  %v15607_v26 = vld [vmem:[%s16395_s9 + $0x16c] ss:$16 sps:$4 sm:$0xff]   ;;  %v15613_v53 = vld [vmem:[%s16395_s9 + $0x1a0] ss:$16 sps:$4 sm:$0xff]  }
0x1dd3   :  { %7032 = vperm.xlu1 %11528, %v6994_v4   ;;  %7611 = vmatpush1.bf16.msra.mxu1 %v15569_v47  ;;  %16823 = vst [vmem:[#allocation31_spill] sm:$0xff] %v15607_v26  ;;  %v15626_v47 = vld [vmem:[%s16395_s9 + $0x1c4] ss:$16 sps:$4 sm:$0xff]  }
0x1dd4   :  { %7612 = vmatprep.subr.bf16.mxu1 %v15581_v50  ;;  %v15621_v50 = vld [vmem:[%s16395_s9 + $0x168] ss:$16 sps:$4 sm:$0xff]   ;;  %7537 = vmatpush1.bf16.msra.mxu0 %v15613_v53 }
0x1dd5   :  { %16824 = vst [vmem:[#allocation30_spill] sm:$0xff] %v15621_v50  ;;  %7538 = vmatprep.subr.bf16.mxu0 %v15626_v47 }
0x1dd7   :  { %11529 = vset.pattern.permute.xlu1 %v16790_v44  ;;  %7613 = vmatpush1.bf16.msra.mxu1 %v15596_v51  ;;  %v15638_v44 = vld [vmem:[%s16395_s9 + $0x1c0] ss:$16 sps:$4 sm:$0xff]   ;;  %v15656_v51 = vld [vmem:[%s16395_s9 + $0x1ac] ss:$16 sps:$4 sm:$0xff]  }
0x1dd8   :  { %7039 = vperm.xlu1 %11529, %v6994_v4   ;;  %7614 = vmatprep.subr.bf16.mxu1 %v15607_v26  ;;  %v15645_v4 = vld [vmem:[%s16395_s9 + $0x188] ss:$16 sps:$4 sm:$0xff]   ;;  %v15650_v26 = vld [vmem:[%s16395_s9 + $0x1e4] ss:$16 sps:$4 sm:$0xff]   ;;  %16827 = vst [vmem:[#allocation34_spill] sm:$0xff] %v15656_v51 }
0x1dd9   :  { %16826 = vst [vmem:[#allocation33_spill] sm:$0xff] %v15645_v4  ;;  %7539 = vmatpush1.bf16.msra.mxu0 %v15638_v44 }
0x1dda   :  { %7540 = vmatprep.subr.bf16.mxu0 %v15650_v26 }
0x1ddb   :  { %7615 = vmatpush1.bf16.msra.mxu1 %v15621_v50  ;;  %v15663_v50 = vld [vmem:[%s16395_s9 + $0x1e0] ss:$16 sps:$4 sm:$0xff]  }
0x1ddc   :  { %7616 = vmatprep.subr.bf16.mxu1 %v15632_v16  ;;  %11531 = vset.pattern.permute.xlu1 %v16651_v3  ;;  %16828 = vst [vmem:[#allocation35_spill] sm:$0xff] %v15663_v50  ;;  %v15670_v16 = vld [vmem:[%s16395_s9 + $0x1a8] ss:$16 sps:$4 sm:$0xff]  }
0x1ddd   :  { %16829 = vst [vmem:[#allocation36_spill] sm:$0xff] %v15670_v16  ;;  %7541 = vmatpush1.bf16.msra.mxu0 %v15663_v50 }
0x1dde   :  { %7551 = vmatprep.subr.bf16.mxu0 %v15681_v48 }
0x1ddf   :  { %7617 = vmatpush1.bf16.msra.mxu1 %v15645_v4  ;;  %v15695_v4 = vld [vmem:[%s16395_s9 + $0x1ec] ss:$16 sps:$4 sm:$0xff]  }
0x1de0   :  { %7618 = vmatprep.subr.bf16.mxu1 %v15656_v51  ;;  %v15689_v51 = vld [vmem:[%s16395_s9 + $0x1c8] ss:$16 sps:$4 sm:$0xff]   ;;  %16833 = vst [vmem:[#allocation41_spill] sm:$0xff] %v15695_v4 }
0x1de1   :  { %16832 = vst [vmem:[#allocation40_spill] sm:$0xff] %v15689_v51 }
0x1de3   :  { %7619 = vmatpush1.bf16.msra.mxu1 %v15670_v16  ;;  %v15707_v16 = vld [vmem:[%s16395_s9 + $0x20c] ss:$16 sps:$4 sm:$0xff]  }
0x1de4   :  { %7620 = vmatprep.subr.bf16.mxu1 %v15676_v18  ;;  %16835 = vst [vmem:[#allocation42_spill] sm:$0xff] %v15707_v16 }
0x1de7   :  { %7621 = vmatpush1.bf16.msra.mxu1 %v15689_v51 }
0x1de8   :  { %7622 = vmatprep.subr.bf16.mxu1 %v15695_v4 }
0x1deb   :  { %7623 = vmatpush1.bf16.msra.mxu1 %v15701_v1 }
0x1dec   :  { %7633 = vmatprep.subr.bf16.mxu1 %v15707_v16 }
0x1e43   :  { %v6999_v18 = vpop.permute.xlu1 %6998  ;;  %v7005_v21 = vpop.permute.xlu0 %7004 }
0x1e44   :  { %v7007_v51 = vmul.f32 %v7005_v21, %v16704_v34  ;;  %v7001_v17 = vmul.f32 %v6999_v18, %v16792_v29 }
0x1e46   :  { %v7008_v8 = vadd.f32 %v7007_v51, %v7001_v17 }
0x1e48   :  { %v7012_v31 = vpop.permute.xlu1 %7011  ;;  %v7026_v25 = vpop.permute.xlu0 %7025 }
0x1e49   :  { %v7014_v10 = vmul.f32 %v7012_v31, %v16793_v7  ;;  %v7028_v1 = vmul.f32 %v7026_v25, %v13479_v11 }
0x1e4b   :  { %v7015_v52 = vadd.f32 %v7014_v10, %v7008_v8  ;;  %v15722_v8 = vld [vmem:[%s16395_s9 + $0x200] ss:$16 sps:$4 sm:$0xff]   ;;  %v6973_v10 = vstv %s6970_s7 }
0x1e4d   :  { %v7019_v4 = vpop.permute.xlu1 %7018  ;;  %v7047_v50 = vpop.permute.xlu0 %7046 }
0x1e4e   :  { %v7021_v62 = vmul.f32 %v7019_v4, %v16650_v63  ;;  %v7049_v31 = vmul.f32 %v7047_v50, %v13698_v56  ;;  %v15743_v50 = vld [vmem:[%s16395_s9 + $0x220] ss:$16 sps:$4 sm:$0xff]  }
0x1e4f   :  { %16839 = vst [vmem:[#allocation50_spill] sm:$0xff] %v15743_v50 }
0x1e50   :  { %v7022_v9 = vadd.f32 %v7021_v62, %v7015_v52  ;;  %v15732_v52 = vld [vmem:[%s16395_s9 + $0x224] ss:$16 sps:$4 sm:$0xff]  }
0x1e51   :  { %16837 = vst [vmem:[#allocation45_spill] sm:$0xff] %v15732_v52  ;;  %v10470_v62 = vld [vmem:[%s16388_s2 + $0x20] sm:$0xff] }
0x1e52   :  { %v7033_v41 = vpop.permute.xlu1 %7032  ;;  %v7029_v16 = vadd.f32 %v7028_v1, %v7022_v9  ;;  %v15727_v9 = vld [vmem:[%s16395_s9 + $0x208] ss:$16 sps:$4 sm:$0xff]   ;;  %v6976_v1 = vstv %s6975_s21 }
0x1e53   :  { %v7035_v48 = vmul.f32 %v7033_v41, %v13541_v20  ;;  %16836 = vst [vmem:[#allocation43_spill] sm:$0xff] %v15727_v9  ;;  %v15749_v41 = vld [vmem:[%s16395_s9 + $0x228] ss:$16 sps:$4 sm:$0xff]  }
0x1e54   :  { %16840 = vst [vmem:[#allocation12_spill] sm:$0xff] %v15749_v41 }
0x1e55   :  { %v7036_v34 = vadd.f32 %v7035_v48, %v7029_v16  ;;  %v6974_v48 = vmul.f32 %v10470_v62, %v6973_v10  ;;  %v12054_v62 = vld [vmem:[%s16397_s11 + $0x18] sm:$0xff]   ;;  %v12055_v10 = vld [vmem:[%s16397_s11 + $0x20] sm:$0xff]  }
0x1e57   :  { %v7040_v21 = vpop.permute.xlu1 %7039 }
0x1e58   :  { %v7042_v18 = vmul.f32 %v7040_v21, %v13637_v60 }
0x1e5a   :  { %v7043_v17 = vadd.f32 %v7042_v18, %v7036_v34  ;;  %v15737_v34 = vld [vmem:[%s16395_s9 + $0x22c] ss:$16 sps:$4 sm:$0xff]  }
0x1e5b   :  { %16838 = vst [vmem:[#allocation47_spill] sm:$0xff] %v15737_v34 }
0x1e5c   :  { %v7050_v51 = vadd.f32 %v7049_v31, %v7043_v17  ;;  %v12051_v17 = vld [vmem:[%s16397_s11] sm:$0xff]  }
0x1e5e   :  { %v7051_v25 = vpack.c.bf16 %v7050_v51, %v7050_v51  ;;  %v12052_v51 = vld [vmem:[%s16397_s11 + $0x8] sm:$0xff]  }
0x1e60   :  { %7543 = vmatmul.mubr.bf16.vlgmr.msra.gmra.mrb[64].mxu0 %v7051_v25  ;;  %7625 = vmatmul.mubr.bf16.vlgmr.msra.gmra.mrb[64].mxu1 %v7051_v25  ;;  %v12053_v25 = vld [vmem:[%s16397_s11 + $0x10] sm:$0xff]  }
0x1e61   :  { %7552 = vmatpush1.bf16.msra.mxu0 %v15722_v8  ;;  %7634 = vmatpush1.bf16.msra.mxu1 %v15727_v9 }
0x1e62   :  { %7553 = vmatprep.subr.bf16.mxu0 %v15732_v52  ;;  %7635 = vmatprep.subr.bf16.mxu1 %v15737_v34 }
0x1e63   :  { %7583 = vmatprep.mubr.bf16.mxu0 %v16651_v3  ;;  %7665 = vmatprep.mubr.bf16.mxu1 %v16651_v3 }
0x1e65   :  { %7554 = vmatpush1.bf16.msra.mxu0 %v15743_v50  ;;  %7636 = vmatpush1.bf16.msra.mxu1 %v15749_v41 }
0x1e66   :  { %11122 = vmatprep.subr.bf16.mxu0 %v15218_v49  ;;  %11348 = vmatprep.subr.bf16.mxu1 %v16652_v6 }
0x1e7e   :  { %v6963_v16 = vpop.f32.mrb[58].mxu1 }
0x1e7f   :  { %v6977_v4 = vmul.f32 %v6976_v1, %v6963_v16  ;;  %v11121_v21 = vpop.f32.mrb[59].mxu1  ;;  %v12056_v1 = vld [vmem:[%s16397_s11 + $0x28] sm:$0xff]   ;;  %v12058_v16 = vld [vmem:[%s16397_s11 + $0x38] sm:$0xff]  }
0x1e81   :  { %v6978_v18 = vadd.f32 %v6977_v4, %v6974_v48  ;;  %v12057_v48 = vld [vmem:[%s16397_s11 + $0x30] sm:$0xff]   ;;  %v7125_v4 = vld [vmem:[%s16396_s10] sm:$0xf] }
0x1e82   :  { %v7130_v21 = vrot.slane %v7125_v4, %v16797_v36  ;;  %v7142_v50 = vrot.slane %v7125_v4, %v12877_v54  ;;  %v7138_v36 = vrot.slane %v7125_v4, %v12880_v0 }
0x1e83   :  { %v7052_v31 = vpack.c.bf16 %v6978_v18, %v6978_v18  ;;  %v7134_v18 = vrot.slane %v7125_v4, %v16798_v37  ;;  %v7841_v4 = vld [vmem:[%s16391_s5 + $0x40] sm:$0xff] }
0x1e85   :  { %10543 = vmatmul.mubr.msk.bf16.vlgmr.msra.gmra.mrb[64].mxu0 %vm329_vm0, %v7052_v31  ;;  %10544 = vmatmul.mubr.msk.bf16.vlgmr.msra.gmra.mrb[64].mxu1 %vm329_vm0, %v7052_v31 }
0x1e86   :  { %11138 = vmatprep.mubr.msk.bf16.mxu0 %vm12548_vm10, %v15218_v49  ;;  %11174 = vmatprep.mubr.msk.f32.mxu1 %vm12548_vm10, %v15218_v49 }
0x1e87   :  { %11123 = vmatpush3.bf16.msra.mxu0 %v12051_v17 }
0x1e88   :  { %11124 = vmatprep.subr.bf16.mxu0 %v15218_v49 }
0x1e8b   :  { %11125 = vmatpush3.bf16.msra.mxu0 %v12052_v51 }
0x1e8c   :  { %11126 = vmatprep.subr.bf16.mxu0 %v15218_v49 }
0x1e8f   :  { %11127 = vmatpush3.bf16.msra.mxu0 %v12053_v25 }
0x1e90   :  { %11128 = vmatprep.subr.bf16.mxu0 %v15218_v49 }
0x1e93   :  { %11129 = vmatpush3.bf16.msra.mxu0 %v12054_v62 }
0x1e94   :  { %11130 = vmatprep.subr.bf16.mxu0 %v15218_v49 }
0x1e97   :  { %11131 = vmatpush3.bf16.msra.mxu0 %v12055_v10 }
0x1e98   :  { %11132 = vmatprep.subr.bf16.mxu0 %v15218_v49 }
0x1e9b   :  { %11133 = vmatpush3.bf16.msra.mxu0 %v12056_v1 }
0x1e9c   :  { %11134 = vmatprep.subr.bf16.mxu0 %v15218_v49 }
0x1e9f   :  { %11135 = vmatpush3.bf16.msra.mxu0 %v12057_v48 }
0x1ea0   :  { %11136 = vmatprep.subr.bf16.mxu0 %v15218_v49 }
0x1ea3   :  { %11137 = vmatpush3.bf16.msra.mxu0 %v12058_v16 }
0x1ea4   :  { %8462 = vmatprep.subr.bf16.mxu0 %v15311_v43 }
0x1f58   :  { %v7585_v31 = vpop.f32.mrb[64].mxu0  ;;  %v7667_v17 = vpop.f32.mrb[64].mxu1 }
0x1f59   :  { %v11416_v51 = vadd.f32 %v7585_v31, %v7130_v21  ;;  %v7587_v25 = vpop.f32.mrb[65].mxu0  ;;  %v7669_v62 = vpop.f32.mrb[65].mxu1  ;;  %v11418_v52 = vadd.f32 %v7667_v17, %v7138_v36  ;;  %v7842_v17 = vld [vmem:[%s16391_s5 + $0x48] sm:$0xff] }
0x1f5a   :  { %v11417_v10 = vadd.f32 %v7587_v25, %v7134_v18  ;;  %v7589_v1 = vpop.f32.mrb[66].mxu0  ;;  %v7671_v48 = vpop.f32.mrb[66].mxu1  ;;  %v11419_v34 = vadd.f32 %v7669_v62, %v7142_v50 }
0x1f5b   :  { %v10545_v49 = vmul.f32 -1.442695, %v11416_v51  ;;  %v7590_v16 = vpop.f32.mrb[67].mxu0  ;;  %v7672_v41 = vpop.f32.mrb[67].mxu1 }
0x1f5c   :  { %v10546_v43 = vmul.f32 -1.442695, %v11417_v10  ;;  %v10547_v37 = vmul.f32 -1.442695, %v11419_v34  ;;  %v7843_v16 = vld [vmem:[%s16391_s5 + $0x50] sm:$0xff] }
0x1f5d   :  { %12395 = vpow2.f32 %v10545_v49  ;;  %v15902_v49 = vpack.c.bf16 %v7842_v17, %v7841_v4  ;;  %v16861_v4 = vld [vmem:[#allocation19_spill] sm:$0xff]  ;;  %v16862_v17 = vmov 2  }
0x1f5e   :  { %12397 = vpow2.f32 %v10546_v43  ;;  %v7844_v43 = vld [vmem:[%s16391_s5 + $0x58] sm:$0xff] }
0x1f5f   :  { %12399 = vpow2.f32 %v10547_v37 }
0x1f60   :  { %12401 = vtanh.f32 %v11418_v52 }
0x1f67   :  { %v12396_v9 = vpop.eup %12395 }
0x1f68   :  { %v12398_v21 = vpop.eup %12397  ;;  %v7677_v31 = vadd.f32 1.0, %v12396_v9 }
0x1f69   :  { %v7683_v18 = vadd.f32 1.0, %v12398_v21  ;;  %v12400_v51 = vpop.eup %12399  ;;  %v15912_v21 = vpack.c.bf16 %v7844_v43, %v7843_v16  ;;  %v16863_v16 = vld [vmem:[#allocation24_spill] sm:$0xff]  ;;  %v16864_v43 = vld [vmem:[#allocation23_spill] sm:$0xff] }
0x1f6a   :  { %12403 = vrcp.f32 %v7677_v31  ;;  %v12402_v41 = vpop.eup %12401  ;;  %v7690_v48 = vadd.f32 1.0, %v12400_v51  ;;  %v7845_v31 = vld [vmem:[%s16391_s5 + $0x60] sm:$0xff] }
0x1f6b   :  { %12405 = vrcp.f32 %v7683_v18  ;;  %v7846_v18 = vld [vmem:[%s16391_s5 + $0x68] sm:$0xff] }
0x1f6c   :  { %12407 = vrcp.f32 %v7690_v48  ;;  %v15922_v51 = vpack.c.bf16 %v7846_v18, %v7845_v31  ;;  %v16865_v31 = vmov 3   ;;  %v16866_v18 = vld [vmem:[#allocation25_spill] sm:$0xff] }
0x1f74   :  { %v12404_v25 = vpop.eup %12403 }
0x1f75   :  { %v12406_v10 = vpop.eup %12405  ;;  %v7694_v1 = vmul.f32 %v12404_v25, %v12402_v41 }
0x1f76   :  { %v7693_v50 = vmul.f32 %v12406_v10, %v15282_v27  ;;  %v12408_v36 = vpop.eup %12407  ;;  %v16841_v27 = vld [vmem:[#allocation35_spill] sm:$0xff] }
0x1f78   :  { %v15808_v62 = vadd.f32 %v7694_v1, %v7693_v50 }
0x1f7a   :  { %12409 = vtanh.f32 %v15808_v62 }
0x1f84   :  { %v12410_v9 = vpop.eup %12409 }
0x1f85   :  { %v7697_v37 = vmul.f32 %v12410_v9, %v12408_v36  ;;  %v7847_v9 = vld [vmem:[%s16391_s5 + $0x70] sm:$0xff] }
0x1f87   :  { %v15811_v52 = vpack.c.bf16 %v7697_v37, %v7697_v37 }
0x1f89   :  { %11139 = vmatmul.mubr.bf16.vlgmr.msra.gmra.mrb[68].mxu0 %v15811_v52 }
0x1f8a   :  { %8494 = vmatprep.mubr.bf16.mxu0 %v15811_v52  ;;  %8463 = vmatpush1.bf16.msra.mxu0 %v15306_v19  ;;  %v16842_v19 = vld [vmem:[#allocation38_spill] sm:$0xff] }
0x1f8b   :  { %8464 = vmatprep.subr.bf16.mxu0 %v15321_v55 }
0x1f8e   :  { %8465 = vmatpush1.bf16.msra.mxu0 %v15329_v45 }
0x1f8f   :  { %8466 = vmatprep.subr.bf16.mxu0 %v15335_v13 }
0x1f92   :  { %8467 = vmatpush1.bf16.msra.mxu0 %v15341_v14 }
0x1f93   :  { %8468 = vmatprep.subr.bf16.mxu0 %v15347_v38  ;;  %v16844_v38 = vld [vmem:[#allocation21_spill] sm:$0xff] }
0x1f96   :  { %8469 = vmatpush1.bf16.msra.mxu0 %v15353_v40 }
0x1f97   :  { %8470 = vmatprep.subr.bf16.mxu0 %v15359_v28 }
0x1f9a   :  { %8471 = vmatpush1.bf16.msra.mxu0 %v15365_v39 }
0x1f9b   :  { %8472 = vmatprep.subr.bf16.mxu0 %v15371_v59  ;;  %v16845_v59 = vld [vmem:[#allocation22_spill] sm:$0xff] }
0x1f9e   :  { %8473 = vmatpush1.bf16.msra.mxu0 %v15377_v58 }
0x1f9f   :  { %8474 = vmatprep.subr.bf16.mxu0 %v15383_v15 }
0x1fa2   :  { %8475 = vmatpush1.bf16.msra.mxu0 %v15389_v42 }
0x1fa3   :  { %8476 = vmatprep.subr.bf16.mxu0 %v15395_v35 }
0x1fa6   :  { %8477 = vmatpush1.bf16.msra.mxu0 %v15401_v23  ;;  %v7833_v23 = vld [vmem:[%s16391_s5] sm:$0xff] }
0x1fa7   :  { %8478 = vmatprep.subr.bf16.mxu0 %v15407_v30  ;;  %v7834_v30 = vld [vmem:[%s16391_s5 + $0x8] sm:$0xff] }
0x1faa   :  { %8479 = vmatpush1.bf16.msra.mxu0 %v15413_v5  ;;  %v7835_v5 = vld [vmem:[%s16391_s5 + $0x10] sm:$0xff] }
0x1fab   :  { %8480 = vmatprep.subr.bf16.mxu0 %v15506_v24 }
0x1fae   :  { %8481 = vmatpush1.bf16.msra.mxu0 %v15511_v32  ;;  %v7839_v32 = vld [vmem:[%s16391_s5 + $0x30] sm:$0xff] }
0x1faf   :  { %8482 = vmatprep.subr.bf16.mxu0 %v15525_v2  ;;  %v7840_v2 = vld [vmem:[%s16391_s5 + $0x38] sm:$0xff] }
0x1fb0   :  { %v15892_v34 = vpack.c.bf16 %v7840_v2, %v7839_v32  ;;  %v16860_v2 = vld [vmem:[#allocation18_spill] sm:$0xff] }
0x1fb2   :  { %8483 = vmatpush1.bf16.msra.mxu0 %v15535_v61 }
0x1fb3   :  { %8484 = vmatprep.subr.bf16.mxu0 %v15551_v46 }
0x1fb6   :  { %8485 = vmatpush1.bf16.msra.mxu0 %v15561_v33  ;;  %v15850_v33 = vld [vmem:[%s16398_s12] ss:$0 sm:$0xff] }
0x1fb7   :  { %8486 = vmatprep.subr.bf16.mxu0 %v15575_v57  ;;  %v7836_v57 = vld [vmem:[%s16391_s5 + $0x18] sm:$0xff] }
0x1fb8   :  { %v15872_v61 = vpack.c.bf16 %v7836_v57, %v7835_v5  ;;  %v16856_v5 = vld [vmem:[#allocation57_spill] sm:$0xff]  ;;  %v16858_v57 = vld [vmem:[#allocation15_spill] sm:$0xff] }
0x1fba   :  { %8487 = vmatpush1.bf16.msra.mxu0 %v15587_v12  ;;  %v7838_v12 = vld [vmem:[%s16391_s5 + $0x28] sm:$0xff] }
0x1fbb   :  { %8488 = vmatprep.subr.bf16.mxu0 %v15601_v22  ;;  %v15866_v22 = vpack.c.bf16 %v7834_v30, %v7833_v23  ;;  %v16854_v23 = vld [vmem:[#allocation51_spill] sm:$0xff] }
0x1fbc   :  { %v16855_v30 = vld [vmem:[#allocation55_spill] sm:$0xff] }
0x1fbd   :  { %11350 = vmatpush3.bf16.msra.mxu1 %v15866_v22 }
0x1fbe   :  { %8489 = vmatpush1.bf16.msra.mxu0 %v15613_v53  ;;  %11351 = vmatprep.subr.bf16.mxu1 %v16652_v6 }
0x1fbf   :  { %8490 = vmatprep.subr.bf16.mxu0 %v15626_v47  ;;  %v7837_v47 = vld [vmem:[%s16391_s5 + $0x20] sm:$0xff] }
0x1fc0   :  { %v15882_v24 = vpack.c.bf16 %v7838_v12, %v7837_v47  ;;  %v16859_v12 = vld [vmem:[#allocation17_spill] sm:$0xff] }
0x1fc1   :  { %11353 = vmatpush3.bf16.msra.mxu1 %v15872_v61 }
0x1fc2   :  { %8491 = vmatpush1.bf16.msra.mxu0 %v15638_v44  ;;  %v16843_v44 = vld [vmem:[#allocation56_spill] sm:$0xff]  ;;  %11354 = vmatprep.subr.bf16.mxu1 %v16652_v6 }
0x1fc3   :  { %8492 = vmatprep.subr.bf16.mxu0 %v15650_v26  ;;  %v7931_v14 = vmul.f32 %v16843_v44, %v7697_v37  ;;  %v7848_v37 = vld [vmem:[%s16391_s5 + $0x78] sm:$0xff]  ;;  %s10559_s5 = sld [smem:[#allocation4 + $0x5]] }
0x1fc5   :  { %11356 = vmatpush3.bf16.msra.mxu1 %v15882_v24 }
0x1fc6   :  { %8493 = vmatpush1.bf16.msra.mxu0 %v16841_v27  ;;  %11357 = vmatprep.subr.bf16.mxu1 %v16652_v6 }
0x1fc7   :  { %8503 = vmatprep.subr.bf16.mxu0 %v16842_v19  ;;  %v15933_v19 = vpack.c.bf16 %v7848_v37, %v7847_v9  ;;  %v16874_v9 = vld [vmem:[#allocation30_spill] sm:$0xff]  ;;  %v16875_v37 = vld [vmem:[#allocation32_spill] sm:$0xff] }
0x1fc9   :  { %11359 = vmatpush3.bf16.msra.mxu1 %v15892_v34  ;;  %p7920_p9 = scmp.gt.s32.totalorder %s10559_s5, 0 }
0x1fca   :  { %11360 = vmatprep.subr.bf16.mxu1 %v16652_v6 }
0x1fcb   :  { %s7921_s29 = scalar_select %p7920_p9, 1, 0 }
0x1fcd   :  { %11362 = vmatpush3.bf16.msra.mxu1 %v15902_v49  ;;  %s7922_s30 = scvt.s32.f32 %s7921_s29 }
0x1fce   :  { %11363 = vmatprep.subr.bf16.mxu1 %v16652_v6 }
0x1fcf   :  { %s7927_s14 = ssub.f32 1.0, %s7922_s30 }
0x1fd1   :  { %11365 = vmatpush3.bf16.msra.mxu1 %v15912_v21 }
0x1fd2   :  { %11366 = vmatprep.subr.bf16.mxu1 %v16652_v6 }
0x1fd5   :  { %11368 = vmatpush3.bf16.msra.mxu1 %v15922_v51 }
0x1fd6   :  { %11369 = vmatprep.subr.bf16.mxu1 %v16652_v6 }
0x1fd9   :  { %11371 = vmatpush3.bf16.msra.mxu1 %v15933_v19 }
0x205c   :  { %v7804_v46 = vpop.f32.mrb[68].mxu0 }
0x205d   :  { %v7805_v55 = vadd.f32 %v15850_v33, %v7804_v46  ;;  %v11140_v45 = vpop.f32.mrb[69].mxu0 }
0x205e   :  { %v7807_v53 = vpop.f32.mrb[70].mxu0 }
0x205f   :  { %7811 = vst [vmem:[#allocation7 + $0x28] sm:$0xff] %v7805_v55  ;;  %7812 = vmax.xlane.f32.xlu1 %v7805_v55  ;;  %v11141_v13 = vpop.f32.mrb[71].mxu0 }
0x2063   :  { %7932 = vadd.xlane.f32.xlu1 %v7931_v14 }
0x20ec   :  { %v7813_v26 = vpop.xlane.xlu1 %7812 }
0x20ed   :  { %vm7814_vm8 = vcmp.eq.f32.partialorder %v7805_v55, %v7813_v26  ;;  %v16846_v55 = vld [vmem:[#allocation58_spill] sm:$0xff]  ;;  %v16847_v26 = vmov 1.0  }
0x20ee   :  { %v7815_v40 = vsel %vm7814_vm8, %v16844_v38, 128  ;;  %8544 = vmatprep.subr.bf16.mxu1 %v16846_v55  ;;  %v16878_v55 = vld [vmem:[#allocation34_spill] sm:$0xff] }
0x20ef   :  { %v7817_v28 = vshra.s32 %v7815_v40, 16  ;;  %v7816_v41 = vand.u32 65535, %v7815_v40  ;;  %v16848_v40 = vld [vmem:[#allocation59_spill] sm:$0xff] }
0x20f0   :  { %v7933_v39 = vpop.xlane.xlu1 %7932 }
0x20f1   :  { %v7934_v58 = vadd.f32 %v7933_v39, %v16845_v59  ;;  %v7819_v15 = vcvt.s32.f32 %v7817_v28  ;;  %v7818_v10 = vcvt.s32.f32 %v7816_v41  ;;  %v16849_v28 = vld [vmem:[#allocation44_spill] sm:$0xff]  ;;  %v16850_v39 = vld [vmem:[#allocation46_spill] sm:$0xff] }
0x20f2   :  { %v16867_v41 = vld [vmem:[#allocation26_spill] sm:$0xff] }
0x20f3   :  { %v7935_v42 = vmax.f32 %v7934_v58, 0.0  ;;  %7820 = vmin.xlane.f32.xlu0 %v7819_v15  ;;  %v16851_v58 = vld [vmem:[#allocation48_spill] sm:$0xff] }
0x20f5   :  { %v7936_v35 = vsel %vm3174_vm9, %v7935_v42, -inf }
0x20f6   :  { %7937 = vmax.xlane.f32.xlu1 %v7936_v35 }
0x2180   :  { %v7821_v25 = vpop.xlane.xlu0 %7820 }
0x2181   :  { %vm7822_vm11 = vcmp.eq.f32.partialorder %v7819_v15, %v7821_v25  ;;  %v7827_v45 = vcvt.f32.s32 %v7821_v25  ;;  %v16852_v15 = vld [vmem:[#allocation16_spill] sm:$0xff]  ;;  %v16868_v25 = vld [vmem:[#allocation27_spill] sm:$0xff] }
0x2182   :  { %v7823_v1 = vsel %vm7822_vm11, %v7818_v10, inf  ;;  %v16869_v10 = vmov 4  }
0x2183   :  { %7824 = vmin.xlane.f32.xlu0 %v7823_v1  ;;  %v7938_v48 = vpop.xlane.xlu1 %7937  ;;  %v7828_v13 = vshll.u32 %v7827_v45, 16  ;;  %v16870_v1 = vld [vmem:[#allocation28_spill] sm:$0xff]  ;;  %v16879_v45 = vmov 7  }
0x2184   :  { %v7939_v50 = vsub.f32 %v7935_v42, %v7938_v48  ;;  %v16853_v42 = vld [vmem:[#allocation53_spill] sm:$0xff] }
0x2185   :  { %v16871_v48 = vld [vmem:[#allocation29_spill] sm:$0xff] }
0x2186   :  { %v7940_v36 = vmul.f32 1.442695, %v7939_v50  ;;  %v16872_v50 = vld [vmem:[#allocation31_spill] sm:$0xff] }
0x2188   :  { %12411 = vpow2.f32 %v7940_v36  ;;  %v16873_v36 = vmov 5  }
0x2192   :  { %v12412_v27 = vpop.eup %12411 }
0x2193   :  { %v7942_v46 = vsel %vm3174_vm9, %v12412_v27, 0.0 }
0x2194   :  { %7943 = vadd.xlane.f32.xlu0 %v7942_v46  ;;  %v16877_v46 = vld [vmem:[#allocation33_spill] sm:$0xff] }
0x2210   :  { %v7825_v53 = vpop.xlane.xlu0 %7824 }
0x2211   :  { %v7826_v44 = vcvt.f32.s32 %v7825_v53  ;;  %v16880_v53 = vld [vmem:[#allocation36_spill] sm:$0xff] }
0x2213   :  { %v7829_v14 = vadd.s32 %v7828_v13, %v7826_v44  ;;  %v16881_v13 = vld [vmem:[#allocation37_spill] sm:$0xff]  ;;  %v16882_v44 = vld [vmem:[#allocation40_spill] sm:$0xff] }
0x2215   :  { %vm7830_vm12 = vcmp.eq.s32.totalorder %v16844_v38, %v7829_v14  ;;  %v16883_v14 = vld [vmem:[#allocation41_spill] sm:$0xff] }
0x2216   :  { %11175 = vmatmul.mubr.msk.f32.vlgmr.msra.gmra.mrb[68].mxu1 %vm7830_vm12, %v16847_v26 }
0x2217   :  { %8576 = vmatprep.mubr.bf16.mxu1 %v15811_v52  ;;  %8545 = vmatpush1.bf16.msra.mxu1 %v16848_v40  ;;  %v16857_v52 = vld [vmem:[#allocation20_spill] sm:$0xff]  ;;  %v16884_v40 = vmov 1  }
0x2218   :  { %8546 = vmatprep.subr.bf16.mxu1 %v16849_v28  ;;  %v16885_v28 = vld [vmem:[#allocation39_spill] sm:$0xff] }
0x221b   :  { %8547 = vmatpush1.bf16.msra.mxu1 %v16850_v39  ;;  %v16886_v39 = vld [vmem:[#allocation42_spill] sm:$0xff] }
0x221c   :  { %8548 = vmatprep.subr.bf16.mxu1 %v16851_v58 }
0x221f   :  { %8549 = vmatpush1.bf16.msra.mxu1 %v16852_v15 }
0x2220   :  { %8550 = vmatprep.subr.bf16.mxu1 %v16853_v42 }
0x2221   :  { %v7944_v35 = vpop.xlane.xlu0 %7943 }
0x2222   :  { %12413 = vrcp.f32 %v7944_v35 }
0x2223   :  { %8551 = vmatpush1.bf16.msra.mxu1 %v16854_v23 }
0x2224   :  { %8552 = vmatprep.subr.bf16.mxu1 %v16855_v30  ;;  %v16887_v30 = vld [vmem:[#allocation13_spill] sm:$0xff] }
0x2227   :  { %8553 = vmatpush1.bf16.msra.mxu1 %v16856_v5 }
0x2228   :  { %8554 = vmatprep.subr.bf16.mxu1 %v16857_v52 }
0x222b   :  { %8555 = vmatpush1.bf16.msra.mxu1 %v16858_v57 }
0x222c   :  { %v12414_v47 = vpop.eup %12413  ;;  %8556 = vmatprep.subr.bf16.mxu1 %v16859_v12 }
0x222d   :  { %v7946_v32 = vmul.f32 %v12414_v47, %v12412_v27  ;;  %v16876_v27 = vmov 6  }
0x222f   :  { %7956 = vperm.xlu0 %11532, %v7946_v32   ;;  %7950 = vperm.xlu1 %11531, %v7946_v32  }
0x2230   :  { %8557 = vmatpush1.bf16.msra.mxu1 %v16860_v2 }
0x2231   :  { %8558 = vmatprep.subr.bf16.mxu1 %v16861_v4 }
0x2233   :  { %11533 = vset.pattern.permute.xlu1 %v16862_v17  ;;  %11539 = vset.pattern.permute.xlu0 %v16651_v3 }
0x2234   :  { %7963 = vperm.xlu1 %11533, %v7946_v32   ;;  %8559 = vmatpush1.bf16.msra.mxu1 %v16863_v16 }
0x2235   :  { %8560 = vmatprep.subr.bf16.mxu1 %v16864_v43 }
0x2238   :  { %11534 = vset.pattern.permute.xlu1 %v16865_v31  ;;  %8561 = vmatpush1.bf16.msra.mxu1 %v16866_v18 }
0x2239   :  { %7970 = vperm.xlu1 %11534, %v7946_v32   ;;  %8562 = vmatprep.subr.bf16.mxu1 %v16867_v41 }
0x223c   :  { %8563 = vmatpush1.bf16.msra.mxu1 %v16868_v25 }
0x223d   :  { %11535 = vset.pattern.permute.xlu1 %v16869_v10  ;;  %8564 = vmatprep.subr.bf16.mxu1 %v16870_v1 }
0x223e   :  { %7977 = vperm.xlu1 %11535, %v7946_v32  }
0x2240   :  { %8565 = vmatpush1.bf16.msra.mxu1 %v16871_v48 }
0x2241   :  { %8566 = vmatprep.subr.bf16.mxu1 %v16872_v50 }
0x2242   :  { %11536 = vset.pattern.permute.xlu1 %v16873_v36 }
0x2243   :  { %7984 = vperm.xlu1 %11536, %v7946_v32  }
0x2244   :  { %8567 = vmatpush1.bf16.msra.mxu1 %v16874_v9 }
0x2245   :  { %8568 = vmatprep.subr.bf16.mxu1 %v16875_v37 }
0x2247   :  { %11537 = vset.pattern.permute.xlu1 %v16876_v27 }
0x2248   :  { %7991 = vperm.xlu1 %11537, %v7946_v32   ;;  %8569 = vmatpush1.bf16.msra.mxu1 %v16877_v46 }
0x2249   :  { %8570 = vmatprep.subr.bf16.mxu1 %v16878_v55  ;;  %v16888_v55 = vld [vmem:[#allocation43_spill] sm:$0xff] }
0x224c   :  { %11538 = vset.pattern.permute.xlu1 %v16879_v45  ;;  %8571 = vmatpush1.bf16.msra.mxu1 %v16880_v53  ;;  %v16889_v53 = vld [vmem:[#allocation45_spill] sm:$0xff] }
0x224d   :  { %7998 = vperm.xlu1 %11538, %v7946_v32   ;;  %8572 = vmatprep.subr.bf16.mxu1 %v16881_v13  ;;  %v16890_v13 = vld [vmem:[#allocation47_spill] sm:$0xff] }
0x2250   :  { %8573 = vmatpush1.bf16.msra.mxu1 %v16882_v44  ;;  %v16891_v44 = vld [vmem:[#allocation50_spill] sm:$0xff] }
0x2251   :  { %8574 = vmatprep.subr.bf16.mxu1 %v16883_v14  ;;  %11540 = vset.pattern.permute.xlu1 %v16884_v40  ;;  %v16892_v14 = vld [vmem:[#allocation12_spill] sm:$0xff]  ;;  %v15997_v40 = vld [vmem:[#allocation7] sm:$0xff] }
0x2254   :  { %8575 = vmatpush1.bf16.msra.mxu1 %v16885_v28  ;;  %v7925_v28 = vstv %s7922_s30 }
0x2255   :  { %8585 = vmatprep.subr.bf16.mxu1 %v16886_v39  ;;  %v7928_v39 = vstv %s7927_s14 }
0x22ae   :  { %v7951_v58 = vpop.permute.xlu1 %7950  ;;  %v7957_v35 = vpop.permute.xlu0 %7956 }
0x22af   :  { %v7959_v5 = vmul.f32 %v7957_v35, %v16887_v30  ;;  %v7953_v52 = vmul.f32 %v7951_v58, %v16792_v29 }
0x22b1   :  { %v7960_v12 = vadd.f32 %v7959_v5, %v7953_v52  ;;  %v16893_v52 = vld [vmem:[#allocation10_spill] sm:$0xff] }
0x22b3   :  { %v7964_v15 = vpop.permute.xlu1 %7963 }
0x22b4   :  { %v7966_v57 = vmul.f32 %v7964_v15, %v16793_v7 }
0x22b6   :  { %v7967_v2 = vadd.f32 %v7966_v57, %v7960_v12 }
0x22b8   :  { %v7971_v42 = vpop.permute.xlu1 %7970 }
0x22b9   :  { %v7973_v32 = vmul.f32 %v7971_v42, %v16650_v63 }
0x22bb   :  { %v7974_v16 = vadd.f32 %v7973_v32, %v7967_v2 }
0x22bd   :  { %v7978_v23 = vpop.permute.xlu1 %7977 }
0x22be   :  { %v7980_v4 = vmul.f32 %v7978_v23, %v13479_v11 }
0x22c0   :  { %v7981_v41 = vadd.f32 %v7980_v4, %v7974_v16 }
0x22c2   :  { %v7985_v47 = vpop.permute.xlu1 %7984 }
0x22c3   :  { %v7987_v43 = vmul.f32 %v7985_v47, %v13541_v20  ;;  %v16894_v47 = vld [vmem:[#allocation11_spill] sm:$0xff] }
0x22c5   :  { %v7988_v1 = vadd.f32 %v7987_v43, %v7981_v41 }
0x22c7   :  { %v7992_v18 = vpop.permute.xlu1 %7991 }
0x22c8   :  { %v7994_v25 = vmul.f32 %v7992_v18, %v13637_v60 }
0x22ca   :  { %v7995_v50 = vadd.f32 %v7994_v25, %v7988_v1 }
0x22cc   :  { %v7999_v48 = vpop.permute.xlu1 %7998 }
0x22cd   :  { %v8001_v9 = vmul.f32 %v7999_v48, %v13698_v56 }
0x22cf   :  { %v8002_v37 = vadd.f32 %v8001_v9, %v7995_v50 }
0x22d1   :  { %v8003_v46 = vpack.c.bf16 %v8002_v37, %v8002_v37 }
0x22d3   :  { %8495 = vmatmul.mubr.bf16.vlgmr.msra.gmra.mrb[72].mxu0 %v8003_v46  ;;  %8577 = vmatmul.mubr.bf16.vlgmr.msra.gmra.mrb[72].mxu1 %v8003_v46 }
0x22d4   :  { %8504 = vmatpush1.bf16.msra.mxu0 %v15722_v8  ;;  %8586 = vmatpush1.bf16.msra.mxu1 %v16888_v55  ;;  %v10560_v8 = vld [vmem:[%s16388_s2 + $0x28] sm:$0xff] }
0x22d5   :  { %8505 = vmatprep.subr.bf16.mxu0 %v16889_v53  ;;  %8587 = vmatprep.subr.bf16.mxu1 %v16890_v13  ;;  %v7926_v58 = vmul.f32 %v10560_v8, %v7925_v28 }
0x22d6   :  { %8535 = vmatprep.mubr.bf16.mxu0 %v16651_v3  ;;  %8617 = vmatprep.mubr.bf16.mxu1 %v16651_v3 }
0x22d8   :  { %8506 = vmatpush1.bf16.msra.mxu0 %v16891_v44  ;;  %8588 = vmatpush1.bf16.msra.mxu1 %v16892_v14 }
0x22d9   :  { %11177 = vmatprep.subr.bf16.mxu0 %v15997_v40  ;;  %11372 = vmatprep.subr.bf16.mxu1 %v16652_v6 }
0x22e9   :  { %v7915_v15 = vpop.f32.mrb[68].mxu1 }
0x22ea   :  { %v7929_v42 = vmul.f32 %v7928_v39, %v7915_v15  ;;  %v11176_v35 = vpop.f32.mrb[69].mxu1 }
0x22ec   :  { %v7930_v23 = vadd.f32 %v7929_v42, %v7926_v58 }
0x22ee   :  { %v8004_v5 = vpack.c.bf16 %v7930_v23, %v7930_v23 }
0x22f0   :  { %10633 = vmatmul.mubr.msk.bf16.vlgmr.msra.gmra.mrb[72].mxu0 %vm329_vm0, %v8004_v5  ;;  %10634 = vmatmul.mubr.msk.bf16.vlgmr.msra.gmra.mrb[72].mxu1 %vm329_vm0, %v8004_v5 }
0x22f1   :  { %11193 = vmatprep.mubr.msk.bf16.mxu0 %vm12548_vm10, %v15997_v40  ;;  %11374 = vmatpush3.bf16.msra.mxu1 %v15866_v22  ;;  %v12059_v22 = vld [vmem:[%s16397_s11] sm:$0xff]  }
0x22f2   :  { %11375 = vmatprep.subr.bf16.mxu1 %v16652_v6  ;;  %11229 = vmatprep.mubr.msk.f32.mxu1 %vm12548_vm10, %v15997_v40 }
0x22f3   :  { %11178 = vmatpush3.bf16.msra.mxu0 %v12059_v22 }
0x22f4   :  { %11179 = vmatprep.subr.bf16.mxu0 %v15997_v40 }
0x22f5   :  { %11377 = vmatpush3.bf16.msra.mxu1 %v15872_v61  ;;  %v12060_v61 = vld [vmem:[%s16397_s11 + $0x8] sm:$0xff]  }
0x22f6   :  { %11378 = vmatprep.subr.bf16.mxu1 %v16652_v6 }
0x22f7   :  { %11180 = vmatpush3.bf16.msra.mxu0 %v12060_v61 }
0x22f8   :  { %11181 = vmatprep.subr.bf16.mxu0 %v15997_v40 }
0x22f9   :  { %11380 = vmatpush3.bf16.msra.mxu1 %v15882_v24  ;;  %v12062_v24 = vld [vmem:[%s16397_s11 + $0x18] sm:$0xff]  }
0x22fa   :  { %11381 = vmatprep.subr.bf16.mxu1 %v16652_v6 }
0x22fd   :  { %11383 = vmatpush3.bf16.msra.mxu1 %v15892_v34  ;;  %v12063_v34 = vld [vmem:[%s16397_s11 + $0x20] sm:$0xff]  }
0x22fe   :  { %11384 = vmatprep.subr.bf16.mxu1 %v16652_v6 }
0x2301   :  { %11386 = vmatpush3.bf16.msra.mxu1 %v15902_v49  ;;  %v12064_v49 = vld [vmem:[%s16397_s11 + $0x28] sm:$0xff]  }
0x2302   :  { %11387 = vmatprep.subr.bf16.mxu1 %v16652_v6 }
0x2305   :  { %11389 = vmatpush3.bf16.msra.mxu1 %v15912_v21  ;;  %v12065_v21 = vld [vmem:[%s16397_s11 + $0x30] sm:$0xff]  }
0x2306   :  { %11390 = vmatprep.subr.bf16.mxu1 %v16652_v6 }
0x2309   :  { %11392 = vmatpush3.bf16.msra.mxu1 %v15922_v51  ;;  %v12066_v51 = vld [vmem:[%s16397_s11 + $0x38] sm:$0xff]  }
0x230a   :  { %11393 = vmatprep.subr.bf16.mxu1 %v16652_v6  ;;  %v12061_v6 = vld [vmem:[%s16397_s11 + $0x10] sm:$0xff]  }
0x230b   :  { %11182 = vmatpush3.bf16.msra.mxu0 %v12061_v6 }
0x230c   :  { %11183 = vmatprep.subr.bf16.mxu0 %v15997_v40 }
0x230d   :  { %11395 = vmatpush3.bf16.msra.mxu1 %v15933_v19  ;;  %v8077_v19 = vld [vmem:[%s16396_s10] sm:$0xf] }
0x230e   :  { %v8082_v57 = vrot.slane %v8077_v19, %v16893_v52  ;;  %v8086_v12 = vrot.slane %v8077_v19, %v16894_v47  ;;  %v8094_v37 = vrot.slane %v8077_v19, %v12877_v54  ;;  %v8090_v55 = vrot.slane %v8077_v19, %v12880_v0 }
0x230f   :  { %11184 = vmatpush3.bf16.msra.mxu0 %v12062_v24 }
0x2310   :  { %11185 = vmatprep.subr.bf16.mxu0 %v15997_v40 }
0x2313   :  { %11186 = vmatpush3.bf16.msra.mxu0 %v12063_v34 }
0x2314   :  { %11187 = vmatprep.subr.bf16.mxu0 %v15997_v40 }
0x2317   :  { %11188 = vmatpush3.bf16.msra.mxu0 %v12064_v49 }
0x2318   :  { %11189 = vmatprep.subr.bf16.mxu0 %v15997_v40 }
0x231b   :  { %11190 = vmatpush3.bf16.msra.mxu0 %v12065_v21 }
0x231c   :  { %11191 = vmatprep.subr.bf16.mxu0 %v15997_v40 }
0x231f   :  { %11192 = vmatpush3.bf16.msra.mxu0 %v12066_v51 }
0x23c3   :  { %v8537_v32 = vpop.f32.mrb[72].mxu0  ;;  %v8619_v2 = vpop.f32.mrb[72].mxu1 }
0x23c4   :  { %v11420_v4 = vadd.f32 %v8537_v32, %v8082_v57  ;;  %v8539_v16 = vpop.f32.mrb[73].mxu0  ;;  %v8621_v43 = vpop.f32.mrb[73].mxu1  ;;  %v11422_v13 = vadd.f32 %v8619_v2, %v8090_v55 }
0x23c5   :  { %v11421_v18 = vadd.f32 %v8539_v16, %v8086_v12  ;;  %v8541_v41 = vpop.f32.mrb[74].mxu0  ;;  %v8623_v25 = vpop.f32.mrb[74].mxu1  ;;  %v11423_v46 = vadd.f32 %v8621_v43, %v8094_v37 }
0x23c6   :  { %v10635_v1 = vmul.f32 -1.442695, %v11420_v4  ;;  %v8542_v48 = vpop.f32.mrb[75].mxu0  ;;  %v8624_v50 = vpop.f32.mrb[75].mxu1  ;;  %v12498_v4 = vld [vmem:[%s16392_s6] ss:$0 sm:$0xff] }
0x23c7   :  { %v10636_v9 = vmul.f32 -1.442695, %v11421_v18  ;;  %v10637_v53 = vmul.f32 -1.442695, %v11423_v46 }
0x23c8   :  { %12415 = vpow2.f32 %v10635_v1 }
0x23c9   :  { %12417 = vpow2.f32 %v10636_v9 }
0x23ca   :  { %12419 = vpow2.f32 %v10637_v53 }
0x23cb   :  { %12421 = vtanh.f32 %v11422_v13 }
0x23d2   :  { %v12416_v44 = vpop.eup %12415 }
0x23d3   :  { %v12418_v14 = vpop.eup %12417  ;;  %v8629_v8 = vadd.f32 1.0, %v12416_v44 }
0x23d4   :  { %v8635_v28 = vadd.f32 1.0, %v12418_v14  ;;  %v12420_v39 = vpop.eup %12419 }
0x23d5   :  { %12423 = vrcp.f32 %v8629_v8  ;;  %v12422_v58 = vpop.eup %12421  ;;  %v8642_v23 = vadd.f32 1.0, %v12420_v39  ;;  %v12072_v39 = vld [vmem:[%s16395_s9 + $0xc] ss:$16 sps:$4 sm:$0xff]  }
0x23d6   :  { %12425 = vrcp.f32 %v8635_v28  ;;  %v12067_v28 = vld [vmem:[%s16395_s9] ss:$16 sps:$4 sm:$0xff]   ;;  %9496 = vmatprep.subr.bf16.mxu1 %v12072_v39  ;;  %v12138_v39 = vld [vmem:[%s16395_s9 + $0x16c] ss:$16 sps:$4 sm:$0xff]  }
0x23d7   :  { %12427 = vrcp.f32 %v8642_v23  ;;  %v12081_v23 = vld [vmem:[%s16395_s9 + $0x44] ss:$16 sps:$4 sm:$0xff]  }
0x23df   :  { %v12424_v15 = vpop.eup %12423 }
0x23e0   :  { %v12426_v42 = vpop.eup %12425  ;;  %v8646_v35 = vmul.f32 %v12424_v15, %v12422_v58  ;;  %v12075_v58 = vld [vmem:[%s16395_s9 + $0x24] ss:$16 sps:$4 sm:$0xff]   ;;  %v12078_v15 = vld [vmem:[%s16395_s9 + $0x2c] ss:$16 sps:$4 sm:$0xff]  }
0x23e1   :  { %v8645_v5 = vmul.f32 %v12426_v42, %v15808_v62  ;;  %v12428_v61 = vpop.eup %12427  ;;  %v12073_v42 = vld [vmem:[%s16395_s9 + $0x20] ss:$16 sps:$4 sm:$0xff]  }
0x23e3   :  { %v16064_v22 = vadd.f32 %v8646_v35, %v8645_v5  ;;  %v12076_v35 = vld [vmem:[%s16395_s9 + $0x28] ss:$16 sps:$4 sm:$0xff]   ;;  %v12084_v5 = vld [vmem:[%s16395_s9 + $0x4c] ss:$16 sps:$4 sm:$0xff]  }
0x23e5   :  { %12429 = vtanh.f32 %v16064_v22 }
0x23ef   :  { %v12430_v6 = vpop.eup %12429 }
0x23f0   :  { %v8649_v24 = vmul.f32 %v12430_v6, %v12428_v61  ;;  %v12079_v61 = vld [vmem:[%s16395_s9 + $0x40] ss:$16 sps:$4 sm:$0xff]   ;;  %v12082_v6 = vld [vmem:[%s16395_s9 + $0x48] ss:$16 sps:$4 sm:$0xff]  }
0x23f2   :  { %v8650_v34 = vpack.c.bf16 %v8649_v24, %v8649_v24  ;;  %v8883_v16 = vmul.f32 %v12498_v4, %v8649_v24  ;;  %v12087_v24 = vld [vmem:[%s16395_s9 + $0x64] ss:$16 sps:$4 sm:$0xff]   ;;  %v12100_v4 = vld [vmem:[%s16395_s9 + $0xa8] ss:$16 sps:$4 sm:$0xff]  }
0x23f4   :  { %11194 = vmatmul.mubr.bf16.vlgmr.msra.gmra.mrb[76].mxu0 %v8650_v34 }
0x23f5   :  { %9446 = vmatprep.mubr.bf16.mxu0 %v8650_v34 }
0x24c7   :  { %v8756_v49 = vpop.f32.mrb[76].mxu0 }
0x24c8   :  { %v8757_v21 = vadd.f32 %v15850_v33, %v8756_v49  ;;  %v11195_v51 = vpop.f32.mrb[77].mxu0  ;;  %v12085_v49 = vld [vmem:[%s16395_s9 + $0x60] ss:$16 sps:$4 sm:$0xff]  }
0x24c9   :  { %v8759_v19 = vpop.f32.mrb[78].mxu0  ;;  %v12093_v51 = vld [vmem:[%s16395_s9 + $0x84] ss:$16 sps:$4 sm:$0xff]  }
0x24ca   :  { %8763 = vst [vmem:[#allocation7 + $0x30] sm:$0xff] %v8757_v21  ;;  %8764 = vmax.xlane.f32.xlu1 %v8757_v21  ;;  %v11196_v57 = vpop.f32.mrb[79].mxu0  ;;  %v12096_v19 = vld [vmem:[%s16395_s9 + $0x8c] ss:$16 sps:$4 sm:$0xff]  }
0x24cb   :  { %v12091_v57 = vld [vmem:[%s16395_s9 + $0x80] ss:$16 sps:$4 sm:$0xff]  }
0x2557   :  { %v8765_v62 = vpop.xlane.xlu1 %8764 }
0x2558   :  { %vm8766_vm13 = vcmp.eq.f32.partialorder %v8757_v21, %v8765_v62  ;;  %v12088_v21 = vld [vmem:[%s16395_s9 + $0x68] ss:$16 sps:$4 sm:$0xff]  }
0x2559   :  { %v8767_v12 = vsel %vm8766_vm13, %v16844_v38, 128  ;;  %v12094_v62 = vld [vmem:[%s16395_s9 + $0x88] ss:$16 sps:$4 sm:$0xff]  }
0x255a   :  { %v8769_v32 = vshra.s32 %v8767_v12, 16  ;;  %v8768_v43 = vand.u32 65535, %v8767_v12  ;;  %v12099_v12 = vld [vmem:[%s16395_s9 + $0xa4] ss:$16 sps:$4 sm:$0xff]  }
0x255c   :  { %v8771_v2 = vcvt.s32.f32 %v8769_v32  ;;  %v8770_v33 = vcvt.s32.f32 %v8768_v43  ;;  %v12102_v32 = vld [vmem:[%s16395_s9 + $0xac] ss:$16 sps:$4 sm:$0xff]  }
0x255d   :  { %v12108_v43 = vld [vmem:[%s16395_s9 + $0xcc] ss:$16 sps:$4 sm:$0xff]  }
0x255e   :  { %8772 = vmin.xlane.f32.xlu0 %v8771_v2 }
0x2562   :  { %8884 = vadd.xlane.f32.xlu0 %v8883_v16  ;;  %v12105_v16 = vld [vmem:[%s16395_s9 + $0xc4] ss:$16 sps:$4 sm:$0xff]  }
0x25eb   :  { %v8773_v18 = vpop.xlane.xlu0 %8772 }
0x25ec   :  { %vm8774_vm14 = vcmp.eq.f32.partialorder %v8771_v2, %v8773_v18  ;;  %v8779_v9 = vcvt.f32.s32 %v8773_v18  ;;  %v12097_v2 = vld [vmem:[%s16395_s9 + $0xa0] ss:$16 sps:$4 sm:$0xff]   ;;  %v12106_v18 = vld [vmem:[%s16395_s9 + $0xc8] ss:$16 sps:$4 sm:$0xff]  }
0x25ed   :  { %v8775_v41 = vsel %vm8774_vm14, %v8770_v33, inf  ;;  %v12103_v33 = vld [vmem:[%s16395_s9 + $0xc0] ss:$16 sps:$4 sm:$0xff]  }
0x25ee   :  { %8776 = vmin.xlane.f32.xlu1 %v8775_v41  ;;  %v8780_v46 = vshll.u32 %v8779_v9, 16  ;;  %v12111_v41 = vld [vmem:[%s16395_s9 + $0xe4] ss:$16 sps:$4 sm:$0xff]   ;;  %v12114_v9 = vld [vmem:[%s16395_s9 + $0xec] ss:$16 sps:$4 sm:$0xff]  }
0x25ef   :  { %v8885_v25 = vpop.xlane.xlu0 %8884 }
0x25f0   :  { %v8886_v1 = vadd.f32 %v8885_v25, %v16845_v59  ;;  %v12109_v25 = vld [vmem:[%s16395_s9 + $0xe0] ss:$16 sps:$4 sm:$0xff]  }
0x25f2   :  { %v8887_v48 = vmax.f32 %v8886_v1, 0.0 }
0x25f4   :  { %v8888_v50 = vsel %vm3174_vm9, %v8887_v48, -inf }
0x25f5   :  { %8889 = vmax.xlane.f32.xlu0 %v8888_v50 }
0x267b   :  { %v8777_v37 = vpop.xlane.xlu1 %8776 }
0x267c   :  { %v8778_v55 = vcvt.f32.s32 %v8777_v37  ;;  %v12112_v37 = vld [vmem:[%s16395_s9 + $0xe8] ss:$16 sps:$4 sm:$0xff]  }
0x267e   :  { %v8781_v53 = vadd.s32 %v8780_v46, %v8778_v55  ;;  %v12115_v46 = vld [vmem:[%s16395_s9 + $0x100] ss:$16 sps:$4 sm:$0xff]   ;;  %v12117_v55 = vld [vmem:[%s16395_s9 + $0x104] ss:$16 sps:$4 sm:$0xff]  }
0x2680   :  { %vm8782_vm15 = vcmp.eq.s32.totalorder %v16844_v38, %v8781_v53  ;;  %v12069_v38 = vld [vmem:[%s16395_s9 + $0x4] ss:$16 sps:$4 sm:$0xff]   ;;  %v12118_v53 = vld [vmem:[%s16395_s9 + $0x108] ss:$16 sps:$4 sm:$0xff]  }
0x2681   :  { %11230 = vmatmul.mubr.msk.f32.vlgmr.msra.gmra.mrb[70].mxu1 %vm8782_vm15, %v16847_v26  ;;  %v12070_v26 = vld [vmem:[%s16395_s9 + $0x8] ss:$16 sps:$4 sm:$0xff]   ;;  %9414 = vmatprep.subr.bf16.mxu0 %v12069_v38  ;;  %v12127_v38 = vld [vmem:[%s16395_s9 + $0x140] ss:$16 sps:$4 sm:$0xff]  }
0x2682   :  { %v8890_v13 = vpop.xlane.xlu0 %8889  ;;  %9528 = vmatprep.mubr.bf16.mxu1 %v8650_v34  ;;  %9415 = vmatpush1.bf16.msra.mxu0 %v12067_v28  ;;  %v12090_v34 = vld [vmem:[%s16395_s9 + $0x6c] ss:$16 sps:$4 sm:$0xff]  }
0x2683   :  { %v8891_v44 = vsub.f32 %v8887_v48, %v8890_v13  ;;  %9497 = vmatpush1.bf16.msra.mxu1 %v12070_v26  ;;  %9416 = vmatprep.subr.bf16.mxu0 %v12075_v58  ;;  %v12120_v13 = vld [vmem:[%s16395_s9 + $0x10c] ss:$16 sps:$4 sm:$0xff]   ;;  %v12135_v26 = vld [vmem:[%s16395_s9 + $0x164] ss:$16 sps:$4 sm:$0xff]   ;;  %v12133_v58 = vld [vmem:[%s16395_s9 + $0x160] ss:$16 sps:$4 sm:$0xff]  }
0x2684   :  { %9498 = vmatprep.subr.bf16.mxu1 %v12078_v15  ;;  %v12132_v28 = vld [vmem:[%s16395_s9 + $0x14c] ss:$16 sps:$4 sm:$0xff]   ;;  %v12141_v15 = vld [vmem:[%s16395_s9 + $0x184] ss:$16 sps:$4 sm:$0xff]  }
0x2685   :  { %v8892_v14 = vmul.f32 1.442695, %v8891_v44  ;;  %v12121_v44 = vld [vmem:[%s16395_s9 + $0x120] ss:$16 sps:$4 sm:$0xff]  }
0x2686   :  { %9417 = vmatpush1.bf16.msra.mxu0 %v12073_v42  ;;  %v12139_v42 = vld [vmem:[%s16395_s9 + $0x180] ss:$16 sps:$4 sm:$0xff]  }
0x2687   :  { %12431 = vpow2.f32 %v8892_v14  ;;  %9499 = vmatpush1.bf16.msra.mxu1 %v12076_v35  ;;  %9418 = vmatprep.subr.bf16.mxu0 %v12081_v23  ;;  %v12123_v14 = vld [vmem:[%s16395_s9 + $0x124] ss:$16 sps:$4 sm:$0xff]   ;;  %v12144_v35 = vld [vmem:[%s16395_s9 + $0x18c] ss:$16 sps:$4 sm:$0xff]   ;;  %v12142_v23 = vld [vmem:[%s16395_s9 + $0x188] ss:$16 sps:$4 sm:$0xff]  }
0x2688   :  { %9500 = vmatprep.subr.bf16.mxu1 %v12084_v5  ;;  %v12145_v5 = vld [vmem:[%s16395_s9 + $0x1a0] ss:$16 sps:$4 sm:$0xff]  }
0x268a   :  { %9419 = vmatpush1.bf16.msra.mxu0 %v12079_v61  ;;  %v12150_v61 = vld [vmem:[%s16395_s9 + $0x1ac] ss:$16 sps:$4 sm:$0xff]  }
0x268b   :  { %9501 = vmatpush1.bf16.msra.mxu1 %v12082_v6  ;;  %9420 = vmatprep.subr.bf16.mxu0 %v12087_v24  ;;  %v12148_v6 = vld [vmem:[%s16395_s9 + $0x1a8] ss:$16 sps:$4 sm:$0xff]   ;;  %v12151_v24 = vld [vmem:[%s16395_s9 + $0x1c0] ss:$16 sps:$4 sm:$0xff]  }
0x268c   :  { %9502 = vmatprep.subr.bf16.mxu1 %v12090_v34  ;;  %v12153_v34 = vld [vmem:[%s16395_s9 + $0x1c4] ss:$16 sps:$4 sm:$0xff]  }
0x268e   :  { %9421 = vmatpush1.bf16.msra.mxu0 %v12085_v49  ;;  %v12156_v49 = vld [vmem:[%s16395_s9 + $0x1cc] ss:$16 sps:$4 sm:$0xff]  }
0x268f   :  { %9503 = vmatpush1.bf16.msra.mxu1 %v12088_v21  ;;  %9422 = vmatprep.subr.bf16.mxu0 %v12093_v51  ;;  %v12159_v21 = vld [vmem:[%s16395_s9 + $0x1e4] ss:$16 sps:$4 sm:$0xff]   ;;  %v12162_v51 = vld [vmem:[%s16395_s9 + $0x1ec] ss:$16 sps:$4 sm:$0xff]  }
0x2690   :  { %9504 = vmatprep.subr.bf16.mxu1 %v12096_v19  ;;  %v12157_v19 = vld [vmem:[%s16395_s9 + $0x1e0] ss:$16 sps:$4 sm:$0xff]  }
0x2691   :  { %v16076_v8 = vpop.eup %12431 }
0x2692   :  { %v8894_v59 = vsel %vm3174_vm9, %v16076_v8, 0.0  ;;  %9423 = vmatpush1.bf16.msra.mxu0 %v12091_v57  ;;  %v12165_v57 = vld [vmem:[%s16395_s9 + $0x204] ss:$16 sps:$4 sm:$0xff]  }
0x2693   :  { %8895 = vadd.xlane.f32.xlu1 %v8894_v59  ;;  %9505 = vmatpush1.bf16.msra.mxu1 %v12094_v62  ;;  %v12129_v59 = vld [vmem:[%s16395_s9 + $0x144] ss:$16 sps:$4 sm:$0xff]   ;;  %v12168_v62 = vld [vmem:[%s16395_s9 + $0x20c] ss:$16 sps:$4 sm:$0xff]  }
0x2694   :  { %9424 = vmatprep.subr.bf16.mxu0 %v12099_v12  ;;  %9506 = vmatprep.subr.bf16.mxu1 %v12102_v32 }
0x2696   :  { %9425 = vmatpush1.bf16.msra.mxu0 %v12097_v2 }
0x2697   :  { %9507 = vmatpush1.bf16.msra.mxu1 %v12100_v4  ;;  %9426 = vmatprep.subr.bf16.mxu0 %v12105_v16 }
0x2698   :  { %9508 = vmatprep.subr.bf16.mxu1 %v12108_v43 }
0x269a   :  { %9427 = vmatpush1.bf16.msra.mxu0 %v12103_v33 }
0x269b   :  { %9509 = vmatpush1.bf16.msra.mxu1 %v12106_v18  ;;  %9428 = vmatprep.subr.bf16.mxu0 %v12111_v41 }
0x269c   :  { %9510 = vmatprep.subr.bf16.mxu1 %v12114_v9 }
0x269e   :  { %9429 = vmatpush1.bf16.msra.mxu0 %v12109_v25 }
0x269f   :  { %9511 = vmatpush1.bf16.msra.mxu1 %v12112_v37  ;;  %9430 = vmatprep.subr.bf16.mxu0 %v12117_v55 }
0x26a0   :  { %9512 = vmatprep.subr.bf16.mxu1 %v12120_v13 }
0x26a2   :  { %9431 = vmatpush1.bf16.msra.mxu0 %v12115_v46 }
0x26a3   :  { %9513 = vmatpush1.bf16.msra.mxu1 %v12118_v53  ;;  %9432 = vmatprep.subr.bf16.mxu0 %v12123_v14 }
0x26a6   :  { %9433 = vmatpush1.bf16.msra.mxu0 %v12121_v44 }
0x26a7   :  { %9434 = vmatprep.subr.bf16.mxu0 %v12129_v59  ;;  %v8877_v59 = vstv %s8874_s17 }
0x26aa   :  { %9435 = vmatpush1.bf16.msra.mxu0 %v12127_v38  ;;  %v12169_v38 = vld [vmem:[%s16395_s9 + $0x220] ss:$16 sps:$4 sm:$0xff]  }
0x26ab   :  { %9436 = vmatprep.subr.bf16.mxu0 %v12135_v26 }
0x26ae   :  { %9437 = vmatpush1.bf16.msra.mxu0 %v12133_v58 }
0x26af   :  { %9438 = vmatprep.subr.bf16.mxu0 %v12141_v15  ;;  %v12175_v15 = vld [vmem:[%s16397_s11] sm:$0xff]  }
0x26b2   :  { %9439 = vmatpush1.bf16.msra.mxu0 %v12139_v42  ;;  %v12177_v42 = vld [vmem:[%s16397_s11 + $0x10] sm:$0xff]  }
0x2720   :  { %v8896_v1 = vpop.xlane.xlu1 %8895 }
0x2721   :  { %12433 = vrcp.f32 %v8896_v1 }
0x272b   :  { %v12434_v48 = vpop.eup %12433 }
0x272c   :  { %v16171_v50 = vmul.f32 %v12434_v48, %v16076_v8  ;;  %v12126_v8 = vld [vmem:[%s16395_s9 + $0x12c] ss:$16 sps:$4 sm:$0xff]  }
0x272d   :  { %9514 = vmatprep.subr.bf16.mxu1 %v12126_v8  ;;  %v12174_v8 = vld [vmem:[%s16395_s9 + $0x22c] ss:$16 sps:$4 sm:$0xff]  }
0x272e   :  { %8908 = vperm.xlu1 %11540, %v16171_v50   ;;  %8902 = vperm.xlu0 %11539, %v16171_v50  }
0x2732   :  { %11541 = vset.pattern.permute.xlu1 %v16862_v17  ;;  %11547 = vset.pattern.permute.xlu0 %v16879_v45  ;;  %v12124_v17 = vld [vmem:[%s16395_s9 + $0x128] ss:$16 sps:$4 sm:$0xff]  }
0x2733   :  { %8915 = vperm.xlu1 %11541, %v16171_v50   ;;  %9515 = vmatpush1.bf16.msra.mxu1 %v12124_v17 }
0x2734   :  { %9516 = vmatprep.subr.bf16.mxu1 %v12132_v28  ;;  %v8880_v28 = vstv %s8879_s18 }
0x2737   :  { %11542 = vset.pattern.permute.xlu1 %v16865_v31  ;;  %v12130_v31 = vld [vmem:[%s16395_s9 + $0x148] ss:$16 sps:$4 sm:$0xff]  }
0x2738   :  { %8922 = vperm.xlu1 %11542, %v16171_v50   ;;  %9517 = vmatpush1.bf16.msra.mxu1 %v12130_v31  ;;  %v12172_v31 = vld [vmem:[%s16395_s9 + $0x228] ss:$16 sps:$4 sm:$0xff]  }
0x2739   :  { %9518 = vmatprep.subr.bf16.mxu1 %v12138_v39 }
0x273c   :  { %11543 = vset.pattern.permute.xlu1 %v16869_v10  ;;  %v12136_v10 = vld [vmem:[%s16395_s9 + $0x168] ss:$16 sps:$4 sm:$0xff]  }
0x273d   :  { %8929 = vperm.xlu1 %11543, %v16171_v50   ;;  %9519 = vmatpush1.bf16.msra.mxu1 %v12136_v10 }
0x273e   :  { %9520 = vmatprep.subr.bf16.mxu1 %v12144_v35  ;;  %v12178_v35 = vld [vmem:[%s16397_s11 + $0x18] sm:$0xff]  }
0x2741   :  { %11544 = vset.pattern.permute.xlu1 %v16873_v36  ;;  %v12147_v36 = vld [vmem:[%s16395_s9 + $0x1a4] ss:$16 sps:$4 sm:$0xff]   ;;  %9521 = vmatpush1.bf16.msra.mxu1 %v12142_v23 }
0x2742   :  { %8936 = vperm.xlu1 %11544, %v16171_v50   ;;  %9440 = vmatprep.subr.bf16.mxu0 %v12147_v36  ;;  %v12179_v23 = vld [vmem:[%s16397_s11 + $0x20] sm:$0xff]   ;;  %v12181_v36 = vld [vmem:[%s16397_s11 + $0x30] sm:$0xff]  }
0x2743   :  { %9441 = vmatpush1.bf16.msra.mxu0 %v12145_v5  ;;  %9522 = vmatprep.subr.bf16.mxu1 %v12150_v61  ;;  %v12180_v5 = vld [vmem:[%s16397_s11 + $0x28] sm:$0xff]   ;;  %v12182_v61 = vld [vmem:[%s16397_s11 + $0x38] sm:$0xff]  }
0x2744   :  { %9442 = vmatprep.subr.bf16.mxu0 %v12153_v34 }
0x2745   :  { %9523 = vmatpush1.bf16.msra.mxu1 %v12148_v6  ;;  %v9029_v6 = vld [vmem:[%s16396_s10] sm:$0xf] }
0x2746   :  { %11545 = vset.pattern.permute.xlu1 %v16876_v27  ;;  %v12154_v27 = vld [vmem:[%s16395_s9 + $0x1c8] ss:$16 sps:$4 sm:$0xff]   ;;  %9524 = vmatprep.subr.bf16.mxu1 %v12156_v49  ;;  %v9038_v34 = vrot.slane %v9029_v6, %v16894_v47 }
0x2747   :  { %8943 = vperm.xlu1 %11545, %v16171_v50   ;;  %9443 = vmatpush1.bf16.msra.mxu0 %v12151_v24  ;;  %v9034_v24 = vrot.slane %v9029_v6, %v16893_v52  ;;  %v9042_v52 = vrot.slane %v9029_v6, %v12880_v0 }
0x2748   :  { %9444 = vmatprep.subr.bf16.mxu0 %v12159_v21 }
0x2749   :  { %9525 = vmatpush1.bf16.msra.mxu1 %v12154_v27 }
0x274a   :  { %9526 = vmatprep.subr.bf16.mxu1 %v12162_v51 }
0x274b   :  { %11546 = vset.pattern.permute.xlu1 %v16879_v45  ;;  %v12160_v45 = vld [vmem:[%s16395_s9 + $0x1e8] ss:$16 sps:$4 sm:$0xff]   ;;  %9445 = vmatpush1.bf16.msra.mxu0 %v12157_v19 }
0x274c   :  { %8950 = vperm.xlu1 %11546, %v16171_v50   ;;  %9455 = vmatprep.subr.bf16.mxu0 %v12165_v57 }
0x274d   :  { %9527 = vmatpush1.bf16.msra.mxu1 %v12160_v45 }
0x274e   :  { %9537 = vmatprep.subr.bf16.mxu1 %v12168_v62 }
0x2754   :  { %v8867_v12 = vpop.f32.mrb[70].mxu1 }
0x2755   :  { %v11231_v32 = vpop.f32.mrb[71].mxu1  ;;  %v8881_v39 = vmul.f32 %v8880_v28, %v8867_v12 }
0x27ad   :  { %v8909_v2 = vpop.permute.xlu1 %8908  ;;  %v8903_v43 = vpop.permute.xlu0 %8902 }
0x27ae   :  { %v8911_v18 = vmul.f32 %v8909_v2, %v16887_v30  ;;  %v8905_v41 = vmul.f32 %v8903_v43, %v16792_v29 }
0x27b0   :  { %v8912_v48 = vadd.f32 %v8911_v18, %v8905_v41 }
0x27b2   :  { %v8916_v4 = vpop.permute.xlu1 %8915 }
0x27b3   :  { %v8918_v25 = vmul.f32 %v8916_v4, %v16793_v7  ;;  %v9046_v4 = vrot.slane %v9029_v6, %v12877_v54 }
0x27b5   :  { %v8919_v9 = vadd.f32 %v8918_v25, %v8912_v48 }
0x27b7   :  { %v8923_v16 = vpop.permute.xlu1 %8922 }
0x27b8   :  { %v8925_v50 = vmul.f32 %v8923_v16, %v16650_v63 }
0x27ba   :  { %v8926_v46 = vadd.f32 %v8925_v50, %v8919_v9 }
0x27bc   :  { %v8930_v33 = vpop.permute.xlu1 %8929 }
0x27bd   :  { %v8932_v37 = vmul.f32 %v8930_v33, %v13479_v11  ;;  %v12163_v11 = vld [vmem:[%s16395_s9 + $0x200] ss:$16 sps:$4 sm:$0xff]  }
0x27bf   :  { %v8933_v13 = vadd.f32 %v8932_v37, %v8926_v46 }
0x27c1   :  { %v8937_v1 = vpop.permute.xlu1 %8936 }
0x27c2   :  { %v8939_v55 = vmul.f32 %v8937_v1, %v13541_v20  ;;  %v12166_v20 = vld [vmem:[%s16395_s9 + $0x208] ss:$16 sps:$4 sm:$0xff]  }
0x27c4   :  { %v8940_v29 = vadd.f32 %v8939_v55, %v8933_v13 }
0x27c6   :  { %v8944_v53 = vpop.permute.xlu1 %8943 }
0x27c7   :  { %v8946_v30 = vmul.f32 %v8944_v53, %v13637_v60  ;;  %v12171_v60 = vld [vmem:[%s16395_s9 + $0x224] ss:$16 sps:$4 sm:$0xff]  }
0x27c9   :  { %v8947_v7 = vadd.f32 %v8946_v30, %v8940_v29  ;;  %v10728_v29 = vld [vmem:[%s16398_s12] ss:$0 sm:$0xff] }
0x27cb   :  { %v8951_v44 = vpop.permute.xlu1 %8950 }
0x27cc   :  { %v8953_v14 = vmul.f32 %v8951_v44, %v13698_v56  ;;  %v10650_v56 = vld [vmem:[%s16388_s2 + $0x30] sm:$0xff] }
0x27cd   :  { %v8878_v26 = vmul.f32 %v10650_v56, %v8877_v59 }
0x27ce   :  { %v8954_v17 = vadd.f32 %v8953_v14, %v8947_v7 }
0x27cf   :  { %v8882_v58 = vadd.f32 %v8881_v39, %v8878_v26 }
0x27d0   :  { %v8955_v63 = vpack.c.bf16 %v8954_v17, %v8954_v17 }
0x27d1   :  { %v8956_v10 = vpack.c.bf16 %v8882_v58, %v8882_v58 }
0x27d2   :  { %9447 = vmatmul.mubr.bf16.vlgmr.msra.gmra.mrb[80].mxu0 %v8955_v63  ;;  %9529 = vmatmul.mubr.bf16.vlgmr.msra.gmra.mrb[76].mxu1 %v8955_v63 }
0x27d3   :  { %9456 = vmatpush1.bf16.msra.mxu0 %v12163_v11  ;;  %9538 = vmatpush1.bf16.msra.mxu1 %v12166_v20 }
0x27d4   :  { %9457 = vmatprep.subr.bf16.mxu0 %v12171_v60  ;;  %9539 = vmatprep.subr.bf16.mxu1 %v12174_v8 }
0x27d5   :  { %9487 = vmatprep.mubr.bf16.mxu0 %v16651_v3  ;;  %9569 = vmatprep.mubr.bf16.mxu1 %v16651_v3  ;;  %v12176_v3 = vld [vmem:[%s16397_s11 + $0x8] sm:$0xff]  }
0x27d7   :  { %9458 = vmatpush1.bf16.msra.mxu0 %v12169_v38  ;;  %9540 = vmatpush1.bf16.msra.mxu1 %v12172_v31 }
0x27d8   :  { %11232 = vmatprep.subr.bf16.mxu0 %v15997_v40 }
0x27de   :  { %10723 = vmatmul.mubr.msk.bf16.vlgmr.msra.gmra.mrb[80].mxu0 %vm329_vm0, %v8956_v10  ;;  %10724 = vmatmul.mubr.msk.bf16.vlgmr.msra.gmra.mrb[76].mxu1 %vm329_vm0, %v8956_v10 }
0x27df   :  { %11248 = vmatprep.mubr.msk.bf16.mxu0 %vm12548_vm10, %v15997_v40  ;;  %11233 = vmatpush3.bf16.msra.mxu0 %v12175_v15 }
0x27e0   :  { %11234 = vmatprep.subr.bf16.mxu0 %v15997_v40 }
0x27e3   :  { %11235 = vmatpush3.bf16.msra.mxu0 %v12176_v3 }
0x27e4   :  { %11236 = vmatprep.subr.bf16.mxu0 %v15997_v40 }
0x27e7   :  { %11237 = vmatpush3.bf16.msra.mxu0 %v12177_v42 }
0x27e8   :  { %11238 = vmatprep.subr.bf16.mxu0 %v15997_v40 }
0x27eb   :  { %11239 = vmatpush3.bf16.msra.mxu0 %v12178_v35 }
0x27ec   :  { %11240 = vmatprep.subr.bf16.mxu0 %v15997_v40 }
0x27ef   :  { %11241 = vmatpush3.bf16.msra.mxu0 %v12179_v23 }
0x27f0   :  { %11242 = vmatprep.subr.bf16.mxu0 %v15997_v40 }
0x27f3   :  { %11243 = vmatpush3.bf16.msra.mxu0 %v12180_v5 }
0x27f4   :  { %11244 = vmatprep.subr.bf16.mxu0 %v15997_v40 }
0x27f7   :  { %11245 = vmatpush3.bf16.msra.mxu0 %v12181_v36 }
0x27f8   :  { %11246 = vmatprep.subr.bf16.mxu0 %v15997_v40 }
0x27fb   :  { %11247 = vmatpush3.bf16.msra.mxu0 %v12182_v61 }
0x28b1   :  { %v9489_v27 = vpop.f32.mrb[80].mxu0  ;;  %v9571_v49 = vpop.f32.mrb[76].mxu1 }
0x28b2   :  { %v11424_v21 = vadd.f32 %v9489_v27, %v9034_v24  ;;  %v9491_v51 = vpop.f32.mrb[81].mxu0  ;;  %v9573_v19 = vpop.f32.mrb[77].mxu1  ;;  %v11426_v43 = vadd.f32 %v9571_v49, %v9042_v52 }
0x28b3   :  { %v11425_v45 = vadd.f32 %v9491_v51, %v9038_v34  ;;  %v9493_v57 = vpop.f32.mrb[82].mxu0  ;;  %v9575_v62 = vpop.f32.mrb[78].mxu1  ;;  %v11427_v16 = vadd.f32 %v9573_v19, %v9046_v4 }
0x28b4   :  { %v10725_v12 = vmul.f32 -1.442695, %v11424_v21  ;;  %v9494_v32 = vpop.f32.mrb[83].mxu0  ;;  %v9576_v40 = vpop.f32.mrb[79].mxu1 }
0x28b5   :  { %v10726_v2 = vmul.f32 -1.442695, %v11425_v45  ;;  %v10727_v47 = vmul.f32 -1.442695, %v11427_v16 }
0x28b6   :  { %12435 = vpow2.f32 %v10725_v12 }
0x28b7   :  { %12437 = vpow2.f32 %v10726_v2 }
0x28b8   :  { %12439 = vpow2.f32 %v10727_v47 }
0x28b9   :  { %12441 = vtanh.f32 %v11426_v43 }
0x28c0   :  { %v12436_v33 = vpop.eup %12435 }
0x28c1   :  { %v12438_v18 = vpop.eup %12437  ;;  %v9581_v41 = vadd.f32 1.0, %v12436_v33 }
0x28c2   :  { %v9587_v25 = vadd.f32 1.0, %v12438_v18  ;;  %v12440_v1 = vpop.eup %12439 }
0x28c3   :  { %12443 = vrcp.f32 %v9581_v41  ;;  %v12442_v48 = vpop.eup %12441  ;;  %v9594_v37 = vadd.f32 1.0, %v12440_v1 }
0x28c4   :  { %12445 = vrcp.f32 %v9587_v25 }
0x28c5   :  { %12447 = vrcp.f32 %v9594_v37 }
0x28cd   :  { %v12444_v50 = vpop.eup %12443 }
0x28ce   :  { %v12446_v9 = vpop.eup %12445  ;;  %v9598_v54 = vmul.f32 %v12444_v50, %v12442_v48 }
0x28cf   :  { %v9597_v46 = vmul.f32 %v12446_v9, %v16064_v22  ;;  %v12448_v0 = vpop.eup %12447 }
0x28d1   :  { %v9599_v55 = vadd.f32 %v9598_v54, %v9597_v46 }
0x28d3   :  { %12449 = vtanh.f32 %v9599_v55 }
0x28dd   :  { %v12450_v53 = vpop.eup %12449 }
0x28de   :  { %v9601_v13 = vmul.f32 %v12450_v53, %v12448_v0 }
0x28e0   :  { %v9602_v30 = vpack.c.bf16 %v9601_v13, %v9601_v13 }
0x28e2   :  { %11249 = vmatmul.mubr.bf16.vlgmr.msra.gmra.mrb[84].mxu0 %v9602_v30 }
0x29b5   :  { %v9708_v44 = vpop.f32.mrb[84].mxu0 }
0x29b6   :  { %v9709_v7 = vadd.f32 %v10728_v29, %v9708_v44  ;;  %v11250_v14 = vpop.f32.mrb[85].mxu0 }
0x29b7   :  { %v9711_v17 = vpop.f32.mrb[86].mxu0 }
0x29b8   :  { %9715 = vst [vmem:[#allocation7 + $0x38] sm:$0xff] %v9709_v7  ;;  %v11251_v22 = vpop.f32.mrb[87].mxu0 }
0x29b9   :  { %12522 = shalt.err (!%p12519_p1)
}
0x29ba   :  { %s12523_s12 = scalar_lea.hbm %s16399_s13, 1024 }
0x29bb   :  { %p12524_p2 = scmp.ne.s32.totalorder %s16399_s13, %s12523_s12  ;;  %p12527_p3 = scmp.lt.u32.totalorder %s12523_s12, %s16399_s13 }
0x29bd   :  { %p12529_p4 = pnand %p12527_p3, %p12524_p2 }
0x29bf   :  { %12532 = shalt.err (!%p12529_p4)
}
0x29c0   :  { %s12551_s2 = smov 128   ;;  %s12552_s9 = smov 8  }
0x29c1   :  { %9727 = dma.vmem_to_hbm [thread:$0]  %s9722_s24, 1024, %s16399_s13, [#allocation5], %s12551_s2, %s12551_s2, %s12552_s9  }
0x29c2   :  { %12535 = dma.done.wait [#allocation5], 1024  }
0x29c3   :  { %12536 = vsyncadd [#allocation5], 4294966272 }
0x29c4   :  { %9731 = vsyncpa [#allocation5], 1 }
0x29c5   :  { %9732 = vsyncpa [#allocation6], 1 }

</bundles_post_ra>
